<compile_context>
chip_gen: v5e
topology: v5e:2x2
jax: 0.10.0
libtpu: 0.0.40
codegen_flags: <defaults>
</compile_context>

<pallas_src>
import functools

import jax
import jax.numpy as jnp
import numpy as np
from jax import lax
from jax.experimental import pallas as pl
from jax.experimental.pallas import tpu as pltpu


def _make_taps(D, H, W, batch_tile):
    """Host-side: per-offset lane-roll amounts and [27, batch_tile*S] validity masks."""
    S = D * H * W
    L = batch_tile * S
    idx = np.arange(S)
    d = idx // (H * W)
    h = (idx // W) % H
    w = idx % W
    masks, shifts = [], []
    for od in (-1, 0, 1):
        for oh in (-1, 0, 1):
            for ow in (-1, 0, 1):
                s = od * H * W + oh * W + ow
                valid = ((d + od >= 0) & (d + od < D) &
                         (h + oh >= 0) & (h + oh < H) &
                         (w + ow >= 0) & (w + ow < W))
                masks.append(valid.astype(np.float32))
                # rolled[:, p] = feat[:, p + s]  (valid taps never cross a batch slab)
                shifts.append(int((-s) % L))
    mask = np.tile(np.stack(masks, axis=0), (1, batch_tile))  # [27, L]
    return jnp.asarray(mask), tuple(shifts)


def _resnet_kernel(shifts, x_ref, mask_ref, w0_ref, b0_ref, w1_ref, b1_ref,
                   o_ref, col_ref):
    """x_ref [C, L] f32, mask_ref [27, L] f32, w*_ref [C, 27*C] bf16,
    b*_ref [C, 1] f32, o_ref [C, L] f32, col_ref [27*C, L] bf16 (scratch)."""
    C = x_ref.shape[0]

    x = x_ref[...]            # f32 [C, L]
    mask = mask_ref[...]      # f32 [27, L]

    def im2col(feat_f32):
        # One XLU roll + one VPU mask/cast pass per tap, stored into the slab.
        for k, shift in enumerate(shifts):
            shifted = feat_f32 if shift == 0 else pltpu.roll(feat_f32, shift, axis=1)
            col_ref[pl.ds(k * C, C), :] = (shifted * mask[k:k + 1, :]).astype(col_ref.dtype)

    def conv(w_ref, b_ref):
        # Single fused MXU matmul: [C_out, 27*C_in] @ [27*C_in, L] -> f32, + bias.
        return jnp.dot(w_ref[...], col_ref[...],
                       preferred_element_type=jnp.float32) + b_ref[...]

    im2col(x)
    h = jnp.maximum(conv(w0_ref, b0_ref), 0.0)        # relu(conv0(x)), f32
    im2col(h)
    o_ref[...] = (conv(w1_ref, b1_ref) + x).astype(o_ref.dtype)   # conv1(.) + x


def resnet_block(x, w0, b0, w1, b1, batch_tile=None):
    """x: [N, C, D, H, W] f32; w*: [27, C_in, C_out] (Minkowski layout); b*: [C]."""
    N, C, D, H, W = x.shape
    S = D * H * W
    assert w0.shape == (27, C, C) and w1.shape == (27, C, C)
    assert C % 16 == 0, "channels should be a multiple of 16 for bf16 sublane tiling"

    if batch_tile is None:
        # Stack batch elements on the matmul-N (lane) axis to amortize per-step
        # overhead, but keep >=2 parallel grid steps when N allows (v7x: 2 TCs).
        batch_tile = min(N, max(1, 4096 // S))
        if N >= 2:
            batch_tile = max(1, min(batch_tile, N // 2))
        while N % batch_tile:
            batch_tile -= 1
    L = batch_tile * S
    assert L % 128 == 0, "per-step lane width must be a multiple of 128"

    # Lane-dense feature layout [C, N*S] (layout plumbing, done in the wrapper).
    x_cl = jnp.transpose(x.reshape(N, C, S), (1, 0, 2)).reshape(C, N * S)

    # Pre-fused, lane-dense bf16 weights [C_out, 27*C_in]: fused[co, k*C+ci] = w[k, ci, co].
    w0f = jnp.transpose(w0, (2, 0, 1)).reshape(C, 27 * C).astype(jnp.bfloat16)
    w1f = jnp.transpose(w1, (2, 0, 1)).reshape(C, 27 * C).astype(jnp.bfloat16)
    b0c = b0.reshape(C, 1).astype(jnp.float32)
    b1c = b1.reshape(C, 1).astype(jnp.float32)

    mask, shifts = _make_taps(D, H, W, batch_tile)

    kernel = functools.partial(_resnet_kernel, shifts)
    out_cl = pl.pallas_call(
        kernel,
        out_shape=jax.ShapeDtypeStruct((C, N * S), x.dtype),
        grid_spec=pltpu.PrefetchScalarGridSpec(
            num_scalar_prefetch=0,
            grid=(N // batch_tile,),
            in_specs=[
                pl.BlockSpec((C, L), lambda i: (0, i)),        # features: one column tile/step
                pl.BlockSpec((27, L), lambda i: (0, 0)),       # boundary masks (resident)
                pl.BlockSpec((C, 27 * C), lambda i: (0, 0)),   # fused W0 (resident)
                pl.BlockSpec((C, 1), lambda i: (0, 0)),        # b0
                pl.BlockSpec((C, 27 * C), lambda i: (0, 0)),   # fused W1 (resident)
                pl.BlockSpec((C, 1), lambda i: (0, 0)),        # b1
            ],
            out_specs=pl.BlockSpec((C, L), lambda i: (0, i)),
            scratch_shapes=[pltpu.VMEM((27 * C, L), jnp.bfloat16)],   # im2col slab
        ),
        compiler_params=pltpu.CompilerParams(dimension_semantics=("parallel",)),
    )(x_cl, mask, w0f, b0c, w1f, b1c)

    return out_cl.reshape(C, N, S).transpose(1, 0, 2).reshape(N, C, D, H, W)


if __name__ == "__main__":
    # Small shapes: batch=2, channels=32, 8x8x8 voxel grid.
    N, C = 2, 32
    D = H = W = 8
    S = D * H * W

    key = jax.random.PRNGKey(0)
    kx, kw0, kb0, kw1, kb1 = jax.random.split(key, 5)
    x = jax.random.normal(kx, (N, C, D, H, W), jnp.float32)          # NCDHW dense grid
    w0 = jax.random.normal(kw0, (27, C, C), jnp.float32) * 0.05      # Minkowski [K^3, Cin, Cout]
    b0 = jax.random.normal(kb0, (C,), jnp.float32) * 0.05
    w1 = jax.random.normal(kw1, (27, C, C), jnp.float32) * 0.05
    b1 = jax.random.normal(kb1, (C,), jnp.float32) * 0.05

    out = jax.block_until_ready(resnet_block(x, w0, b0, w1, b1))

    # Pure-JAX f32 reference: dense 3-D conv == Minkowski sparse conv on a
    # fully-occupied grid.
    def ref_conv(feat_ndhwc, wk, bk):
        rhs = wk.reshape(3, 3, 3, C, C)                              # DHWIO
        y = lax.conv_general_dilated(
            feat_ndhwc, rhs, window_strides=(1, 1, 1), padding="SAME",
            dimension_numbers=("NDHWC", "DHWIO", "NDHWC"),
            precision=lax.Precision.HIGHEST)
        return y + bk.reshape(1, 1, 1, 1, C)

    x_ndhwc = jnp.transpose(x, (0, 2, 3, 4, 1))
    ref = ref_conv(jnp.maximum(ref_conv(x_ndhwc, w0, b0), 0.0), w1, b1) + x_ndhwc
    ref_ncdhw = jnp.transpose(ref, (0, 4, 1, 2, 3))

    # Tolerance widened vs the f32 version: matmul operands are bf16
    # (f32 accumulation); ReLU / bias / residual stay in f32.
    np.testing.assert_allclose(np.asarray(out), np.asarray(ref_ncdhw),
                               rtol=2e-2, atol=3e-2)
    print("KERNEL_OK")
</pallas_src>

<mosaic_0001>
module attributes {stable_mosaic.version = 11 : i64} {
  func.func @_resnet_kernel(%arg0: i32, %arg1: memref<32x512xf32, #tpu.memory_space<vmem>>, %arg2: memref<27x512xf32, #tpu.memory_space<vmem>>, %arg3: memref<32x864xbf16, #tpu.memory_space<vmem>>, %arg4: memref<32x1xf32, #tpu.memory_space<vmem>>, %arg5: memref<32x864xbf16, #tpu.memory_space<vmem>>, %arg6: memref<32x1xf32, #tpu.memory_space<vmem>>, %arg7: memref<32x512xf32, #tpu.memory_space<vmem>>, %arg8: memref<864x512xbf16, #tpu.memory_space<vmem>>) attributes {dimension_semantics = [#tpu.dimension_semantics<parallel>], iteration_bounds = array<i64: 2>, scalar_prefetch = 0 : i64, scratch_operands = 1 : i64, tpu.core_type = #tpu.core_type<tc>, window_params = [{transform_indices = @transform_0, window_bounds = array<i64: 32, 512>}, {pipeline_mode = #tpu.pipeline_mode<synchronous>, transform_indices = @transform_1, window_bounds = array<i64: 27, 512>}, {pipeline_mode = #tpu.pipeline_mode<synchronous>, transform_indices = @transform_2, window_bounds = array<i64: 32, 864>}, {pipeline_mode = #tpu.pipeline_mode<synchronous>, transform_indices = @transform_3, window_bounds = array<i64: 32, 1>}, {pipeline_mode = #tpu.pipeline_mode<synchronous>, transform_indices = @transform_4, window_bounds = array<i64: 32, 864>}, {pipeline_mode = #tpu.pipeline_mode<synchronous>, transform_indices = @transform_5, window_bounds = array<i64: 32, 1>}, {transform_indices = @transform_6, window_bounds = array<i64: 32, 512>}]} {
    %c0 = arith.constant 0 : index
    %c0_0 = arith.constant 0 : index
    %0 = vector.load %arg1[%c0, %c0_0] : memref<32x512xf32, #tpu.memory_space<vmem>>, vector<32x512xf32>
    %c0_1 = arith.constant 0 : index
    %c0_2 = arith.constant 0 : index
    %1 = vector.load %arg2[%c0_1, %c0_2] : memref<27x512xf32, #tpu.memory_space<vmem>>, vector<27x512xf32>
    %c73_i32 = arith.constant 73 : i32
    %2 = tpu.dynamic_rotate %0 by %c73_i32 dim 1 : vector<32x512xf32>, i32 -> vector<32x512xf32>
    %3 = vector.extract_strided_slice %1 {offsets = [0, 0], sizes = [1, 512], strides = [1, 1]} : vector<27x512xf32> to vector<1x512xf32>
    %4 = vector.broadcast %3 : vector<1x512xf32> to vector<32x512xf32>
    %5 = arith.mulf %2, %4 : vector<32x512xf32>
    %6 = arith.truncf %5 : vector<32x512xf32> to vector<32x512xbf16>
    %c0_3 = arith.constant 0 : index
    %c0_4 = arith.constant 0 : index
    %7 = vector.load %arg8[%c0_3, %c0_4] : memref<864x512xbf16, #tpu.memory_space<vmem>>, vector<32x512xbf16>
    tpu.vector_store %arg8[%c0_3, %c0_4], %6 {strides = array<i32>} : memref<864x512xbf16, #tpu.memory_space<vmem>>, vector<32x512xbf16>,
    %c72_i32 = arith.constant 72 : i32
    %8 = tpu.dynamic_rotate %0 by %c72_i32 dim 1 : vector<32x512xf32>, i32 -> vector<32x512xf32>
    %9 = vector.extract_strided_slice %1 {offsets = [1, 0], sizes = [1, 512], strides = [1, 1]} : vector<27x512xf32> to vector<1x512xf32>
    %10 = vector.broadcast %9 : vector<1x512xf32> to vector<32x512xf32>
    %11 = arith.mulf %8, %10 : vector<32x512xf32>
    %12 = arith.truncf %11 : vector<32x512xf32> to vector<32x512xbf16>
    %c32 = arith.constant 32 : index
    %c0_5 = arith.constant 0 : index
    %13 = vector.load %arg8[%c32, %c0_5] : memref<864x512xbf16, #tpu.memory_space<vmem>>, vector<32x512xbf16>
    tpu.vector_store %arg8[%c32, %c0_5], %12 {strides = array<i32>} : memref<864x512xbf16, #tpu.memory_space<vmem>>, vector<32x512xbf16>,
    %c71_i32 = arith.constant 71 : i32
    %14 = tpu.dynamic_rotate %0 by %c71_i32 dim 1 : vector<32x512xf32>, i32 -> vector<32x512xf32>
    %15 = vector.extract_strided_slice %1 {offsets = [2, 0], sizes = [1, 512], strides = [1, 1]} : vector<27x512xf32> to vector<1x512xf32>
    %16 = vector.broadcast %15 : vector<1x512xf32> to vector<32x512xf32>
    %17 = arith.mulf %14, %16 : vector<32x512xf32>
    %18 = arith.truncf %17 : vector<32x512xf32> to vector<32x512xbf16>
    %c64 = arith.constant 64 : index
    %c0_6 = arith.constant 0 : index
    %19 = vector.load %arg8[%c64, %c0_6] : memref<864x512xbf16, #tpu.memory_space<vmem>>, vector<32x512xbf16>
    tpu.vector_store %arg8[%c64, %c0_6], %18 {strides = array<i32>} : memref<864x512xbf16, #tpu.memory_space<vmem>>, vector<32x512xbf16>,
    %c65_i32 = arith.constant 65 : i32
    %20 = tpu.dynamic_rotate %0 by %c65_i32 dim 1 : vector<32x512xf32>, i32 -> vector<32x512xf32>
    %21 = vector.extract_strided_slice %1 {offsets = [3, 0], sizes = [1, 512], strides = [1, 1]} : vector<27x512xf32> to vector<1x512xf32>
    %22 = vector.broadcast %21 : vector<1x512xf32> to vector<32x512xf32>
    %23 = arith.mulf %20, %22 : vector<32x512xf32>
    %24 = arith.truncf %23 : vector<32x512xf32> to vector<32x512xbf16>
    %c96 = arith.constant 96 : index
    %c0_7 = arith.constant 0 : index
    %25 = vector.load %arg8[%c96, %c0_7] : memref<864x512xbf16, #tpu.memory_space<vmem>>, vector<32x512xbf16>
    tpu.vector_store %arg8[%c96, %c0_7], %24 {strides = array<i32>} : memref<864x512xbf16, #tpu.memory_space<vmem>>, vector<32x512xbf16>,
    %c64_i32 = arith.constant 64 : i32
    %26 = tpu.dynamic_rotate %0 by %c64_i32 dim 1 : vector<32x512xf32>, i32 -> vector<32x512xf32>
    %27 = vector.extract_strided_slice %1 {offsets = [4, 0], sizes = [1, 512], strides = [1, 1]} : vector<27x512xf32> to vector<1x512xf32>
    %28 = vector.broadcast %27 : vector<1x512xf32> to vector<32x512xf32>
    %29 = arith.mulf %26, %28 : vector<32x512xf32>
    %30 = arith.truncf %29 : vector<32x512xf32> to vector<32x512xbf16>
    %c128 = arith.constant 128 : index
    %c0_8 = arith.constant 0 : index
    %31 = vector.load %arg8[%c128, %c0_8] : memref<864x512xbf16, #tpu.memory_space<vmem>>, vector<32x512xbf16>
    tpu.vector_store %arg8[%c128, %c0_8], %30 {strides = array<i32>} : memref<864x512xbf16, #tpu.memory_space<vmem>>, vector<32x512xbf16>,
    %c63_i32 = arith.constant 63 : i32
    %32 = tpu.dynamic_rotate %0 by %c63_i32 dim 1 : vector<32x512xf32>, i32 -> vector<32x512xf32>
    %33 = vector.extract_strided_slice %1 {offsets = [5, 0], sizes = [1, 512], strides = [1, 1]} : vector<27x512xf32> to vector<1x512xf32>
    %34 = vector.broadcast %33 : vector<1x512xf32> to vector<32x512xf32>
    %35 = arith.mulf %32, %34 : vector<32x512xf32>
    %36 = arith.truncf %35 : vector<32x512xf32> to vector<32x512xbf16>
    %c160 = arith.constant 160 : index
    %c0_9 = arith.constant 0 : index
    %37 = vector.load %arg8[%c160, %c0_9] : memref<864x512xbf16, #tpu.memory_space<vmem>>, vector<32x512xbf16>
    tpu.vector_store %arg8[%c160, %c0_9], %36 {strides = array<i32>} : memref<864x512xbf16, #tpu.memory_space<vmem>>, vector<32x512xbf16>,
    %c57_i32 = arith.constant 57 : i32
    %38 = tpu.dynamic_rotate %0 by %c57_i32 dim 1 : vector<32x512xf32>, i32 -> vector<32x512xf32>
    %39 = vector.extract_strided_slice %1 {offsets = [6, 0], sizes = [1, 512], strides = [1, 1]} : vector<27x512xf32> to vector<1x512xf32>
    %40 = vector.broadcast %39 : vector<1x512xf32> to vector<32x512xf32>
    %41 = arith.mulf %38, %40 : vector<32x512xf32>
    %42 = arith.truncf %41 : vector<32x512xf32> to vector<32x512xbf16>
    %c192 = arith.constant 192 : index
    %c0_10 = arith.constant 0 : index
    %43 = vector.load %arg8[%c192, %c0_10] : memref<864x512xbf16, #tpu.memory_space<vmem>>, vector<32x512xbf16>
    tpu.vector_store %arg8[%c192, %c0_10], %42 {strides = array<i32>} : memref<864x512xbf16, #tpu.memory_space<vmem>>, vector<32x512xbf16>,
    %c56_i32 = arith.constant 56 : i32
    %44 = tpu.dynamic_rotate %0 by %c56_i32 dim 1 : vector<32x512xf32>, i32 -> vector<32x512xf32>
    %45 = vector.extract_strided_slice %1 {offsets = [7, 0], sizes = [1, 512], strides = [1, 1]} : vector<27x512xf32> to vector<1x512xf32>
    %46 = vector.broadcast %45 : vector<1x512xf32> to vector<32x512xf32>
    %47 = arith.mulf %44, %46 : vector<32x512xf32>
    %48 = arith.truncf %47 : vector<32x512xf32> to vector<32x512xbf16>
    %c224 = arith.constant 224 : index
    %c0_11 = arith.constant 0 : index
    %49 = vector.load %arg8[%c224, %c0_11] : memref<864x512xbf16, #tpu.memory_space<vmem>>, vector<32x512xbf16>
    tpu.vector_store %arg8[%c224, %c0_11], %48 {strides = array<i32>} : memref<864x512xbf16, #tpu.memory_space<vmem>>, vector<32x512xbf16>,
    %c55_i32 = arith.constant 55 : i32
    %50 = tpu.dynamic_rotate %0 by %c55_i32 dim 1 : vector<32x512xf32>, i32 -> vector<32x512xf32>
    %51 = vector.extract_strided_slice %1 {offsets = [8, 0], sizes = [1, 512], strides = [1, 1]} : vector<27x512xf32> to vector<1x512xf32>
    %52 = vector.broadcast %51 : vector<1x512xf32> to vector<32x512xf32>
    %53 = arith.mulf %50, %52 : vector<32x512xf32>
    %54 = arith.truncf %53 : vector<32x512xf32> to vector<32x512xbf16>
    %c256 = arith.constant 256 : index
    %c0_12 = arith.constant 0 : index
    %55 = vector.load %arg8[%c256, %c0_12] : memref<864x512xbf16, #tpu.memory_space<vmem>>, vector<32x512xbf16>
    tpu.vector_store %arg8[%c256, %c0_12], %54 {strides = array<i32>} : memref<864x512xbf16, #tpu.memory_space<vmem>>, vector<32x512xbf16>,
    %c9_i32 = arith.constant 9 : i32
    %56 = tpu.dynamic_rotate %0 by %c9_i32 dim 1 : vector<32x512xf32>, i32 -> vector<32x512xf32>
    %57 = vector.extract_strided_slice %1 {offsets = [9, 0], sizes = [1, 512], strides = [1, 1]} : vector<27x512xf32> to vector<1x512xf32>
    %58 = vector.broadcast %57 : vector<1x512xf32> to vector<32x512xf32>
    %59 = arith.mulf %56, %58 : vector<32x512xf32>
    %60 = arith.truncf %59 : vector<32x512xf32> to vector<32x512xbf16>
    %c288 = arith.constant 288 : index
    %c0_13 = arith.constant 0 : index
    %61 = vector.load %arg8[%c288, %c0_13] : memref<864x512xbf16, #tpu.memory_space<vmem>>, vector<32x512xbf16>
    tpu.vector_store %arg8[%c288, %c0_13], %60 {strides = array<i32>} : memref<864x512xbf16, #tpu.memory_space<vmem>>, vector<32x512xbf16>,
    %c8_i32 = arith.constant 8 : i32
    %62 = tpu.dynamic_rotate %0 by %c8_i32 dim 1 : vector<32x512xf32>, i32 -> vector<32x512xf32>
    %63 = vector.extract_strided_slice %1 {offsets = [10, 0], sizes = [1, 512], strides = [1, 1]} : vector<27x512xf32> to vector<1x512xf32>
    %64 = vector.broadcast %63 : vector<1x512xf32> to vector<32x512xf32>
    %65 = arith.mulf %62, %64 : vector<32x512xf32>
    %66 = arith.truncf %65 : vector<32x512xf32> to vector<32x512xbf16>
    %c320 = arith.constant 320 : index
    %c0_14 = arith.constant 0 : index
    %67 = vector.load %arg8[%c320, %c0_14] : memref<864x512xbf16, #tpu.memory_space<vmem>>, vector<32x512xbf16>
    tpu.vector_store %arg8[%c320, %c0_14], %66 {strides = array<i32>} : memref<864x512xbf16, #tpu.memory_space<vmem>>, vector<32x512xbf16>,
    %c7_i32 = arith.constant 7 : i32
    %68 = tpu.dynamic_rotate %0 by %c7_i32 dim 1 : vector<32x512xf32>, i32 -> vector<32x512xf32>
    %69 = vector.extract_strided_slice %1 {offsets = [11, 0], sizes = [1, 512], strides = [1, 1]} : vector<27x512xf32> to vector<1x512xf32>
    %70 = vector.broadcast %69 : vector<1x512xf32> to vector<32x512xf32>
    %71 = arith.mulf %68, %70 : vector<32x512xf32>
    %72 = arith.truncf %71 : vector<32x512xf32> to vector<32x512xbf16>
    %c352 = arith.constant 352 : index
    %c0_15 = arith.constant 0 : index
    %73 = vector.load %arg8[%c352, %c0_15] : memref<864x512xbf16, #tpu.memory_space<vmem>>, vector<32x512xbf16>
    tpu.vector_store %arg8[%c352, %c0_15], %72 {strides = array<i32>} : memref<864x512xbf16, #tpu.memory_space<vmem>>, vector<32x512xbf16>,
    %c1_i32 = arith.constant 1 : i32
    %74 = tpu.dynamic_rotate %0 by %c1_i32 dim 1 : vector<32x512xf32>, i32 -> vector<32x512xf32>
    %75 = vector.extract_strided_slice %1 {offsets = [12, 0], sizes = [1, 512], strides = [1, 1]} : vector<27x512xf32> to vector<1x512xf32>
    %76 = vector.broadcast %75 : vector<1x512xf32> to vector<32x512xf32>
    %77 = arith.mulf %74, %76 : vector<32x512xf32>
    %78 = arith.truncf %77 : vector<32x512xf32> to vector<32x512xbf16>
    %c384 = arith.constant 384 : index
    %c0_16 = arith.constant 0 : index
    %79 = vector.load %arg8[%c384, %c0_16] : memref<864x512xbf16, #tpu.memory_space<vmem>>, vector<32x512xbf16>
    tpu.vector_store %arg8[%c384, %c0_16], %78 {strides = array<i32>} : memref<864x512xbf16, #tpu.memory_space<vmem>>, vector<32x512xbf16>,
    %80 = vector.extract_strided_slice %1 {offsets = [13, 0], sizes = [1, 512], strides = [1, 1]} : vector<27x512xf32> to vector<1x512xf32>
    %81 = vector.broadcast %80 : vector<1x512xf32> to vector<32x512xf32>
    %82 = arith.mulf %0, %81 : vector<32x512xf32>
    %83 = arith.truncf %82 : vector<32x512xf32> to vector<32x512xbf16>
    %c416 = arith.constant 416 : index
    %c0_17 = arith.constant 0 : index
    %84 = vector.load %arg8[%c416, %c0_17] : memref<864x512xbf16, #tpu.memory_space<vmem>>, vector<32x512xbf16>
    tpu.vector_store %arg8[%c416, %c0_17], %83 {strides = array<i32>} : memref<864x512xbf16, #tpu.memory_space<vmem>>, vector<32x512xbf16>,
    %c511_i32 = arith.constant 511 : i32
    %85 = tpu.dynamic_rotate %0 by %c511_i32 dim 1 : vector<32x512xf32>, i32 -> vector<32x512xf32>
    %86 = vector.extract_strided_slice %1 {offsets = [14, 0], sizes = [1, 512], strides = [1, 1]} : vector<27x512xf32> to vector<1x512xf32>
    %87 = vector.broadcast %86 : vector<1x512xf32> to vector<32x512xf32>
    %88 = arith.mulf %85, %87 : vector<32x512xf32>
    %89 = arith.truncf %88 : vector<32x512xf32> to vector<32x512xbf16>
    %c448 = arith.constant 448 : index
    %c0_18 = arith.constant 0 : index
    %90 = vector.load %arg8[%c448, %c0_18] : memref<864x512xbf16, #tpu.memory_space<vmem>>, vector<32x512xbf16>
    tpu.vector_store %arg8[%c448, %c0_18], %89 {strides = array<i32>} : memref<864x512xbf16, #tpu.memory_space<vmem>>, vector<32x512xbf16>,
    %c505_i32 = arith.constant 505 : i32
    %91 = tpu.dynamic_rotate %0 by %c505_i32 dim 1 : vector<32x512xf32>, i32 -> vector<32x512xf32>
    %92 = vector.extract_strided_slice %1 {offsets = [15, 0], sizes = [1, 512], strides = [1, 1]} : vector<27x512xf32> to vector<1x512xf32>
    %93 = vector.broadcast %92 : vector<1x512xf32> to vector<32x512xf32>
    %94 = arith.mulf %91, %93 : vector<32x512xf32>
    %95 = arith.truncf %94 : vector<32x512xf32> to vector<32x512xbf16>
    %c480 = arith.constant 480 : index
    %c0_19 = arith.constant 0 : index
    %96 = vector.load %arg8[%c480, %c0_19] : memref<864x512xbf16, #tpu.memory_space<vmem>>, vector<32x512xbf16>
    tpu.vector_store %arg8[%c480, %c0_19], %95 {strides = array<i32>} : memref<864x512xbf16, #tpu.memory_space<vmem>>, vector<32x512xbf16>,
    %c504_i32 = arith.constant 504 : i32
    %97 = tpu.dynamic_rotate %0 by %c504_i32 dim 1 : vector<32x512xf32>, i32 -> vector<32x512xf32>
    %98 = vector.extract_strided_slice %1 {offsets = [16, 0], sizes = [1, 512], strides = [1, 1]} : vector<27x512xf32> to vector<1x512xf32>
    %99 = vector.broadcast %98 : vector<1x512xf32> to vector<32x512xf32>
    %100 = arith.mulf %97, %99 : vector<32x512xf32>
    %101 = arith.truncf %100 : vector<32x512xf32> to vector<32x512xbf16>
    %c512 = arith.constant 512 : index
    %c0_20 = arith.constant 0 : index
    %102 = vector.load %arg8[%c512, %c0_20] : memref<864x512xbf16, #tpu.memory_space<vmem>>, vector<32x512xbf16>
    tpu.vector_store %arg8[%c512, %c0_20], %101 {strides = array<i32>} : memref<864x512xbf16, #tpu.memory_space<vmem>>, vector<32x512xbf16>,
    %c503_i32 = arith.constant 503 : i32
    %103 = tpu.dynamic_rotate %0 by %c503_i32 dim 1 : vector<32x512xf32>, i32 -> vector<32x512xf32>
    %104 = vector.extract_strided_slice %1 {offsets = [17, 0], sizes = [1, 512], strides = [1, 1]} : vector<27x512xf32> to vector<1x512xf32>
    %105 = vector.broadcast %104 : vector<1x512xf32> to vector<32x512xf32>
    %106 = arith.mulf %103, %105 : vector<32x512xf32>
    %107 = arith.truncf %106 : vector<32x512xf32> to vector<32x512xbf16>
    %c544 = arith.constant 544 : index
    %c0_21 = arith.constant 0 : index
    %108 = vector.load %arg8[%c544, %c0_21] : memref<864x512xbf16, #tpu.memory_space<vmem>>, vector<32x512xbf16>
    tpu.vector_store %arg8[%c544, %c0_21], %107 {strides = array<i32>} : memref<864x512xbf16, #tpu.memory_space<vmem>>, vector<32x512xbf16>,
    %c457_i32 = arith.constant 457 : i32
    %109 = tpu.dynamic_rotate %0 by %c457_i32 dim 1 : vector<32x512xf32>, i32 -> vector<32x512xf32>
    %110 = vector.extract_strided_slice %1 {offsets = [18, 0], sizes = [1, 512], strides = [1, 1]} : vector<27x512xf32> to vector<1x512xf32>
    %111 = vector.broadcast %110 : vector<1x512xf32> to vector<32x512xf32>
    %112 = arith.mulf %109, %111 : vector<32x512xf32>
    %113 = arith.truncf %112 : vector<32x512xf32> to vector<32x512xbf16>
    %c576 = arith.constant 576 : index
    %c0_22 = arith.constant 0 : index
    %114 = vector.load %arg8[%c576, %c0_22] : memref<864x512xbf16, #tpu.memory_space<vmem>>, vector<32x512xbf16>
    tpu.vector_store %arg8[%c576, %c0_22], %113 {strides = array<i32>} : memref<864x512xbf16, #tpu.memory_space<vmem>>, vector<32x512xbf16>,
    %c456_i32 = arith.constant 456 : i32
    %115 = tpu.dynamic_rotate %0 by %c456_i32 dim 1 : vector<32x512xf32>, i32 -> vector<32x512xf32>
    %116 = vector.extract_strided_slice %1 {offsets = [19, 0], sizes = [1, 512], strides = [1, 1]} : vector<27x512xf32> to vector<1x512xf32>
    %117 = vector.broadcast %116 : vector<1x512xf32> to vector<32x512xf32>
    %118 = arith.mulf %115, %117 : vector<32x512xf32>
    %119 = arith.truncf %118 : vector<32x512xf32> to vector<32x512xbf16>
    %c608 = arith.constant 608 : index
    %c0_23 = arith.constant 0 : index
    %120 = vector.load %arg8[%c608, %c0_23] : memref<864x512xbf16, #tpu.memory_space<vmem>>, vector<32x512xbf16>
    tpu.vector_store %arg8[%c608, %c0_23], %119 {strides = array<i32>} : memref<864x512xbf16, #tpu.memory_space<vmem>>, vector<32x512xbf16>,
    %c455_i32 = arith.constant 455 : i32
    %121 = tpu.dynamic_rotate %0 by %c455_i32 dim 1 : vector<32x512xf32>, i32 -> vector<32x512xf32>
    %122 = vector.extract_strided_slice %1 {offsets = [20, 0], sizes = [1, 512], strides = [1, 1]} : vector<27x512xf32> to vector<1x512xf32>
    %123 = vector.broadcast %122 : vector<1x512xf32> to vector<32x512xf32>
    %124 = arith.mulf %121, %123 : vector<32x512xf32>
    %125 = arith.truncf %124 : vector<32x512xf32> to vector<32x512xbf16>
    %c640 = arith.constant 640 : index
    %c0_24 = arith.constant 0 : index
    %126 = vector.load %arg8[%c640, %c0_24] : memref<864x512xbf16, #tpu.memory_space<vmem>>, vector<32x512xbf16>
    tpu.vector_store %arg8[%c640, %c0_24], %125 {strides = array<i32>} : memref<864x512xbf16, #tpu.memory_space<vmem>>, vector<32x512xbf16>,
    %c449_i32 = arith.constant 449 : i32
    %127 = tpu.dynamic_rotate %0 by %c449_i32 dim 1 : vector<32x512xf32>, i32 -> vector<32x512xf32>
    %128 = vector.extract_strided_slice %1 {offsets = [21, 0], sizes = [1, 512], strides = [1, 1]} : vector<27x512xf32> to vector<1x512xf32>
    %129 = vector.broadcast %128 : vector<1x512xf32> to vector<32x512xf32>
    %130 = arith.mulf %127, %129 : vector<32x512xf32>
    %131 = arith.truncf %130 : vector<32x512xf32> to vector<32x512xbf16>
    %c672 = arith.constant 672 : index
    %c0_25 = arith.constant 0 : index
    %132 = vector.load %arg8[%c672, %c0_25] : memref<864x512xbf16, #tpu.memory_space<vmem>>, vector<32x512xbf16>
    tpu.vector_store %arg8[%c672, %c0_25], %131 {strides = array<i32>} : memref<864x512xbf16, #tpu.memory_space<vmem>>, vector<32x512xbf16>,
    %c448_i32 = arith.constant 448 : i32
    %133 = tpu.dynamic_rotate %0 by %c448_i32 dim 1 : vector<32x512xf32>, i32 -> vector<32x512xf32>
    %134 = vector.extract_strided_slice %1 {offsets = [22, 0], sizes = [1, 512], strides = [1, 1]} : vector<27x512xf32> to vector<1x512xf32>
    %135 = vector.broadcast %134 : vector<1x512xf32> to vector<32x512xf32>
    %136 = arith.mulf %133, %135 : vector<32x512xf32>
    %137 = arith.truncf %136 : vector<32x512xf32> to vector<32x512xbf16>
    %c704 = arith.constant 704 : index
    %c0_26 = arith.constant 0 : index
    %138 = vector.load %arg8[%c704, %c0_26] : memref<864x512xbf16, #tpu.memory_space<vmem>>, vector<32x512xbf16>
    tpu.vector_store %arg8[%c704, %c0_26], %137 {strides = array<i32>} : memref<864x512xbf16, #tpu.memory_space<vmem>>, vector<32x512xbf16>,
    %c447_i32 = arith.constant 447 : i32
    %139 = tpu.dynamic_rotate %0 by %c447_i32 dim 1 : vector<32x512xf32>, i32 -> vector<32x512xf32>
    %140 = vector.extract_strided_slice %1 {offsets = [23, 0], sizes = [1, 512], strides = [1, 1]} : vector<27x512xf32> to vector<1x512xf32>
    %141 = vector.broadcast %140 : vector<1x512xf32> to vector<32x512xf32>
    %142 = arith.mulf %139, %141 : vector<32x512xf32>
    %143 = arith.truncf %142 : vector<32x512xf32> to vector<32x512xbf16>
    %c736 = arith.constant 736 : index
    %c0_27 = arith.constant 0 : index
    %144 = vector.load %arg8[%c736, %c0_27] : memref<864x512xbf16, #tpu.memory_space<vmem>>, vector<32x512xbf16>
    tpu.vector_store %arg8[%c736, %c0_27], %143 {strides = array<i32>} : memref<864x512xbf16, #tpu.memory_space<vmem>>, vector<32x512xbf16>,
    %c441_i32 = arith.constant 441 : i32
    %145 = tpu.dynamic_rotate %0 by %c441_i32 dim 1 : vector<32x512xf32>, i32 -> vector<32x512xf32>
    %146 = vector.extract_strided_slice %1 {offsets = [24, 0], sizes = [1, 512], strides = [1, 1]} : vector<27x512xf32> to vector<1x512xf32>
    %147 = vector.broadcast %146 : vector<1x512xf32> to vector<32x512xf32>
    %148 = arith.mulf %145, %147 : vector<32x512xf32>
    %149 = arith.truncf %148 : vector<32x512xf32> to vector<32x512xbf16>
    %c768 = arith.constant 768 : index
    %c0_28 = arith.constant 0 : index
    %150 = vector.load %arg8[%c768, %c0_28] : memref<864x512xbf16, #tpu.memory_space<vmem>>, vector<32x512xbf16>
    tpu.vector_store %arg8[%c768, %c0_28], %149 {strides = array<i32>} : memref<864x512xbf16, #tpu.memory_space<vmem>>, vector<32x512xbf16>,
    %c440_i32 = arith.constant 440 : i32
    %151 = tpu.dynamic_rotate %0 by %c440_i32 dim 1 : vector<32x512xf32>, i32 -> vector<32x512xf32>
    %152 = vector.extract_strided_slice %1 {offsets = [25, 0], sizes = [1, 512], strides = [1, 1]} : vector<27x512xf32> to vector<1x512xf32>
    %153 = vector.broadcast %152 : vector<1x512xf32> to vector<32x512xf32>
    %154 = arith.mulf %151, %153 : vector<32x512xf32>
    %155 = arith.truncf %154 : vector<32x512xf32> to vector<32x512xbf16>
    %c800 = arith.constant 800 : index
    %c0_29 = arith.constant 0 : index
    %156 = vector.load %arg8[%c800, %c0_29] : memref<864x512xbf16, #tpu.memory_space<vmem>>, vector<32x512xbf16>
    tpu.vector_store %arg8[%c800, %c0_29], %155 {strides = array<i32>} : memref<864x512xbf16, #tpu.memory_space<vmem>>, vector<32x512xbf16>,
    %c439_i32 = arith.constant 439 : i32
    %157 = tpu.dynamic_rotate %0 by %c439_i32 dim 1 : vector<32x512xf32>, i32 -> vector<32x512xf32>
    %158 = vector.extract_strided_slice %1 {offsets = [26, 0], sizes = [1, 512], strides = [1, 1]} : vector<27x512xf32> to vector<1x512xf32>
    %159 = vector.broadcast %158 : vector<1x512xf32> to vector<32x512xf32>
    %160 = arith.mulf %157, %159 : vector<32x512xf32>
    %161 = arith.truncf %160 : vector<32x512xf32> to vector<32x512xbf16>
    %c832 = arith.constant 832 : index
    %c0_30 = arith.constant 0 : index
    %162 = vector.load %arg8[%c832, %c0_30] : memref<864x512xbf16, #tpu.memory_space<vmem>>, vector<32x512xbf16>
    tpu.vector_store %arg8[%c832, %c0_30], %161 {strides = array<i32>} : memref<864x512xbf16, #tpu.memory_space<vmem>>, vector<32x512xbf16>,
    %c0_31 = arith.constant 0 : index
    %c0_32 = arith.constant 0 : index
    %163 = vector.load %arg3[%c0_31, %c0_32] : memref<32x864xbf16, #tpu.memory_space<vmem>>, vector<32x864xbf16>
    %c0_33 = arith.constant 0 : index
    %c0_34 = arith.constant 0 : index
    %164 = vector.load %arg8[%c0_33, %c0_34] : memref<864x512xbf16, #tpu.memory_space<vmem>>, vector<864x512xbf16>
    %cst = arith.constant dense<0.000000e+00> : vector<32x512xf32>
    %165 = tpu.matmul %163, %164, %cst {dimension_numbers = #tpu.dot_dimension_numbers<[1], [0], [0], [1], [0, 0, 1, 1], [], []>} : vector<32x864xbf16>, vector<864x512xbf16>, vector<32x512xf32> -> vector<32x512xf32>
    %c0_35 = arith.constant 0 : index
    %c0_36 = arith.constant 0 : index
    %166 = vector.load %arg4[%c0_35, %c0_36] : memref<32x1xf32, #tpu.memory_space<vmem>>, vector<32x1xf32>
    %167 = vector.broadcast %166 : vector<32x1xf32> to vector<32x512xf32>
    %168 = arith.addf %165, %167 : vector<32x512xf32>
    %cst_37 = arith.constant 0.000000e+00 : f32
    %169 = vector.broadcast %cst_37 : f32 to vector<32x512xf32>
    %170 = arith.maximumf %168, %169 : vector<32x512xf32>
    %c73_i32_38 = arith.constant 73 : i32
    %171 = tpu.dynamic_rotate %170 by %c73_i32_38 dim 1 : vector<32x512xf32>, i32 -> vector<32x512xf32>
    %172 = vector.extract_strided_slice %1 {offsets = [0, 0], sizes = [1, 512], strides = [1, 1]} : vector<27x512xf32> to vector<1x512xf32>
    %173 = vector.broadcast %172 : vector<1x512xf32> to vector<32x512xf32>
    %174 = arith.mulf %171, %173 : vector<32x512xf32>
    %175 = arith.truncf %174 : vector<32x512xf32> to vector<32x512xbf16>
    %c0_39 = arith.constant 0 : index
    %c0_40 = arith.constant 0 : index
    %176 = vector.load %arg8[%c0_39, %c0_40] : memref<864x512xbf16, #tpu.memory_space<vmem>>, vector<32x512xbf16>
    tpu.vector_store %arg8[%c0_39, %c0_40], %175 {strides = array<i32>} : memref<864x512xbf16, #tpu.memory_space<vmem>>, vector<32x512xbf16>,
    %c72_i32_41 = arith.constant 72 : i32
    %177 = tpu.dynamic_rotate %170 by %c72_i32_41 dim 1 : vector<32x512xf32>, i32 -> vector<32x512xf32>
    %178 = vector.extract_strided_slice %1 {offsets = [1, 0], sizes = [1, 512], strides = [1, 1]} : vector<27x512xf32> to vector<1x512xf32>
    %179 = vector.broadcast %178 : vector<1x512xf32> to vector<32x512xf32>
    %180 = arith.mulf %177, %179 : vector<32x512xf32>
    %181 = arith.truncf %180 : vector<32x512xf32> to vector<32x512xbf16>
    %c32_42 = arith.constant 32 : index
    %c0_43 = arith.constant 0 : index
    %182 = vector.load %arg8[%c32_42, %c0_43] : memref<864x512xbf16, #tpu.memory_space<vmem>>, vector<32x512xbf16>
    tpu.vector_store %arg8[%c32_42, %c0_43], %181 {strides = array<i32>} : memref<864x512xbf16, #tpu.memory_space<vmem>>, vector<32x512xbf16>,
    %c71_i32_44 = arith.constant 71 : i32
    %183 = tpu.dynamic_rotate %170 by %c71_i32_44 dim 1 : vector<32x512xf32>, i32 -> vector<32x512xf32>
    %184 = vector.extract_strided_slice %1 {offsets = [2, 0], sizes = [1, 512], strides = [1, 1]} : vector<27x512xf32> to vector<1x512xf32>
    %185 = vector.broadcast %184 : vector<1x512xf32> to vector<32x512xf32>
    %186 = arith.mulf %183, %185 : vector<32x512xf32>
    %187 = arith.truncf %186 : vector<32x512xf32> to vector<32x512xbf16>
    %c64_45 = arith.constant 64 : index
    %c0_46 = arith.constant 0 : index
    %188 = vector.load %arg8[%c64_45, %c0_46] : memref<864x512xbf16, #tpu.memory_space<vmem>>, vector<32x512xbf16>
    tpu.vector_store %arg8[%c64_45, %c0_46], %187 {strides = array<i32>} : memref<864x512xbf16, #tpu.memory_space<vmem>>, vector<32x512xbf16>,
    %c65_i32_47 = arith.constant 65 : i32
    %189 = tpu.dynamic_rotate %170 by %c65_i32_47 dim 1 : vector<32x512xf32>, i32 -> vector<32x512xf32>
    %190 = vector.extract_strided_slice %1 {offsets = [3, 0], sizes = [1, 512], strides = [1, 1]} : vector<27x512xf32> to vector<1x512xf32>
    %191 = vector.broadcast %190 : vector<1x512xf32> to vector<32x512xf32>
    %192 = arith.mulf %189, %191 : vector<32x512xf32>
    %193 = arith.truncf %192 : vector<32x512xf32> to vector<32x512xbf16>
    %c96_48 = arith.constant 96 : index
    %c0_49 = arith.constant 0 : index
    %194 = vector.load %arg8[%c96_48, %c0_49] : memref<864x512xbf16, #tpu.memory_space<vmem>>, vector<32x512xbf16>
    tpu.vector_store %arg8[%c96_48, %c0_49], %193 {strides = array<i32>} : memref<864x512xbf16, #tpu.memory_space<vmem>>, vector<32x512xbf16>,
    %c64_i32_50 = arith.constant 64 : i32
    %195 = tpu.dynamic_rotate %170 by %c64_i32_50 dim 1 : vector<32x512xf32>, i32 -> vector<32x512xf32>
    %196 = vector.extract_strided_slice %1 {offsets = [4, 0], sizes = [1, 512], strides = [1, 1]} : vector<27x512xf32> to vector<1x512xf32>
    %197 = vector.broadcast %196 : vector<1x512xf32> to vector<32x512xf32>
    %198 = arith.mulf %195, %197 : vector<32x512xf32>
    %199 = arith.truncf %198 : vector<32x512xf32> to vector<32x512xbf16>
    %c128_51 = arith.constant 128 : index
    %c0_52 = arith.constant 0 : index
    %200 = vector.load %arg8[%c128_51, %c0_52] : memref<864x512xbf16, #tpu.memory_space<vmem>>, vector<32x512xbf16>
    tpu.vector_store %arg8[%c128_51, %c0_52], %199 {strides = array<i32>} : memref<864x512xbf16, #tpu.memory_space<vmem>>, vector<32x512xbf16>,
    %c63_i32_53 = arith.constant 63 : i32
    %201 = tpu.dynamic_rotate %170 by %c63_i32_53 dim 1 : vector<32x512xf32>, i32 -> vector<32x512xf32>
    %202 = vector.extract_strided_slice %1 {offsets = [5, 0], sizes = [1, 512], strides = [1, 1]} : vector<27x512xf32> to vector<1x512xf32>
    %203 = vector.broadcast %202 : vector<1x512xf32> to vector<32x512xf32>
    %204 = arith.mulf %201, %203 : vector<32x512xf32>
    %205 = arith.truncf %204 : vector<32x512xf32> to vector<32x512xbf16>
    %c160_54 = arith.constant 160 : index
    %c0_55 = arith.constant 0 : index
    %206 = vector.load %arg8[%c160_54, %c0_55] : memref<864x512xbf16, #tpu.memory_space<vmem>>, vector<32x512xbf16>
    tpu.vector_store %arg8[%c160_54, %c0_55], %205 {strides = array<i32>} : memref<864x512xbf16, #tpu.memory_space<vmem>>, vector<32x512xbf16>,
    %c57_i32_56 = arith.constant 57 : i32
    %207 = tpu.dynamic_rotate %170 by %c57_i32_56 dim 1 : vector<32x512xf32>, i32 -> vector<32x512xf32>
    %208 = vector.extract_strided_slice %1 {offsets = [6, 0], sizes = [1, 512], strides = [1, 1]} : vector<27x512xf32> to vector<1x512xf32>
    %209 = vector.broadcast %208 : vector<1x512xf32> to vector<32x512xf32>
    %210 = arith.mulf %207, %209 : vector<32x512xf32>
    %211 = arith.truncf %210 : vector<32x512xf32> to vector<32x512xbf16>
    %c192_57 = arith.constant 192 : index
    %c0_58 = arith.constant 0 : index
    %212 = vector.load %arg8[%c192_57, %c0_58] : memref<864x512xbf16, #tpu.memory_space<vmem>>, vector<32x512xbf16>
    tpu.vector_store %arg8[%c192_57, %c0_58], %211 {strides = array<i32>} : memref<864x512xbf16, #tpu.memory_space<vmem>>, vector<32x512xbf16>,
    %c56_i32_59 = arith.constant 56 : i32
    %213 = tpu.dynamic_rotate %170 by %c56_i32_59 dim 1 : vector<32x512xf32>, i32 -> vector<32x512xf32>
    %214 = vector.extract_strided_slice %1 {offsets = [7, 0], sizes = [1, 512], strides = [1, 1]} : vector<27x512xf32> to vector<1x512xf32>
    %215 = vector.broadcast %214 : vector<1x512xf32> to vector<32x512xf32>
    %216 = arith.mulf %213, %215 : vector<32x512xf32>
    %217 = arith.truncf %216 : vector<32x512xf32> to vector<32x512xbf16>
    %c224_60 = arith.constant 224 : index
    %c0_61 = arith.constant 0 : index
    %218 = vector.load %arg8[%c224_60, %c0_61] : memref<864x512xbf16, #tpu.memory_space<vmem>>, vector<32x512xbf16>
    tpu.vector_store %arg8[%c224_60, %c0_61], %217 {strides = array<i32>} : memref<864x512xbf16, #tpu.memory_space<vmem>>, vector<32x512xbf16>,
    %c55_i32_62 = arith.constant 55 : i32
    %219 = tpu.dynamic_rotate %170 by %c55_i32_62 dim 1 : vector<32x512xf32>, i32 -> vector<32x512xf32>
    %220 = vector.extract_strided_slice %1 {offsets = [8, 0], sizes = [1, 512], strides = [1, 1]} : vector<27x512xf32> to vector<1x512xf32>
    %221 = vector.broadcast %220 : vector<1x512xf32> to vector<32x512xf32>
    %222 = arith.mulf %219, %221 : vector<32x512xf32>
    %223 = arith.truncf %222 : vector<32x512xf32> to vector<32x512xbf16>
    %c256_63 = arith.constant 256 : index
    %c0_64 = arith.constant 0 : index
    %224 = vector.load %arg8[%c256_63, %c0_64] : memref<864x512xbf16, #tpu.memory_space<vmem>>, vector<32x512xbf16>
    tpu.vector_store %arg8[%c256_63, %c0_64], %223 {strides = array<i32>} : memref<864x512xbf16, #tpu.memory_space<vmem>>, vector<32x512xbf16>,
    %c9_i32_65 = arith.constant 9 : i32
    %225 = tpu.dynamic_rotate %170 by %c9_i32_65 dim 1 : vector<32x512xf32>, i32 -> vector<32x512xf32>
    %226 = vector.extract_strided_slice %1 {offsets = [9, 0], sizes = [1, 512], strides = [1, 1]} : vector<27x512xf32> to vector<1x512xf32>
    %227 = vector.broadcast %226 : vector<1x512xf32> to vector<32x512xf32>
    %228 = arith.mulf %225, %227 : vector<32x512xf32>
    %229 = arith.truncf %228 : vector<32x512xf32> to vector<32x512xbf16>
    %c288_66 = arith.constant 288 : index
    %c0_67 = arith.constant 0 : index
    %230 = vector.load %arg8[%c288_66, %c0_67] : memref<864x512xbf16, #tpu.memory_space<vmem>>, vector<32x512xbf16>
    tpu.vector_store %arg8[%c288_66, %c0_67], %229 {strides = array<i32>} : memref<864x512xbf16, #tpu.memory_space<vmem>>, vector<32x512xbf16>,
    %c8_i32_68 = arith.constant 8 : i32
    %231 = tpu.dynamic_rotate %170 by %c8_i32_68 dim 1 : vector<32x512xf32>, i32 -> vector<32x512xf32>
    %232 = vector.extract_strided_slice %1 {offsets = [10, 0], sizes = [1, 512], strides = [1, 1]} : vector<27x512xf32> to vector<1x512xf32>
    %233 = vector.broadcast %232 : vector<1x512xf32> to vector<32x512xf32>
    %234 = arith.mulf %231, %233 : vector<32x512xf32>
    %235 = arith.truncf %234 : vector<32x512xf32> to vector<32x512xbf16>
    %c320_69 = arith.constant 320 : index
    %c0_70 = arith.constant 0 : index
    %236 = vector.load %arg8[%c320_69, %c0_70] : memref<864x512xbf16, #tpu.memory_space<vmem>>, vector<32x512xbf16>
    tpu.vector_store %arg8[%c320_69, %c0_70], %235 {strides = array<i32>} : memref<864x512xbf16, #tpu.memory_space<vmem>>, vector<32x512xbf16>,
    %c7_i32_71 = arith.constant 7 : i32
    %237 = tpu.dynamic_rotate %170 by %c7_i32_71 dim 1 : vector<32x512xf32>, i32 -> vector<32x512xf32>
    %238 = vector.extract_strided_slice %1 {offsets = [11, 0], sizes = [1, 512], strides = [1, 1]} : vector<27x512xf32> to vector<1x512xf32>
    %239 = vector.broadcast %238 : vector<1x512xf32> to vector<32x512xf32>
    %240 = arith.mulf %237, %239 : vector<32x512xf32>
    %241 = arith.truncf %240 : vector<32x512xf32> to vector<32x512xbf16>
    %c352_72 = arith.constant 352 : index
    %c0_73 = arith.constant 0 : index
    %242 = vector.load %arg8[%c352_72, %c0_73] : memref<864x512xbf16, #tpu.memory_space<vmem>>, vector<32x512xbf16>
    tpu.vector_store %arg8[%c352_72, %c0_73], %241 {strides = array<i32>} : memref<864x512xbf16, #tpu.memory_space<vmem>>, vector<32x512xbf16>,
    %c1_i32_74 = arith.constant 1 : i32
    %243 = tpu.dynamic_rotate %170 by %c1_i32_74 dim 1 : vector<32x512xf32>, i32 -> vector<32x512xf32>
    %244 = vector.extract_strided_slice %1 {offsets = [12, 0], sizes = [1, 512], strides = [1, 1]} : vector<27x512xf32> to vector<1x512xf32>
    %245 = vector.broadcast %244 : vector<1x512xf32> to vector<32x512xf32>
    %246 = arith.mulf %243, %245 : vector<32x512xf32>
    %247 = arith.truncf %246 : vector<32x512xf32> to vector<32x512xbf16>
    %c384_75 = arith.constant 384 : index
    %c0_76 = arith.constant 0 : index
    %248 = vector.load %arg8[%c384_75, %c0_76] : memref<864x512xbf16, #tpu.memory_space<vmem>>, vector<32x512xbf16>
    tpu.vector_store %arg8[%c384_75, %c0_76], %247 {strides = array<i32>} : memref<864x512xbf16, #tpu.memory_space<vmem>>, vector<32x512xbf16>,
    %249 = vector.extract_strided_slice %1 {offsets = [13, 0], sizes = [1, 512], strides = [1, 1]} : vector<27x512xf32> to vector<1x512xf32>
    %250 = vector.broadcast %249 : vector<1x512xf32> to vector<32x512xf32>
    %251 = arith.mulf %170, %250 : vector<32x512xf32>
    %252 = arith.truncf %251 : vector<32x512xf32> to vector<32x512xbf16>
    %c416_77 = arith.constant 416 : index
    %c0_78 = arith.constant 0 : index
    %253 = vector.load %arg8[%c416_77, %c0_78] : memref<864x512xbf16, #tpu.memory_space<vmem>>, vector<32x512xbf16>
    tpu.vector_store %arg8[%c416_77, %c0_78], %252 {strides = array<i32>} : memref<864x512xbf16, #tpu.memory_space<vmem>>, vector<32x512xbf16>,
    %c511_i32_79 = arith.constant 511 : i32
    %254 = tpu.dynamic_rotate %170 by %c511_i32_79 dim 1 : vector<32x512xf32>, i32 -> vector<32x512xf32>
    %255 = vector.extract_strided_slice %1 {offsets = [14, 0], sizes = [1, 512], strides = [1, 1]} : vector<27x512xf32> to vector<1x512xf32>
    %256 = vector.broadcast %255 : vector<1x512xf32> to vector<32x512xf32>
    %257 = arith.mulf %254, %256 : vector<32x512xf32>
    %258 = arith.truncf %257 : vector<32x512xf32> to vector<32x512xbf16>
    %c448_80 = arith.constant 448 : index
    %c0_81 = arith.constant 0 : index
    %259 = vector.load %arg8[%c448_80, %c0_81] : memref<864x512xbf16, #tpu.memory_space<vmem>>, vector<32x512xbf16>
    tpu.vector_store %arg8[%c448_80, %c0_81], %258 {strides = array<i32>} : memref<864x512xbf16, #tpu.memory_space<vmem>>, vector<32x512xbf16>,
    %c505_i32_82 = arith.constant 505 : i32
    %260 = tpu.dynamic_rotate %170 by %c505_i32_82 dim 1 : vector<32x512xf32>, i32 -> vector<32x512xf32>
    %261 = vector.extract_strided_slice %1 {offsets = [15, 0], sizes = [1, 512], strides = [1, 1]} : vector<27x512xf32> to vector<1x512xf32>
    %262 = vector.broadcast %261 : vector<1x512xf32> to vector<32x512xf32>
    %263 = arith.mulf %260, %262 : vector<32x512xf32>
    %264 = arith.truncf %263 : vector<32x512xf32> to vector<32x512xbf16>
    %c480_83 = arith.constant 480 : index
    %c0_84 = arith.constant 0 : index
    %265 = vector.load %arg8[%c480_83, %c0_84] : memref<864x512xbf16, #tpu.memory_space<vmem>>, vector<32x512xbf16>
    tpu.vector_store %arg8[%c480_83, %c0_84], %264 {strides = array<i32>} : memref<864x512xbf16, #tpu.memory_space<vmem>>, vector<32x512xbf16>,
    %c504_i32_85 = arith.constant 504 : i32
    %266 = tpu.dynamic_rotate %170 by %c504_i32_85 dim 1 : vector<32x512xf32>, i32 -> vector<32x512xf32>
    %267 = vector.extract_strided_slice %1 {offsets = [16, 0], sizes = [1, 512], strides = [1, 1]} : vector<27x512xf32> to vector<1x512xf32>
    %268 = vector.broadcast %267 : vector<1x512xf32> to vector<32x512xf32>
    %269 = arith.mulf %266, %268 : vector<32x512xf32>
    %270 = arith.truncf %269 : vector<32x512xf32> to vector<32x512xbf16>
    %c512_86 = arith.constant 512 : index
    %c0_87 = arith.constant 0 : index
    %271 = vector.load %arg8[%c512_86, %c0_87] : memref<864x512xbf16, #tpu.memory_space<vmem>>, vector<32x512xbf16>
    tpu.vector_store %arg8[%c512_86, %c0_87], %270 {strides = array<i32>} : memref<864x512xbf16, #tpu.memory_space<vmem>>, vector<32x512xbf16>,
    %c503_i32_88 = arith.constant 503 : i32
    %272 = tpu.dynamic_rotate %170 by %c503_i32_88 dim 1 : vector<32x512xf32>, i32 -> vector<32x512xf32>
    %273 = vector.extract_strided_slice %1 {offsets = [17, 0], sizes = [1, 512], strides = [1, 1]} : vector<27x512xf32> to vector<1x512xf32>
    %274 = vector.broadcast %273 : vector<1x512xf32> to vector<32x512xf32>
    %275 = arith.mulf %272, %274 : vector<32x512xf32>
    %276 = arith.truncf %275 : vector<32x512xf32> to vector<32x512xbf16>
    %c544_89 = arith.constant 544 : index
    %c0_90 = arith.constant 0 : index
    %277 = vector.load %arg8[%c544_89, %c0_90] : memref<864x512xbf16, #tpu.memory_space<vmem>>, vector<32x512xbf16>
    tpu.vector_store %arg8[%c544_89, %c0_90], %276 {strides = array<i32>} : memref<864x512xbf16, #tpu.memory_space<vmem>>, vector<32x512xbf16>,
    %c457_i32_91 = arith.constant 457 : i32
    %278 = tpu.dynamic_rotate %170 by %c457_i32_91 dim 1 : vector<32x512xf32>, i32 -> vector<32x512xf32>
    %279 = vector.extract_strided_slice %1 {offsets = [18, 0], sizes = [1, 512], strides = [1, 1]} : vector<27x512xf32> to vector<1x512xf32>
    %280 = vector.broadcast %279 : vector<1x512xf32> to vector<32x512xf32>
    %281 = arith.mulf %278, %280 : vector<32x512xf32>
    %282 = arith.truncf %281 : vector<32x512xf32> to vector<32x512xbf16>
    %c576_92 = arith.constant 576 : index
    %c0_93 = arith.constant 0 : index
    %283 = vector.load %arg8[%c576_92, %c0_93] : memref<864x512xbf16, #tpu.memory_space<vmem>>, vector<32x512xbf16>
    tpu.vector_store %arg8[%c576_92, %c0_93], %282 {strides = array<i32>} : memref<864x512xbf16, #tpu.memory_space<vmem>>, vector<32x512xbf16>,
    %c456_i32_94 = arith.constant 456 : i32
    %284 = tpu.dynamic_rotate %170 by %c456_i32_94 dim 1 : vector<32x512xf32>, i32 -> vector<32x512xf32>
    %285 = vector.extract_strided_slice %1 {offsets = [19, 0], sizes = [1, 512], strides = [1, 1]} : vector<27x512xf32> to vector<1x512xf32>
    %286 = vector.broadcast %285 : vector<1x512xf32> to vector<32x512xf32>
    %287 = arith.mulf %284, %286 : vector<32x512xf32>
    %288 = arith.truncf %287 : vector<32x512xf32> to vector<32x512xbf16>
    %c608_95 = arith.constant 608 : index
    %c0_96 = arith.constant 0 : index
    %289 = vector.load %arg8[%c608_95, %c0_96] : memref<864x512xbf16, #tpu.memory_space<vmem>>, vector<32x512xbf16>
    tpu.vector_store %arg8[%c608_95, %c0_96], %288 {strides = array<i32>} : memref<864x512xbf16, #tpu.memory_space<vmem>>, vector<32x512xbf16>,
    %c455_i32_97 = arith.constant 455 : i32
    %290 = tpu.dynamic_rotate %170 by %c455_i32_97 dim 1 : vector<32x512xf32>, i32 -> vector<32x512xf32>
    %291 = vector.extract_strided_slice %1 {offsets = [20, 0], sizes = [1, 512], strides = [1, 1]} : vector<27x512xf32> to vector<1x512xf32>
    %292 = vector.broadcast %291 : vector<1x512xf32> to vector<32x512xf32>
    %293 = arith.mulf %290, %292 : vector<32x512xf32>
    %294 = arith.truncf %293 : vector<32x512xf32> to vector<32x512xbf16>
    %c640_98 = arith.constant 640 : index
    %c0_99 = arith.constant 0 : index
    %295 = vector.load %arg8[%c640_98, %c0_99] : memref<864x512xbf16, #tpu.memory_space<vmem>>, vector<32x512xbf16>
    tpu.vector_store %arg8[%c640_98, %c0_99], %294 {strides = array<i32>} : memref<864x512xbf16, #tpu.memory_space<vmem>>, vector<32x512xbf16>,
    %c449_i32_100 = arith.constant 449 : i32
    %296 = tpu.dynamic_rotate %170 by %c449_i32_100 dim 1 : vector<32x512xf32>, i32 -> vector<32x512xf32>
    %297 = vector.extract_strided_slice %1 {offsets = [21, 0], sizes = [1, 512], strides = [1, 1]} : vector<27x512xf32> to vector<1x512xf32>
    %298 = vector.broadcast %297 : vector<1x512xf32> to vector<32x512xf32>
    %299 = arith.mulf %296, %298 : vector<32x512xf32>
    %300 = arith.truncf %299 : vector<32x512xf32> to vector<32x512xbf16>
    %c672_101 = arith.constant 672 : index
    %c0_102 = arith.constant 0 : index
    %301 = vector.load %arg8[%c672_101, %c0_102] : memref<864x512xbf16, #tpu.memory_space<vmem>>, vector<32x512xbf16>
    tpu.vector_store %arg8[%c672_101, %c0_102], %300 {strides = array<i32>} : memref<864x512xbf16, #tpu.memory_space<vmem>>, vector<32x512xbf16>,
    %c448_i32_103 = arith.constant 448 : i32
    %302 = tpu.dynamic_rotate %170 by %c448_i32_103 dim 1 : vector<32x512xf32>, i32 -> vector<32x512xf32>
    %303 = vector.extract_strided_slice %1 {offsets = [22, 0], sizes = [1, 512], strides = [1, 1]} : vector<27x512xf32> to vector<1x512xf32>
    %304 = vector.broadcast %303 : vector<1x512xf32> to vector<32x512xf32>
    %305 = arith.mulf %302, %304 : vector<32x512xf32>
    %306 = arith.truncf %305 : vector<32x512xf32> to vector<32x512xbf16>
    %c704_104 = arith.constant 704 : index
    %c0_105 = arith.constant 0 : index
    %307 = vector.load %arg8[%c704_104, %c0_105] : memref<864x512xbf16, #tpu.memory_space<vmem>>, vector<32x512xbf16>
    tpu.vector_store %arg8[%c704_104, %c0_105], %306 {strides = array<i32>} : memref<864x512xbf16, #tpu.memory_space<vmem>>, vector<32x512xbf16>,
    %c447_i32_106 = arith.constant 447 : i32
    %308 = tpu.dynamic_rotate %170 by %c447_i32_106 dim 1 : vector<32x512xf32>, i32 -> vector<32x512xf32>
    %309 = vector.extract_strided_slice %1 {offsets = [23, 0], sizes = [1, 512], strides = [1, 1]} : vector<27x512xf32> to vector<1x512xf32>
    %310 = vector.broadcast %309 : vector<1x512xf32> to vector<32x512xf32>
    %311 = arith.mulf %308, %310 : vector<32x512xf32>
    %312 = arith.truncf %311 : vector<32x512xf32> to vector<32x512xbf16>
    %c736_107 = arith.constant 736 : index
    %c0_108 = arith.constant 0 : index
    %313 = vector.load %arg8[%c736_107, %c0_108] : memref<864x512xbf16, #tpu.memory_space<vmem>>, vector<32x512xbf16>
    tpu.vector_store %arg8[%c736_107, %c0_108], %312 {strides = array<i32>} : memref<864x512xbf16, #tpu.memory_space<vmem>>, vector<32x512xbf16>,
    %c441_i32_109 = arith.constant 441 : i32
    %314 = tpu.dynamic_rotate %170 by %c441_i32_109 dim 1 : vector<32x512xf32>, i32 -> vector<32x512xf32>
    %315 = vector.extract_strided_slice %1 {offsets = [24, 0], sizes = [1, 512], strides = [1, 1]} : vector<27x512xf32> to vector<1x512xf32>
    %316 = vector.broadcast %315 : vector<1x512xf32> to vector<32x512xf32>
    %317 = arith.mulf %314, %316 : vector<32x512xf32>
    %318 = arith.truncf %317 : vector<32x512xf32> to vector<32x512xbf16>
    %c768_110 = arith.constant 768 : index
    %c0_111 = arith.constant 0 : index
    %319 = vector.load %arg8[%c768_110, %c0_111] : memref<864x512xbf16, #tpu.memory_space<vmem>>, vector<32x512xbf16>
    tpu.vector_store %arg8[%c768_110, %c0_111], %318 {strides = array<i32>} : memref<864x512xbf16, #tpu.memory_space<vmem>>, vector<32x512xbf16>,
    %c440_i32_112 = arith.constant 440 : i32
    %320 = tpu.dynamic_rotate %170 by %c440_i32_112 dim 1 : vector<32x512xf32>, i32 -> vector<32x512xf32>
    %321 = vector.extract_strided_slice %1 {offsets = [25, 0], sizes = [1, 512], strides = [1, 1]} : vector<27x512xf32> to vector<1x512xf32>
    %322 = vector.broadcast %321 : vector<1x512xf32> to vector<32x512xf32>
    %323 = arith.mulf %320, %322 : vector<32x512xf32>
    %324 = arith.truncf %323 : vector<32x512xf32> to vector<32x512xbf16>
    %c800_113 = arith.constant 800 : index
    %c0_114 = arith.constant 0 : index
    %325 = vector.load %arg8[%c800_113, %c0_114] : memref<864x512xbf16, #tpu.memory_space<vmem>>, vector<32x512xbf16>
    tpu.vector_store %arg8[%c800_113, %c0_114], %324 {strides = array<i32>} : memref<864x512xbf16, #tpu.memory_space<vmem>>, vector<32x512xbf16>,
    %c439_i32_115 = arith.constant 439 : i32
    %326 = tpu.dynamic_rotate %170 by %c439_i32_115 dim 1 : vector<32x512xf32>, i32 -> vector<32x512xf32>
    %327 = vector.extract_strided_slice %1 {offsets = [26, 0], sizes = [1, 512], strides = [1, 1]} : vector<27x512xf32> to vector<1x512xf32>
    %328 = vector.broadcast %327 : vector<1x512xf32> to vector<32x512xf32>
    %329 = arith.mulf %326, %328 : vector<32x512xf32>
    %330 = arith.truncf %329 : vector<32x512xf32> to vector<32x512xbf16>
    %c832_116 = arith.constant 832 : index
    %c0_117 = arith.constant 0 : index
    %331 = vector.load %arg8[%c832_116, %c0_117] : memref<864x512xbf16, #tpu.memory_space<vmem>>, vector<32x512xbf16>
    tpu.vector_store %arg8[%c832_116, %c0_117], %330 {strides = array<i32>} : memref<864x512xbf16, #tpu.memory_space<vmem>>, vector<32x512xbf16>,
    %c0_118 = arith.constant 0 : index
    %c0_119 = arith.constant 0 : index
    %332 = vector.load %arg5[%c0_118, %c0_119] : memref<32x864xbf16, #tpu.memory_space<vmem>>, vector<32x864xbf16>
    %c0_120 = arith.constant 0 : index
    %c0_121 = arith.constant 0 : index
    %333 = vector.load %arg8[%c0_120, %c0_121] : memref<864x512xbf16, #tpu.memory_space<vmem>>, vector<864x512xbf16>
    %cst_122 = arith.constant dense<0.000000e+00> : vector<32x512xf32>
    %334 = tpu.matmul %332, %333, %cst_122 {dimension_numbers = #tpu.dot_dimension_numbers<[1], [0], [0], [1], [0, 0, 1, 1], [], []>} : vector<32x864xbf16>, vector<864x512xbf16>, vector<32x512xf32> -> vector<32x512xf32>
    %c0_123 = arith.constant 0 : index
    %c0_124 = arith.constant 0 : index
    %335 = vector.load %arg6[%c0_123, %c0_124] : memref<32x1xf32, #tpu.memory_space<vmem>>, vector<32x1xf32>
    %336 = vector.broadcast %335 : vector<32x1xf32> to vector<32x512xf32>
    %337 = arith.addf %334, %336 : vector<32x512xf32>
    %338 = arith.addf %337, %0 : vector<32x512xf32>
    %c0_125 = arith.constant 0 : index
    %c0_126 = arith.constant 0 : index
    %339 = vector.load %arg7[%c0_125, %c0_126] : memref<32x512xf32, #tpu.memory_space<vmem>>, vector<32x512xf32>
    tpu.vector_store %arg7[%c0_125, %c0_126], %338 {strides = array<i32>} : memref<32x512xf32, #tpu.memory_space<vmem>>, vector<32x512xf32>,
    return
  }
  func.func @transform_0(%arg0: i32) -> (i32, i32) {
    %c0_i32 = arith.constant 0 : i32
    %c0_i32_0 = arith.constant 0 : i32
    return %c0_i32, %arg0 : i32, i32
  }
  func.func @transform_1(%arg0: i32) -> (i32, i32) {
    %c0_i32 = arith.constant 0 : i32
    %c0_i32_0 = arith.constant 0 : i32
    %c0_i32_1 = arith.constant 0 : i32
    return %c0_i32, %c0_i32_0 : i32, i32
  }
  func.func @transform_2(%arg0: i32) -> (i32, i32) {
    %c0_i32 = arith.constant 0 : i32
    %c0_i32_0 = arith.constant 0 : i32
    %c0_i32_1 = arith.constant 0 : i32
    return %c0_i32, %c0_i32_0 : i32, i32
  }
  func.func @transform_3(%arg0: i32) -> (i32, i32) {
    %c0_i32 = arith.constant 0 : i32
    %c0_i32_0 = arith.constant 0 : i32
    %c0_i32_1 = arith.constant 0 : i32
    return %c0_i32, %c0_i32_0 : i32, i32
  }
  func.func @transform_4(%arg0: i32) -> (i32, i32) {
    %c0_i32 = arith.constant 0 : i32
    %c0_i32_0 = arith.constant 0 : i32
    %c0_i32_1 = arith.constant 0 : i32
    return %c0_i32, %c0_i32_0 : i32, i32
  }
  func.func @transform_5(%arg0: i32) -> (i32, i32) {
    %c0_i32 = arith.constant 0 : i32
    %c0_i32_0 = arith.constant 0 : i32
    %c0_i32_1 = arith.constant 0 : i32
    return %c0_i32, %c0_i32_0 : i32, i32
  }
  func.func @transform_6(%arg0: i32) -> (i32, i32) {
    %c0_i32 = arith.constant 0 : i32
    %c0_i32_0 = arith.constant 0 : i32
    return %c0_i32, %arg0 : i32, i32
  }
}

</mosaic_0001>

<bundles_post_ra>
// kernel: tpu_custom_call.1
= control target key start
LH: loop header
LB: loop body
LE: loop exit
PB: predicated region body
PF: predicated region fallthrough
CT: control target
= control target key end

     0   :  { %s16240_s0 = inlined_call_operand.hbm [shape: f32[32,1024], index: 0, kind: input, shape index: {}]   ;;  %s16241_s1 = inlined_call_operand.hbm [shape: f32[27,512], index: 1, kind: input, shape index: {}]   ;;  %s16242_s2 = inlined_call_operand.hbm [shape: bf16[32,864], index: 2, kind: input, shape index: {}]   ;;  %s16243_s3 = inlined_call_operand.vmem [shape: f32[32,1], index: 3, kind: input, shape index: {}]   ;;  %s16244_s4 = inlined_call_operand.hbm [shape: bf16[32,864], index: 4, kind: input, shape index: {}]   ;;  %s16245_s5 = inlined_call_operand.vmem [shape: f32[32,1], index: 5, kind: input, shape index: {}]   ;;  %s16246_s6 = inlined_call_operand.hbm [shape: f32[32,1024], index: 6, kind: output, shape index: {}]  }
   0x1   :  { %16504 = sst [smem:[#allocation115_spill]] %s16241_s1 }
   0x2   :  { %11 = vsyncpa [#allocation4], 0 }
   0x3   :  { %13 = vsyncpa [#allocation4 + $0x1], 0 }
   0x4   :  { %14 = vsyncpa [#allocation7], 0 }
   0x5   :  { %15 = vsyncpa [#allocation10], 0 }
   0x6   :  { %16 = vsyncpa [#allocation5], 0 }
   0x7   :  { %18 = vsyncpa [#allocation5 + $0x1], 0  ;;  %s10683_s21 = smov 0   ;;  %s10685_s22 = smov 0  }
   0x8   :  { %s10687_s23 = smov 0   ;;  %s10689_s24 = smov 0  }
   0x9 LB: > { %s10704_s25 = sadd.s32 4294967295, %s10617_s24   ;;  %s7899_s26 = sadd.s32 4294967294, %s10617_s24   ;;  %s10617_s24 = sphi %s10689_s24, %s16830_s24   ;;  %s10613_s23 = sphi %s10687_s23, %s16829_s23   ;;  %s10609_s22 = sphi %s10685_s22, %s16828_s22   ;;  %s10605_s21 = sphi %s10683_s21, %s16827_s21  }
   0xa   : > { %p44_p0 = scmp.ne.s32.totalorder %s10609_s22, %s10605_s21  ;;  %p45_p1 = scmp.eq.s32.totalorder %s10704_s25, 0 }
   0xb   : > { %p173_p2 = scmp.eq.s32.totalorder %s10704_s25, 1  ;;  %p179_p3 = scmp.eq.s32.totalorder %s7899_s26, 1 }
   0xc   : > { %p10713_p4 = por %p45_p1, %p44_p0  ;;  %p7900_p5 = scmp.ge.s32.totalorder %s10617_s24, 1 }
   0xd   : > { %p10718_p6 = por %p179_p3, %p44_p0  ;;  %p186_p7 = scmp.lt.s32.totalorder %s10617_s24, 3 }
   0xe   : > { %s16507_s1 = sld [smem:[#allocation115_spill]]  ;;  %s10619_s9 = smov [#allocation6]  }
   0xf   : > { %p10726_p8 = pnand %p7900_p5, %p186_p7  ;;  %s199_s10 = sshll.u32 %s10619_s9, 4  ;;  %s200_s10 = int_to_ptr.vmem [resolvable:$true] %s199_s10 }
  0x10   : > { %s211_s14 = sshll.u32 %s16242_s2, 4  ;;  %s16247_s15 = smov 512   ;;  %s212_s14 = int_to_ptr.hbm [resolvable:$true] %s211_s14 }
  0x11   : > { %p10253_p9 = pneg %p10726_p8  ;;  %s16248_s16 = smov 32  }
  0x12   : > { %s10622_s17 = smov [#allocation8]   ;;  %s10623_s19 = smov 448  }
  0x13   : > { %p10734_p10 = pnand %p10253_p9, %p45_p1  ;;  %s213_s18 = sshll.u32 %s10622_s17, 4  ;;  %s214_s18 = int_to_ptr.vmem [resolvable:$true] %s213_s18 }
  0x14   : > { %s197_s7 = sshll.u32 %s16507_s1, 4  ;;  %s10624_s20 = smov 28   ;;  %s198_s7 = int_to_ptr.hbm [resolvable:$true] %s197_s7 }
  0x15   : > { %10256 = dma.hbm_to_vmem [thread:$0]  (!%p10734_p10), %s198_s7, 2048, %s200_s10, [#allocation7], %s16247_s15, %s16247_s15, %s16248_s16  }
  0x16   : > { %10259 = dma.hbm_to_vmem [thread:$0]  (!%p10734_p10), %s212_s14, 1792, %s214_s18, [#allocation7], %s10623_s19, %s10623_s19, %s10624_s20  }
  0x17   : > { %s228_s30 = sshll.u32 %s16244_s4, 4  ;;  %s10625_s7 = smov [#allocation9]   ;;  %s229_s30 = int_to_ptr.hbm [resolvable:$true] %s228_s30 }
  0x18   : > { %s230_s9 = sshll.u32 %s10625_s7, 4  ;;  %s10755_s10 = sadd.s32 1, %s10617_s24   ;;  %s231_s9 = int_to_ptr.vmem [resolvable:$true] %s230_s9 }
  0x19   : > { %10262 = dma.hbm_to_vmem [thread:$0]  (!%p10734_p10), %s229_s30, 1792, %s231_s9, [#allocation10], %s10623_s19, %s10623_s19, %s10624_s20  }
  0x1a   : > { %s28_s12 = ssub.s32 %s10617_s24, %s10755_s10  ;;  %s31_s13 = sadd.s32 1, %s10613_s23 }
  0x1b   : > { %p29_p12 = scmp.eq.s32.totalorder %s28_s12, 0  ;;  %p38_p13 = scmp.ne.s32.totalorder %s10613_s23, %s10609_s22 }
  0x1c   : > { %p39_p0 = scmp.eq.s32.totalorder %s10617_s24, 0  ;;  %p10274_p3 = scmp.lt.s32.totalorder %s10617_s24, 2 }
  0x1d   : > { %s10765_s14 = scalar_select %p29_p12, %s10613_s23, %s31_s13  }
  0x1e   : > { %p40_p5 = por %p39_p0, %p38_p13  ;;  %p10769_p7 = por %p173_p2, %p38_p13 }
  0x1f   : > { %s247_s11 = sand.u32 1, %s10613_s23   ;;  %s9775_s18 = sshll.u32 %s10617_s24, 5 }
  0x20   : > { %s7905_s19 = sshll.u32 %s247_s11, 7  ;;  %s256_s29 = scalar_lea.hbm %s16240_s0, %s9775_s18 }
  0x21   : > { %s257_s30 = sshll.u32 %s256_s29, 4  ;;  %s251_s7 = scalar_lea.vmem [#allocation3], %s7905_s19  ;;  %s258_s30 = int_to_ptr.hbm [resolvable:$true] %s257_s30 }
  0x22   : > { %s259_s9 = sshll.u32 %s251_s7, 4  ;;  %p10780_p9 = pnand %p10274_p3, %p40_p5  ;;  %s260_s9 = int_to_ptr.vmem [resolvable:$true] %s259_s9 }
  0x23   : > { %s248_s13 = scalar_lea.sflag [#allocation4], %s247_s11  ;;  %s10513_s15 = sshra.s32 %s258_s30, 4  ;;  %s10514_s15 = int_to_ptr.hbm [resolvable:$true] %s10513_s15 }
  0x24   : > { %s10515_s16 = scalar_lea.hbm %s10514_s15, 128  ;;  %p10517_p10 = pneg %p10780_p9 }
  0x25   : > { %p10516_p2 = scmp.ne.s32.totalorder %s10514_s15, %s10515_s16  ;;  %s10520_s20 = scalar_lea.hbm %s16240_s0, 256 }
  0x26   : > { %p10521_p0 = scmp.lt.s32.totalorder %s10514_s15, %s16240_s0  ;;  %p10522_p3 = scmp.lt.s32.totalorder %s10520_s20, %s10515_s16 }
  0x27   : > { %p10518_p12 = pnand %p10517_p10, %p10516_p2 }
  0x28   : > { %p10523_p5 = por %p10522_p3, %p10521_p0 }
  0x29   : > { %p10519_p13 = pneg %p10518_p12 }
  0x2b   : > { %p10524_p11 = pnand %p10523_p5, %p10519_p13 }
  0x2d   : > { %10527 = shalt.err (!%p10524_p11)
}
  0x2e   : > { %s10626_s11 = smov 1024   ;;  %s16512_s7 = smov 32  }
  0x2f   : > { %s16513_s1 = smov 512   ;;  %271 = sbr.rel (%p10726_p8) target bundleno = 2296 (0x8f8), region = 44 }
  0x30   : > { %10266 = dma.hbm_to_vmem [thread:$0]  (!%p10780_p9), %s258_s30, 2048, %s260_s9, %s248_s13, %s10626_s11, %s16513_s1, %s16512_s7  }
  0x34   : > { %s10799_s18 = sand.u32 1, %s10609_s22  }
  0x35   : > { %s16365_s15 = sshll.u32 %s10799_s18, 7  ;;  %s274_s16 = scalar_lea.sflag [#allocation4], %s10799_s18 }
  0x36   : > { %s10805_s19 = scalar_lea.vmem [#allocation3], %s16365_s15 }
  0x37   : > { %10588 = dma.done.wait (%p10713_p4), %s274_s16, 2048  }
  0x38   : > { %10590 = vsyncadd (%p10713_p4), %s274_s16, 4294965248 }
  0x39   : > { %10592 = dma.done.wait (%p45_p1), [#allocation7], 3840  }
  0x3a   : > { %10594 = vsyncadd (%p45_p1), [#allocation7], 4294963456 }
  0x3b   : > { %10596 = dma.done.wait (%p45_p1), [#allocation10], 1792  }
  0x3c   : > { %10598 = vsyncadd (%p45_p1), [#allocation10], 4294965504  ;;  %v10820_v0 = vld [vmem:[%s10805_s19 + $0x40] sm:$0xff]  ;;  %v10823_v1 = vld [vmem:[%s10805_s19 + $0x8] sm:$0xff]  ;;  %s10627_s1 = smov 73   ;;  %s10628_s27 = smov 72   ;;  %v389_v18 = vlaneseq }
  0x3d   : > { %v10826_v2 = vld [vmem:[%s10805_s19] sm:$0xff]  ;;  %361 = vrot.lane.b32.xlu1 %v10820_v0, %s10627_s1  ;;  %365 = vrot.lane.b32.xlu2 %v10823_v1, %s10627_s1  ;;  %v10838_v4 = vld [vmem:[%s10805_s19 + $0x28] sm:$0xff]  ;;  %s10629_s8 = smov 71   ;;  %s10630_s30 = smov 65   ;;  %v11017_v41 = vld [vmem:[#allocation6 + $0x58] sm:$0xff]  ;;  %vm3570_vm15 = vcmask 785408  }
  0x3e   : > { %357 = vrot.lane.b32.xlu0 %v10826_v2, %s10627_s1  ;;  %v10835_v3 = vld [vmem:[%s10805_s19 + $0x60] sm:$0xff]  ;;  %v10850_v6 = vld [vmem:[%s10805_s19 + $0x68] sm:$0xff]  ;;  %v10853_v7 = vld [vmem:[%s10805_s19 + $0x10] sm:$0xff]  ;;  %v10953_v19 = vand.u32 127, %v389_v18  ;;  %v11045_v52 = vperm.slane %v11017_v41, 2  ;;  %s10631_s9 = smov 64  }
  0x3f   : > { %v10841_v5 = vld [vmem:[%s10805_s19 + $0x20] sm:$0xff]  ;;  %v10856_v8 = vld [vmem:[%s10805_s19 + $0x48] sm:$0xff]  ;;  %v10865_v9 = vld [vmem:[%s10805_s19 + $0x50] sm:$0xff]  ;;  %s10632_s12 = smov 63   ;;  %s10633_s13 = smov 57  }
  0x40   : > { %v10868_v10 = vld [vmem:[%s10805_s19 + $0x70] sm:$0xff]  ;;  %v10880_v12 = vld [vmem:[%s10805_s19 + $0x38] sm:$0xff]  ;;  %v10957_v21 = vld [vmem:[#allocation6 + $0x48] sm:$0xff]  ;;  %vm391_vm0 = vcmp.lt.s32.totalorder %v10953_v19, 73  ;;  %16516 = vst [vmem:[#allocation18_spill] sm:$0xff] %v11045_v52  ;;  %vm476_vm1 = vcmp.lt.s32.totalorder %v10953_v19, 72 }
  0x41   : > { %v10871_v11 = vld [vmem:[%s10805_s19 + $0x30] sm:$0xff]  ;;  %v10883_v13 = vld [vmem:[%s10805_s19 + $0x58] sm:$0xff]  ;;  %v10960_v22 = vld [vmem:[#allocation6 + $0x40] sm:$0xff]  ;;  %v10963_v23 = vperm.slane %v10957_v21, 2  ;;  %vm561_vm2 = vcmp.lt.s32.totalorder %v10953_v19, 71  ;;  %vm646_vm3 = vcmp.lt.s32.totalorder %v10953_v19, 65 }
  0x42   : > { %v10886_v14 = vld [vmem:[%s10805_s19 + $0x18] sm:$0xff]  ;;  %v10977_v25 = vperm.slane %v10960_v22, 2  ;;  %v11002_v36 = vld [vmem:[#allocation6] sm:$0xff]  ;;  %v11008_v37 = vld [vmem:[#allocation6 + $0x8] sm:$0xff]  ;;  %vm731_vm4 = vcmp.lt.s32.totalorder %v10953_v19, 64  ;;  %s10634_s20 = smov 56  }
  0x43   : > { %v10895_v15 = vld [vmem:[%s10805_s19 + $0x78] sm:$0xff]  ;;  %v11013_v38 = vperm.slane %v11002_v36, 0  ;;  %v11032_v46 = vperm.slane %v11008_v37, 0  ;;  %v11042_v51 = vld [vmem:[#allocation6 + $0x50] sm:$0xff]  ;;  %vm816_vm5 = vcmp.lt.s32.totalorder %v10953_v19, 63  ;;  %s10635_s26 = smov 55  }
  0x44   : > { %v11040_v50 = vld [vmem:[#allocation6 + $0x18] sm:$0xff]  ;;  %v11049_v56 = vld [vmem:[#allocation6 + $0x10] sm:$0xff]  ;;  %v11059_v59 = vperm.slane %v11042_v51, 2  ;;  %vm901_vm6 = vcmp.lt.s32.totalorder %v10953_v19, 57  ;;  %s16380_s29 = smov 9   ;;  %vm986_vm7 = vcmp.lt.s32.totalorder %v10953_v19, 56 }
  0x45   : > { %363 = vrot.lane.b32.xlu1 %v10835_v3, %s10627_s1  ;;  %367 = vrot.lane.b32.xlu2 %v10838_v4, %s10627_s1  ;;  %16514 = vst [vmem:[#allocation16_spill] sm:$0xff] %v11013_v38  ;;  %v11056_v58 = vperm.slane %v11040_v50, 0  ;;  %v11064_v60 = vperm.slane %v11049_v56, 0  ;;  %s10637_s11 = smov 8   ;;  %s10638_s7 = smov 7   ;;  %vm1071_vm8 = vcmp.lt.s32.totalorder %v10953_v19, 55 }
  0x46   : > { %359 = vrot.lane.b32.xlu0 %v10841_v5, %s10627_s1  ;;  %16515 = vst [vmem:[#allocation17_spill] sm:$0xff] %v11032_v46  ;;  %vm1156_vm9 = vcmp.lt.s32.totalorder %v10953_v19, 9  ;;  %s16370_s16 = smov 1   ;;  %vm1241_vm10 = vcmp.lt.s32.totalorder %v10953_v19, 8  ;;  %s16382_s15 = smov 127   ;;  %vm1326_vm11 = vcmp.lt.s32.totalorder %v10953_v19, 7 }
  0x47   : > { %16517 = vst [vmem:[#allocation19_spill] sm:$0xff] %v11056_v58  ;;  %vm16416_vm12 = vcmp.lt.s32.totalorder %v10953_v19, 1  ;;  %vm1532_vm13 = vcmp.lt.s32.totalorder %v10953_v19, 127  ;;  %vm1617_vm14 = vcmp.lt.s32.totalorder %v10953_v19, 121 }
  0x48   : > { %16518 = vst [vmem:[#allocation20_spill] sm:$0xff] %v11059_v59 }
  0x49   : > { %16519 = vst [vmem:[#allocation21_spill] sm:$0xff] %v11064_v60 }
  0x4d   : > { %371 = vrot.lane.b32.xlu1 %v10850_v6, %s10627_s1  ;;  %373 = vrot.lane.b32.xlu2 %v10853_v7, %s10627_s1 }
  0x4e   : > { %369 = vrot.lane.b32.xlu0 %v10856_v8, %s10627_s1 }
  0x55   : > { %377 = vrot.lane.b32.xlu1 %v10865_v9, %s10627_s1  ;;  %379 = vrot.lane.b32.xlu2 %v10868_v10, %s10627_s1 }
  0x56   : > { %375 = vrot.lane.b32.xlu0 %v10871_v11, %s10627_s1 }
  0x5d   : > { %383 = vrot.lane.b32.xlu1 %v10880_v12, %s10627_s1  ;;  %385 = vrot.lane.b32.xlu2 %v10883_v13, %s10627_s1 }
  0x5e   : > { %381 = vrot.lane.b32.xlu0 %v10886_v14, %s10627_s1 }
  0x65   : > { %446 = vrot.lane.b32.xlu2 %v10841_v5, %s10628_s27  ;;  %444 = vrot.lane.b32.xlu1 %v10826_v2, %s10628_s27 }
  0x66   : > { %387 = vrot.lane.b32.xlu0 %v10895_v15, %s10627_s1 }
  0x6d   : > { %452 = vrot.lane.b32.xlu2 %v10823_v1, %s10628_s27  ;;  %450 = vrot.lane.b32.xlu1 %v10835_v3, %s10628_s27 }
  0x6e   : > { %448 = vrot.lane.b32.xlu0 %v10820_v0, %s10628_s27 }
  0x75   : > { %458 = vrot.lane.b32.xlu2 %v10850_v6, %s10628_s27  ;;  %456 = vrot.lane.b32.xlu1 %v10856_v8, %s10628_s27 }
  0x76   : > { %454 = vrot.lane.b32.xlu0 %v10838_v4, %s10628_s27 }
  0x7d   : > { %464 = vrot.lane.b32.xlu2 %v10865_v9, %s10628_s27  ;;  %462 = vrot.lane.b32.xlu1 %v10871_v11, %s10628_s27 }
  0x7e   : > { %460 = vrot.lane.b32.xlu0 %v10853_v7, %s10628_s27 }
  0x85   : > { %470 = vrot.lane.b32.xlu2 %v10880_v12, %s10628_s27  ;;  %468 = vrot.lane.b32.xlu1 %v10886_v14, %s10628_s27 }
  0x86   : > { %466 = vrot.lane.b32.xlu0 %v10868_v10, %s10628_s27 }
  0x8d   : > { %529 = vrot.lane.b32.xlu2 %v10826_v2, %s10629_s8  ;;  %474 = vrot.lane.b32.xlu1 %v10895_v15, %s10628_s27 }
  0x8e   : > { %472 = vrot.lane.b32.xlu0 %v10883_v13, %s10628_s27 }
  0x95   : > { %535 = vrot.lane.b32.xlu2 %v10835_v3, %s10629_s8  ;;  %533 = vrot.lane.b32.xlu1 %v10820_v0, %s10629_s8 }
  0x96   : > { %531 = vrot.lane.b32.xlu0 %v10841_v5, %s10629_s8 }
  0x97   : > { %v366_v16 = vpop.permute.xlu2 %365 }
  0x9d   : > { %541 = vrot.lane.b32.xlu2 %v10856_v8, %s10629_s8  ;;  %539 = vrot.lane.b32.xlu1 %v10838_v4, %s10629_s8 }
  0x9e   : > { %537 = vrot.lane.b32.xlu0 %v10823_v1, %s10629_s8 }
  0x9f   : > { %v10945_v17 = vpop.permute.xlu2 %367 }
  0xa5   : > { %547 = vrot.lane.b32.xlu2 %v10871_v11, %s10629_s8  ;;  %545 = vrot.lane.b32.xlu1 %v10853_v7, %s10629_s8 }
  0xa6   : > { %543 = vrot.lane.b32.xlu0 %v10850_v6, %s10629_s8 }
  0xa7   : > { %v10955_v20 = vpop.permute.xlu2 %373 }
  0xa8   : > { %v10968_v24 = vsel %vm391_vm0, %v366_v16, %v10955_v20 }
  0xa9   : > { %v1845_v28 = vmul.f32 %v10963_v23, %v10968_v24 }
  0xad   : > { %553 = vrot.lane.b32.xlu2 %v10886_v14, %s10629_s8  ;;  %551 = vrot.lane.b32.xlu1 %v10868_v10, %s10629_s8 }
  0xae   : > { %549 = vrot.lane.b32.xlu0 %v10865_v9, %s10629_s8 }
  0xaf   : > { %v362_v26 = vpop.permute.xlu1 %361  ;;  %v10979_v27 = vpop.permute.xlu2 %379 }
  0xb0   : > { %v10983_v29 = vpop.permute.xlu0 %357 }
  0xb1   : > { %v10988_v30 = vsel %vm391_vm0, %v10983_v29, %v366_v16 }
  0xb2   : > { %v1844_v31 = vmul.f32 %v10977_v25, %v10988_v30 }
  0xb4   : > { %v1860_v32 = vpack.c.bf16 %v1845_v28, %v1844_v31 }
  0xb5   : > { %559 = vrot.lane.b32.xlu2 %v10895_v15, %s10629_s8  ;;  %557 = vrot.lane.b32.xlu1 %v10883_v13, %s10629_s8 }
  0xb6   : > { %1868 = vst [vmem:[#allocation2 + $0x480] sm:$0xff] %v1860_v32  ;;  %555 = vrot.lane.b32.xlu0 %v10880_v12, %s10629_s8 }
  0xb7   : > { %v10998_v33 = vpop.permute.xlu1 %363  ;;  %v386_v34 = vpop.permute.xlu2 %385 }
  0xb8   : > { %v11000_v35 = vpop.permute.xlu0 %359  ;;  %v406_v42 = vsel %vm391_vm0, %v386_v34, %v362_v26 }
  0xb9   : > { %v420_v53 = vmul.f32 %v11013_v38, %v406_v42  ;;  %v1855_v61 = vmul.f32 %v11045_v52, %v406_v42  ;;  %v401_v16 = vsel %vm391_vm0, %v11000_v35, %v10945_v17 }
  0xbd   : > { %618 = vrot.lane.b32.xlu2 %v10820_v0, %s10630_s30  ;;  %616 = vrot.lane.b32.xlu1 %v10841_v5, %s10630_s30 }
  0xbe   : > { %614 = vrot.lane.b32.xlu0 %v10826_v2, %s10630_s30 }
  0xbf   : > { %v372_v39 = vpop.permute.xlu1 %371  ;;  %v11015_v40 = vpop.permute.xlu2 %446 }
  0xc0   : > { %v11024_v43 = vsel %vm391_vm0, %v372_v39, %v10979_v27  ;;  %v11029_v44 = vsel %vm391_vm0, %v10998_v33, %v372_v39  ;;  %v370_v45 = vpop.permute.xlu0 %369 }
  0xc1   : > { %v1856_v47 = vmul.f32 %v10977_v25, %v11029_v44  ;;  %v1857_v48 = vmul.f32 %v10963_v23, %v11024_v43  ;;  %v402_v49 = vsel %vm391_vm0, %v362_v26, %v370_v45 }
  0xc2   : > { %v421_v55 = vmul.f32 %v11032_v46, %v402_v49  ;;  %v1852_v18 = vmul.f32 %v10977_v25, %v402_v49 }
  0xc3   : > { %v1866_v54 = vpack.c.bf16 %v1857_v48, %v1856_v47 }
  0xc4   : > { %v432_v57 = vpack.c.bf16 %v421_v55, %v420_v53 }
  0xc5   : > { %1874 = vst [vmem:[#allocation2 + $0x4b0] sm:$0xff] %v1866_v54  ;;  %624 = vrot.lane.b32.xlu2 %v10838_v4, %s10630_s30  ;;  %622 = vrot.lane.b32.xlu1 %v10823_v1, %s10630_s30 }
  0xc6   : > { %620 = vrot.lane.b32.xlu0 %v10835_v3, %s10630_s30  ;;  %440 = vst [vmem:[#allocation2 + $0x20] sm:$0xff] %v432_v57 }
  0xc7   : > { %v378_v62 = vpop.permute.xlu1 %377  ;;  %v11067_v63 = vpop.permute.xlu2 %452 }
  0xc8   : > { %v394_v26 = vsel %vm391_vm0, %v378_v62, %v386_v34  ;;  %v398_v28 = vsel %vm391_vm0, %v370_v45, %v378_v62  ;;  %v376_v31 = vpop.permute.xlu0 %375  ;;  %v1848_v34 = vmul.f32 %v10977_v25, %v401_v16 }
  0xc9   : > { %v422_v32 = vmul.f32 %v11064_v60, %v398_v28  ;;  %v423_v39 = vmul.f32 %v11056_v58, %v394_v26  ;;  %v1853_v42 = vmul.f32 %v10963_v23, %v398_v28  ;;  %v1854_v47 = vmul.f32 %v11059_v59, %v394_v26 }
  0xca   : > { %v397_v48 = vsel %vm391_vm0, %v10945_v17, %v376_v31 }
  0xcb   : > { %v433_v49 = vpack.c.bf16 %v423_v39, %v422_v32  ;;  %v1864_v53 = vpack.c.bf16 %v1853_v42, %v1852_v18  ;;  %v1865_v54 = vpack.c.bf16 %v1855_v61, %v1854_v47  ;;  %v1849_v45 = vmul.f32 %v10963_v23, %v397_v48 }
  0xcc   : > { %v417_v61 = vmul.f32 %v11032_v46, %v401_v16  ;;  %v418_v62 = vmul.f32 %v11064_v60, %v397_v48  ;;  %v413_v16 = vmul.f32 %v11032_v46, %v10988_v30 }
  0xcd   : > { %441 = vst [vmem:[#allocation2 + $0x28] sm:$0xff] %v433_v49  ;;  %630 = vrot.lane.b32.xlu2 %v10853_v7, %s10630_s30  ;;  %628 = vrot.lane.b32.xlu1 %v10850_v6, %s10630_s30  ;;  %v1862_v55 = vpack.c.bf16 %v1849_v45, %v1848_v34  ;;  %v414_v34 = vmul.f32 %v11064_v60, %v10968_v24 }
  0xce   : > { %1872 = vst [vmem:[#allocation2 + $0x4a0] sm:$0xff] %v1864_v53  ;;  %626 = vrot.lane.b32.xlu0 %v10856_v8, %s10630_s30 }
  0xcf   : > { %1873 = vst [vmem:[#allocation2 + $0x4a8] sm:$0xff] %v1865_v54  ;;  %v384_v17 = vpop.permute.xlu1 %383  ;;  %v11093_v57 = vpop.permute.xlu2 %458 }
  0xd0   : > { %1870 = vst [vmem:[#allocation2 + $0x490] sm:$0xff] %v1862_v55  ;;  %v393_v18 = vsel %vm391_vm0, %v376_v31, %v384_v17  ;;  %v405_v26 = vsel %vm391_vm0, %v384_v17, %v11000_v35  ;;  %v382_v28 = vpop.permute.xlu0 %381 }
  0xd1   : > { %v416_v32 = vmul.f32 %v11013_v38, %v405_v26  ;;  %v419_v39 = vmul.f32 %v11056_v58, %v393_v18  ;;  %v1850_v42 = vmul.f32 %v11059_v59, %v393_v18  ;;  %v1851_v47 = vmul.f32 %v11045_v52, %v405_v26 }
  0xd2   : > { %v392_v31 = vsel %vm391_vm0, %v10955_v20, %v382_v28  ;;  %v404_v35 = vsel %vm391_vm0, %v382_v28, %v10983_v29  ;;  %v425_v18 = vmul.f32 %v11032_v46, %v11029_v44  ;;  %v426_v26 = vmul.f32 %v11064_v60, %v11024_v43 }
  0xd3   : > { %v430_v48 = vpack.c.bf16 %v417_v61, %v416_v32  ;;  %v431_v49 = vpack.c.bf16 %v419_v39, %v418_v62  ;;  %v1863_v53 = vpack.c.bf16 %v1851_v47, %v1850_v42  ;;  %v412_v54 = vmul.f32 %v11013_v38, %v404_v35 }
  0xd4   : > { %v415_v45 = vmul.f32 %v11056_v58, %v392_v31  ;;  %v1846_v30 = vmul.f32 %v11059_v59, %v392_v31  ;;  %v1847_v55 = vmul.f32 %v11045_v52, %v404_v35 }
  0xd5   : > { %438 = vst [vmem:[#allocation2 + $0x10] sm:$0xff] %v430_v48  ;;  %v428_v20 = vpack.c.bf16 %v413_v16, %v412_v54  ;;  %636 = vrot.lane.b32.xlu2 %v10868_v10, %s10630_s30  ;;  %634 = vrot.lane.b32.xlu1 %v10865_v9, %s10630_s30  ;;  %v11160_v48 = vperm.slane %v10957_v21, 3 }
  0xd6   : > { %439 = vst [vmem:[#allocation2 + $0x18] sm:$0xff] %v431_v49  ;;  %v429_v29 = vpack.c.bf16 %v415_v45, %v414_v34  ;;  %v1861_v17 = vpack.c.bf16 %v1847_v55, %v1846_v30  ;;  %632 = vrot.lane.b32.xlu0 %v10871_v11, %s10630_s30  ;;  %v11165_v49 = vperm.slane %v10960_v22, 3 }
  0xd7   : > { %1871 = vst [vmem:[#allocation2 + $0x498] sm:$0xff] %v1863_v53  ;;  %v11126_v24 = vpop.permute.xlu2 %464  ;;  %v11128_v61 = vpop.permute.xlu1 %444  ;;  %v11168_v53 = vperm.slane %v11002_v36, 1 }
  0xd8   : > { %436 = vst [vmem:[#allocation2] sm:$0xff] %v428_v20  ;;  %v388_v62 = vpop.permute.xlu0 %387 }
  0xd9   : > { %437 = vst [vmem:[#allocation2 + $0x8] sm:$0xff] %v429_v29  ;;  %v395_v28 = vsel %vm391_vm0, %v10979_v27, %v388_v62  ;;  %v407_v32 = vsel %vm391_vm0, %v388_v62, %v10998_v33  ;;  %v11186_v29 = vperm.slane %v11008_v37, 1 }
  0xda   : > { %1869 = vst [vmem:[#allocation2 + $0x488] sm:$0xff] %v1861_v17  ;;  %v424_v39 = vmul.f32 %v11013_v38, %v407_v32  ;;  %v427_v42 = vmul.f32 %v11056_v58, %v395_v28  ;;  %v1858_v47 = vmul.f32 %v11059_v59, %v395_v28  ;;  %v1859_v44 = vmul.f32 %v11045_v52, %v407_v32 }
  0xdb   : > { %16520 = vst [vmem:[#allocation22_spill] sm:$0xff] %v11160_v48 }
  0xdc   : > { %v434_v16 = vpack.c.bf16 %v425_v18, %v424_v39  ;;  %v435_v43 = vpack.c.bf16 %v427_v42, %v426_v26  ;;  %v1867_v31 = vpack.c.bf16 %v1859_v44, %v1858_v47  ;;  %16521 = vst [vmem:[#allocation23_spill] sm:$0xff] %v11165_v49  ;;  %v11198_v39 = vperm.slane %v11017_v41, 3 }
  0xdd   : > { %642 = vrot.lane.b32.xlu2 %v10883_v13, %s10630_s30  ;;  %640 = vrot.lane.b32.xlu1 %v10880_v12, %s10630_s30  ;;  %16522 = vst [vmem:[#allocation24_spill] sm:$0xff] %v11168_v53  ;;  %v11201_v42 = vperm.slane %v11049_v56, 1  ;;  %v11211_v44 = vperm.slane %v11042_v51, 3 }
  0xde   : > { %442 = vst [vmem:[#allocation2 + $0x30] sm:$0xff] %v434_v16  ;;  %638 = vrot.lane.b32.xlu0 %v10886_v14, %s10630_s30  ;;  %v485_v16 = vsel %vm476_vm1, %v11128_v61, %v11067_v63 }
  0xdf   : > { %443 = vst [vmem:[#allocation2 + $0x38] sm:$0xff] %v435_v43  ;;  %v471_v27 = vpop.permute.xlu2 %470  ;;  %v11150_v33 = vpop.permute.xlu1 %450 }
  0xe0   : > { %1875 = vst [vmem:[#allocation2 + $0x4b8] sm:$0xff] %v1867_v31  ;;  %v11152_v35 = vpop.permute.xlu0 %448  ;;  %v490_v45 = vsel %vm476_vm1, %v471_v27, %v11015_v40 }
  0xe1   : > { %16523 = vst [vmem:[#allocation25_spill] sm:$0xff] %v11186_v29  ;;  %v501_v26 = vmul.f32 %v11168_v53, %v490_v45 }
  0xe2   : > { %16524 = vst [vmem:[#allocation26_spill] sm:$0xff] %v11198_v39 }
  0xe3   : > { %16525 = vst [vmem:[#allocation27_spill] sm:$0xff] %v11201_v42 }
  0xe4   : > { %16527 = vst [vmem:[#allocation29_spill] sm:$0xff] %v11211_v44 }
  0xe5   : > { %701 = vrot.lane.b32.xlu2 %v10841_v5, %s10631_s9  ;;  %699 = vrot.lane.b32.xlu1 %v10826_v2, %s10631_s9 }
  0xe6   : > { %644 = vrot.lane.b32.xlu0 %v10895_v15, %s10630_s30 }
  0xe7   : > { %v11170_v54 = vpop.permute.xlu2 %529  ;;  %v457_v34 = vpop.permute.xlu1 %456 }
  0xe8   : > { %v11178_v30 = vsel %vm476_vm1, %v457_v34, %v11126_v24  ;;  %v11183_v55 = vsel %vm476_vm1, %v11152_v35, %v457_v34  ;;  %v455_v20 = vpop.permute.xlu0 %454  ;;  %v1887_v34 = vmul.f32 %v11198_v39, %v490_v45 }
  0xe9   : > { %v1888_v17 = vmul.f32 %v11165_v49, %v11183_v55  ;;  %v1889_v62 = vmul.f32 %v11160_v48, %v11178_v30  ;;  %v486_v18 = vsel %vm476_vm1, %v11015_v40, %v455_v20  ;;  %v11208_v40 = vperm.slane %v11040_v50, 1 }
  0xea   : > { %v502_v32 = vmul.f32 %v11186_v29, %v486_v18 }
  0xeb   : > { %v1900_v28 = vpack.c.bf16 %v1889_v62, %v1888_v17  ;;  %16526 = vst [vmem:[#allocation28_spill] sm:$0xff] %v11208_v40  ;;  %v1884_v17 = vmul.f32 %v11165_v49, %v486_v18 }
  0xec   : > { %v515_v47 = vpack.c.bf16 %v502_v32, %v501_v26 }
  0xed   : > { %1908 = vst [vmem:[#allocation2 + $0x4e0] sm:$0xff] %v1900_v28  ;;  %707 = vrot.lane.b32.xlu2 %v10823_v1, %s10631_s9  ;;  %705 = vrot.lane.b32.xlu1 %v10835_v3, %s10631_s9 }
  0xee   : > { %703 = vrot.lane.b32.xlu0 %v10820_v0, %s10631_s9  ;;  %523 = vst [vmem:[#allocation2 + $0x50] sm:$0xff] %v515_v47 }
  0xef   : > { %v11219_v43 = vpop.permute.xlu2 %535  ;;  %v463_v31 = vpop.permute.xlu1 %462 }
  0xf0   : > { %v478_v62 = vsel %vm476_vm1, %v463_v31, %v471_v27  ;;  %v482_v26 = vsel %vm476_vm1, %v455_v20, %v463_v31  ;;  %v461_v28 = vpop.permute.xlu0 %460  ;;  %v1880_v27 = vmul.f32 %v11165_v49, %v485_v16 }
  0xf1   : > { %v503_v32 = vmul.f32 %v11201_v42, %v482_v26  ;;  %v504_v52 = vmul.f32 %v11208_v40, %v478_v62  ;;  %v1885_v47 = vmul.f32 %v11160_v48, %v482_v26  ;;  %v1886_v59 = vmul.f32 %v11211_v44, %v478_v62 }
  0xf2   : > { %v481_v45 = vsel %vm476_vm1, %v11067_v63, %v461_v28 }
  0xf3   : > { %v516_v18 = vpack.c.bf16 %v504_v52, %v503_v32  ;;  %v1898_v58 = vpack.c.bf16 %v1885_v47, %v1884_v17  ;;  %v1899_v38 = vpack.c.bf16 %v1887_v34, %v1886_v59  ;;  %v1881_v20 = vmul.f32 %v11160_v48, %v481_v45 }
  0xf4   : > { %v498_v52 = vmul.f32 %v11186_v29, %v485_v16  ;;  %v488_v34 = vsel %vm476_vm1, %v11150_v33, %v11093_v57  ;;  %v499_v17 = vmul.f32 %v11201_v42, %v481_v45 }
  0xf5   : > { %524 = vst [vmem:[#allocation2 + $0x58] sm:$0xff] %v516_v18  ;;  %713 = vrot.lane.b32.xlu2 %v10850_v6, %s10631_s9  ;;  %711 = vrot.lane.b32.xlu1 %v10856_v8, %s10631_s9  ;;  %v1896_v31 = vpack.c.bf16 %v1881_v20, %v1880_v27  ;;  %v1892_v20 = vmul.f32 %v11165_v49, %v488_v34 }
  0xf6   : > { %1906 = vst [vmem:[#allocation2 + $0x4d0] sm:$0xff] %v1898_v58  ;;  %709 = vrot.lane.b32.xlu0 %v10838_v4, %s10631_s9 }
  0xf7   : > { %1907 = vst [vmem:[#allocation2 + $0x4d8] sm:$0xff] %v1899_v38  ;;  %v11243_v59 = vpop.permute.xlu2 %541  ;;  %v469_v63 = vpop.permute.xlu1 %468 }
  0xf8   : > { %1904 = vst [vmem:[#allocation2 + $0x4c0] sm:$0xff] %v1896_v31  ;;  %v477_v58 = vsel %vm476_vm1, %v461_v28, %v469_v63  ;;  %v489_v62 = vsel %vm476_vm1, %v469_v63, %v11128_v61  ;;  %v467_v16 = vpop.permute.xlu0 %466  ;;  %v510_v63 = vmul.f32 %v11186_v29, %v488_v34  ;;  %v506_v34 = vmul.f32 %v11186_v29, %v11183_v55 }
  0xf9   : > { %v497_v38 = vmul.f32 %v11168_v53, %v489_v62  ;;  %v500_v26 = vmul.f32 %v11208_v40, %v477_v58  ;;  %v1882_v32 = vmul.f32 %v11211_v44, %v477_v58  ;;  %v1883_v47 = vmul.f32 %v11198_v39, %v489_v62 }
  0xfa   : > { %v484_v45 = vsel %vm476_vm1, %v11093_v57, %v467_v16 }
  0xfb   : > { %v513_v18 = vpack.c.bf16 %v498_v52, %v497_v38  ;;  %v514_v27 = vpack.c.bf16 %v500_v26, %v499_v17  ;;  %v1897_v28 = vpack.c.bf16 %v1883_v47, %v1882_v32  ;;  %v1893_v61 = vmul.f32 %v11160_v48, %v484_v45 }
  0xfc   : > { %v511_v17 = vmul.f32 %v11201_v42, %v484_v45 }
  0xfd   : > { %521 = vst [vmem:[#allocation2 + $0x40] sm:$0xff] %v513_v18  ;;  %719 = vrot.lane.b32.xlu2 %v10865_v9, %s10631_s9  ;;  %717 = vrot.lane.b32.xlu1 %v10871_v11, %s10631_s9  ;;  %v1902_v31 = vpack.c.bf16 %v1893_v61, %v1892_v20  ;;  %v507_v61 = vmul.f32 %v11201_v42, %v11178_v30 }
  0xfe   : > { %522 = vst [vmem:[#allocation2 + $0x48] sm:$0xff] %v514_v27  ;;  %715 = vrot.lane.b32.xlu0 %v10853_v7, %s10631_s9 }
  0xff   : > { %1905 = vst [vmem:[#allocation2 + $0x4c8] sm:$0xff] %v1897_v28  ;;  %v11270_v57 = vpop.permute.xlu2 %547  ;;  %v475_v52 = vpop.permute.xlu1 %474 }
 0x100   : > { %1910 = vst [vmem:[#allocation2 + $0x4f0] sm:$0xff] %v1902_v31  ;;  %v480_v58 = vsel %vm476_vm1, %v467_v16, %v475_v52  ;;  %v492_v62 = vsel %vm476_vm1, %v475_v52, %v11150_v33  ;;  %v473_v38 = vpop.permute.xlu0 %472 }
 0x101   : > { %v509_v26 = vmul.f32 %v11168_v53, %v492_v62  ;;  %v512_v32 = vmul.f32 %v11208_v40, %v480_v58  ;;  %v1894_v47 = vmul.f32 %v11211_v44, %v480_v58  ;;  %v1895_v18 = vmul.f32 %v11198_v39, %v492_v62 }
 0x102   : > { %v479_v16 = vsel %vm476_vm1, %v11126_v24, %v473_v38  ;;  %v491_v33 = vsel %vm476_vm1, %v473_v38, %v11152_v35  ;;  %v11313_v62 = vperm.slane %v10960_v22, 4  ;;  %v11318_v38 = vperm.slane %v10957_v21, 4 }
 0x103   : > { %v519_v45 = vpack.c.bf16 %v510_v63, %v509_v26  ;;  %v520_v27 = vpack.c.bf16 %v512_v32, %v511_v17  ;;  %v1903_v28 = vpack.c.bf16 %v1895_v18, %v1894_v47  ;;  %v505_v20 = vmul.f32 %v11168_v53, %v491_v33 }
 0x104   : > { %v508_v31 = vmul.f32 %v11208_v40, %v479_v16  ;;  %v1890_v55 = vmul.f32 %v11211_v44, %v479_v16  ;;  %v1891_v52 = vmul.f32 %v11198_v39, %v491_v33  ;;  %16528 = vst [vmem:[#allocation30_spill] sm:$0xff] %v11313_v62  ;;  %v11321_v26 = vperm.slane %v11002_v36, 2 }
 0x105   : > { %527 = vst [vmem:[#allocation2 + $0x70] sm:$0xff] %v519_v45  ;;  %v517_v24 = vpack.c.bf16 %v506_v34, %v505_v20  ;;  %725 = vrot.lane.b32.xlu2 %v10880_v12, %s10631_s9  ;;  %723 = vrot.lane.b32.xlu1 %v10886_v14, %s10631_s9  ;;  %v11324_v32 = vperm.slane %v11008_v37, 2 }
 0x106   : > { %528 = vst [vmem:[#allocation2 + $0x78] sm:$0xff] %v520_v27  ;;  %v518_v35 = vpack.c.bf16 %v508_v31, %v507_v61  ;;  %v1901_v63 = vpack.c.bf16 %v1891_v52, %v1890_v55  ;;  %721 = vrot.lane.b32.xlu0 %v10868_v10, %s10631_s9  ;;  %v11349_v55 = vperm.slane %v11017_v41, 4 }
 0x107   : > { %1911 = vst [vmem:[#allocation2 + $0x4f8] sm:$0xff] %v1903_v28  ;;  %v554_v30 = vpop.permute.xlu2 %553  ;;  %v11303_v17 = vpop.permute.xlu1 %533 }
 0x108   : > { %525 = vst [vmem:[#allocation2 + $0x60] sm:$0xff] %v517_v24  ;;  %v11305_v58 = vpop.permute.xlu0 %531  ;;  %v574_v34 = vsel %vm561_vm2, %v554_v30, %v11170_v54  ;;  %v11352_v24 = vperm.slane %v11049_v56, 2 }
 0x109   : > { %526 = vst [vmem:[#allocation2 + $0x68] sm:$0xff] %v518_v35  ;;  %v582_v61 = vmul.f32 %v11321_v26, %v574_v34 }
 0x10a   : > { %1909 = vst [vmem:[#allocation2 + $0x4e8] sm:$0xff] %v1901_v63  ;;  %v11362_v63 = vperm.slane %v11042_v51, 4 }
 0x10b   : > { %16529 = vst [vmem:[#allocation31_spill] sm:$0xff] %v11318_v38 }
 0x10c   : > { %16530 = vst [vmem:[#allocation32_spill] sm:$0xff] %v11321_v26 }
 0x10d   : > { %784 = vrot.lane.b32.xlu2 %v10826_v2, %s10632_s12  ;;  %729 = vrot.lane.b32.xlu1 %v10895_v15, %s10631_s9  ;;  %16531 = vst [vmem:[#allocation33_spill] sm:$0xff] %v11324_v32 }
 0x10e   : > { %727 = vrot.lane.b32.xlu0 %v10883_v13, %s10631_s9  ;;  %16532 = vst [vmem:[#allocation34_spill] sm:$0xff] %v11349_v55 }
 0x10f   : > { %v560_v47 = vpop.permute.xlu2 %559  ;;  %v540_v18 = vpop.permute.xlu1 %539  ;;  %16533 = vst [vmem:[#allocation35_spill] sm:$0xff] %v11352_v24 }
 0x110   : > { %v11332_v16 = vsel %vm561_vm2, %v540_v18, %v11270_v57  ;;  %v11337_v33 = vsel %vm561_vm2, %v11305_v58, %v540_v18  ;;  %v538_v45 = vpop.permute.xlu0 %537  ;;  %16535 = vst [vmem:[#allocation37_spill] sm:$0xff] %v11362_v63  ;;  %v577_v18 = vsel %vm561_vm2, %v560_v47, %v11219_v43 }
 0x111   : > { %v1920_v27 = vmul.f32 %v11313_v62, %v11337_v33  ;;  %v1921_v28 = vmul.f32 %v11318_v38, %v11332_v16  ;;  %v570_v20 = vsel %vm561_vm2, %v11170_v54, %v538_v45  ;;  %v11359_v54 = vperm.slane %v11040_v50, 2 }
 0x112   : > { %v583_v31 = vmul.f32 %v11324_v32, %v570_v20  ;;  %v594_v49 = vmul.f32 %v11321_v26, %v577_v18 }
 0x113   : > { %v1934_v52 = vpack.c.bf16 %v1921_v28, %v1920_v27  ;;  %16534 = vst [vmem:[#allocation36_spill] sm:$0xff] %v11359_v54 }
 0x114   : > { %v598_v35 = vpack.c.bf16 %v583_v31, %v582_v61  ;;  %v1919_v61 = vmul.f32 %v11349_v55, %v574_v34  ;;  %v1916_v31 = vmul.f32 %v11313_v62, %v570_v20 }
 0x115   : > { %790 = vrot.lane.b32.xlu2 %v10835_v3, %s10632_s12  ;;  %788 = vrot.lane.b32.xlu1 %v10820_v0, %s10632_s12  ;;  %1942 = vst [vmem:[#allocation2 + $0x510] sm:$0xff] %v1934_v52 }
 0x116   : > { %786 = vrot.lane.b32.xlu0 %v10841_v5, %s10632_s12  ;;  %606 = vst [vmem:[#allocation2 + $0x80] sm:$0xff] %v598_v35 }
 0x117   : > { %v11369_v27 = vpop.permute.xlu2 %618  ;;  %v546_v28 = vpop.permute.xlu1 %545 }
 0x118   : > { %v562_v44 = vsel %vm561_vm2, %v546_v28, %v554_v30  ;;  %v566_v52 = vsel %vm561_vm2, %v538_v45, %v546_v28  ;;  %v544_v40 = vpop.permute.xlu0 %543 }
 0x119   : > { %v584_v42 = vmul.f32 %v11352_v24, %v566_v52  ;;  %v585_v39 = vmul.f32 %v11359_v54, %v562_v44  ;;  %v1917_v35 = vmul.f32 %v11318_v38, %v566_v52  ;;  %v1918_v48 = vmul.f32 %v11362_v63, %v562_v44 }
 0x11a   : > { %v573_v34 = vsel %vm561_vm2, %v11219_v43, %v544_v40 }
 0x11b   : > { %v599_v20 = vpack.c.bf16 %v585_v39, %v584_v42  ;;  %v1932_v30 = vpack.c.bf16 %v1917_v35, %v1916_v31  ;;  %v1933_v29 = vpack.c.bf16 %v1919_v61, %v1918_v48  ;;  %v595_v45 = vmul.f32 %v11324_v32, %v573_v34 }
 0x11c   : > { %v572_v39 = vsel %vm561_vm2, %v11303_v17, %v11243_v59  ;;  %v1928_v44 = vmul.f32 %v11313_v62, %v573_v34 }
 0x11d   : > { %607 = vst [vmem:[#allocation2 + $0x88] sm:$0xff] %v599_v20  ;;  %v604_v28 = vpack.c.bf16 %v595_v45, %v594_v49  ;;  %796 = vrot.lane.b32.xlu2 %v10856_v8, %s10632_s12  ;;  %794 = vrot.lane.b32.xlu1 %v10838_v4, %s10632_s12  ;;  %v1931_v49 = vmul.f32 %v11349_v55, %v577_v18 }
 0x11e   : > { %1940 = vst [vmem:[#allocation2 + $0x500] sm:$0xff] %v1932_v30  ;;  %792 = vrot.lane.b32.xlu0 %v10823_v1, %s10632_s12 }
 0x11f   : > { %1941 = vst [vmem:[#allocation2 + $0x508] sm:$0xff] %v1933_v29  ;;  %v11396_v48 = vpop.permute.xlu2 %624  ;;  %v552_v42 = vpop.permute.xlu1 %551 }
 0x120   : > { %612 = vst [vmem:[#allocation2 + $0xb0] sm:$0xff] %v604_v28  ;;  %v565_v43 = vsel %vm561_vm2, %v552_v42, %v560_v47  ;;  %v569_v61 = vsel %vm561_vm2, %v544_v40, %v552_v42  ;;  %v550_v31 = vpop.permute.xlu0 %549  ;;  %v1924_v47 = vmul.f32 %v11313_v62, %v572_v39 }
 0x121   : > { %v596_v52 = vmul.f32 %v11352_v24, %v569_v61  ;;  %v597_v35 = vmul.f32 %v11359_v54, %v565_v43  ;;  %v1929_v29 = vmul.f32 %v11318_v38, %v569_v61  ;;  %v1930_v20 = vmul.f32 %v11362_v63, %v565_v43 }
 0x122   : > { %v568_v18 = vsel %vm561_vm2, %v11243_v59, %v550_v31 }
 0x123   : > { %v605_v34 = vpack.c.bf16 %v597_v35, %v596_v52  ;;  %v1938_v30 = vpack.c.bf16 %v1929_v29, %v1928_v44  ;;  %v1939_v45 = vpack.c.bf16 %v1931_v49, %v1930_v20  ;;  %v1925_v40 = vmul.f32 %v11318_v38, %v568_v18 }
 0x124   : > { %v591_v49 = vmul.f32 %v11324_v32, %v572_v39  ;;  %v592_v44 = vmul.f32 %v11352_v24, %v568_v18  ;;  %v587_v39 = vmul.f32 %v11324_v32, %v11337_v33 }
 0x125   : > { %613 = vst [vmem:[#allocation2 + $0xb8] sm:$0xff] %v605_v34  ;;  %802 = vrot.lane.b32.xlu2 %v10871_v11, %s10632_s12  ;;  %800 = vrot.lane.b32.xlu1 %v10853_v7, %s10632_s12  ;;  %v1936_v28 = vpack.c.bf16 %v1925_v40, %v1924_v47  ;;  %v588_v47 = vmul.f32 %v11352_v24, %v11332_v16 }
 0x126   : > { %1946 = vst [vmem:[#allocation2 + $0x530] sm:$0xff] %v1938_v30  ;;  %798 = vrot.lane.b32.xlu0 %v10850_v6, %s10632_s12 }
 0x127   : > { %1947 = vst [vmem:[#allocation2 + $0x538] sm:$0xff] %v1939_v45  ;;  %v11419_v59 = vpop.permute.xlu2 %630  ;;  %v558_v42 = vpop.permute.xlu1 %557 }
 0x128   : > { %1944 = vst [vmem:[#allocation2 + $0x520] sm:$0xff] %v1936_v28  ;;  %v564_v11 = vsel %vm561_vm2, %v550_v31, %v558_v42  ;;  %v576_v43 = vsel %vm561_vm2, %v558_v42, %v11303_v17  ;;  %v556_v61 = vpop.permute.xlu0 %555 }
 0x129   : > { %v590_v52 = vmul.f32 %v11321_v26, %v576_v43  ;;  %v593_v35 = vmul.f32 %v11359_v54, %v564_v11  ;;  %v1926_v29 = vmul.f32 %v11362_v63, %v564_v11  ;;  %v1927_v20 = vmul.f32 %v11349_v55, %v576_v43 }
 0x12a   : > { %v563_v31 = vsel %vm561_vm2, %v11270_v57, %v556_v61  ;;  %v575_v17 = vsel %vm561_vm2, %v556_v61, %v11305_v58 }
 0x12b   : > { %v602_v18 = vpack.c.bf16 %v591_v49, %v590_v52  ;;  %v603_v34 = vpack.c.bf16 %v593_v35, %v592_v44  ;;  %v1937_v30 = vpack.c.bf16 %v1927_v20, %v1926_v29  ;;  %v586_v45 = vmul.f32 %v11321_v26, %v575_v17 }
 0x12c   : > { %v589_v40 = vmul.f32 %v11359_v54, %v563_v31  ;;  %v1922_v33 = vmul.f32 %v11362_v63, %v563_v31  ;;  %v1923_v28 = vmul.f32 %v11349_v55, %v575_v17  ;;  %v11494_v52 = vperm.slane %v11002_v36, 3  ;;  %v7972_v55 = vld [vmem:[#allocation2] sm:$0xf] }
 0x12d   : > { %610 = vst [vmem:[#allocation2 + $0xa0] sm:$0xff] %v602_v18  ;;  %v600_v57 = vpack.c.bf16 %v587_v39, %v586_v45  ;;  %808 = vrot.lane.b32.xlu2 %v10886_v14, %s10632_s12  ;;  %806 = vrot.lane.b32.xlu1 %v10868_v10, %s10632_s12  ;;  %v11469_v10 = vperm.slane %v10957_v21, 5  ;;  %v11512_v39 = vperm.slane %v11008_v37, 3 }
 0x12e   : > { %611 = vst [vmem:[#allocation2 + $0xa8] sm:$0xff] %v603_v34  ;;  %v601_v58 = vpack.c.bf16 %v589_v40, %v588_v47  ;;  %v1935_v42 = vpack.c.bf16 %v1923_v28, %v1922_v33  ;;  %804 = vrot.lane.b32.xlu0 %v10865_v9, %s10632_s12  ;;  %v11464_v9 = vperm.slane %v10960_v22, 5  ;;  %v11524_v47 = vperm.slane %v11017_v41, 5 }
 0x12f   : > { %1945 = vst [vmem:[#allocation2 + $0x528] sm:$0xff] %v1937_v30  ;;  %v11452_v16 = vpop.permute.xlu2 %636  ;;  %v11454_v49 = vpop.permute.xlu1 %616  ;;  %v11531_v33 = vperm.slane %v11040_v50, 3 }
 0x130   : > { %608 = vst [vmem:[#allocation2 + $0x90] sm:$0xff] %v600_v57  ;;  %v11456_v44 = vpop.permute.xlu0 %614  ;;  %v656_v28 = vsel %vm646_vm3, %v11454_v49, %v11396_v48  ;;  %v11543_v57 = vperm.slane %v11049_v56, 3 }
 0x131   : > { %609 = vst [vmem:[#allocation2 + $0x98] sm:$0xff] %v601_v58 }
 0x132   : > { %1943 = vst [vmem:[#allocation2 + $0x518] sm:$0xff] %v1935_v42 }
 0x133   : > { %16536 = vst [vmem:[#allocation38_spill] sm:$0xff] %v11464_v9 }
 0x134   : > { %16537 = vst [vmem:[#allocation39_spill] sm:$0xff] %v11469_v10 }
 0x135   : > { %814 = vrot.lane.b32.xlu2 %v10895_v15, %s10632_s12  ;;  %812 = vrot.lane.b32.xlu1 %v10883_v13, %s10632_s12  ;;  %16538 = vst [vmem:[#allocation40_spill] sm:$0xff] %v11494_v52 }
 0x136   : > { %810 = vrot.lane.b32.xlu0 %v10880_v12, %s10632_s12  ;;  %16539 = vst [vmem:[#allocation41_spill] sm:$0xff] %v11512_v39 }
 0x137   : > { %v643_v14 = vpop.permute.xlu2 %642  ;;  %v623_v11 = vpop.permute.xlu1 %622  ;;  %16540 = vst [vmem:[#allocation42_spill] sm:$0xff] %v11524_v47 }
 0x138   : > { %v11474_v43 = vsel %vm646_vm3, %v623_v11, %v11419_v59  ;;  %v11479_v13 = vsel %vm646_vm3, %v11456_v44, %v623_v11  ;;  %v11481_v15 = vpop.permute.xlu0 %620  ;;  %v661_v20 = vsel %vm646_vm3, %v643_v14, %v11369_v27  ;;  %16541 = vst [vmem:[#allocation43_spill] sm:$0xff] %v11531_v33 }
 0x139   : > { %v1952_v12 = vmul.f32 %v11464_v9, %v11479_v13  ;;  %v1953_v22 = vmul.f32 %v11469_v10, %v11474_v43  ;;  %v675_v34 = vmul.f32 %v11494_v52, %v661_v20  ;;  %16543 = vst [vmem:[#allocation45_spill] sm:$0xff] %v11543_v57  ;;  %v1963_v58 = vmul.f32 %v11524_v47, %v661_v20 }
 0x13b   : > { %v1968_v61 = vpack.c.bf16 %v1953_v22, %v1952_v12 }
 0x13d   : > { %873 = vrot.lane.b32.xlu2 %v10820_v0, %s10633_s13  ;;  %871 = vrot.lane.b32.xlu1 %v10841_v5, %s10633_s13  ;;  %1976 = vst [vmem:[#allocation2 + $0x540] sm:$0xff] %v1968_v61 }
 0x13e   : > { %869 = vrot.lane.b32.xlu0 %v10826_v2, %s10633_s13 }
 0x13f   : > { %v11496_v35 = vpop.permute.xlu2 %701  ;;  %v629_v29 = vpop.permute.xlu1 %628 }
 0x140   : > { %v11504_v0 = vsel %vm646_vm3, %v629_v29, %v11452_v16  ;;  %v11509_v5 = vsel %vm646_vm3, %v11481_v15, %v629_v29  ;;  %v627_v2 = vpop.permute.xlu0 %626 }
 0x141   : > { %v1964_v31 = vmul.f32 %v11464_v9, %v11509_v5  ;;  %v1965_v17 = vmul.f32 %v11469_v10, %v11504_v0  ;;  %v657_v18 = vsel %vm646_vm3, %v11369_v27, %v627_v2  ;;  %v11534_v27 = vperm.slane %v11042_v51, 5 }
 0x142   : > { %v676_v45 = vmul.f32 %v11512_v39, %v657_v18  ;;  %v1960_v42 = vmul.f32 %v11464_v9, %v657_v18 }
 0x143   : > { %v1974_v30 = vpack.c.bf16 %v1965_v17, %v1964_v31  ;;  %16542 = vst [vmem:[#allocation44_spill] sm:$0xff] %v11534_v27 }
 0x144   : > { %v687_v40 = vpack.c.bf16 %v676_v45, %v675_v34 }
 0x145   : > { %1982 = vst [vmem:[#allocation2 + $0x570] sm:$0xff] %v1974_v30  ;;  %879 = vrot.lane.b32.xlu2 %v10838_v4, %s10633_s13  ;;  %877 = vrot.lane.b32.xlu1 %v10823_v1, %s10633_s13 }
 0x146   : > { %875 = vrot.lane.b32.xlu0 %v10835_v3, %s10633_s13  ;;  %695 = vst [vmem:[#allocation2 + $0xe0] sm:$0xff] %v687_v40  ;;  %v672_v40 = vmul.f32 %v11512_v39, %v656_v28 }
 0x147   : > { %v11545_v4 = vpop.permute.xlu2 %707  ;;  %v635_v1 = vpop.permute.xlu1 %634 }
 0x148   : > { %v649_v11 = vsel %vm646_vm3, %v635_v1, %v643_v14  ;;  %v653_v3 = vsel %vm646_vm3, %v627_v2, %v635_v1  ;;  %v633_v12 = vpop.permute.xlu0 %632  ;;  %v1956_v14 = vmul.f32 %v11464_v9, %v656_v28  ;;  %v8036_v9 = vld [vmem:[#allocation2 + $0x80] sm:$0xf] }
 0x149   : > { %v677_v22 = vmul.f32 %v11543_v57, %v653_v3  ;;  %v678_v61 = vmul.f32 %v11531_v33, %v649_v11  ;;  %v1961_v29 = vmul.f32 %v11469_v10, %v653_v3  ;;  %v1962_v31 = vmul.f32 %v11534_v27, %v649_v11 }
 0x14a   : > { %v652_v20 = vsel %vm646_vm3, %v11396_v48, %v633_v12  ;;  %v668_v3 = vmul.f32 %v11512_v39, %v11479_v13 }
 0x14b   : > { %v688_v17 = vpack.c.bf16 %v678_v61, %v677_v22  ;;  %v1972_v18 = vpack.c.bf16 %v1961_v29, %v1960_v42  ;;  %v1973_v34 = vpack.c.bf16 %v1963_v58, %v1962_v31  ;;  %v1957_v2 = vmul.f32 %v11469_v10, %v652_v20 }
 0x14c   : > { %v673_v1 = vmul.f32 %v11543_v57, %v652_v20  ;;  %v669_v20 = vmul.f32 %v11543_v57, %v11474_v43 }
 0x14d   : > { %696 = vst [vmem:[#allocation2 + $0xe8] sm:$0xff] %v688_v17  ;;  %885 = vrot.lane.b32.xlu2 %v10853_v7, %s10633_s13  ;;  %883 = vrot.lane.b32.xlu1 %v10850_v6, %s10633_s13  ;;  %v1970_v30 = vpack.c.bf16 %v1957_v2, %v1956_v14  ;;  %v11606_v2 = vld [vmem:[%s10805_s19 + $0x30] sm:$0xff] }
 0x14e   : > { %1980 = vst [vmem:[#allocation2 + $0x560] sm:$0xff] %v1972_v18  ;;  %881 = vrot.lane.b32.xlu0 %v10856_v8, %s10633_s13 }
 0x14f   : > { %1981 = vst [vmem:[#allocation2 + $0x568] sm:$0xff] %v1973_v34  ;;  %v11568_v48 = vpop.permute.xlu2 %713  ;;  %v641_v45 = vpop.permute.xlu1 %640  ;;  %v11596_v34 = vld [vmem:[%s10805_s19 + $0x70] sm:$0xff] }
 0x150   : > { %1978 = vst [vmem:[#allocation2 + $0x550] sm:$0xff] %v1970_v30  ;;  %v648_v7 = vsel %vm646_vm3, %v633_v12, %v641_v45  ;;  %v660_v6 = vsel %vm646_vm3, %v641_v45, %v11454_v49  ;;  %v639_v58 = vpop.permute.xlu0 %638 }
 0x151   : > { %v671_v42 = vmul.f32 %v11494_v52, %v660_v6  ;;  %v674_v8 = vmul.f32 %v11531_v33, %v648_v7  ;;  %v1958_v11 = vmul.f32 %v11534_v27, %v648_v7  ;;  %v1959_v28 = vmul.f32 %v11524_v47, %v660_v6 }
 0x152   : > { %v647_v12 = vsel %vm646_vm3, %v11419_v59, %v639_v58  ;;  %v659_v49 = vsel %vm646_vm3, %v639_v58, %v11456_v44  ;;  %v11601_v44 = vld [vmem:[%s10805_s19 + $0x50] sm:$0xff]  ;;  %v681_v7 = vmul.f32 %v11543_v57, %v11504_v0  ;;  %v11708_v57 = vld [vmem:[%s10805_s19 + $0x8] sm:$0xff] }
 0x153   : > { %v685_v22 = vpack.c.bf16 %v672_v40, %v671_v42  ;;  %v686_v61 = vpack.c.bf16 %v674_v8, %v673_v1  ;;  %v1971_v29 = vpack.c.bf16 %v1959_v28, %v1958_v11  ;;  %v667_v31 = vmul.f32 %v11494_v52, %v659_v49 }
 0x154   : > { %v670_v17 = vmul.f32 %v11531_v33, %v647_v12  ;;  %v1954_v13 = vmul.f32 %v11534_v27, %v647_v12  ;;  %v1955_v18 = vmul.f32 %v11524_v47, %v659_v49  ;;  %v680_v1 = vmul.f32 %v11512_v39, %v11509_v5  ;;  %v11629_v12 = vld [vmem:[%s10805_s19 + $0x58] sm:$0xff]  ;;  %v8020_v39 = vld [vmem:[#allocation2 + $0x60] sm:$0xf] }
 0x155   : > { %693 = vst [vmem:[#allocation2 + $0xd0] sm:$0xff] %v685_v22  ;;  %v683_v59 = vpack.c.bf16 %v668_v3, %v667_v31  ;;  %891 = vrot.lane.b32.xlu2 %v11596_v34, %s10633_s13  ;;  %889 = vrot.lane.b32.xlu1 %v11601_v44, %s10633_s13  ;;  %v11654_v31 = vld [vmem:[%s10805_s19] sm:$0xff] }
 0x156   : > { %694 = vst [vmem:[#allocation2 + $0xd8] sm:$0xff] %v686_v61  ;;  %v684_v43 = vpack.c.bf16 %v670_v17, %v669_v20  ;;  %v1969_v14 = vpack.c.bf16 %v1955_v18, %v1954_v13  ;;  %887 = vrot.lane.b32.xlu0 %v11606_v2, %s10633_s13  ;;  %v11659_v20 = vperm.slane %v10957_v21, 6  ;;  %v8084_v17 = vld [vmem:[#allocation2 + $0xe0] sm:$0xf]  ;;  %v11662_v18 = vld [vmem:[%s10805_s19 + $0x78] sm:$0xff] }
 0x157   : > { %1979 = vst [vmem:[#allocation2 + $0x558] sm:$0xff] %v1971_v29  ;;  %v11610_v30 = vpop.permute.xlu2 %719  ;;  %v11612_v45 = vpop.permute.xlu1 %699  ;;  %v11649_v29 = vld [vmem:[%s10805_s19 + $0x20] sm:$0xff] }
 0x158   : > { %691 = vst [vmem:[#allocation2 + $0xc0] sm:$0xff] %v683_v59  ;;  %v645_v40 = vpop.permute.xlu0 %644 }
 0x159   : > { %692 = vst [vmem:[#allocation2 + $0xc8] sm:$0xff] %v684_v43  ;;  %v650_v6 = vsel %vm646_vm3, %v11452_v16, %v645_v40  ;;  %v662_v58 = vsel %vm646_vm3, %v645_v40, %v11481_v15  ;;  %v11634_v16 = vld [vmem:[%s10805_s19 + $0x38] sm:$0xff]  ;;  %v11666_v43 = vld [vmem:[#allocation6 + $0x40] sm:$0xff]  ;;  %v11672_v40 = vperm.slane %v11002_v36, 4 }
 0x15a   : > { %1977 = vst [vmem:[#allocation2 + $0x548] sm:$0xff] %v1969_v14  ;;  %v679_v42 = vmul.f32 %v11494_v52, %v662_v58  ;;  %v682_v8 = vmul.f32 %v11531_v33, %v650_v6  ;;  %v1966_v5 = vmul.f32 %v11534_v27, %v650_v6  ;;  %v1967_v11 = vmul.f32 %v11524_v47, %v662_v58  ;;  %v11639_v15 = vld [vmem:[%s10805_s19 + $0x18] sm:$0xff]  ;;  %v9804_v52 = vld [vmem:[#allocation2 + $0x6c] sm:$0xf0] }
 0x15b   : > { %16544 = vst [vmem:[#allocation46_spill] sm:$0xff] %v11659_v20  ;;  %v11669_v14 = vperm.slane %v11666_v43, 6  ;;  %v11705_v27 = vperm.slane %v11049_v56, 4  ;;  %v9812_v56 = vld [vmem:[#allocation2 + $0xac] sm:$0xf0] }
 0x15c   : > { %v689_v0 = vpack.c.bf16 %v680_v1, %v679_v42  ;;  %v690_v28 = vpack.c.bf16 %v682_v8, %v681_v7  ;;  %v1975_v3 = vpack.c.bf16 %v1967_v11, %v1966_v5  ;;  %16546 = vst [vmem:[#allocation48_spill] sm:$0xff] %v11672_v40  ;;  %v9816_v6 = vld [vmem:[#allocation2 + $0xcc] sm:$0xf0]  ;;  %v11690_v5 = vperm.slane %v11008_v37, 4  ;;  %v8052_v37 = vld [vmem:[#allocation2 + $0xa0] sm:$0xf] }
 0x15d   : > { %897 = vrot.lane.b32.xlu2 %v11629_v12, %s10633_s13  ;;  %895 = vrot.lane.b32.xlu1 %v11634_v16, %s10633_s13  ;;  %16545 = vst [vmem:[#allocation47_spill] sm:$0xff] %v11669_v14 }
 0x15e   : > { %697 = vst [vmem:[#allocation2 + $0xf0] sm:$0xff] %v689_v0  ;;  %893 = vrot.lane.b32.xlu0 %v11639_v15, %s10633_s13 }
 0x15f   : > { %698 = vst [vmem:[#allocation2 + $0xf8] sm:$0xff] %v690_v28  ;;  %v726_v49 = vpop.permute.xlu2 %725  ;;  %v11643_v22 = vpop.permute.xlu1 %705  ;;  %v8068_v7 = vld [vmem:[#allocation2 + $0xc0] sm:$0xf] }
 0x160   : > { %1983 = vst [vmem:[#allocation2 + $0x578] sm:$0xff] %v1975_v3  ;;  %v11645_v61 = vpop.permute.xlu0 %703  ;;  %v745_v58 = vsel %vm731_vm4, %v726_v49, %v11496_v35  ;;  %v8069_v3 = vor.u32 %v9816_v6, %v8068_v7  ;;  %v11718_v7 = vperm.slane %v11040_v50, 4  ;;  %v11724_v6 = vld [vmem:[%s10805_s19 + $0x40] sm:$0xff] }
 0x161   : > { %16547 = vst [vmem:[#allocation49_spill] sm:$0xff] %v11690_v5 }
 0x162   : > { %16549 = vst [vmem:[#allocation51_spill] sm:$0xff] %v11705_v27 }
 0x163   : > { %16550 = vst [vmem:[#allocation52_spill] sm:$0xff] %v11718_v7 }
 0x165   : > { %956 = vrot.lane.b32.xlu2 %v11649_v29, %s10634_s20  ;;  %954 = vrot.lane.b32.xlu1 %v11654_v31, %s10634_s20  ;;  %v9820_v13 = vld [vmem:[#allocation2 + $0xec] sm:$0xf0] }
 0x166   : > { %899 = vrot.lane.b32.xlu0 %v11662_v18, %s10633_s13  ;;  %v8085_v59 = vor.u32 %v9820_v13, %v8084_v17  ;;  %v756_v17 = vmul.f32 %v11672_v40, %v745_v58 }
 0x167   : > { %v11674_v1 = vpop.permute.xlu2 %784  ;;  %v712_v21 = vpop.permute.xlu1 %711 }
 0x168   : > { %v11682_v42 = vsel %vm731_vm4, %v712_v21, %v11610_v30  ;;  %v11687_v8 = vsel %vm731_vm4, %v11645_v61, %v712_v21  ;;  %3577 = vmatpush.bf16.msra.mxu0 %v8085_v59  ;;  %v710_v36 = vpop.permute.xlu0 %709  ;;  %v11702_v21 = vperm.slane %v11017_v41, 6  ;;  %v11721_v41 = vperm.slane %v11042_v51, 6 }
 0x169   : > { %v1996_v11 = vmul.f32 %v11669_v14, %v11687_v8  ;;  %v1997_v0 = vmul.f32 %v11659_v20, %v11682_v42  ;;  %v741_v28 = vsel %vm731_vm4, %v11496_v35, %v710_v36  ;;  %v11713_v35 = vld [vmem:[%s10805_s19 + $0x60] sm:$0xff] }
 0x16a   : > { %v757_v59 = vmul.f32 %v11690_v5, %v741_v28  ;;  %16548 = vst [vmem:[#allocation50_spill] sm:$0xff] %v11702_v21  ;;  %v1995_v51 = vmul.f32 %v11702_v21, %v745_v58 }
 0x16b   : > { %v2008_v13 = vpack.c.bf16 %v1997_v0, %v1996_v11  ;;  %16551 = vst [vmem:[#allocation53_spill] sm:$0xff] %v11721_v41  ;;  %v8053_v11 = vor.u32 %v9812_v56, %v8052_v37  ;;  %v740_v0 = vsel %vm731_vm4, %v11612_v45, %v11545_v4 }
 0x16c   : > { %3578 = vmatpush.bf16.msra.mxu0 %v8069_v3  ;;  %v770_v33 = vpack.c.bf16 %v757_v59, %v756_v17  ;;  %v9808_v17 = vld [vmem:[#allocation2 + $0x8c] sm:$0xf0]  ;;  %v1988_v63 = vmul.f32 %v11669_v14, %v740_v0 }
 0x16d   : > { %2016 = vst [vmem:[#allocation2 + $0x5a0] sm:$0xff] %v2008_v13  ;;  %962 = vrot.lane.b32.xlu2 %v11708_v57, %s10634_s20  ;;  %960 = vrot.lane.b32.xlu1 %v11713_v35, %s10634_s20  ;;  %v1992_v13 = vmul.f32 %v11669_v14, %v741_v28  ;;  %v8037_v28 = vor.u32 %v9808_v17, %v8036_v9 }
 0x16e   : > { %958 = vrot.lane.b32.xlu0 %v11724_v6, %s10634_s20  ;;  %778 = vst [vmem:[#allocation2 + $0x110] sm:$0xff] %v770_v33  ;;  %v743_v17 = vsel %vm731_vm4, %v11643_v22, %v11568_v48 }
 0x16f   : > { %v11732_v3 = vpop.permute.xlu2 %790  ;;  %v718_v50 = vpop.permute.xlu1 %717 }
 0x170   : > { %v733_v59 = vsel %vm731_vm4, %v718_v50, %v726_v49  ;;  %v737_v37 = vsel %vm731_vm4, %v710_v36, %v718_v50  ;;  %3579 = vmatpush.bf16.msra.mxu0 %v8053_v11  ;;  %v716_v56 = vpop.permute.xlu0 %715 }
 0x171   : > { %v758_v47 = vmul.f32 %v11705_v27, %v737_v37  ;;  %v759_v33 = vmul.f32 %v11718_v7, %v733_v59  ;;  %v1993_v10 = vmul.f32 %v11659_v20, %v737_v37  ;;  %v1994_v58 = vmul.f32 %v11721_v41, %v733_v59  ;;  %v11750_v37 = vld [vmem:[%s10805_s19 + $0x68] sm:$0xff] }
 0x172   : > { %v736_v49 = vsel %vm731_vm4, %v11545_v4, %v716_v56  ;;  %v11755_v59 = vld [vmem:[%s10805_s19 + $0x48] sm:$0xff]  ;;  %v753_v4 = vmul.f32 %v11690_v5, %v740_v0 }
 0x173   : > { %v771_v36 = vpack.c.bf16 %v759_v33, %v758_v47  ;;  %v2006_v11 = vpack.c.bf16 %v1993_v10, %v1992_v13  ;;  %v2007_v50 = vpack.c.bf16 %v1995_v51, %v1994_v58  ;;  %v1989_v54 = vmul.f32 %v11659_v20, %v736_v49  ;;  %v11760_v10 = vld [vmem:[%s10805_s19 + $0x28] sm:$0xff]  ;;  %v8004_v33 = vld [vmem:[#allocation2 + $0x40] sm:$0xf] }
 0x174   : > { %3580 = vmatpush.bf16.msra.mxu0 %v8037_v28  ;;  %v8021_v47 = vor.u32 %v9804_v52, %v8020_v39 }
 0x175   : > { %779 = vst [vmem:[#allocation2 + $0x118] sm:$0xff] %v771_v36  ;;  %968 = vrot.lane.b32.xlu2 %v11750_v37, %s10634_s20  ;;  %966 = vrot.lane.b32.xlu1 %v11755_v59, %s10634_s20  ;;  %v2004_v9 = vpack.c.bf16 %v1989_v54, %v1988_v63  ;;  %v754_v54 = vmul.f32 %v11705_v27, %v736_v49 }
 0x176   : > { %2014 = vst [vmem:[#allocation2 + $0x590] sm:$0xff] %v2006_v11  ;;  %964 = vrot.lane.b32.xlu0 %v11760_v10, %s10634_s20  ;;  %v9800_v11 = vld [vmem:[#allocation2 + $0x4c] sm:$0xf0] }
 0x177   : > { %2015 = vst [vmem:[#allocation2 + $0x598] sm:$0xff] %v2007_v50  ;;  %v11769_v51 = vpop.permute.xlu2 %796  ;;  %v724_v13 = vpop.permute.xlu1 %723 }
 0x178   : > { %2012 = vst [vmem:[#allocation2 + $0x580] sm:$0xff] %v2004_v9  ;;  %v732_v63 = vsel %vm731_vm4, %v716_v56, %v724_v13  ;;  %v744_v52 = vsel %vm731_vm4, %v724_v13, %v11612_v45  ;;  %3581 = vmatpush.bf16.msra.mxu0 %v8021_v47  ;;  %v722_v39 = vpop.permute.xlu0 %721  ;;  %v8005_v56 = vor.u32 %v9800_v11, %v8004_v33  ;;  %v9796_v47 = vld [vmem:[#allocation2 + $0x2c] sm:$0xf0] }
 0x179   : > { %v752_v0 = vmul.f32 %v11672_v40, %v744_v52  ;;  %v755_v58 = vmul.f32 %v11718_v7, %v732_v63  ;;  %v1990_v28 = vmul.f32 %v11721_v41, %v732_v63  ;;  %v1991_v36 = vmul.f32 %v11702_v21, %v744_v52  ;;  %v9792_v63 = vld [vmem:[#allocation2 + $0xc] sm:$0xf0] }
 0x17a   : > { %v739_v49 = vsel %vm731_vm4, %v11568_v48, %v722_v39  ;;  %v2000_v13 = vmul.f32 %v11669_v14, %v743_v17  ;;  %v7988_v48 = vld [vmem:[#allocation2 + $0x20] sm:$0xf]  ;;  %v11791_v33 = vld [vmem:[%s10805_s19 + $0x10] sm:$0xff]  ;;  %v765_v52 = vmul.f32 %v11690_v5, %v743_v17 }
 0x17b   : > { %v768_v50 = vpack.c.bf16 %v753_v4, %v752_v0  ;;  %v769_v9 = vpack.c.bf16 %v755_v58, %v754_v54  ;;  %v2005_v45 = vpack.c.bf16 %v1991_v36, %v1990_v28  ;;  %v2001_v24 = vmul.f32 %v11659_v20, %v739_v49  ;;  %v9948_v36 = vld [vmem:[#allocation2 + $0x4ec] sm:$0xf0] }
 0x17c   : > { %3582 = vmatpush.bf16.msra.mxu0 %v8005_v56  ;;  %v7989_v54 = vor.u32 %v9796_v47, %v7988_v48  ;;  %v7973_v28 = vor.u32 %v9792_v63, %v7972_v55  ;;  %v766_v11 = vmul.f32 %v11705_v27, %v739_v49  ;;  %v8596_v47 = vld [vmem:[#allocation2 + $0x4e0] sm:$0xf]  ;;  %v761_v49 = vmul.f32 %v11690_v5, %v11687_v8 }
 0x17d   : > { %776 = vst [vmem:[#allocation2 + $0x100] sm:$0xff] %v768_v50  ;;  %974 = vrot.lane.b32.xlu2 %v11601_v44, %s10634_s20  ;;  %972 = vrot.lane.b32.xlu1 %v11606_v2, %s10634_s20  ;;  %v2010_v4 = vpack.c.bf16 %v2001_v24, %v2000_v13  ;;  %v8597_v13 = vor.u32 %v9948_v36, %v8596_v47  ;;  %v9936_v47 = vld [vmem:[#allocation2 + $0x48c] sm:$0xf0] }
 0x17e   : > { %777 = vst [vmem:[#allocation2 + $0x108] sm:$0xff] %v769_v9  ;;  %970 = vrot.lane.b32.xlu0 %v11791_v33, %s10634_s20 }
 0x17f   : > { %2013 = vst [vmem:[#allocation2 + $0x588] sm:$0xff] %v2005_v45  ;;  %v11796_v0 = vpop.permute.xlu2 %802  ;;  %v730_v58 = vpop.permute.xlu1 %729 }
 0x180   : > { %2018 = vst [vmem:[#allocation2 + $0x5b0] sm:$0xff] %v2010_v4  ;;  %v735_v24 = vsel %vm731_vm4, %v722_v39, %v730_v58  ;;  %v747_v56 = vsel %vm731_vm4, %v730_v58, %v11643_v22  ;;  %3583 = vmatpush.bf16.msra.mxu0 %v7989_v54  ;;  %v728_v50 = vpop.permute.xlu0 %727  ;;  %v762_v58 = vmul.f32 %v11705_v27, %v11682_v42 }
 0x181   : > { %v764_v17 = vmul.f32 %v11672_v40, %v747_v56  ;;  %v767_v9 = vmul.f32 %v11718_v7, %v735_v24  ;;  %v2002_v45 = vmul.f32 %v11721_v41, %v735_v24  ;;  %v2003_v55 = vmul.f32 %v11702_v21, %v747_v56 }
 0x182   : > { %v734_v39 = vsel %vm731_vm4, %v11610_v30, %v728_v50  ;;  %v746_v22 = vsel %vm731_vm4, %v728_v50, %v11645_v61  ;;  %v8580_v61 = vld [vmem:[#allocation2 + $0x4c0] sm:$0xf] }
 0x183   : > { %v774_v63 = vpack.c.bf16 %v765_v52, %v764_v17  ;;  %v775_v48 = vpack.c.bf16 %v767_v9, %v766_v11  ;;  %v2011_v4 = vpack.c.bf16 %v2003_v55, %v2002_v45  ;;  %v760_v54 = vmul.f32 %v11672_v40, %v746_v22  ;;  %v9944_v52 = vld [vmem:[#allocation2 + $0x4cc] sm:$0xf0]  ;;  %v8564_v9 = vld [vmem:[#allocation2 + $0x4a0] sm:$0xf] }
 0x184   : > { %v763_v24 = vmul.f32 %v11718_v7, %v734_v39  ;;  %v1998_v8 = vmul.f32 %v11721_v41, %v734_v39  ;;  %v1999_v56 = vmul.f32 %v11702_v21, %v746_v22  ;;  %3584 = vmatpush.bf16.msra.mxu0 %v7973_v28  ;;  %v8581_v17 = vor.u32 %v9944_v52, %v8580_v61  ;;  %v9940_v45 = vld [vmem:[#allocation2 + $0x4ac] sm:$0xf0]  ;;  %v10360_v39 = vld [vmem:[#allocation6 + $0x48] sm:$0xff]  ;;  %v11885_v41 = vld [vmem:[#allocation6 + $0x18] sm:$0xff] }
 0x185   : > { %782 = vst [vmem:[#allocation2 + $0x130] sm:$0xff] %v774_v63  ;;  %v772_v30 = vpack.c.bf16 %v761_v49, %v760_v54  ;;  %980 = vrot.lane.b32.xlu2 %v11634_v16, %s10634_s20  ;;  %978 = vrot.lane.b32.xlu1 %v11639_v15, %s10634_s20  ;;  %v8565_v55 = vor.u32 %v9940_v45, %v8564_v9  ;;  %v11836_v49 = vperm.slane %v11666_v43, 7  ;;  %v11840_v22 = vperm.slane %v10360_v39, 7  ;;  %v10363_v45 = vld [vmem:[#allocation6 + $0x58] sm:$0xff] }
 0x186   : > { %783 = vst [vmem:[#allocation2 + $0x138] sm:$0xff] %v775_v48  ;;  %v773_v36 = vpack.c.bf16 %v763_v24, %v762_v58  ;;  %v2009_v11 = vpack.c.bf16 %v1999_v56, %v1998_v8  ;;  %976 = vrot.lane.b32.xlu0 %v11596_v34, %s10634_s20  ;;  %v11847_v48 = vld [vmem:[#allocation6 + $0x8] sm:$0xff]  ;;  %v8548_v58 = vld [vmem:[#allocation2 + $0x480] sm:$0xf] }
 0x187   : > { %2019 = vst [vmem:[#allocation2 + $0x5b8] sm:$0xff] %v2011_v4  ;;  %v809_v42 = vpop.permute.xlu2 %808  ;;  %v11828_v28 = vpop.permute.xlu1 %788  ;;  %v11850_v4 = vperm.slane %v11847_v48, 5  ;;  %v8549_v61 = vor.u32 %v9936_v47, %v8548_v58  ;;  %v11878_v47 = vld [vmem:[#allocation6 + $0x10] sm:$0xff] }
 0x188   : > { %3653 = vmatpush.bf16.msrb.mxu0 %v8597_v13  ;;  %780 = vst [vmem:[#allocation2 + $0x120] sm:$0xff] %v772_v30  ;;  %v11830_v50 = vpop.permute.xlu0 %786  ;;  %v11842_v13 = vld [vmem:[#allocation6] sm:$0xff]  ;;  %v829_v24 = vsel %vm816_vm5, %v809_v42, %v11674_v1 }
 0x189   : > { %781 = vst [vmem:[#allocation2 + $0x128] sm:$0xff] %v773_v36  ;;  %v11845_v63 = vperm.slane %v11842_v13, 5 }
 0x18a   : > { %2017 = vst [vmem:[#allocation2 + $0x5a8] sm:$0xff] %v2009_v11 }
 0x18b   : > { %16552 = vst [vmem:[#allocation54_spill] sm:$0xff] %v11836_v49 }
 0x18c   : > { %3654 = vmatpush.bf16.msrb.mxu0 %v8581_v17  ;;  %16553 = vst [vmem:[#allocation55_spill] sm:$0xff] %v11840_v22  ;;  %v837_v17 = vmul.f32 %v11845_v63, %v829_v24 }
 0x18d   : > { %1039 = vrot.lane.b32.xlu2 %v11654_v31, %s10635_s26  ;;  %984 = vrot.lane.b32.xlu1 %v11662_v18, %s10634_s20  ;;  %16554 = vst [vmem:[#allocation56_spill] sm:$0xff] %v11845_v63 }
 0x18e   : > { %16555 = vst [vmem:[#allocation57_spill] sm:$0xff] %v11850_v4  ;;  %982 = vrot.lane.b32.xlu0 %v11629_v12, %s10634_s20 }
 0x18f   : > { %v815_v43 = vpop.permute.xlu2 %814  ;;  %v795_v54 = vpop.permute.xlu1 %794 }
 0x190   : > { %3655 = vmatpush.bf16.msrb.mxu0 %v8565_v55  ;;  %v11860_v8 = vsel %vm816_vm5, %v795_v54, %v11796_v0  ;;  %v11865_v56 = vsel %vm816_vm5, %v11830_v50, %v795_v54  ;;  %v793_v30 = vpop.permute.xlu0 %792  ;;  %v11876_v55 = vperm.slane %v10363_v45, 7  ;;  %v11881_v54 = vperm.slane %v11878_v47, 5 }
 0x191   : > { %v2028_v52 = vmul.f32 %v11836_v49, %v11865_v56  ;;  %v2029_v36 = vmul.f32 %v11840_v22, %v11860_v8  ;;  %v825_v11 = vsel %vm816_vm5, %v11674_v1, %v793_v30  ;;  %v11888_v1 = vperm.slane %v11885_v41, 5 }
 0x192   : > { %v838_v9 = vmul.f32 %v11850_v4, %v825_v11  ;;  %16556 = vst [vmem:[#allocation58_spill] sm:$0xff] %v11876_v55  ;;  %v2024_v45 = vmul.f32 %v11836_v49, %v825_v11 }
 0x193   : > { %v2042_v39 = vpack.c.bf16 %v2029_v36, %v2028_v52  ;;  %16557 = vst [vmem:[#allocation59_spill] sm:$0xff] %v11881_v54  ;;  %v832_v52 = vsel %vm816_vm5, %v815_v43, %v11732_v3 }
 0x194   : > { %3656 = vmatpush.bf16.msrb.mxu0 %v8549_v61  ;;  %v853_v58 = vpack.c.bf16 %v838_v9, %v837_v17  ;;  %16558 = vst [vmem:[#allocation60_spill] sm:$0xff] %v11888_v1  ;;  %v10366_v61 = vld [vmem:[#allocation6 + $0x50] sm:$0xff]  ;;  %v2027_v9 = vmul.f32 %v11876_v55, %v829_v24  ;;  %v849_v5 = vmul.f32 %v11845_v63, %v832_v52 }
 0x195   : > { %1045 = vrot.lane.b32.xlu2 %v11713_v35, %s10635_s26  ;;  %v11890_v7 = vperm.slane %v10366_v61, 7  ;;  %2050 = vst [vmem:[#allocation2 + $0x5d0] sm:$0xff] %v2042_v39  ;;  %1043 = vrot.lane.b32.xlu1 %v11724_v6, %s10635_s26 }
 0x196   : > { %861 = vst [vmem:[#allocation2 + $0x140] sm:$0xff] %v853_v58  ;;  %1041 = vrot.lane.b32.xlu0 %v11649_v29, %s10635_s26 }
 0x197   : > { %16559 = vst [vmem:[#allocation61_spill] sm:$0xff] %v11890_v7  ;;  %v11899_v36 = vpop.permute.xlu2 %873  ;;  %v801_v17 = vpop.permute.xlu1 %800 }
 0x198   : > { %v817_v39 = vsel %vm816_vm5, %v801_v17, %v809_v42  ;;  %v821_v61 = vsel %vm816_vm5, %v793_v30, %v801_v17  ;;  %v799_v27 = vpop.permute.xlu0 %798 }
 0x199   : > { %v839_v21 = vmul.f32 %v11881_v54, %v821_v61  ;;  %v840_v58 = vmul.f32 %v11888_v1, %v817_v39  ;;  %v2025_v20 = vmul.f32 %v11840_v22, %v821_v61  ;;  %v2026_v14 = vmul.f32 %v11890_v7, %v817_v39 }
 0x19a   : > { %v828_v24 = vsel %vm816_vm5, %v11732_v3, %v799_v27  ;;  %v827_v39 = vsel %vm816_vm5, %v11828_v28, %v11769_v51 }
 0x19b   : > { %v854_v11 = vpack.c.bf16 %v840_v58, %v839_v21  ;;  %v2040_v42 = vpack.c.bf16 %v2025_v20, %v2024_v45  ;;  %v2041_v40 = vpack.c.bf16 %v2027_v9, %v2026_v14  ;;  %v850_v30 = vmul.f32 %v11850_v4, %v828_v24 }
 0x19c   : > { %v2036_v21 = vmul.f32 %v11836_v49, %v828_v24 }
 0x19d   : > { %862 = vst [vmem:[#allocation2 + $0x148] sm:$0xff] %v854_v11  ;;  %v859_v17 = vpack.c.bf16 %v850_v30, %v849_v5  ;;  %1051 = vrot.lane.b32.xlu2 %v11755_v59, %s10635_s26  ;;  %1049 = vrot.lane.b32.xlu1 %v11760_v10, %s10635_s26  ;;  %v2039_v5 = vmul.f32 %v11876_v55, %v832_v52 }
 0x19e   : > { %2048 = vst [vmem:[#allocation2 + $0x5c0] sm:$0xff] %v2040_v42  ;;  %1047 = vrot.lane.b32.xlu0 %v11708_v57, %s10635_s26 }
 0x19f   : > { %2049 = vst [vmem:[#allocation2 + $0x5c8] sm:$0xff] %v2041_v40  ;;  %v11926_v20 = vpop.permute.xlu2 %879  ;;  %v807_v14 = vpop.permute.xlu1 %806 }
 0x1a0   : > { %867 = vst [vmem:[#allocation2 + $0x170] sm:$0xff] %v859_v17  ;;  %v820_v3 = vsel %vm816_vm5, %v807_v14, %v815_v43  ;;  %v824_v9 = vsel %vm816_vm5, %v799_v27, %v807_v14  ;;  %v805_v45 = vpop.permute.xlu0 %804  ;;  %v2032_v43 = vmul.f32 %v11836_v49, %v827_v39 }
 0x1a1   : > { %v851_v40 = vmul.f32 %v11881_v54, %v824_v9  ;;  %v852_v61 = vmul.f32 %v11888_v1, %v820_v3  ;;  %v2037_v58 = vmul.f32 %v11840_v22, %v824_v9  ;;  %v2038_v11 = vmul.f32 %v11890_v7, %v820_v3 }
 0x1a2   : > { %v823_v52 = vsel %vm816_vm5, %v11769_v51, %v805_v45 }
 0x1a3   : > { %v860_v24 = vpack.c.bf16 %v852_v61, %v851_v40  ;;  %v2046_v42 = vpack.c.bf16 %v2037_v58, %v2036_v21  ;;  %v2047_v30 = vpack.c.bf16 %v2039_v5, %v2038_v11  ;;  %v2033_v27 = vmul.f32 %v11840_v22, %v823_v52 }
 0x1a4   : > { %v846_v5 = vmul.f32 %v11850_v4, %v827_v39  ;;  %v847_v21 = vmul.f32 %v11881_v54, %v823_v52  ;;  %v842_v39 = vmul.f32 %v11850_v4, %v11865_v56 }
 0x1a5   : > { %868 = vst [vmem:[#allocation2 + $0x178] sm:$0xff] %v860_v24  ;;  %1057 = vrot.lane.b32.xlu2 %v11606_v2, %s10635_s26  ;;  %v2044_v17 = vpack.c.bf16 %v2033_v27, %v2032_v43  ;;  %1055 = vrot.lane.b32.xlu1 %v11791_v33, %s10635_s26  ;;  %v843_v27 = vmul.f32 %v11881_v54, %v11860_v8 }
 0x1a6   : > { %2054 = vst [vmem:[#allocation2 + $0x5f0] sm:$0xff] %v2046_v42  ;;  %1053 = vrot.lane.b32.xlu0 %v11750_v37, %s10635_s26 }
 0x1a7   : > { %2055 = vst [vmem:[#allocation2 + $0x5f8] sm:$0xff] %v2047_v30  ;;  %v11949_v51 = vpop.permute.xlu2 %885  ;;  %v813_v14 = vpop.permute.xlu1 %812 }
 0x1a8   : > { %2052 = vst [vmem:[#allocation2 + $0x5e0] sm:$0xff] %v2044_v17  ;;  %v819_v3 = vsel %vm816_vm5, %v805_v45, %v813_v14  ;;  %v831_v9 = vsel %vm816_vm5, %v813_v14, %v11828_v28  ;;  %v811_v40 = vpop.permute.xlu0 %810 }
 0x1a9   : > { %v845_v61 = vmul.f32 %v11845_v63, %v831_v9  ;;  %v848_v58 = vmul.f32 %v11888_v1, %v819_v3  ;;  %v2034_v11 = vmul.f32 %v11890_v7, %v819_v3  ;;  %v2035_v24 = vmul.f32 %v11876_v55, %v831_v9  ;;  %v11988_v9 = vld [vmem:[#allocation6 + $0x60] sm:$0x7] }
 0x1aa   : > { %v818_v45 = vsel %vm816_vm5, %v11796_v0, %v811_v40  ;;  %v830_v28 = vsel %vm816_vm5, %v811_v40, %v11830_v50  ;;  %v11990_v40 = vld [vmem:[#allocation6 + $0x68] sm:$0x7] }
 0x1ab   : > { %v857_v52 = vpack.c.bf16 %v846_v5, %v845_v61  ;;  %v858_v42 = vpack.c.bf16 %v848_v58, %v847_v21  ;;  %v2045_v30 = vpack.c.bf16 %v2035_v24, %v2034_v11  ;;  %v841_v43 = vmul.f32 %v11845_v63, %v830_v28 }
 0x1ac   : > { %v844_v17 = vmul.f32 %v11888_v1, %v818_v45  ;;  %v2030_v56 = vmul.f32 %v11890_v7, %v818_v45  ;;  %v2031_v14 = vmul.f32 %v11876_v55, %v830_v28  ;;  %v11996_v61 = vperm.slane %v11988_v9, 0  ;;  %v12057_v7 = vld [vmem:[#allocation6 + $0x70] sm:$0x7] }
 0x1ad   : > { %865 = vst [vmem:[#allocation2 + $0x160] sm:$0xff] %v857_v52  ;;  %v855_v0 = vpack.c.bf16 %v842_v39, %v841_v43  ;;  %1063 = vrot.lane.b32.xlu2 %v11639_v15, %s10635_s26  ;;  %1061 = vrot.lane.b32.xlu1 %v11596_v34, %s10635_s26  ;;  %v12001_v58 = vperm.slane %v11990_v40, 0  ;;  %v12026_v43 = vperm.slane %v11842_v13, 6  ;;  %v12067_v63 = vperm.slane %v11885_v41, 6 }
 0x1ae   : > { %866 = vst [vmem:[#allocation2 + $0x168] sm:$0xff] %v858_v42  ;;  %v856_v50 = vpack.c.bf16 %v844_v17, %v843_v27  ;;  %v2043_v5 = vpack.c.bf16 %v2031_v14, %v2030_v56  ;;  %1059 = vrot.lane.b32.xlu0 %v11601_v44, %s10635_s26 }
 0x1af   : > { %2053 = vst [vmem:[#allocation2 + $0x5e8] sm:$0xff] %v2045_v30  ;;  %v11982_v8 = vpop.permute.xlu2 %891  ;;  %v11984_v21 = vpop.permute.xlu1 %871 }
 0x1b0   : > { %863 = vst [vmem:[#allocation2 + $0x150] sm:$0xff] %v855_v0  ;;  %v11986_v3 = vpop.permute.xlu0 %869 }
 0x1b1   : > { %864 = vst [vmem:[#allocation2 + $0x158] sm:$0xff] %v856_v50 }
 0x1b2   : > { %2051 = vst [vmem:[#allocation2 + $0x5d8] sm:$0xff] %v2043_v5  ;;  %v12046_v5 = vperm.slane %v11847_v48, 6 }
 0x1b3   : > { %16560 = vst [vmem:[#allocation62_spill] sm:$0xff] %v11996_v61 }
 0x1b4   : > { %16561 = vst [vmem:[#allocation63_spill] sm:$0xff] %v12001_v58 }
 0x1b5   : > { %1069 = vrot.lane.b32.xlu2 %v11662_v18, %s10635_s26  ;;  %1067 = vrot.lane.b32.xlu1 %v11629_v12, %s10635_s26  ;;  %16562 = vst [vmem:[#allocation64_spill] sm:$0xff] %v12046_v5 }
 0x1b6   : > { %1065 = vrot.lane.b32.xlu0 %v11634_v16, %s10635_s26  ;;  %16564 = vst [vmem:[#allocation66_spill] sm:$0xff] %v12067_v63 }
 0x1b7   : > { %v898_v11 = vpop.permute.xlu2 %897  ;;  %v878_v24 = vpop.permute.xlu1 %877 }
 0x1b8   : > { %v12008_v39 = vsel %vm901_vm6, %v878_v24, %v11949_v51  ;;  %v12013_v45 = vsel %vm901_vm6, %v11986_v3, %v878_v24  ;;  %v12015_v28 = vpop.permute.xlu0 %875  ;;  %v916_v56 = vsel %vm901_vm6, %v898_v11, %v11899_v36  ;;  %v12048_v24 = vld [vmem:[#allocation6 + $0x78] sm:$0x7] }
 0x1b9   : > { %v2060_v52 = vmul.f32 %v11996_v61, %v12013_v45  ;;  %v2061_v42 = vmul.f32 %v12001_v58, %v12008_v39  ;;  %v12062_v55 = vperm.slane %v12048_v24, 0 }
 0x1bb   : > { %v2076_v30 = vpack.c.bf16 %v2061_v42, %v2060_v52  ;;  %16563 = vst [vmem:[#allocation65_spill] sm:$0xff] %v12062_v55 }
 0x1bd   : > { %1128 = vrot.lane.b32.xlu2 %v11724_v6, %s16380_s29  ;;  %2084 = vst [vmem:[#allocation2 + $0x600] sm:$0xff] %v2076_v30  ;;  %1126 = vrot.lane.b32.xlu1 %v11649_v29, %s16380_s29 }
 0x1be   : > { %1124 = vrot.lane.b32.xlu0 %v11654_v31, %s16380_s29 }
 0x1bf   : > { %v12030_v27 = vpop.permute.xlu2 %956  ;;  %v884_v17 = vpop.permute.xlu1 %883 }
 0x1c0   : > { %v12038_v14 = vsel %vm901_vm6, %v884_v17, %v11982_v8  ;;  %v12043_v0 = vsel %vm901_vm6, %v12015_v28, %v884_v17  ;;  %v882_v50 = vpop.permute.xlu0 %881  ;;  %v930_v17 = vmul.f32 %v12026_v43, %v916_v56 }
 0x1c1   : > { %v2072_v52 = vmul.f32 %v11996_v61, %v12043_v0  ;;  %v2073_v42 = vmul.f32 %v12001_v58, %v12038_v14  ;;  %v912_v30 = vsel %vm901_vm6, %v11899_v36, %v882_v50  ;;  %v12070_v36 = vperm.slane %v12057_v7, 0 }
 0x1c2   : > { %v931_v54 = vmul.f32 %v12046_v5, %v912_v30  ;;  %v2068_v22 = vmul.f32 %v11996_v61, %v912_v30 }
 0x1c3   : > { %v2082_v1 = vpack.c.bf16 %v2073_v42, %v2072_v52  ;;  %16565 = vst [vmem:[#allocation67_spill] sm:$0xff] %v12070_v36  ;;  %v911_v52 = vsel %vm901_vm6, %v11984_v21, %v11926_v20 }
 0x1c4   : > { %v942_v4 = vpack.c.bf16 %v931_v54, %v930_v17  ;;  %v2071_v17 = vmul.f32 %v12062_v55, %v916_v56 }
 0x1c5   : > { %2090 = vst [vmem:[#allocation2 + $0x630] sm:$0xff] %v2082_v1  ;;  %1134 = vrot.lane.b32.xlu2 %v11760_v10, %s16380_s29  ;;  %1132 = vrot.lane.b32.xlu1 %v11708_v57, %s16380_s29  ;;  %v12079_v1 = vperm.slane %v11878_v47, 6 }
 0x1c6   : > { %950 = vst [vmem:[#allocation2 + $0x1a0] sm:$0xff] %v942_v4  ;;  %1130 = vrot.lane.b32.xlu0 %v11713_v35, %s16380_s29 }
 0x1c7   : > { %16566 = vst [vmem:[#allocation68_spill] sm:$0xff] %v12079_v1  ;;  %v12083_v54 = vpop.permute.xlu2 %962  ;;  %v890_v42 = vpop.permute.xlu1 %889 }
 0x1c8   : > { %v904_v49 = vsel %vm901_vm6, %v890_v42, %v898_v11  ;;  %v908_v32 = vsel %vm901_vm6, %v882_v50, %v890_v42  ;;  %v888_v26 = vpop.permute.xlu0 %887  ;;  %v2064_v11 = vmul.f32 %v11996_v61, %v911_v52 }
 0x1c9   : > { %v932_v38 = vmul.f32 %v12079_v1, %v908_v32  ;;  %v933_v4 = vmul.f32 %v12067_v63, %v904_v49  ;;  %v2069_v62 = vmul.f32 %v12001_v58, %v908_v32  ;;  %v2070_v53 = vmul.f32 %v12070_v36, %v904_v49 }
 0x1ca   : > { %v907_v56 = vsel %vm901_vm6, %v11926_v20, %v888_v26 }
 0x1cb   : > { %v943_v30 = vpack.c.bf16 %v933_v4, %v932_v38  ;;  %v2080_v60 = vpack.c.bf16 %v2069_v62, %v2068_v22  ;;  %v2081_v46 = vpack.c.bf16 %v2071_v17, %v2070_v53  ;;  %v2065_v50 = vmul.f32 %v12001_v58, %v907_v56 }
 0x1cc   : > { %v927_v62 = vmul.f32 %v12046_v5, %v911_v52  ;;  %v928_v32 = vmul.f32 %v12079_v1, %v907_v56  ;;  %v923_v52 = vmul.f32 %v12046_v5, %v12013_v45 }
 0x1cd   : > { %951 = vst [vmem:[#allocation2 + $0x1a8] sm:$0xff] %v943_v30  ;;  %1140 = vrot.lane.b32.xlu2 %v11791_v33, %s16380_s29  ;;  %v2078_v42 = vpack.c.bf16 %v2065_v50, %v2064_v11  ;;  %1138 = vrot.lane.b32.xlu1 %v11750_v37, %s16380_s29 }
 0x1ce   : > { %2088 = vst [vmem:[#allocation2 + $0x620] sm:$0xff] %v2080_v60  ;;  %1136 = vrot.lane.b32.xlu0 %v11755_v59, %s16380_s29 }
 0x1cf   : > { %2089 = vst [vmem:[#allocation2 + $0x628] sm:$0xff] %v2081_v46  ;;  %v12106_v38 = vpop.permute.xlu2 %968  ;;  %v896_v53 = vpop.permute.xlu1 %895 }
 0x1d0   : > { %2086 = vst [vmem:[#allocation2 + $0x610] sm:$0xff] %v2078_v42  ;;  %v903_v49 = vsel %vm901_vm6, %v888_v26, %v896_v53  ;;  %v915_v60 = vsel %vm901_vm6, %v896_v53, %v11984_v21  ;;  %v894_v22 = vpop.permute.xlu0 %893  ;;  %v924_v42 = vmul.f32 %v12079_v1, %v12008_v39 }
 0x1d1   : > { %v926_v46 = vmul.f32 %v12026_v43, %v915_v60  ;;  %v929_v20 = vmul.f32 %v12067_v63, %v903_v49  ;;  %v2066_v17 = vmul.f32 %v12070_v36, %v903_v49  ;;  %v2067_v4 = vmul.f32 %v12062_v55, %v915_v60 }
 0x1d2   : > { %v902_v26 = vsel %vm901_vm6, %v11949_v51, %v894_v22  ;;  %v914_v21 = vsel %vm901_vm6, %v894_v22, %v11986_v3  ;;  %v935_v22 = vmul.f32 %v12046_v5, %v12043_v0 }
 0x1d3   : > { %v940_v56 = vpack.c.bf16 %v927_v62, %v926_v46  ;;  %v941_v30 = vpack.c.bf16 %v929_v20, %v928_v32  ;;  %v2079_v11 = vpack.c.bf16 %v2067_v4, %v2066_v17  ;;  %v922_v50 = vmul.f32 %v12026_v43, %v914_v21 }
 0x1d4   : > { %v925_v53 = vmul.f32 %v12067_v63, %v902_v26  ;;  %v2062_v45 = vmul.f32 %v12070_v36, %v902_v26  ;;  %v2063_v49 = vmul.f32 %v12062_v55, %v914_v21 }
 0x1d5   : > { %948 = vst [vmem:[#allocation2 + $0x190] sm:$0xff] %v940_v56  ;;  %v938_v51 = vpack.c.bf16 %v923_v52, %v922_v50  ;;  %1146 = vrot.lane.b32.xlu2 %v11596_v34, %s16380_s29  ;;  %1144 = vrot.lane.b32.xlu1 %v11601_v44, %s16380_s29  ;;  %v936_v34 = vmul.f32 %v12079_v1, %v12038_v14 }
 0x1d6   : > { %949 = vst [vmem:[#allocation2 + $0x198] sm:$0xff] %v941_v30  ;;  %v939_v3 = vpack.c.bf16 %v925_v53, %v924_v42  ;;  %v2077_v62 = vpack.c.bf16 %v2063_v49, %v2062_v45  ;;  %1142 = vrot.lane.b32.xlu0 %v11606_v2, %s16380_s29 }
 0x1d7   : > { %2087 = vst [vmem:[#allocation2 + $0x618] sm:$0xff] %v2079_v11  ;;  %v12139_v39 = vpop.permute.xlu2 %974  ;;  %v12141_v32 = vpop.permute.xlu1 %954 }
 0x1d8   : > { %946 = vst [vmem:[#allocation2 + $0x180] sm:$0xff] %v938_v51  ;;  %v900_v60 = vpop.permute.xlu0 %899  ;;  %v12211_v51 = vperm.slane %v12048_v24, 1 }
 0x1d9   : > { %947 = vst [vmem:[#allocation2 + $0x188] sm:$0xff] %v939_v3  ;;  %v905_v44 = vsel %vm901_vm6, %v11982_v8, %v900_v60  ;;  %v917_v2 = vsel %vm901_vm6, %v900_v60, %v12015_v28 }
 0x1da   : > { %2085 = vst [vmem:[#allocation2 + $0x608] sm:$0xff] %v2077_v62  ;;  %v934_v46 = vmul.f32 %v12026_v43, %v917_v2  ;;  %v937_v20 = vmul.f32 %v12067_v63, %v905_v44  ;;  %v2074_v17 = vmul.f32 %v12070_v36, %v905_v44  ;;  %v2075_v0 = vmul.f32 %v12062_v55, %v917_v2 }
 0x1db   : > { %16571 = vst [vmem:[#allocation73_spill] sm:$0xff] %v12211_v51  ;;  %v12219_v62 = vperm.slane %v11885_v41, 7 }
 0x1dc   : > { %v944_v4 = vpack.c.bf16 %v935_v22, %v934_v46  ;;  %v945_v14 = vpack.c.bf16 %v937_v20, %v936_v34  ;;  %v2083_v52 = vpack.c.bf16 %v2075_v0, %v2074_v17 }
 0x1dd   : > { %1152 = vrot.lane.b32.xlu2 %v11629_v12, %s16380_s29  ;;  %1150 = vrot.lane.b32.xlu1 %v11634_v16, %s16380_s29  ;;  %v12171_v12 = vperm.slane %v11990_v40, 1  ;;  %v12176_v16 = vperm.slane %v11988_v9, 1  ;;  %16573 = vst [vmem:[#allocation75_spill] sm:$0xff] %v12219_v62 }
 0x1de   : > { %952 = vst [vmem:[#allocation2 + $0x1b0] sm:$0xff] %v944_v4  ;;  %1148 = vrot.lane.b32.xlu0 %v11639_v15, %s16380_s29  ;;  %v12179_v15 = vperm.slane %v11842_v13, 7 }
 0x1df   : > { %953 = vst [vmem:[#allocation2 + $0x1b8] sm:$0xff] %v945_v14  ;;  %v981_v8 = vpop.permute.xlu2 %980  ;;  %v12163_v28 = vpop.permute.xlu1 %960 }
 0x1e0   : > { %2091 = vst [vmem:[#allocation2 + $0x638] sm:$0xff] %v2083_v52  ;;  %v12165_v26 = vpop.permute.xlu0 %958 }
 0x1e1   : > { %16567 = vst [vmem:[#allocation69_spill] sm:$0xff] %v12171_v12 }
 0x1e2   : > { %16568 = vst [vmem:[#allocation70_spill] sm:$0xff] %v12176_v16 }
 0x1e3   : > { %16569 = vst [vmem:[#allocation71_spill] sm:$0xff] %v12179_v15 }
 0x1e5   : > { %1211 = vrot.lane.b32.xlu2 %v11649_v29, %s10637_s11  ;;  %1209 = vrot.lane.b32.xlu1 %v11654_v31, %s10637_s11  ;;  %v1000_v29 = vsel %vm986_vm7, %v981_v8, %v12030_v27 }
 0x1e6   : > { %1154 = vrot.lane.b32.xlu0 %v11662_v18, %s16380_s29  ;;  %v12199_v18 = vperm.slane %v11847_v48, 7  ;;  %v1011_v53 = vmul.f32 %v12179_v15, %v1000_v29  ;;  %v12214_v48 = vperm.slane %v11878_v47, 7  ;;  %v995_v47 = vsel %vm986_vm7, %v12141_v32, %v12083_v54  ;;  %s16447_s29 = smov 120  }
 0x1e7   : > { %v12183_v21 = vpop.permute.xlu2 %1039  ;;  %v967_v56 = vpop.permute.xlu1 %966  ;;  %v2103_v41 = vmul.f32 %v12211_v51, %v1000_v29  ;;  %v2096_v52 = vmul.f32 %v12176_v16, %v995_v47 }
 0x1e8   : > { %v12191_v31 = vsel %vm986_vm7, %v967_v56, %v12139_v39  ;;  %v12196_v13 = vsel %vm986_vm7, %v12165_v26, %v967_v56  ;;  %v965_v30 = vpop.permute.xlu0 %964  ;;  %16570 = vst [vmem:[#allocation72_spill] sm:$0xff] %v12199_v18  ;;  %v1008_v29 = vmul.f32 %v12199_v18, %v995_v47 }
 0x1e9   : > { %v2104_v11 = vmul.f32 %v12176_v16, %v12196_v13  ;;  %v2105_v50 = vmul.f32 %v12171_v12, %v12191_v31  ;;  %v996_v42 = vsel %vm986_vm7, %v12030_v27, %v965_v30  ;;  %16572 = vst [vmem:[#allocation74_spill] sm:$0xff] %v12214_v48  ;;  %v12222_v27 = vperm.slane %v12057_v7, 1 }
 0x1ea   : > { %v1012_v49 = vmul.f32 %v12199_v18, %v996_v42  ;;  %v2100_v22 = vmul.f32 %v12176_v16, %v996_v42 }
 0x1eb   : > { %v2116_v45 = vpack.c.bf16 %v2105_v50, %v2104_v11  ;;  %16574 = vst [vmem:[#allocation76_spill] sm:$0xff] %v12222_v27 }
 0x1ec   : > { %v1025_v3 = vpack.c.bf16 %v1012_v49, %v1011_v53 }
 0x1ed   : > { %2124 = vst [vmem:[#allocation2 + $0x660] sm:$0xff] %v2116_v45  ;;  %1217 = vrot.lane.b32.xlu2 %v11708_v57, %s10637_s11  ;;  %1215 = vrot.lane.b32.xlu1 %v11713_v35, %s10637_s11 }
 0x1ee   : > { %1033 = vst [vmem:[#allocation2 + $0x1d0] sm:$0xff] %v1025_v3  ;;  %1213 = vrot.lane.b32.xlu0 %v11724_v6, %s10637_s11 }
 0x1ef   : > { %v12232_v60 = vpop.permute.xlu2 %1045  ;;  %v973_v57 = vpop.permute.xlu1 %972 }
 0x1f0   : > { %v988_v34 = vsel %vm986_vm7, %v973_v57, %v981_v8  ;;  %v992_v35 = vsel %vm986_vm7, %v965_v30, %v973_v57  ;;  %v971_v44 = vpop.permute.xlu0 %970  ;;  %v998_v30 = vsel %vm986_vm7, %v12163_v28, %v12106_v38 }
 0x1f1   : > { %v1013_v2 = vmul.f32 %v12214_v48, %v992_v35  ;;  %v1014_v46 = vmul.f32 %v12219_v62, %v988_v34  ;;  %v2101_v6 = vmul.f32 %v12171_v12, %v992_v35  ;;  %v2102_v20 = vmul.f32 %v12222_v27, %v988_v34  ;;  %v12278_v35 = vld [vmem:[%s10805_s19 + $0x50] sm:$0xff] }
 0x1f2   : > { %v991_v17 = vsel %vm986_vm7, %v12083_v54, %v971_v44  ;;  %v2108_v47 = vmul.f32 %v12176_v16, %v998_v30 }
 0x1f3   : > { %v1026_v0 = vpack.c.bf16 %v1014_v46, %v1013_v2  ;;  %v2114_v4 = vpack.c.bf16 %v2101_v6, %v2100_v22  ;;  %v2115_v14 = vpack.c.bf16 %v2103_v41, %v2102_v20  ;;  %v2097_v8 = vmul.f32 %v12171_v12, %v991_v17 }
 0x1f4   : > { %v1009_v50 = vmul.f32 %v12214_v48, %v991_v17  ;;  %v1020_v46 = vmul.f32 %v12199_v18, %v998_v30 }
 0x1f5   : > { %1034 = vst [vmem:[#allocation2 + $0x1d8] sm:$0xff] %v1026_v0  ;;  %1223 = vrot.lane.b32.xlu2 %v11750_v37, %s10637_s11  ;;  %v2112_v56 = vpack.c.bf16 %v2097_v8, %v2096_v52  ;;  %1221 = vrot.lane.b32.xlu1 %v11755_v59, %s10637_s11  ;;  %v1016_v8 = vmul.f32 %v12199_v18, %v12196_v13  ;;  %v8164_v18 = vld [vmem:[#allocation2 + $0x180] sm:$0xf] }
 0x1f6   : > { %2122 = vst [vmem:[#allocation2 + $0x650] sm:$0xff] %v2114_v4  ;;  %1219 = vrot.lane.b32.xlu0 %v11760_v10, %s10637_s11 }
 0x1f7   : > { %2123 = vst [vmem:[#allocation2 + $0x658] sm:$0xff] %v2115_v14  ;;  %v12255_v54 = vpop.permute.xlu2 %1051  ;;  %v979_v37 = vpop.permute.xlu1 %978 }
 0x1f8   : > { %2120 = vst [vmem:[#allocation2 + $0x640] sm:$0xff] %v2112_v56  ;;  %v977_v11 = vpop.permute.xlu0 %976  ;;  %v987_v59 = vsel %vm986_vm7, %v971_v44, %v979_v37  ;;  %v999_v10 = vsel %vm986_vm7, %v979_v37, %v12141_v32 }
 0x1f9   : > { %v994_v42 = vsel %vm986_vm7, %v12106_v38, %v977_v11  ;;  %v1007_v53 = vmul.f32 %v12179_v15, %v999_v10  ;;  %v1010_v45 = vmul.f32 %v12219_v62, %v987_v59  ;;  %v2098_v49 = vmul.f32 %v12222_v27, %v987_v59  ;;  %v12283_v38 = vld [vmem:[%s10805_s19 + $0x30] sm:$0xff] }
 0x1fa   : > { %v2099_v3 = vmul.f32 %v12211_v51, %v999_v10  ;;  %v2109_v57 = vmul.f32 %v12171_v12, %v994_v42  ;;  %v1021_v6 = vmul.f32 %v12214_v48, %v994_v42  ;;  %v12322_v42 = vld [vmem:[%s10805_s19 + $0x18] sm:$0xff] }
 0x1fb   : > { %v1023_v41 = vpack.c.bf16 %v1008_v29, %v1007_v53  ;;  %v1024_v22 = vpack.c.bf16 %v1010_v45, %v1009_v50  ;;  %v1017_v50 = vmul.f32 %v12214_v48, %v12191_v31  ;;  %v12327_v45 = vld [vmem:[%s10805_s19 + $0x70] sm:$0xff] }
 0x1fc   : > { %v2113_v34 = vpack.c.bf16 %v2099_v3, %v2098_v49  ;;  %v2118_v32 = vpack.c.bf16 %v2109_v57, %v2108_v47  ;;  %v12337_v57 = vld [vmem:[#allocation6 + $0x20] sm:$0xff] }
 0x1fd   : > { %1229 = vrot.lane.b32.xlu2 %v12278_v35, %s10637_s11  ;;  %1031 = vst [vmem:[#allocation2 + $0x1c0] sm:$0xff] %v1023_v41  ;;  %1227 = vrot.lane.b32.xlu1 %v12283_v38, %s10637_s11  ;;  %v12339_v41 = vld [vmem:[#allocation6 + $0x28] sm:$0xff] }
 0x1fe   : > { %1032 = vst [vmem:[#allocation2 + $0x1c8] sm:$0xff] %v1024_v22  ;;  %1225 = vrot.lane.b32.xlu0 %v11791_v33, %s10637_s11  ;;  %v12342_v22 = vld [vmem:[%s10805_s19] sm:$0xff] }
 0x1ff   : > { %v12289_v44 = vpop.permute.xlu2 %1057  ;;  %2121 = vst [vmem:[#allocation2 + $0x648] sm:$0xff] %v2113_v34  ;;  %v985_v2 = vpop.permute.xlu1 %984  ;;  %v12348_v34 = vperm.slane %v11988_v9, 2  ;;  %v12369_v9 = vperm.slane %v12339_v41, 0 }
 0x200   : > { %2126 = vst [vmem:[#allocation2 + $0x670] sm:$0xff] %v2118_v32  ;;  %v990_v20 = vsel %vm986_vm7, %v977_v11, %v985_v2  ;;  %v1002_v17 = vsel %vm986_vm7, %v985_v2, %v12163_v28  ;;  %v983_v0 = vpop.permute.xlu0 %982  ;;  %v12351_v32 = vld [vmem:[%s10805_s19 + $0x78] sm:$0xff]  ;;  %v12356_v2 = vperm.slane %v11990_v40, 2 }
 0x201   : > { %v1019_v33 = vmul.f32 %v12179_v15, %v1002_v17  ;;  %v1022_v4 = vmul.f32 %v12219_v62, %v990_v20  ;;  %v2110_v14 = vmul.f32 %v12222_v27, %v990_v20  ;;  %v2111_v52 = vmul.f32 %v12211_v51, %v1002_v17  ;;  %16575 = vst [vmem:[#allocation77_spill] sm:$0xff] %v12348_v34 }
 0x202   : > { %v989_v56 = vsel %vm986_vm7, %v12139_v39, %v983_v0  ;;  %v1001_v28 = vsel %vm986_vm7, %v983_v0, %v12165_v26  ;;  %v12317_v39 = vld [vmem:[%s10805_s19 + $0x38] sm:$0xff]  ;;  %16576 = vst [vmem:[#allocation78_spill] sm:$0xff] %v12356_v2  ;;  %v12366_v20 = vperm.slane %v12337_v57, 0 }
 0x203   : > { %v1029_v29 = vpack.c.bf16 %v1020_v46, %v1019_v33  ;;  %v1030_v30 = vpack.c.bf16 %v1022_v4, %v1021_v6  ;;  %v2119_v37 = vpack.c.bf16 %v2111_v52, %v2110_v14  ;;  %v1015_v11 = vmul.f32 %v12179_v15, %v1001_v28  ;;  %v12359_v46 = vld [vmem:[%s10805_s19 + $0x58] sm:$0xff]  ;;  %16578 = vst [vmem:[#allocation80_spill] sm:$0xff] %v12369_v9  ;;  %v9840_v15 = vld [vmem:[#allocation2 + $0x18c] sm:$0xf0] }
 0x204   : > { %v1018_v59 = vmul.f32 %v12219_v62, %v989_v56  ;;  %v2106_v13 = vmul.f32 %v12222_v27, %v989_v56  ;;  %v2107_v10 = vmul.f32 %v12211_v51, %v1001_v28  ;;  %16577 = vst [vmem:[#allocation79_spill] sm:$0xff] %v12366_v20  ;;  %v12389_v28 = vld [vmem:[#allocation6 + $0x30] sm:$0xff] }
 0x205   : > { %1235 = vrot.lane.b32.xlu2 %v12317_v39, %s10637_s11  ;;  %1037 = vst [vmem:[#allocation2 + $0x1f0] sm:$0xff] %v1029_v29  ;;  %v1027_v26 = vpack.c.bf16 %v1016_v8, %v1015_v11  ;;  %1233 = vrot.lane.b32.xlu1 %v12322_v42, %s10637_s11 }
 0x206   : > { %1038 = vst [vmem:[#allocation2 + $0x1f8] sm:$0xff] %v1030_v30  ;;  %v1028_v31 = vpack.c.bf16 %v1018_v59, %v1017_v50  ;;  %v2117_v53 = vpack.c.bf16 %v2107_v10, %v2106_v13  ;;  %1231 = vrot.lane.b32.xlu0 %v12327_v45, %s10637_s11  ;;  %v8196_v13 = vld [vmem:[#allocation2 + $0x1c0] sm:$0xf]  ;;  %v12399_v10 = vperm.slane %v12048_v24, 2 }
 0x207   : > { %v12331_v49 = vpop.permute.xlu2 %1063  ;;  %2127 = vst [vmem:[#allocation2 + $0x678] sm:$0xff] %v2119_v37  ;;  %v12333_v3 = vpop.permute.xlu1 %1043  ;;  %v12394_v37 = vld [vmem:[#allocation6 + $0x38] sm:$0xff] }
 0x208   : > { %1035 = vst [vmem:[#allocation2 + $0x1e0] sm:$0xff] %v1027_v26  ;;  %v12335_v47 = vpop.permute.xlu0 %1041  ;;  %v1084_v40 = vsel %vm1071_vm8, %v12331_v49, %v12183_v21  ;;  %v12402_v26 = vld [vmem:[%s10805_s19 + $0x60] sm:$0xff]  ;;  %v12415_v24 = vperm.slane %v12394_v37, 0 }
 0x209   : > { %1036 = vst [vmem:[#allocation2 + $0x1e8] sm:$0xff] %v1028_v31  ;;  %v1092_v11 = vmul.f32 %v12366_v20, %v1084_v40 }
 0x20a   : > { %2125 = vst [vmem:[#allocation2 + $0x668] sm:$0xff] %v2117_v53  ;;  %v9848_v53 = vld [vmem:[#allocation2 + $0x1cc] sm:$0xf0] }
 0x20b   : > { %16579 = vst [vmem:[#allocation81_spill] sm:$0xff] %v12399_v10 }
 0x20c   : > { %v9852_v33 = vld [vmem:[#allocation2 + $0x1ec] sm:$0xf0]  ;;  %16581 = vst [vmem:[#allocation83_spill] sm:$0xff] %v12415_v24 }
 0x20d   : > { %1294 = vrot.lane.b32.xlu2 %v12342_v22, %s10638_s7  ;;  %1239 = vrot.lane.b32.xlu1 %v12351_v32, %s10637_s11 }
 0x20e   : > { %1237 = vrot.lane.b32.xlu0 %v12359_v46, %s10637_s11 }
 0x20f   : > { %v12363_v6 = vpop.permute.xlu2 %1069  ;;  %v1050_v17 = vpop.permute.xlu1 %1049  ;;  %v8212_v0 = vld [vmem:[#allocation2 + $0x1e0] sm:$0xf] }
 0x210   : > { %v12378_v4 = vsel %vm1071_vm8, %v1050_v17, %v12289_v44  ;;  %v12383_v14 = vsel %vm1071_vm8, %v12335_v47, %v1050_v17  ;;  %v1048_v52 = vpop.permute.xlu0 %1047  ;;  %v8213_v29 = vor.u32 %v9852_v33, %v8212_v0  ;;  %v12410_v17 = vld [vmem:[%s10805_s19 + $0x40] sm:$0xff]  ;;  %v12418_v0 = vperm.slane %v12057_v7, 2 }
 0x211   : > { %v2136_v8 = vmul.f32 %v12348_v34, %v12383_v14  ;;  %v2137_v56 = vmul.f32 %v12356_v2, %v12378_v4  ;;  %v1080_v30 = vsel %vm1071_vm8, %v12183_v21, %v1048_v52  ;;  %v12407_v21 = vperm.slane %v12389_v28, 0 }
 0x212   : > { %v1093_v59 = vmul.f32 %v12369_v9, %v1080_v30  ;;  %3596 = vmatpush.bf16.msra.mxu1 %v8213_v29  ;;  %16582 = vst [vmem:[#allocation84_spill] sm:$0xff] %v12418_v0  ;;  %v8197_v33 = vor.u32 %v9848_v53, %v8196_v13  ;;  %v1087_v29 = vsel %vm1071_vm8, %v12363_v6, %v12232_v60 }
 0x213   : > { %v2150_v50 = vpack.c.bf16 %v2137_v56, %v2136_v8  ;;  %16580 = vst [vmem:[#allocation82_spill] sm:$0xff] %v12407_v21  ;;  %v12421_v8 = vld [vmem:[%s10805_s19 + $0x20] sm:$0xff]  ;;  %v2132_v7 = vmul.f32 %v12348_v34, %v1080_v30 }
 0x214   : > { %v1108_v31 = vpack.c.bf16 %v1093_v59, %v1092_v11  ;;  %v2135_v59 = vmul.f32 %v12399_v10, %v1084_v40  ;;  %v8180_v30 = vld [vmem:[#allocation2 + $0x1a0] sm:$0xf] }
 0x215   : > { %1300 = vrot.lane.b32.xlu2 %v12402_v26, %s10638_s7  ;;  %2158 = vst [vmem:[#allocation2 + $0x690] sm:$0xff] %v2150_v50  ;;  %1298 = vrot.lane.b32.xlu1 %v12410_v17, %s10638_s7  ;;  %v9844_v50 = vld [vmem:[#allocation2 + $0x1ac] sm:$0xf0] }
 0x216   : > { %1296 = vrot.lane.b32.xlu0 %v12421_v8, %s10638_s7  ;;  %1116 = vst [vmem:[#allocation2 + $0x200] sm:$0xff] %v1108_v31  ;;  %3597 = vmatpush.bf16.msra.mxu1 %v8197_v33  ;;  %v1104_v33 = vmul.f32 %v12366_v20, %v1087_v29  ;;  %v8181_v51 = vor.u32 %v9844_v50, %v8180_v30 }
 0x217   : > { %v12425_v56 = vpop.permute.xlu2 %1128  ;;  %v1056_v11 = vpop.permute.xlu1 %1055 }
 0x218   : > { %v1072_v13 = vsel %vm1071_vm8, %v1056_v11, %v12331_v49  ;;  %v1076_v53 = vsel %vm1071_vm8, %v1048_v52, %v1056_v11  ;;  %v1054_v27 = vpop.permute.xlu0 %1053 }
 0x219   : > { %v1094_v62 = vmul.f32 %v12407_v21, %v1076_v53  ;;  %v1095_v31 = vmul.f32 %v12415_v24, %v1072_v13  ;;  %v2133_v48 = vmul.f32 %v12356_v2, %v1076_v53  ;;  %v2134_v40 = vmul.f32 %v12418_v0, %v1072_v13  ;;  %v12448_v53 = vld [vmem:[%s10805_s19 + $0x48] sm:$0xff] }
 0x21a   : > { %v1083_v49 = vsel %vm1071_vm8, %v12232_v60, %v1054_v27  ;;  %3598 = vmatpush.bf16.msra.mxu1 %v8181_v51  ;;  %v12453_v13 = vld [vmem:[%s10805_s19 + $0x28] sm:$0xff]  ;;  %v1082_v60 = vsel %vm1071_vm8, %v12333_v3, %v12255_v54 }
 0x21b   : > { %v1109_v52 = vpack.c.bf16 %v1095_v31, %v1094_v62  ;;  %v2148_v11 = vpack.c.bf16 %v2133_v48, %v2132_v7  ;;  %v2149_v12 = vpack.c.bf16 %v2135_v59, %v2134_v40  ;;  %v1105_v16 = vmul.f32 %v12369_v9, %v1083_v49  ;;  %v12458_v62 = vld [vmem:[%s10805_s19 + $0x8] sm:$0xff]  ;;  %v8148_v7 = vld [vmem:[#allocation2 + $0x160] sm:$0xf] }
 0x21c   : > { %v8165_v48 = vor.u32 %v9840_v15, %v8164_v18  ;;  %v2144_v15 = vmul.f32 %v12348_v34, %v1083_v49 }
 0x21d   : > { %1306 = vrot.lane.b32.xlu2 %v12448_v53, %s10638_s7  ;;  %1117 = vst [vmem:[#allocation2 + $0x208] sm:$0xff] %v1109_v52  ;;  %v1114_v50 = vpack.c.bf16 %v1105_v16, %v1104_v33  ;;  %1304 = vrot.lane.b32.xlu1 %v12453_v13, %s10638_s7  ;;  %v2147_v16 = vmul.f32 %v12399_v10, %v1087_v29  ;;  %v9836_v52 = vld [vmem:[#allocation2 + $0x16c] sm:$0xf0] }
 0x21e   : > { %2156 = vst [vmem:[#allocation2 + $0x680] sm:$0xff] %v2148_v11  ;;  %1302 = vrot.lane.b32.xlu0 %v12458_v62, %s10638_s7  ;;  %3599 = vmatpush.bf16.msra.mxu1 %v8165_v48  ;;  %v8149_v49 = vor.u32 %v9836_v52, %v8148_v7  ;;  %v9832_v48 = vld [vmem:[#allocation2 + $0x14c] sm:$0xf0]  ;;  %v8132_v7 = vld [vmem:[#allocation2 + $0x140] sm:$0xf] }
 0x21f   : > { %v12462_v51 = vpop.permute.xlu2 %1134  ;;  %2157 = vst [vmem:[#allocation2 + $0x688] sm:$0xff] %v2149_v12  ;;  %v1062_v59 = vpop.permute.xlu1 %1061  ;;  %v12487_v52 = vld [vmem:[%s10805_s19 + $0x10] sm:$0xff] }
 0x220   : > { %1122 = vst [vmem:[#allocation2 + $0x230] sm:$0xff] %v1114_v50  ;;  %v1075_v18 = vsel %vm1071_vm8, %v1062_v59, %v12363_v6  ;;  %v1079_v31 = vsel %vm1071_vm8, %v1054_v27, %v1062_v59  ;;  %v1060_v40 = vpop.permute.xlu0 %1059  ;;  %v2140_v59 = vmul.f32 %v12348_v34, %v1082_v60 }
 0x221   : > { %v1106_v30 = vmul.f32 %v12407_v21, %v1079_v31  ;;  %v1107_v33 = vmul.f32 %v12415_v24, %v1075_v18  ;;  %v2145_v12 = vmul.f32 %v12356_v2, %v1079_v31  ;;  %v2146_v29 = vmul.f32 %v12418_v0, %v1075_v18  ;;  %v8116_v18 = vld [vmem:[#allocation2 + $0x120] sm:$0xf]  ;;  %v9828_v31 = vld [vmem:[#allocation2 + $0x12c] sm:$0xf0] }
 0x222   : > { %v1078_v11 = vsel %vm1071_vm8, %v12255_v54, %v1060_v40  ;;  %3600 = vmatpush.bf16.msra.mxu1 %v8149_v49 }
 0x223   : > { %v1115_v6 = vpack.c.bf16 %v1107_v33, %v1106_v30  ;;  %v2154_v50 = vpack.c.bf16 %v2145_v12, %v2144_v15  ;;  %v2155_v27 = vpack.c.bf16 %v2147_v16, %v2146_v29  ;;  %v2141_v36 = vmul.f32 %v12356_v2, %v1078_v11  ;;  %v12492_v15 = vld [vmem:[%s10805_s19 + $0x68] sm:$0xff] }
 0x224   : > { %v8133_v16 = vor.u32 %v9832_v48, %v8132_v7  ;;  %v1101_v33 = vmul.f32 %v12369_v9, %v1082_v60  ;;  %v8117_v29 = vor.u32 %v9828_v31, %v8116_v18  ;;  %v1102_v49 = vmul.f32 %v12407_v21, %v1078_v11 }
 0x225   : > { %1312 = vrot.lane.b32.xlu2 %v12283_v38, %s10638_s7  ;;  %1123 = vst [vmem:[#allocation2 + $0x238] sm:$0xff] %v1115_v6  ;;  %1310 = vrot.lane.b32.xlu1 %v12487_v52, %s10638_s7  ;;  %v2152_v54 = vpack.c.bf16 %v2141_v36, %v2140_v59  ;;  %v1097_v11 = vmul.f32 %v12369_v9, %v12383_v14 }
 0x226   : > { %2162 = vst [vmem:[#allocation2 + $0x6b0] sm:$0xff] %v2154_v50  ;;  %1308 = vrot.lane.b32.xlu0 %v12492_v15, %s10638_s7  ;;  %3601 = vmatpush.bf16.msra.mxu1 %v8133_v16  ;;  %v1098_v18 = vmul.f32 %v12407_v21, %v12378_v4  ;;  %v9980_v21 = vld [vmem:[#allocation2 + $0x5ec] sm:$0xf0] }
 0x227   : > { %v12496_v30 = vpop.permute.xlu2 %1140  ;;  %2163 = vst [vmem:[#allocation2 + $0x6b8] sm:$0xff] %v2155_v27  ;;  %v1068_v12 = vpop.permute.xlu1 %1067 }
 0x228   : > { %2160 = vst [vmem:[#allocation2 + $0x6a0] sm:$0xff] %v2152_v54  ;;  %v1074_v36 = vsel %vm1071_vm8, %v1060_v40, %v1068_v12  ;;  %v1086_v6 = vsel %vm1071_vm8, %v1068_v12, %v12333_v3  ;;  %v1066_v50 = vpop.permute.xlu0 %1065  ;;  %v8100_v12 = vld [vmem:[#allocation2 + $0x100] sm:$0xf] }
 0x229   : > { %v1100_v48 = vmul.f32 %v12366_v20, %v1086_v6  ;;  %v1103_v59 = vmul.f32 %v12415_v24, %v1074_v36  ;;  %v2142_v60 = vmul.f32 %v12418_v0, %v1074_v36  ;;  %v2143_v27 = vmul.f32 %v12399_v10, %v1086_v6  ;;  %v8724_v6 = vld [vmem:[#allocation2 + $0x5e0] sm:$0xf] }
 0x22a   : > { %v1073_v40 = vsel %vm1071_vm8, %v12289_v44, %v1066_v50  ;;  %v1085_v3 = vsel %vm1071_vm8, %v1066_v50, %v12335_v47  ;;  %3602 = vmatpush.bf16.msra.mxu1 %v8117_v29  ;;  %v9824_v47 = vld [vmem:[#allocation2 + $0x10c] sm:$0xf0] }
 0x22b   : > { %v1112_v31 = vpack.c.bf16 %v1101_v33, %v1100_v48  ;;  %v1113_v7 = vpack.c.bf16 %v1103_v59, %v1102_v49  ;;  %v2153_v54 = vpack.c.bf16 %v2143_v27, %v2142_v60  ;;  %v1096_v16 = vmul.f32 %v12366_v20, %v1085_v3  ;;  %v8708_v27 = vld [vmem:[#allocation2 + $0x5c0] sm:$0xf] }
 0x22c   : > { %v1099_v14 = vmul.f32 %v12415_v24, %v1073_v40  ;;  %v2138_v36 = vmul.f32 %v12418_v0, %v1073_v40  ;;  %v2139_v4 = vmul.f32 %v12399_v10, %v1085_v3  ;;  %v8101_v49 = vor.u32 %v9824_v47, %v8100_v12  ;;  %v9972_v40 = vld [vmem:[#allocation2 + $0x5ac] sm:$0xf0] }
 0x22d   : > { %1318 = vrot.lane.b32.xlu2 %v12322_v42, %s10638_s7  ;;  %1120 = vst [vmem:[#allocation2 + $0x220] sm:$0xff] %v1112_v31  ;;  %v1110_v44 = vpack.c.bf16 %v1097_v11, %v1096_v16  ;;  %1316 = vrot.lane.b32.xlu1 %v12327_v45, %s10638_s7  ;;  %v8725_v48 = vor.u32 %v9980_v21, %v8724_v6  ;;  %v9976_v11 = vld [vmem:[#allocation2 + $0x5cc] sm:$0xf0]  ;;  %v8692_v21 = vld [vmem:[#allocation2 + $0x5a0] sm:$0xf] }
 0x22e   : > { %1121 = vst [vmem:[#allocation2 + $0x228] sm:$0xff] %v1113_v7  ;;  %v1111_v33 = vpack.c.bf16 %v1099_v14, %v1098_v18  ;;  %v2151_v29 = vpack.c.bf16 %v2139_v4, %v2138_v36  ;;  %1314 = vrot.lane.b32.xlu0 %v12278_v35, %s10638_s7  ;;  %3603 = vmatpush.bf16.msra.mxu1 %v8101_v49  ;;  %v8676_v16 = vld [vmem:[#allocation2 + $0x580] sm:$0xf]  ;;  %v9968_v12 = vld [vmem:[#allocation2 + $0x58c] sm:$0xf0]  ;;  %v12549_v4 = vperm.slane %v12337_v57, 1 }
 0x22f   : > { %v12529_v50 = vpop.permute.xlu2 %1146  ;;  %2161 = vst [vmem:[#allocation2 + $0x6a8] sm:$0xff] %v2153_v54  ;;  %v12531_v59 = vpop.permute.xlu1 %1126  ;;  %v8709_v18 = vor.u32 %v9976_v11, %v8708_v27  ;;  %v8693_v31 = vor.u32 %v9972_v40, %v8692_v21  ;;  %v8677_v14 = vor.u32 %v9968_v12, %v8676_v16  ;;  %v8660_v36 = vld [vmem:[#allocation2 + $0x560] sm:$0xf]  ;;  %v9964_v6 = vld [vmem:[#allocation2 + $0x56c] sm:$0xf0]  ;;  %v12561_v49 = vperm.slane %v12339_v41, 1 }
 0x230   : > { %1118 = vst [vmem:[#allocation2 + $0x210] sm:$0xff] %v1110_v44  ;;  %v12533_v60 = vpop.permute.xlu0 %1124  ;;  %v9960_v27 = vld [vmem:[#allocation2 + $0x54c] sm:$0xf0]  ;;  %v8644_v21 = vld [vmem:[#allocation2 + $0x540] sm:$0xf] }
 0x231   : > { %1119 = vst [vmem:[#allocation2 + $0x218] sm:$0xff] %v1111_v33  ;;  %v8661_v33 = vor.u32 %v9964_v6, %v8660_v36  ;;  %v8628_v12 = vld [vmem:[#allocation2 + $0x520] sm:$0xf]  ;;  %v12573_v36 = vperm.slane %v12394_v37, 1  ;;  %v12580_v6 = vperm.slane %v12389_v28, 1 }
 0x232   : > { %3672 = vmatpush.bf16.msrb.mxu1 %v8725_v48  ;;  %2159 = vst [vmem:[#allocation2 + $0x698] sm:$0xff] %v2151_v29 }
 0x233   : > { %16583 = vst [vmem:[#allocation85_spill] sm:$0xff] %v12549_v4 }
 0x234   : > { %16584 = vst [vmem:[#allocation86_spill] sm:$0xff] %v12561_v49 }
 0x235   : > { %1324 = vrot.lane.b32.xlu2 %v12351_v32, %s10638_s7  ;;  %1322 = vrot.lane.b32.xlu1 %v12359_v46, %s10638_s7  ;;  %16585 = vst [vmem:[#allocation87_spill] sm:$0xff] %v12573_v36 }
 0x236   : > { %3673 = vmatpush.bf16.msrb.mxu1 %v8709_v18  ;;  %1320 = vrot.lane.b32.xlu0 %v12317_v39, %s10638_s7  ;;  %16586 = vst [vmem:[#allocation88_spill] sm:$0xff] %v12580_v6 }
 0x237   : > { %v1153_v3 = vpop.permute.xlu2 %1152  ;;  %v1133_v7 = vpop.permute.xlu1 %1132 }
 0x238   : > { %v12541_v54 = vpop.permute.xlu0 %1130  ;;  %v1171_v47 = vsel %vm1156_vm9, %v1153_v3, %v12425_v56 }
 0x239   : > { %v1185_v18 = vmul.f32 %v12549_v4, %v1171_v47 }
 0x23a   : > { %3674 = vmatpush.bf16.msrb.mxu1 %v8693_v31  ;;  %v8645_v31 = vor.u32 %v9960_v27, %v8644_v21 }
 0x23d   : > { %1383 = vrot.lane.b32.xlu2 %v12410_v17, %s16370_s16  ;;  %1381 = vrot.lane.b32.xlu1 %v12421_v8, %s16370_s16 }
 0x23e   : > { %3675 = vmatpush.bf16.msrb.mxu1 %v8677_v14  ;;  %1379 = vrot.lane.b32.xlu0 %v12342_v22, %s16370_s16  ;;  %v9956_v14 = vld [vmem:[#allocation2 + $0x52c] sm:$0xf0] }
 0x23f   : > { %v12553_v44 = vpop.permute.xlu2 %1211  ;;  %v12558_v29 = vpop.permute.xlu1 %1138  ;;  %v8629_v47 = vor.u32 %v9956_v14, %v8628_v12  ;;  %v1161_v14 = vsel %vm1156_vm9, %v1133_v7, %v12496_v30 }
 0x240   : > { %v1137_v48 = vpop.permute.xlu0 %1136 }
 0x241   : > { %v1167_v11 = vsel %vm1156_vm9, %v12425_v56, %v1137_v48 }
 0x242   : > { %3676 = vmatpush.bf16.msrb.mxu1 %v8661_v33  ;;  %v1186_v40 = vmul.f32 %v12561_v49, %v1167_v11 }
 0x244   : > { %v1197_v16 = vpack.c.bf16 %v1186_v40, %v1185_v18  ;;  %v8612_v40 = vld [vmem:[#allocation2 + $0x500] sm:$0xf] }
 0x245   : > { %1389 = vrot.lane.b32.xlu2 %v12453_v13, %s16370_s16  ;;  %1387 = vrot.lane.b32.xlu1 %v12458_v62, %s16370_s16 }
 0x246   : > { %3677 = vmatpush.bf16.msrb.mxu1 %v8645_v31  ;;  %1205 = vst [vmem:[#allocation2 + $0x260] sm:$0xff] %v1197_v16  ;;  %1385 = vrot.lane.b32.xlu0 %v12402_v26, %s16370_s16  ;;  %v9952_v16 = vld [vmem:[#allocation2 + $0x50c] sm:$0xf0] }
 0x247   : > { %v12577_v56 = vpop.permute.xlu2 %1217  ;;  %v1145_v33 = vpop.permute.xlu1 %1144  ;;  %v8613_v0 = vor.u32 %v9952_v16, %v8612_v40 }
 0x248   : > { %v1159_v27 = vsel %vm1156_vm9, %v1145_v33, %v1153_v3  ;;  %v1163_v11 = vsel %vm1156_vm9, %v1137_v48, %v1145_v33  ;;  %v1143_v18 = vpop.permute.xlu0 %1142  ;;  %v1166_v3 = vsel %vm1156_vm9, %v12531_v59, %v12462_v51 }
 0x249   : > { %v1187_v21 = vmul.f32 %v12580_v6, %v1163_v11  ;;  %v1188_v31 = vmul.f32 %v12573_v36, %v1159_v27  ;;  %v1162_v48 = vsel %vm1156_vm9, %v12462_v51, %v1143_v18  ;;  %v1182_v51 = vmul.f32 %v12561_v49, %v1166_v3 }
 0x24a   : > { %3678 = vmatpush.bf16.msrb.mxu1 %v8629_v47 }
 0x24b   : > { %v1198_v10 = vpack.c.bf16 %v1188_v31, %v1187_v21 }
 0x24d   : > { %1395 = vrot.lane.b32.xlu2 %v12487_v52, %s16370_s16  ;;  %1206 = vst [vmem:[#allocation2 + $0x268] sm:$0xff] %v1198_v10  ;;  %1393 = vrot.lane.b32.xlu1 %v12492_v15, %s16370_s16  ;;  %v1165_v10 = vsel %vm1156_vm9, %v12533_v60, %v1133_v7 }
 0x24e   : > { %3679 = vmatpush.bf16.msrb.mxu1 %v8613_v0  ;;  %1391 = vrot.lane.b32.xlu0 %v12448_v53, %s16370_s16  ;;  %v1183_v0 = vmul.f32 %v12580_v6, %v1162_v48  ;;  %v1178_v16 = vmul.f32 %v12561_v49, %v1165_v10 }
 0x24f   : > { %v12601_v12 = vpop.permute.xlu2 %1223  ;;  %v1151_v47 = vpop.permute.xlu1 %1150 }
 0x250   : > { %v1158_v33 = vsel %vm1156_vm9, %v1143_v18, %v1151_v47  ;;  %v1170_v27 = vsel %vm1156_vm9, %v1151_v47, %v12531_v59  ;;  %v1149_v11 = vpop.permute.xlu0 %1148  ;;  %v1179_v18 = vmul.f32 %v12580_v6, %v1161_v14  ;;  %v1168_v14 = vsel %vm1156_vm9, %v12541_v54, %v12558_v29 }
 0x251   : > { %v1181_v40 = vmul.f32 %v12549_v4, %v1170_v27  ;;  %v1184_v21 = vmul.f32 %v12573_v36, %v1158_v33  ;;  %v1157_v7 = vsel %vm1156_vm9, %v12496_v30, %v1149_v11  ;;  %v1169_v31 = vsel %vm1156_vm9, %v1149_v11, %v12533_v60 }
 0x252   : > { %v1177_v3 = vmul.f32 %v12549_v4, %v1169_v31  ;;  %v1180_v59 = vmul.f32 %v12573_v36, %v1157_v7  ;;  %v1164_v60 = vsel %vm1156_vm9, %v12558_v29, %v12529_v50 }
 0x253   : > { %v1195_v48 = vpack.c.bf16 %v1182_v51, %v1181_v40  ;;  %v1196_v47 = vpack.c.bf16 %v1184_v21, %v1183_v0  ;;  %v1190_v40 = vmul.f32 %v12561_v49, %v1168_v14  ;;  %v1191_v21 = vmul.f32 %v12580_v6, %v1164_v60 }
 0x254   : > { %v1193_v27 = vpack.c.bf16 %v1178_v16, %v1177_v3  ;;  %v1194_v33 = vpack.c.bf16 %v1180_v59, %v1179_v18  ;;  %v12670_v3 = vperm.slane %v12337_v57, 2 }
 0x255   : > { %1401 = vrot.lane.b32.xlu2 %v12327_v45, %s16370_s16  ;;  %1203 = vst [vmem:[#allocation2 + $0x250] sm:$0xff] %v1195_v48  ;;  %1399 = vrot.lane.b32.xlu1 %v12278_v35, %s16370_s16 }
 0x256   : > { %1204 = vst [vmem:[#allocation2 + $0x258] sm:$0xff] %v1196_v47  ;;  %1397 = vrot.lane.b32.xlu0 %v12283_v38, %s16370_s16 }
 0x257   : > { %v12634_v30 = vpop.permute.xlu2 %1229  ;;  %1201 = vst [vmem:[#allocation2 + $0x240] sm:$0xff] %v1193_v27  ;;  %v1210_v10 = vpop.permute.xlu1 %1209  ;;  %v12680_v27 = vperm.slane %v12339_v41, 2 }
 0x258   : > { %1202 = vst [vmem:[#allocation2 + $0x248] sm:$0xff] %v1194_v33  ;;  %v1155_v51 = vpop.permute.xlu0 %1154 }
 0x259   : > { %v1160_v0 = vsel %vm1156_vm9, %v12529_v50, %v1155_v51  ;;  %v1172_v11 = vsel %vm1156_vm9, %v1155_v51, %v12541_v54  ;;  %16587 = vst [vmem:[#allocation89_spill] sm:$0xff] %v12670_v3 }
 0x25a   : > { %v1189_v7 = vmul.f32 %v12549_v4, %v1172_v11  ;;  %v1192_v29 = vmul.f32 %v12573_v36, %v1160_v0  ;;  %16588 = vst [vmem:[#allocation90_spill] sm:$0xff] %v12680_v27  ;;  %v12690_v11 = vperm.slane %v12389_v28, 2 }
 0x25c   : > { %v1199_v31 = vpack.c.bf16 %v1190_v40, %v1189_v7  ;;  %v1200_v16 = vpack.c.bf16 %v1192_v29, %v1191_v21  ;;  %16589 = vst [vmem:[#allocation91_spill] sm:$0xff] %v12690_v11  ;;  %v12695_v40 = vperm.slane %v12394_v37, 2 }
 0x25d   : > { %1407 = vrot.lane.b32.xlu2 %v12359_v46, %s16370_s16  ;;  %1405 = vrot.lane.b32.xlu1 %v12317_v39, %s16370_s16 }
 0x25e   : > { %1207 = vst [vmem:[#allocation2 + $0x270] sm:$0xff] %v1199_v31  ;;  %1403 = vrot.lane.b32.xlu0 %v12322_v42, %s16370_s16 }
 0x25f   : > { %v1236_v50 = vpop.permute.xlu2 %1235  ;;  %1208 = vst [vmem:[#allocation2 + $0x278] sm:$0xff] %v1200_v16  ;;  %v12660_v54 = vpop.permute.xlu1 %1215 }
 0x260   : > { %v12662_v18 = vpop.permute.xlu0 %1213  ;;  %v1255_v48 = vsel %vm1241_vm10, %v1236_v50, %v12553_v44  ;;  %16590 = vst [vmem:[#allocation92_spill] sm:$0xff] %v12695_v40 }
 0x261   : > { %v1266_v14 = vmul.f32 %v12670_v3, %v1255_v48 }
 0x265   : > { %1502 = vrot.lane.b32.xlu2 %v12421_v8, %s16382_s15  ;;  %1500 = vrot.lane.b32.xlu1 %v12342_v22, %s16382_s15 }
 0x266   : > { %1409 = vrot.lane.b32.xlu0 %v12351_v32, %s16370_s16  ;;  %s10641_s16 = smov 121  }
 0x267   : > { %v12674_v59 = vpop.permute.xlu2 %1294  ;;  %v1222_v47 = vpop.permute.xlu1 %1221 }
 0x268   : > { %v1220_v33 = vpop.permute.xlu0 %1219 }
 0x269   : > { %v1251_v60 = vsel %vm1241_vm10, %v12553_v44, %v1220_v33 }
 0x26a   : > { %v1267_v51 = vmul.f32 %v12680_v27, %v1251_v60 }
 0x26c   : > { %v1280_v0 = vpack.c.bf16 %v1267_v51, %v1266_v14 }
 0x26d   : > { %1508 = vrot.lane.b32.xlu2 %v12458_v62, %s16382_s15  ;;  %1506 = vrot.lane.b32.xlu1 %v12402_v26, %s16382_s15 }
 0x26e   : > { %1288 = vst [vmem:[#allocation2 + $0x290] sm:$0xff] %v1280_v0  ;;  %1504 = vrot.lane.b32.xlu0 %v12410_v17, %s16382_s15 }
 0x26f   : > { %v12699_v44 = vpop.permute.xlu2 %1300  ;;  %v1228_v21 = vpop.permute.xlu1 %1227 }
 0x270   : > { %v1243_v7 = vsel %vm1241_vm10, %v1228_v21, %v1236_v50  ;;  %v1247_v29 = vsel %vm1241_vm10, %v1220_v33, %v1228_v21  ;;  %v1226_v31 = vpop.permute.xlu0 %1225  ;;  %v1250_v50 = vsel %vm1241_vm10, %v1210_v10, %v12577_v56 }
 0x271   : > { %v1268_v16 = vmul.f32 %v12690_v11, %v1247_v29  ;;  %v1269_v48 = vmul.f32 %v12695_v40, %v1243_v7  ;;  %v1246_v33 = vsel %vm1241_vm10, %v12577_v56, %v1226_v31  ;;  %v1263_v29 = vmul.f32 %v12680_v27, %v1250_v50 }
 0x273   : > { %v1281_v60 = vpack.c.bf16 %v1269_v48, %v1268_v16  ;;  %v1264_v16 = vmul.f32 %v12690_v11, %v1246_v33  ;;  %v1248_v33 = vsel %vm1241_vm10, %v1222_v47, %v12634_v30 }
 0x275   : > { %1514 = vrot.lane.b32.xlu2 %v12492_v15, %s16382_s15  ;;  %1289 = vst [vmem:[#allocation2 + $0x298] sm:$0xff] %v1281_v60  ;;  %1512 = vrot.lane.b32.xlu1 %v12448_v53, %s16382_s15 }
 0x276   : > { %1510 = vrot.lane.b32.xlu0 %v12453_v13, %s16382_s15 }
 0x277   : > { %v12719_v14 = vpop.permute.xlu2 %1306  ;;  %v1234_v51 = vpop.permute.xlu1 %1233 }
 0x278   : > { %v1242_v0 = vsel %vm1241_vm10, %v1226_v31, %v1234_v51  ;;  %v1254_v21 = vsel %vm1241_vm10, %v1234_v51, %v1210_v10  ;;  %v1232_v7 = vpop.permute.xlu0 %1231  ;;  %v1253_v31 = vsel %vm1241_vm10, %v12660_v54, %v12601_v12  ;;  %v1252_v51 = vsel %vm1241_vm10, %v12662_v18, %v1222_v47 }
 0x279   : > { %v1262_v48 = vmul.f32 %v12670_v3, %v1254_v21  ;;  %v1265_v56 = vmul.f32 %v12695_v40, %v1242_v0  ;;  %v1249_v10 = vsel %vm1241_vm10, %v12601_v12, %v1232_v7  ;;  %v1275_v12 = vmul.f32 %v12680_v27, %v1253_v31 }
 0x27a   : > { %v1276_v21 = vmul.f32 %v12690_v11, %v1249_v10  ;;  %v1271_v31 = vmul.f32 %v12680_v27, %v1252_v51  ;;  %v12785_v51 = vperm.slane %v12337_v57, 3 }
 0x27b   : > { %v1278_v60 = vpack.c.bf16 %v1263_v29, %v1262_v48  ;;  %v1279_v36 = vpack.c.bf16 %v1265_v56, %v1264_v16 }
 0x27c   : > { %16591 = vst [vmem:[#allocation93_spill] sm:$0xff] %v12785_v51 }
 0x27d   : > { %1520 = vrot.lane.b32.xlu2 %v12278_v35, %s16382_s15  ;;  %1286 = vst [vmem:[#allocation2 + $0x280] sm:$0xff] %v1278_v60  ;;  %1518 = vrot.lane.b32.xlu1 %v12283_v38, %s16382_s15 }
 0x27e   : > { %1287 = vst [vmem:[#allocation2 + $0x288] sm:$0xff] %v1279_v36  ;;  %1516 = vrot.lane.b32.xlu0 %v12487_v52, %s16382_s15 }
 0x27f   : > { %v12742_v50 = vpop.permute.xlu2 %1312  ;;  %v1240_v0 = vpop.permute.xlu1 %1239 }
 0x280   : > { %v1245_v36 = vsel %vm1241_vm10, %v1232_v7, %v1240_v0  ;;  %v1257_v29 = vsel %vm1241_vm10, %v1240_v0, %v12660_v54  ;;  %v1238_v16 = vpop.permute.xlu0 %1237  ;;  %v1272_v7 = vmul.f32 %v12690_v11, %v1248_v33 }
 0x281   : > { %v1274_v48 = vmul.f32 %v12670_v3, %v1257_v29  ;;  %v1277_v56 = vmul.f32 %v12695_v40, %v1245_v36  ;;  %v1244_v47 = vsel %vm1241_vm10, %v12634_v30, %v1238_v16  ;;  %v1256_v60 = vsel %vm1241_vm10, %v1238_v16, %v12662_v18 }
 0x282   : > { %v1270_v10 = vmul.f32 %v12670_v3, %v1256_v60  ;;  %v1273_v54 = vmul.f32 %v12695_v40, %v1244_v47  ;;  %v9776_v47 = vld [vmem:[#allocation8 + $0x4] sm:$0xf]  ;;  %v7918_v60 = vld [vmem:[#allocation8 + $0x1c] sm:$0xf0] }
 0x283   : > { %v1284_v0 = vpack.c.bf16 %v1275_v12, %v1274_v48  ;;  %v1285_v29 = vpack.c.bf16 %v1277_v56, %v1276_v21  ;;  %v12788_v12 = vperm.slane %v12339_v41, 3 }
 0x284   : > { %v1282_v6 = vpack.c.bf16 %v1271_v31, %v1270_v10  ;;  %v1283_v36 = vpack.c.bf16 %v1273_v54, %v1272_v7  ;;  %v12800_v10 = vor.u32 %v9776_v47, %v7918_v60 }
 0x285   : > { %1526 = vrot.lane.b32.xlu2 %v12317_v39, %s16382_s15  ;;  %1292 = vst [vmem:[#allocation2 + $0x2b0] sm:$0xff] %v1284_v0  ;;  %1524 = vrot.lane.b32.xlu1 %v12322_v42, %s16382_s15  ;;  %v12806_v0 = vperm.slane %v12389_v28, 3 }
 0x286   : > { %1293 = vst [vmem:[#allocation2 + $0x2b8] sm:$0xff] %v1285_v29  ;;  %1522 = vrot.lane.b32.xlu0 %v12327_v45, %s16382_s15  ;;  %3604 = vmatmul.bf16.vlgmr.msra.gmra.mxu1 %v12800_v10 }
 0x287   : > { %v1319_v30 = vpop.permute.xlu2 %1318  ;;  %1290 = vst [vmem:[#allocation2 + $0x2a0] sm:$0xff] %v1282_v6  ;;  %v12775_v18 = vpop.permute.xlu1 %1298 }
 0x288   : > { %1291 = vst [vmem:[#allocation2 + $0x2a8] sm:$0xff] %v1283_v36  ;;  %v12777_v33 = vpop.permute.xlu0 %1296  ;;  %v1339_v21 = vsel %vm1326_vm11, %v1319_v30, %v12674_v59 }
 0x289   : > { %16592 = vst [vmem:[#allocation94_spill] sm:$0xff] %v12788_v12  ;;  %v1347_v31 = vmul.f32 %v12785_v51, %v1339_v21 }
 0x28a   : > { %16593 = vst [vmem:[#allocation95_spill] sm:$0xff] %v12806_v0 }
 0x28d   : > { %1585 = vrot.lane.b32.xlu2 %v12342_v22, %s10641_s16  ;;  %1530 = vrot.lane.b32.xlu1 %v12351_v32, %s16382_s15 }
 0x28e   : > { %1528 = vrot.lane.b32.xlu0 %v12359_v46, %s16382_s15  ;;  %s16449_s15 = smov 119  }
 0x28f   : > { %v1325_v6 = vpop.permute.xlu2 %1324  ;;  %v1305_v16 = vpop.permute.xlu1 %1304 }
 0x290   : > { %v1303_v48 = vpop.permute.xlu0 %1302  ;;  %v1342_v36 = vsel %vm1326_vm11, %v1325_v6, %v12699_v44 }
 0x291   : > { %v1335_v56 = vsel %vm1326_vm11, %v12674_v59, %v1303_v48  ;;  %v12811_v59 = vperm.slane %v12394_v37, 3  ;;  %v1359_v40 = vmul.f32 %v12785_v51, %v1342_v36 }
 0x292   : > { %v1348_v7 = vmul.f32 %v12788_v12, %v1335_v56 }
 0x293   : > { %16594 = vst [vmem:[#allocation96_spill] sm:$0xff] %v12811_v59 }
 0x294   : > { %v1363_v54 = vpack.c.bf16 %v1348_v7, %v1347_v31 }
 0x295   : > { %1591 = vrot.lane.b32.xlu2 %v12402_v26, %s10641_s16  ;;  %1589 = vrot.lane.b32.xlu1 %v12410_v17, %s10641_s16 }
 0x296   : > { %1371 = vst [vmem:[#allocation2 + $0x2c0] sm:$0xff] %v1363_v54  ;;  %1587 = vrot.lane.b32.xlu0 %v12421_v8, %s10641_s16 }
 0x297   : > { %v12815_v29 = vpop.permute.xlu2 %1383  ;;  %v1311_v21 = vpop.permute.xlu1 %1310 }
 0x298   : > { %v1327_v56 = vsel %vm1326_vm11, %v1311_v21, %v1319_v30  ;;  %v1331_v47 = vsel %vm1326_vm11, %v1303_v48, %v1311_v21  ;;  %v1309_v60 = vpop.permute.xlu0 %1308 }
 0x299   : > { %v1349_v31 = vmul.f32 %v12806_v0, %v1331_v47  ;;  %v1350_v7 = vmul.f32 %v12811_v59, %v1327_v56  ;;  %v1338_v54 = vsel %vm1326_vm11, %v12699_v44, %v1309_v60  ;;  %v9783_v47 = vld [vmem:[#allocation8 + $0x3c] sm:$0xf] }
 0x29a   : > { %v1360_v11 = vmul.f32 %v12788_v12, %v1338_v54 }
 0x29b   : > { %v1364_v24 = vpack.c.bf16 %v1350_v7, %v1349_v31  ;;  %v1336_v31 = vsel %vm1326_vm11, %v12777_v33, %v1305_v16 }
 0x29c   : > { %v1369_v2 = vpack.c.bf16 %v1360_v11, %v1359_v40 }
 0x29d   : > { %1597 = vrot.lane.b32.xlu2 %v12448_v53, %s10641_s16  ;;  %1372 = vst [vmem:[#allocation2 + $0x2c8] sm:$0xff] %v1364_v24  ;;  %1595 = vrot.lane.b32.xlu1 %v12453_v13, %s10641_s16 }
 0x29e   : > { %1377 = vst [vmem:[#allocation2 + $0x2f0] sm:$0xff] %v1369_v2  ;;  %1593 = vrot.lane.b32.xlu0 %v12458_v62, %s10641_s16  ;;  %v1337_v2 = vsel %vm1326_vm11, %v12775_v18, %v12719_v14 }
 0x29f   : > { %v12837_v30 = vpop.permute.xlu2 %1389  ;;  %v1317_v44 = vpop.permute.xlu1 %1316  ;;  %v1356_v54 = vmul.f32 %v12788_v12, %v1337_v2 }
 0x2a0   : > { %v1330_v48 = vsel %vm1326_vm11, %v1317_v44, %v1325_v6  ;;  %v1334_v11 = vsel %vm1326_vm11, %v1309_v60, %v1317_v44  ;;  %v1315_v40 = vpop.permute.xlu0 %1314  ;;  %v1332_v60 = vsel %vm1326_vm11, %v1305_v16, %v12742_v50 }
 0x2a1   : > { %v1361_v36 = vmul.f32 %v12806_v0, %v1334_v11  ;;  %v1362_v24 = vmul.f32 %v12811_v59, %v1330_v48  ;;  %v1333_v6 = vsel %vm1326_vm11, %v12719_v14, %v1315_v40 }
 0x2a2   : > { %v1357_v44 = vmul.f32 %v12806_v0, %v1333_v6  ;;  %v1353_v6 = vmul.f32 %v12806_v0, %v1332_v60 }
 0x2a3   : > { %v1370_v21 = vpack.c.bf16 %v1362_v24, %v1361_v36 }
 0x2a5   : > { %1603 = vrot.lane.b32.xlu2 %v12283_v38, %s10641_s16  ;;  %1378 = vst [vmem:[#allocation2 + $0x2f8] sm:$0xff] %v1370_v21  ;;  %1601 = vrot.lane.b32.xlu1 %v12487_v52, %s10641_s16  ;;  %v7946_v38 = vld [vmem:[#allocation8 + $0x54] sm:$0xf0] }
 0x2a6   : > { %1599 = vrot.lane.b32.xlu0 %v12492_v15, %s10641_s16  ;;  %v12866_v14 = vor.u32 %v9783_v47, %v7946_v38 }
 0x2a7   : > { %v12858_v56 = vpop.permute.xlu2 %1395  ;;  %v1323_v7 = vpop.permute.xlu1 %1322 }
 0x2a8   : > { %v1329_v48 = vsel %vm1326_vm11, %v1315_v40, %v1323_v7  ;;  %v1341_v11 = vsel %vm1326_vm11, %v1323_v7, %v12775_v18  ;;  %v1321_v36 = vpop.permute.xlu0 %1320  ;;  %3609 = vmatmul.bf16.gmra.mxu1 %v12866_v14  ;;  %v1352_v40 = vmul.f32 %v12788_v12, %v1336_v31  ;;  %v9884_v31 = vld [vmem:[#allocation2 + $0x2ec] sm:$0xf0]  ;;  %v8070_v12 = vld [vmem:[#allocation2 + $0xd0] sm:$0xf0] }
 0x2a9   : > { %v1355_v24 = vmul.f32 %v12785_v51, %v1341_v11  ;;  %v1358_v21 = vmul.f32 %v12811_v59, %v1329_v48  ;;  %v1328_v16 = vsel %vm1326_vm11, %v12742_v50, %v1321_v36  ;;  %v1340_v2 = vsel %vm1326_vm11, %v1321_v36, %v12777_v33 }
 0x2aa   : > { %v1351_v18 = vmul.f32 %v12785_v51, %v1340_v2  ;;  %v1354_v47 = vmul.f32 %v12811_v59, %v1328_v16  ;;  %v9778_v16 = vld [vmem:[#allocation8 + $0x14] sm:$0xf] }
 0x2ab   : > { %v1367_v38 = vpack.c.bf16 %v1356_v54, %v1355_v24  ;;  %v1368_v7 = vpack.c.bf16 %v1358_v21, %v1357_v44  ;;  %v8342_v44 = vld [vmem:[#allocation2 + $0x2f0] sm:$0xf0] }
 0x2ac   : > { %v1365_v48 = vpack.c.bf16 %v1352_v40, %v1351_v18  ;;  %v1366_v11 = vpack.c.bf16 %v1354_v47, %v1353_v6  ;;  %v8324_v6 = vld [vmem:[#allocation2 + $0x2c0] sm:$0xf]  ;;  %v9878_v18 = vld [vmem:[#allocation2 + $0x2c4] sm:$0xf] }
 0x2ad   : > { %1609 = vrot.lane.b32.xlu2 %v12322_v42, %s10641_s16  ;;  %1375 = vst [vmem:[#allocation2 + $0x2e0] sm:$0xff] %v1367_v38  ;;  %1607 = vrot.lane.b32.xlu1 %v12327_v45, %s10641_s16 }
 0x2ae   : > { %1376 = vst [vmem:[#allocation2 + $0x2e8] sm:$0xff] %v1368_v7  ;;  %1605 = vrot.lane.b32.xlu0 %v12278_v35, %s10641_s16  ;;  %v9876_v7 = vld [vmem:[#allocation2 + $0x2ac] sm:$0xf0] }
 0x2af   : > { %v12894_v50 = vpop.permute.xlu2 %1401  ;;  %1373 = vst [vmem:[#allocation2 + $0x2d0] sm:$0xff] %v1365_v48  ;;  %v12896_v33 = vpop.permute.xlu1 %1381  ;;  %v9874_v48 = vld [vmem:[#allocation2 + $0x2a4] sm:$0xf] }
 0x2b0   : > { %1374 = vst [vmem:[#allocation2 + $0x2d8] sm:$0xff] %v1366_v11  ;;  %v12898_v60 = vpop.permute.xlu0 %1379  ;;  %v8310_v11 = vld [vmem:[#allocation2 + $0x2b0] sm:$0xf0] }
 0x2b4   : > { %v8340_v42 = vld [vmem:[#allocation2 + $0x2e0] sm:$0xf]  ;;  %v9882_v54 = vld [vmem:[#allocation2 + $0x2e4] sm:$0xf] }
 0x2b5   : > { %1615 = vrot.lane.b32.xlu2 %v12351_v32, %s10641_s16  ;;  %1613 = vrot.lane.b32.xlu1 %v12359_v46, %s10641_s16  ;;  %v8341_v45 = vor.u32 %v9884_v31, %v8340_v42  ;;  %v8345_v35 = vor.u32 %v9882_v54, %v8342_v44  ;;  %v7934_v32 = vld [vmem:[#allocation8 + $0x2c] sm:$0xf0]  ;;  %v8313_v42 = vor.u32 %v9874_v48, %v8310_v11  ;;  %v12921_v54 = vperm.slane %v12337_v57, 4  ;;  %v9866_v48 = vld [vmem:[#allocation2 + $0x264] sm:$0xf] }
 0x2b6   : > { %1611 = vrot.lane.b32.xlu0 %v12317_v39, %s10641_s16  ;;  %v9880_v24 = vld [vmem:[#allocation2 + $0x2cc] sm:$0xf0]  ;;  %v8326_v21 = vld [vmem:[#allocation2 + $0x2d0] sm:$0xf0]  ;;  %v12912_v46 = vor.u32 %v9778_v16, %v7934_v32  ;;  %v8308_v39 = vld [vmem:[#allocation2 + $0x2a0] sm:$0xf] }
 0x2b7   : > { %v12906_v36 = vpop.permute.xlu2 %1407  ;;  %v12908_v2 = vpop.permute.xlu1 %1387  ;;  %3615 = vmatpush.bf16.msra.mxu2 %v8341_v45  ;;  %3748 = vmatpush.bf16.msra.mxu1 %v8345_v35  ;;  %v8325_v47 = vor.u32 %v9880_v24, %v8324_v6  ;;  %v8329_v38 = vor.u32 %v9878_v18, %v8326_v21  ;;  %v8309_v31 = vor.u32 %v9876_v7, %v8308_v39  ;;  %v8292_v45 = vld [vmem:[#allocation2 + $0x280] sm:$0xf]  ;;  %v9870_v35 = vld [vmem:[#allocation2 + $0x284] sm:$0xf]  ;;  %v9872_v21 = vld [vmem:[#allocation2 + $0x28c] sm:$0xf0] }
 0x2b8   : > { %v12910_v40 = vpop.permute.xlu0 %1385  ;;  %3680 = vmatmul.bf16.vlgmr.msrb.gmra.mxu1 %v12912_v46  ;;  %16595 = vst [vmem:[#allocation97_spill] sm:$0xff] %v12921_v54  ;;  %v8294_v16 = vld [vmem:[#allocation2 + $0x290] sm:$0xf0]  ;;  %v8293_v32 = vor.u32 %v9872_v21, %v8292_v45  ;;  %v12953_v21 = vperm.slane %v12389_v28, 4  ;;  %v9860_v28 = vld [vmem:[#allocation2 + $0x22c] sm:$0xf0] }
 0x2b9   : > { %v8297_v6 = vor.u32 %v9870_v35, %v8294_v16  ;;  %v8278_v7 = vld [vmem:[#allocation2 + $0x270] sm:$0xf0] }
 0x2ba   : > { %v8262_v45 = vld [vmem:[#allocation2 + $0x250] sm:$0xf0]  ;;  %16598 = vst [vmem:[#allocation100_spill] sm:$0xff] %v12953_v21 }
 0x2bb   : > { %3616 = vmatpush.bf16.msra.mxu2 %v8325_v47  ;;  %3749 = vmatpush.bf16.msra.mxu1 %v8329_v38  ;;  %v9868_v38 = vld [vmem:[#allocation2 + $0x26c] sm:$0xf0] }
 0x2bd   : > { %1674 = vrot.lane.b32.xlu2 %v12410_v17, %s16447_s29  ;;  %1672 = vrot.lane.b32.xlu1 %v12421_v8, %s16447_s29  ;;  %v1426_v17 = vsel %vm16416_vm12, %v12906_v36, %v12815_v29  ;;  %v12934_v8 = vperm.slane %v12339_v41, 4  ;;  %v8276_v41 = vld [vmem:[#allocation2 + $0x260] sm:$0xf] }
 0x2be   : > { %1670 = vrot.lane.b32.xlu0 %v12342_v22, %s16447_s29  ;;  %v1440_v18 = vmul.f32 %v12921_v54, %v1426_v17  ;;  %v8277_v11 = vor.u32 %v9868_v38, %v8276_v41  ;;  %v8260_v17 = vld [vmem:[#allocation2 + $0x240] sm:$0xf]  ;;  %v9858_v38 = vld [vmem:[#allocation2 + $0x224] sm:$0xf] }
 0x2bf   : > { %v12925_v44 = vpop.permute.xlu2 %1502  ;;  %v12931_v24 = vpop.permute.xlu1 %1393  ;;  %3617 = vmatpush.bf16.msra.mxu2 %v8309_v31  ;;  %3750 = vmatpush.bf16.msra.mxu1 %v8313_v42  ;;  %16596 = vst [vmem:[#allocation98_spill] sm:$0xff] %v12934_v8  ;;  %v8281_v31 = vor.u32 %v9866_v48, %v8278_v7  ;;  %v9864_v42 = vld [vmem:[#allocation2 + $0x24c] sm:$0xf0] }
 0x2c0   : > { %v1392_v57 = vpop.permute.xlu0 %1391  ;;  %v10004_v7 = vld [vmem:[#allocation2 + $0x6ac] sm:$0xf0] }
 0x2c1   : > { %v1422_v22 = vsel %vm16416_vm12, %v12815_v29, %v1392_v57  ;;  %v12946_v29 = vperm.slane %v12394_v37, 4  ;;  %v9856_v48 = vld [vmem:[#allocation2 + $0x20c] sm:$0xf0] }
 0x2c2   : > { %v1441_v47 = vmul.f32 %v12934_v8, %v1422_v22 }
 0x2c3   : > { %3618 = vmatpush.bf16.msra.mxu2 %v8293_v32  ;;  %3751 = vmatpush.bf16.msra.mxu1 %v8297_v6  ;;  %16597 = vst [vmem:[#allocation99_spill] sm:$0xff] %v12946_v29  ;;  %v8261_v6 = vor.u32 %v9864_v42, %v8260_v17  ;;  %v1421_v42 = vsel %vm16416_vm12, %v12896_v33, %v12837_v30 }
 0x2c4   : > { %v1452_v39 = vpack.c.bf16 %v1441_v47, %v1440_v18  ;;  %v8244_v47 = vld [vmem:[#allocation2 + $0x220] sm:$0xf] }
 0x2c5   : > { %1680 = vrot.lane.b32.xlu2 %v12453_v13, %s16447_s29  ;;  %1678 = vrot.lane.b32.xlu1 %v12458_v62, %s16447_s29  ;;  %v9862_v13 = vld [vmem:[#allocation2 + $0x244] sm:$0xf] }
 0x2c6   : > { %1460 = vst [vmem:[#allocation2 + $0x320] sm:$0xff] %v1452_v39  ;;  %1676 = vrot.lane.b32.xlu0 %v12402_v26, %s16447_s29  ;;  %v8265_v18 = vor.u32 %v9862_v13, %v8262_v45  ;;  %v8822_v39 = vld [vmem:[#allocation2 + $0x6b0] sm:$0xf0]  ;;  %v8228_v13 = vld [vmem:[#allocation2 + $0x200] sm:$0xf] }
 0x2c7   : > { %v12950_v35 = vpop.permute.xlu2 %1508  ;;  %v1400_v16 = vpop.permute.xlu1 %1399  ;;  %3619 = vmatpush.bf16.msra.mxu2 %v8277_v11  ;;  %3752 = vmatpush.bf16.msra.mxu1 %v8281_v31  ;;  %v10002_v11 = vld [vmem:[#allocation2 + $0x6a4] sm:$0xf]  ;;  %v8246_v31 = vld [vmem:[#allocation2 + $0x230] sm:$0xf0] }
 0x2c8   : > { %v1414_v37 = vsel %vm16416_vm12, %v1400_v16, %v12906_v36  ;;  %v1418_v62 = vsel %vm16416_vm12, %v1392_v57, %v1400_v16  ;;  %v1398_v22 = vpop.permute.xlu0 %1397  ;;  %v8820_v36 = vld [vmem:[#allocation2 + $0x6a0] sm:$0xf]  ;;  %v8245_v57 = vor.u32 %v9860_v28, %v8244_v47  ;;  %v8230_v16 = vld [vmem:[#allocation2 + $0x210] sm:$0xf0]  ;;  %v8249_v17 = vor.u32 %v9858_v38, %v8246_v31 }
 0x2c9   : > { %v1442_v26 = vmul.f32 %v12953_v21, %v1418_v62  ;;  %v1443_v32 = vmul.f32 %v12946_v29, %v1414_v37  ;;  %v1417_v45 = vsel %vm16416_vm12, %v12837_v30, %v1398_v22  ;;  %v8229_v37 = vor.u32 %v9856_v48, %v8228_v13  ;;  %v9854_v62 = vld [vmem:[#allocation2 + $0x204] sm:$0xf]  ;;  %v10000_v13 = vld [vmem:[#allocation2 + $0x68c] sm:$0xf0] }
 0x2ca   : > { %v1438_v47 = vmul.f32 %v12953_v21, %v1417_v45 }
 0x2cb   : > { %v1453_v41 = vpack.c.bf16 %v1443_v32, %v1442_v26  ;;  %3620 = vmatpush.bf16.msra.mxu2 %v8261_v6  ;;  %3753 = vmatpush.bf16.msra.mxu1 %v8265_v18  ;;  %v8821_v26 = vor.u32 %v10004_v7, %v8820_v36  ;;  %v8825_v32 = vor.u32 %v10002_v11, %v8822_v39 }
 0x2cc   : > { %v1416_v6 = vsel %vm16416_vm12, %v12908_v2, %v12858_v56  ;;  %v1437_v18 = vmul.f32 %v12934_v8, %v1421_v42 }
 0x2cd   : > { %1686 = vrot.lane.b32.xlu2 %v12487_v52, %s16447_s29  ;;  %1461 = vst [vmem:[#allocation2 + $0x328] sm:$0xff] %v1453_v41  ;;  %1684 = vrot.lane.b32.xlu1 %v12492_v15, %s16447_s29  ;;  %v1420_v15 = vsel %vm16416_vm12, %v12898_v60, %v12908_v2  ;;  %v1434_v36 = vmul.f32 %v12953_v21, %v1416_v6 }
 0x2ce   : > { %1682 = vrot.lane.b32.xlu0 %v12448_v53, %s16447_s29  ;;  %v8233_v53 = vor.u32 %v9854_v62, %v8230_v16  ;;  %v9998_v16 = vld [vmem:[#allocation2 + $0x684] sm:$0xf]  ;;  %v13015_v62 = vld [vmem:[%s10805_s19 + $0x30] sm:$0xff] }
 0x2cf   : > { %v12975_v52 = vpop.permute.xlu2 %1514  ;;  %v1406_v30 = vpop.permute.xlu1 %1405  ;;  %3621 = vmatpush.bf16.msra.mxu2 %v8245_v57  ;;  %3754 = vmatpush.bf16.msra.mxu1 %v8249_v17  ;;  %v13010_v17 = vld [vmem:[%s10805_s19 + $0x50] sm:$0xff] }
 0x2d0   : > { %v1413_v28 = vsel %vm16416_vm12, %v1398_v22, %v1406_v30  ;;  %v1425_v38 = vsel %vm16416_vm12, %v1406_v30, %v12896_v33  ;;  %v1404_v7 = vpop.permute.xlu0 %1403  ;;  %v1433_v22 = vmul.f32 %v12934_v8, %v1420_v15  ;;  %v9996_v15 = vld [vmem:[#allocation2 + $0x66c] sm:$0xf0]  ;;  %v8790_v30 = vld [vmem:[#allocation2 + $0x670] sm:$0xf0] }
 0x2d1   : > { %v1436_v39 = vmul.f32 %v12921_v54, %v1425_v38  ;;  %v1439_v2 = vmul.f32 %v12946_v29, %v1413_v28  ;;  %v1412_v41 = vsel %vm16416_vm12, %v12858_v56, %v1404_v7  ;;  %v1424_v48 = vsel %vm16416_vm12, %v1404_v7, %v12898_v60  ;;  %v8804_v56 = vld [vmem:[#allocation2 + $0x680] sm:$0xf]  ;;  %v13005_v60 = vld [vmem:[%s10805_s19 + $0x70] sm:$0xff]  ;;  %v9994_v7 = vld [vmem:[#allocation2 + $0x664] sm:$0xf] }
 0x2d2   : > { %v1432_v33 = vmul.f32 %v12921_v54, %v1424_v48  ;;  %v1435_v11 = vmul.f32 %v12946_v29, %v1412_v41  ;;  %v8788_v38 = vld [vmem:[#allocation2 + $0x660] sm:$0xf] }
 0x2d3   : > { %v1450_v57 = vpack.c.bf16 %v1437_v18, %v1436_v39  ;;  %v1451_v31 = vpack.c.bf16 %v1439_v2, %v1438_v47  ;;  %3622 = vmatpush.bf16.msra.mxu2 %v8229_v37  ;;  %3755 = vmatpush.bf16.msra.mxu1 %v8233_v53  ;;  %v8806_v37 = vld [vmem:[#allocation2 + $0x690] sm:$0xf0]  ;;  %v1419_v53 = vsel %vm16416_vm12, %v12931_v24, %v12894_v50 }
 0x2d4   : > { %v1448_v42 = vpack.c.bf16 %v1433_v22, %v1432_v33  ;;  %v1449_v45 = vpack.c.bf16 %v1435_v11, %v1434_v36  ;;  %v8809_v6 = vor.u32 %v9998_v16, %v8806_v37  ;;  %v1423_v18 = vsel %vm16416_vm12, %v12910_v40, %v12931_v24  ;;  %v9992_v11 = vld [vmem:[#allocation2 + $0x64c] sm:$0xf0]  ;;  %v8380_v5 = vld [vmem:[#allocation2 + $0x328] sm:$0xf] }
 0x2d5   : > { %1458 = vst [vmem:[#allocation2 + $0x310] sm:$0xff] %v1450_v57  ;;  %1692 = vrot.lane.b32.xlu2 %v13005_v60, %s16447_s29  ;;  %1690 = vrot.lane.b32.xlu1 %v13010_v17, %s16447_s29  ;;  %v8789_v41 = vor.u32 %v9996_v15, %v8788_v38  ;;  %v8793_v24 = vor.u32 %v9994_v7, %v8790_v30  ;;  %v8772_v57 = vld [vmem:[#allocation2 + $0x640] sm:$0xf]  ;;  %v9986_v30 = vld [vmem:[#allocation2 + $0x624] sm:$0xf] }
 0x2d6   : > { %1459 = vst [vmem:[#allocation2 + $0x318] sm:$0xff] %v1451_v31  ;;  %1688 = vrot.lane.b32.xlu0 %v13015_v62, %s16447_s29  ;;  %v1445_v48 = vmul.f32 %v12934_v8, %v1423_v18  ;;  %v1446_v22 = vmul.f32 %v12953_v21, %v1419_v53  ;;  %v8774_v31 = vld [vmem:[#allocation2 + $0x650] sm:$0xf0]  ;;  %v8773_v37 = vor.u32 %v9992_v11, %v8772_v57  ;;  %v8756_v15 = vld [vmem:[#allocation2 + $0x620] sm:$0xf]  ;;  %v13076_v11 = vld [vmem:[%s10805_s19 + $0x78] sm:$0xff] }
 0x2d7   : > { %3693 = vmatpush.bf16.msrb.mxu2 %v8821_v26  ;;  %3826 = vmatpush.bf16.msrb.mxu1 %v8825_v32  ;;  %v13019_v26 = vpop.permute.xlu2 %1520  ;;  %v8805_v32 = vor.u32 %v10000_v13, %v8804_v56  ;;  %1456 = vst [vmem:[#allocation2 + $0x300] sm:$0xff] %v1448_v42  ;;  %v13029_v47 = vpop.permute.xlu1 %1500  ;;  %v13047_v42 = vld [vmem:[%s10805_s19 + $0x38] sm:$0xff]  ;;  %v9988_v18 = vld [vmem:[#allocation2 + $0x62c] sm:$0xf0] }
 0x2d8   : > { %1457 = vst [vmem:[#allocation2 + $0x308] sm:$0xff] %v1449_v45  ;;  %v1410_v28 = vpop.permute.xlu0 %1409  ;;  %v13052_v45 = vld [vmem:[%s10805_s19 + $0x18] sm:$0xff]  ;;  %v8757_v38 = vor.u32 %v9988_v18, %v8756_v15 }
 0x2d9   : > { %v1415_v39 = vsel %vm16416_vm12, %v12894_v50, %v1410_v28  ;;  %v1427_v2 = vsel %vm16416_vm12, %v1410_v28, %v12910_v40  ;;  %v9990_v50 = vld [vmem:[#allocation2 + $0x644] sm:$0xf]  ;;  %v13042_v40 = vld [vmem:[%s10805_s19 + $0x58] sm:$0xff]  ;;  %v8758_v28 = vld [vmem:[#allocation2 + $0x630] sm:$0xf0]  ;;  %vm16451_vm12 = vcmp.lt.s32.totalorder %v10953_v19, 120 }
 0x2da   : > { %v1444_v36 = vmul.f32 %v12921_v54, %v1427_v2  ;;  %v1447_v33 = vmul.f32 %v12946_v29, %v1415_v39  ;;  %v8761_v7 = vor.u32 %v9986_v30, %v8758_v28  ;;  %v9984_v39 = vld [vmem:[#allocation2 + $0x60c] sm:$0xf0]  ;;  %v8742_v2 = vld [vmem:[#allocation2 + $0x610] sm:$0xf0] }
 0x2db   : > { %3694 = vmatpush.bf16.msrb.mxu2 %v8805_v32  ;;  %3827 = vmatpush.bf16.msrb.mxu1 %v8809_v6  ;;  %v8777_v32 = vor.u32 %v9990_v50, %v8774_v31 }
 0x2dc   : > { %v1454_v56 = vpack.c.bf16 %v1445_v48, %v1444_v36  ;;  %v1455_v16 = vpack.c.bf16 %v1447_v33, %v1446_v22  ;;  %v13070_v48 = vld [vmem:[#allocation6 + $0x28] sm:$0xff]  ;;  %v8740_v36 = vld [vmem:[#allocation2 + $0x600] sm:$0xf]  ;;  %v9982_v33 = vld [vmem:[#allocation2 + $0x604] sm:$0xf] }
 0x2dd   : > { %1698 = vrot.lane.b32.xlu2 %v13042_v40, %s16447_s29  ;;  %1696 = vrot.lane.b32.xlu1 %v13047_v42, %s16447_s29  ;;  %v13073_v22 = vperm.slane %v13070_v48, 6  ;;  %v8741_v50 = vor.u32 %v9984_v39, %v8740_v36  ;;  %v8745_v31 = vor.u32 %v9982_v33, %v8742_v2  ;;  %v13105_v36 = vld [vmem:[%s10805_s19 + $0x8] sm:$0xff]  ;;  %v13110_v33 = vld [vmem:[%s10805_s19 + $0x60] sm:$0xff] }
 0x2de   : > { %1462 = vst [vmem:[#allocation2 + $0x330] sm:$0xff] %v1454_v56  ;;  %1694 = vrot.lane.b32.xlu0 %v13052_v45, %s16447_s29  ;;  %v13083_v56 = vld [vmem:[#allocation6 + $0x20] sm:$0xff] }
 0x2df   : > { %3695 = vmatpush.bf16.msrb.mxu2 %v8789_v41  ;;  %3828 = vmatpush.bf16.msrb.mxu1 %v8793_v24  ;;  %v1527_v13 = vpop.permute.xlu2 %1526  ;;  %1463 = vst [vmem:[#allocation2 + $0x338] sm:$0xff] %v1455_v16  ;;  %v13056_v6 = vpop.permute.xlu1 %1506  ;;  %v13061_v41 = vld [vmem:[%s10805_s19 + $0x20] sm:$0xff]  ;;  %v13086_v16 = vperm.slane %v13083_v56, 6 }
 0x2e0   : > { %v13058_v53 = vpop.permute.xlu0 %1504  ;;  %v13066_v24 = vld [vmem:[%s10805_s19] sm:$0xff]  ;;  %16599 = vst [vmem:[#allocation101_spill] sm:$0xff] %v13073_v22  ;;  %v1546_v2 = vsel %vm1532_vm13, %v1527_v13, %v12925_v44 }
 0x2e1   : > { %16600 = vst [vmem:[#allocation102_spill] sm:$0xff] %v13086_v16 }
 0x2e3   : > { %3696 = vmatpush.bf16.msrb.mxu2 %v8773_v37  ;;  %3829 = vmatpush.bf16.msrb.mxu1 %v8777_v32 }
 0x2e5   : > { %1757 = vrot.lane.b32.xlu2 %v13061_v41, %s16449_s15  ;;  %1755 = vrot.lane.b32.xlu1 %v13066_v24, %s16449_s15 }
 0x2e6   : > { %1700 = vrot.lane.b32.xlu0 %v13076_v11, %s16447_s29  ;;  %s16825_s29 = sshll.u32 %s10799_s18, 7 }
 0x2e7   : > { %3697 = vmatpush.bf16.msrb.mxu2 %v8757_v38  ;;  %3830 = vmatpush.bf16.msrb.mxu1 %v8761_v7  ;;  %v13080_v57 = vpop.permute.xlu2 %1585  ;;  %v1513_v37 = vpop.permute.xlu1 %1512  ;;  %v13096_v7 = vld [vmem:[#allocation6 + $0x38] sm:$0xff] }
 0x2e8   : > { %v1539_v32 = vsel %vm1532_vm13, %v1513_v37, %v13019_v26  ;;  %v1543_v15 = vsel %vm1532_vm13, %v13058_v53, %v1513_v37  ;;  %v1511_v30 = vpop.permute.xlu0 %1510  ;;  %v13099_v39 = vperm.slane %v13096_v7, 6 }
 0x2e9   : > { %v1561_v18 = vmul.f32 %v13086_v16, %v1543_v15  ;;  %v1562_v28 = vmul.f32 %v13073_v22, %v1539_v32  ;;  %v1542_v37 = vsel %vm1532_vm13, %v12925_v44, %v1511_v30  ;;  %v13123_v32 = vld [vmem:[%s10805_s19 + $0x40] sm:$0xff] }
 0x2ea   : > { %16601 = vst [vmem:[#allocation103_spill] sm:$0xff] %v13099_v39  ;;  %v1557_v59 = vmul.f32 %v13086_v16, %v1542_v37 }
 0x2eb   : > { %3698 = vmatpush.bf16.msrb.mxu2 %v8741_v50  ;;  %3831 = vmatpush.bf16.msrb.mxu1 %v8745_v31  ;;  %v1573_v38 = vpack.c.bf16 %v1562_v28, %v1561_v18  ;;  %v13114_v50 = vld [vmem:[#allocation6 + $0x30] sm:$0xff]  ;;  %v1541_v18 = vsel %vm1532_vm13, %v13029_v47, %v12950_v35 }
 0x2ec   : > { %v13117_v31 = vperm.slane %v13114_v50, 6 }
 0x2ed   : > { %1581 = vst [vmem:[#allocation2 + $0x3a0] sm:$0xff] %v1573_v38  ;;  %1763 = vrot.lane.b32.xlu2 %v13105_v36, %s16449_s15  ;;  %1761 = vrot.lane.b32.xlu1 %v13110_v33, %s16449_s15  ;;  %v1560_v38 = vmul.f32 %v13099_v39, %v1546_v2  ;;  %v1553_v2 = vmul.f32 %v13086_v16, %v1541_v18 }
 0x2ee   : > { %16602 = vst [vmem:[#allocation104_spill] sm:$0xff] %v13117_v31  ;;  %1759 = vrot.lane.b32.xlu0 %v13123_v32, %s16449_s15 }
 0x2ef   : > { %v13127_v15 = vpop.permute.xlu2 %1591  ;;  %v1519_v28 = vpop.permute.xlu1 %1518 }
 0x2f0   : > { %v1534_v44 = vsel %vm1532_vm13, %v1519_v28, %v1527_v13  ;;  %v1538_v29 = vsel %vm1532_vm13, %v1511_v30, %v1519_v28  ;;  %v1517_v21 = vpop.permute.xlu0 %1516  ;;  %v13147_v30 = vld [vmem:[%s10805_s19 + $0x68] sm:$0xff] }
 0x2f1   : > { %v1558_v0 = vmul.f32 %v13073_v22, %v1538_v29  ;;  %v1559_v34 = vmul.f32 %v13117_v31, %v1534_v44  ;;  %v1537_v8 = vsel %vm1532_vm13, %v12950_v35, %v1517_v21  ;;  %v13152_v29 = vld [vmem:[%s10805_s19 + $0x48] sm:$0xff] }
 0x2f2   : > { %v1554_v54 = vmul.f32 %v13073_v22, %v1537_v8  ;;  %v13157_v35 = vld [vmem:[%s10805_s19 + $0x28] sm:$0xff] }
 0x2f3   : > { %v1571_v13 = vpack.c.bf16 %v1558_v0, %v1557_v59  ;;  %v1572_v9 = vpack.c.bf16 %v1560_v38, %v1559_v34  ;;  %v1544_v34 = vsel %vm1532_vm13, %v13056_v6, %v12975_v52 }
 0x2f4   : > { %v1569_v20 = vpack.c.bf16 %v1554_v54, %v1553_v2 }
 0x2f5   : > { %1579 = vst [vmem:[#allocation2 + $0x390] sm:$0xff] %v1571_v13  ;;  %1769 = vrot.lane.b32.xlu2 %v13147_v30, %s16449_s15  ;;  %1767 = vrot.lane.b32.xlu1 %v13152_v29, %s16449_s15 }
 0x2f6   : > { %1580 = vst [vmem:[#allocation2 + $0x398] sm:$0xff] %v1572_v9  ;;  %1765 = vrot.lane.b32.xlu0 %v13157_v35, %s16449_s15 }
 0x2f7   : > { %v13161_v0 = vpop.permute.xlu2 %1597  ;;  %1577 = vst [vmem:[#allocation2 + $0x380] sm:$0xff] %v1569_v20  ;;  %v1525_v59 = vpop.permute.xlu1 %1524  ;;  %v1565_v20 = vmul.f32 %v13086_v16, %v1544_v34 }
 0x2f8   : > { %v1533_v54 = vsel %vm1532_vm13, %v1517_v21, %v1525_v59  ;;  %v1545_v9 = vsel %vm1532_vm13, %v1525_v59, %v13029_v47  ;;  %v1523_v8 = vpop.permute.xlu0 %1522  ;;  %v13184_v21 = vld [vmem:[%s10805_s19 + $0x10] sm:$0xff] }
 0x2f9   : > { %v1555_v37 = vmul.f32 %v13117_v31, %v1533_v54  ;;  %v1556_v18 = vmul.f32 %v13099_v39, %v1545_v9  ;;  %v1540_v28 = vsel %vm1532_vm13, %v12975_v52, %v1523_v8 }
 0x2fa   : > { %v1566_v38 = vmul.f32 %v13073_v22, %v1540_v28 }
 0x2fb   : > { %v1570_v44 = vpack.c.bf16 %v1556_v18, %v1555_v37 }
 0x2fc   : > { %v1575_v2 = vpack.c.bf16 %v1566_v38, %v1565_v20  ;;  %v9785_v38 = vld [vmem:[#allocation8 + $0x4c] sm:$0xf] }
 0x2fd   : > { %1578 = vst [vmem:[#allocation2 + $0x388] sm:$0xff] %v1570_v44  ;;  %1775 = vrot.lane.b32.xlu2 %v13010_v17, %s16449_s15  ;;  %1773 = vrot.lane.b32.xlu1 %v13015_v62, %s16449_s15 }
 0x2fe   : > { %1583 = vst [vmem:[#allocation2 + $0x3b0] sm:$0xff] %v1575_v2  ;;  %1771 = vrot.lane.b32.xlu0 %v13184_v21, %s16449_s15 }
 0x2ff   : > { %v13188_v52 = vpop.permute.xlu2 %1603  ;;  %v1531_v47 = vpop.permute.xlu1 %1530 }
 0x300   : > { %v1536_v13 = vsel %vm1532_vm13, %v1523_v8, %v1531_v47  ;;  %v1548_v34 = vsel %vm1532_vm13, %v1531_v47, %v13056_v6  ;;  %v1529_v59 = vpop.permute.xlu0 %1528  ;;  %v7962_v6 = vld [vmem:[#allocation8 + $0x64] sm:$0xf0] }
 0x301   : > { %v1567_v54 = vmul.f32 %v13117_v31, %v1536_v13  ;;  %v1568_v9 = vmul.f32 %v13099_v39, %v1548_v34  ;;  %v1535_v37 = vsel %vm1532_vm13, %v13019_v26, %v1529_v59  ;;  %v1547_v18 = vsel %vm1532_vm13, %v1529_v59, %v13058_v53  ;;  %v7924_v13 = vld [vmem:[#allocation8 + $0x8] sm:$0xf]  ;;  %v9780_v34 = vld [vmem:[#allocation8 + $0x20] sm:$0xf0] }
 0x302   : > { %v1563_v28 = vmul.f32 %v13117_v31, %v1535_v37  ;;  %v1564_v8 = vmul.f32 %v13099_v39, %v1547_v18  ;;  %v13205_v2 = vor.u32 %v9785_v38, %v7962_v6  ;;  %v13218_v59 = vor.u32 %v9780_v34, %v7924_v13 }
 0x303   : > { %v1576_v20 = vpack.c.bf16 %v1568_v9, %v1567_v54  ;;  %v13221_v54 = vperm.slane %v13083_v56, 7  ;;  %v13226_v9 = vperm.slane %v13070_v48, 7  ;;  %v13246_v13 = vperm.slane %v13070_v48, 5 }
 0x304   : > { %v1574_v44 = vpack.c.bf16 %v1564_v8, %v1563_v28  ;;  %3685 = vmatmul.bf16.gmra.mxu1 %v13205_v2  ;;  %3623 = vmatmul.bf16.vlgmr.msra.gmra.mxu2 %v13218_v59  ;;  %v13249_v39 = vperm.slane %v13096_v7, 7 }
 0x305   : > { %1584 = vst [vmem:[#allocation2 + $0x3b8] sm:$0xff] %v1576_v20  ;;  %1781 = vrot.lane.b32.xlu2 %v13047_v42, %s16449_s15  ;;  %1779 = vrot.lane.b32.xlu1 %v13052_v45, %s16449_s15 }
 0x306   : > { %1582 = vst [vmem:[#allocation2 + $0x3a8] sm:$0xff] %v1574_v44  ;;  %1777 = vrot.lane.b32.xlu0 %v13005_v60, %s16449_s15  ;;  %v13243_v44 = vperm.slane %v13083_v56, 5 }
 0x307   : > { %v1610_v26 = vpop.permute.xlu2 %1609  ;;  %v13214_v53 = vpop.permute.xlu1 %1589  ;;  %16603 = vst [vmem:[#allocation105_spill] sm:$0xff] %v13221_v54 }
 0x308   : > { %v13216_v47 = vpop.permute.xlu0 %1587  ;;  %16604 = vst [vmem:[#allocation106_spill] sm:$0xff] %v13226_v9  ;;  %v1630_v31 = vsel %vm1617_vm14, %v1610_v26, %v13080_v57  ;;  %v1476_v48 = vmul.f32 %v13123_v32, %v13243_v44 }
 0x309   : > { %16605 = vst [vmem:[#allocation107_spill] sm:$0xff] %v13249_v39 }
 0x30d   : > { %1785 = vrot.lane.b32.xlu1 %v13076_v11, %s16449_s15 }
 0x30e   : > { %1783 = vrot.lane.b32.xlu0 %v13042_v40, %s16449_s15 }
 0x30f   : > { %v13230_v37 = vpop.permute.xlu2 %1615  ;;  %v1596_v18 = vpop.permute.xlu1 %1595 }
 0x310   : > { %v1623_v28 = vsel %vm1617_vm14, %v1596_v18, %v13188_v52  ;;  %v1627_v8 = vsel %vm1617_vm14, %v13216_v47, %v1596_v18  ;;  %v1594_v20 = vpop.permute.xlu0 %1593 }
 0x311   : > { %v1642_v38 = vmul.f32 %v13221_v54, %v1627_v8  ;;  %v1643_v6 = vmul.f32 %v13226_v9, %v1623_v28  ;;  %v1626_v18 = vsel %vm1617_vm14, %v13080_v57, %v1594_v20  ;;  %v13258_v28 = vperm.slane %v13114_v50, 7 }
 0x312   : > { %v1477_v8 = vmul.f32 %v13152_v29, %v13246_v13  ;;  %v13272_v57 = vperm.slane %v13114_v50, 5  ;;  %v1641_v29 = vmul.f32 %v13249_v39, %v1630_v31  ;;  %v13283_v50 = vperm.slane %v13096_v7, 5 }
 0x313   : > { %v1656_v34 = vpack.c.bf16 %v1643_v6, %v1642_v38  ;;  %16606 = vst [vmem:[#allocation108_spill] sm:$0xff] %v13258_v28  ;;  %v1480_v38 = vmul.f32 %v13110_v33, %v13243_v44  ;;  %v1481_v6 = vmul.f32 %v13147_v30, %v13246_v13  ;;  %v1638_v33 = vmul.f32 %v13221_v54, %v1626_v18  ;;  %v7952_v18 = vld [vmem:[#allocation8 + $0x40] sm:$0xf] }
 0x314   : > { %3756 = vmatmul.bf16.vlgmr.msra.gmra.mxu1 %v13218_v59  ;;  %v1488_v22 = vpack.c.bf16 %v1477_v8, %v1476_v48  ;;  %v1472_v48 = vmul.f32 %v13061_v41, %v13243_v44 }
 0x315   : > { %1664 = vst [vmem:[#allocation2 + $0x3d0] sm:$0xff] %v1656_v34  ;;  %v1490_v16 = vpack.c.bf16 %v1481_v6, %v1480_v38  ;;  %v9787_v38 = vld [vmem:[#allocation8 + $0x58] sm:$0xf0]  ;;  %v1482_v6 = vmul.f32 %v13005_v60, %v13272_v57 }
 0x316   : > { %1496 = vst [vmem:[#allocation2 + $0x360] sm:$0xff] %v1488_v22  ;;  %v13301_v22 = vor.u32 %v9787_v38, %v7952_v18  ;;  %v1474_v18 = vmul.f32 %v13015_v62, %v13272_v57 }
 0x317   : > { %v13260_v56 = vpop.permute.xlu2 %1674  ;;  %v1602_v34 = vpop.permute.xlu1 %1601  ;;  %1498 = vst [vmem:[#allocation2 + $0x370] sm:$0xff] %v1490_v16 }
 0x318   : > { %v1618_v49 = vsel %vm1617_vm14, %v1602_v34, %v1610_v26  ;;  %v1622_v4 = vsel %vm1617_vm14, %v1594_v20, %v1602_v34  ;;  %v1600_v32 = vpop.permute.xlu0 %1599  ;;  %v1468_v26 = vmul.f32 %v13066_v24, %v13243_v44  ;;  %v1469_v20 = vmul.f32 %v13105_v36, %v13246_v13  ;;  %3628 = vmatmul.bf16.gmra.mxu2 %v13301_v22 }
 0x319   : > { %v1639_v27 = vmul.f32 %v13226_v9, %v1622_v4  ;;  %v1640_v30 = vmul.f32 %v13258_v28, %v1618_v49  ;;  %v1473_v4 = vmul.f32 %v13157_v35, %v13246_v13  ;;  %v1628_v49 = vsel %vm1617_vm14, %v13214_v53, %v13161_v0 }
 0x31a   : > { %v1633_v24 = vsel %vm1617_vm14, %v13230_v37, %v13127_v15  ;;  %v1629_v41 = vsel %vm1617_vm14, %v13127_v15, %v1600_v32  ;;  %v1478_v36 = vmul.f32 %v13010_v17, %v13272_v57  ;;  %v1479_v35 = vmul.f32 %v13042_v40, %v13283_v50 }
 0x31b   : > { %v1654_v31 = vpack.c.bf16 %v1639_v27, %v1638_v33  ;;  %v1655_v8 = vpack.c.bf16 %v1641_v29, %v1640_v30  ;;  %v1484_v27 = vpack.c.bf16 %v1469_v20, %v1468_v26  ;;  %v1486_v16 = vpack.c.bf16 %v1473_v4, %v1472_v48 }
 0x31c   : > { %v1646_v34 = vmul.f32 %v13221_v54, %v1628_v49  ;;  %v1653_v29 = vmul.f32 %v13249_v39, %v1633_v24  ;;  %v1483_v33 = vmul.f32 %v13076_v11, %v13283_v50  ;;  %v1650_v30 = vmul.f32 %v13221_v54, %v1629_v41  ;;  %v9886_v54 = vld [vmem:[#allocation2 + $0x304] sm:$0xf] }
 0x31d   : > { %1662 = vst [vmem:[#allocation2 + $0x3c0] sm:$0xff] %v1654_v31  ;;  %v1489_v60 = vpack.c.bf16 %v1479_v35, %v1478_v36 }
 0x31e   : > { %1663 = vst [vmem:[#allocation2 + $0x3c8] sm:$0xff] %v1655_v8  ;;  %v1491_v31 = vpack.c.bf16 %v1483_v33, %v1482_v6  ;;  %v9782_v33 = vld [vmem:[#allocation8 + $0x30] sm:$0xf0] }
 0x31f   : > { %v13306_v7 = vpop.permute.xlu2 %1680  ;;  %v1608_v15 = vpop.permute.xlu1 %1607  ;;  %1492 = vst [vmem:[#allocation2 + $0x340] sm:$0xff] %v1484_v27 }
 0x320   : > { %v1621_v17 = vsel %vm1617_vm14, %v1608_v15, %v13230_v37  ;;  %v1625_v40 = vsel %vm1617_vm14, %v1600_v32, %v1608_v15  ;;  %v1606_v26 = vpop.permute.xlu0 %1605  ;;  %1494 = vst [vmem:[#allocation2 + $0x350] sm:$0xff] %v1486_v16  ;;  %v1470_v37 = vmul.f32 %v13184_v21, %v13272_v57  ;;  %v1471_v32 = vmul.f32 %v13052_v45, %v13283_v50  ;;  %v7940_v15 = vld [vmem:[#allocation8 + $0x18] sm:$0xf] }
 0x321   : > { %v1651_v20 = vmul.f32 %v13226_v9, %v1625_v40  ;;  %v1652_v48 = vmul.f32 %v13258_v28, %v1621_v17  ;;  %v1624_v11 = vsel %vm1617_vm14, %v13161_v0, %v1606_v26  ;;  %1497 = vst [vmem:[#allocation2 + $0x368] sm:$0xff] %v1489_v60  ;;  %v1475_v0 = vmul.f32 %v13047_v42, %v13283_v50 }
 0x322   : > { %v1647_v8 = vmul.f32 %v13226_v9, %v1624_v11  ;;  %1499 = vst [vmem:[#allocation2 + $0x378] sm:$0xff] %v1491_v31  ;;  %v1485_v24 = vpack.c.bf16 %v1471_v32, %v1470_v37  ;;  %v9912_v32 = vld [vmem:[#allocation2 + $0x3cc] sm:$0xf0]  ;;  %v8356_v9 = vld [vmem:[#allocation2 + $0x300] sm:$0xf] }
 0x323   : > { %v1660_v38 = vpack.c.bf16 %v1651_v20, %v1650_v30  ;;  %v1661_v4 = vpack.c.bf16 %v1653_v29, %v1652_v48  ;;  %v1487_v21 = vpack.c.bf16 %v1475_v0, %v1474_v18  ;;  %v8454_v18 = vld [vmem:[#allocation2 + $0x3d0] sm:$0xf0] }
 0x324   : > { %v1658_v49 = vpack.c.bf16 %v1647_v8, %v1646_v34  ;;  %3761 = vmatmul.bf16.gmra.mxu1 %v13301_v22  ;;  %1493 = vst [vmem:[#allocation2 + $0x348] sm:$0xff] %v1485_v24  ;;  %v8452_v8 = vld [vmem:[#allocation2 + $0x3c0] sm:$0xf]  ;;  %v9910_v37 = vld [vmem:[#allocation2 + $0x3c4] sm:$0xf] }
 0x325   : > { %1668 = vst [vmem:[#allocation2 + $0x3f0] sm:$0xff] %v1660_v38  ;;  %v8453_v38 = vor.u32 %v9912_v32, %v8452_v8  ;;  %v8438_v0 = vld [vmem:[#allocation2 + $0x3b0] sm:$0xf0] }
 0x326   : > { %1669 = vst [vmem:[#allocation2 + $0x3f8] sm:$0xff] %v1661_v4  ;;  %v8457_v4 = vor.u32 %v9910_v37, %v8454_v18  ;;  %v8404_v18 = vld [vmem:[#allocation2 + $0x360] sm:$0xf] }
 0x327   : > { %v13339_v27 = vpop.permute.xlu2 %1686  ;;  %1666 = vst [vmem:[#allocation2 + $0x3e0] sm:$0xff] %v1658_v49  ;;  %v1614_v45 = vpop.permute.xlu1 %1613  ;;  %v9908_v49 = vld [vmem:[#allocation2 + $0x3ac] sm:$0xf0]  ;;  %v8390_v3 = vld [vmem:[#allocation2 + $0x350] sm:$0xf0] }
 0x328   : > { %v1620_v62 = vsel %vm1617_vm14, %v1606_v26, %v1614_v45  ;;  %v1632_v41 = vsel %vm1617_vm14, %v1614_v45, %v13214_v53  ;;  %v1612_v16 = vpop.permute.xlu0 %1611  ;;  %1495 = vst [vmem:[#allocation2 + $0x358] sm:$0xff] %v1487_v21  ;;  %v13357_v26 = vor.u32 %v9782_v33, %v7940_v15  ;;  %v13368_v45 = vld [vmem:[#allocation6 + $0x40] sm:$0xff]  ;;  %v9904_v33 = vld [vmem:[#allocation2 + $0x38c] sm:$0xf0] }
 0x329   : > { %v1648_v42 = vmul.f32 %v13258_v28, %v1620_v62  ;;  %v1649_v36 = vmul.f32 %v13249_v39, %v1632_v41  ;;  %v1619_v35 = vsel %vm1617_vm14, %v13188_v52, %v1612_v16  ;;  %v1631_v6 = vsel %vm1617_vm14, %v1612_v16, %v13216_v47  ;;  %v13373_v41 = vld [vmem:[#allocation6 + $0x48] sm:$0xff] }
 0x32a   : > { %v1644_v34 = vmul.f32 %v13258_v28, %v1619_v35  ;;  %v1645_v29 = vmul.f32 %v13249_v39, %v1631_v6  ;;  %8834 = vmatmul.msk.bf16.vlgmr.msrb.gmra.mxu2 %vm3570_vm15, %v13357_v26  ;;  %v13371_v62 = vperm.slane %v13368_v45, 0  ;;  %v13376_v16 = vperm.slane %v13373_v41, 0  ;;  %v9906_v35 = vld [vmem:[#allocation2 + $0x3a4] sm:$0xf]  ;;  %v8428_v39 = vld [vmem:[#allocation2 + $0x388] sm:$0xf] }
 0x32b   : > { %v1659_v53 = vpack.c.bf16 %v1649_v36, %v1648_v42  ;;  %v8436_v36 = vld [vmem:[#allocation2 + $0x3a0] sm:$0xf]  ;;  %v8441_v15 = vor.u32 %v9906_v35, %v8438_v0  ;;  %v9898_v0 = vld [vmem:[#allocation2 + $0x364] sm:$0xf]  ;;  %v7968_v35 = vld [vmem:[#allocation8 + $0x50] sm:$0xf] }
 0x32c   : > { %v1657_v30 = vpack.c.bf16 %v1645_v29, %v1644_v34  ;;  %v9916_v17 = vld [vmem:[#allocation2 + $0x3ec] sm:$0xf0]  ;;  %v8470_v40 = vld [vmem:[#allocation2 + $0x3f0] sm:$0xf0]  ;;  %16607 = vst [vmem:[#allocation109_spill] sm:$0xff] %v13371_v62 }
 0x32d   : > { %1667 = vst [vmem:[#allocation2 + $0x3e8] sm:$0xff] %v1659_v53  ;;  %v9917_v21 = vld [vmem:[#allocation2 + $0x3f4] sm:$0xf0]  ;;  %v8437_v53 = vor.u32 %v9908_v49, %v8436_v36  ;;  %v9900_v49 = vld [vmem:[#allocation2 + $0x36c] sm:$0xf0] }
 0x32e   : > { %1665 = vst [vmem:[#allocation2 + $0x3d8] sm:$0xff] %v1657_v30  ;;  %v8468_v52 = vld [vmem:[#allocation2 + $0x3e0] sm:$0xf]  ;;  %v9914_v60 = vld [vmem:[#allocation2 + $0x3e4] sm:$0xf] }
 0x32f   : > { %v13361_v47 = vpop.permute.xlu2 %1692  ;;  %v13363_v20 = vpop.permute.xlu1 %1672  ;;  %v8469_v48 = vor.u32 %v9916_v17, %v8468_v52  ;;  %v8473_v11 = vor.u32 %v9914_v60, %v8470_v40  ;;  %16608 = vst [vmem:[#allocation110_spill] sm:$0xff] %v13376_v16  ;;  %v8422_v30 = vld [vmem:[#allocation2 + $0x390] sm:$0xf0]  ;;  %v8420_v60 = vld [vmem:[#allocation2 + $0x380] sm:$0xf] }
 0x330   : > { %v13365_v31 = vpop.permute.xlu0 %1670 }
 0x331   : > { %3634 = vmatpush.bf16.msra.mxu3 %v8469_v48  ;;  %3767 = vmatpush.bf16.msra.mxu2 %v8473_v11  ;;  %v9902_v48 = vld [vmem:[#allocation2 + $0x384] sm:$0xf]  ;;  %v8460_v11 = vld [vmem:[#allocation2 + $0x3c8] sm:$0xf] }
 0x332   : > { %v8425_v36 = vor.u32 %v9902_v48, %v8422_v30  ;;  %v9905_v30 = vld [vmem:[#allocation2 + $0x394] sm:$0xf0] }
 0x334   : > { %v8476_v24 = vld [vmem:[#allocation2 + $0x3e8] sm:$0xf]  ;;  %8836 = vmatmul.msk.bf16.vlgmr.msrb.gmra.mxu1 %vm3570_vm15, %v13357_v26 }
 0x335   : > { %3635 = vmatpush.bf16.msra.mxu3 %v8453_v38  ;;  %3768 = vmatpush.bf16.msra.mxu2 %v8457_v4  ;;  %v8477_v42 = vor.u32 %v9917_v21, %v8476_v24  ;;  %v9913_v6 = vld [vmem:[#allocation2 + $0x3d4] sm:$0xf0]  ;;  %v8444_v38 = vld [vmem:[#allocation2 + $0x3a8] sm:$0xf]  ;;  %v8406_v24 = vld [vmem:[#allocation2 + $0x370] sm:$0xf0] }
 0x336   : > { %v8461_v32 = vor.u32 %v9913_v6, %v8460_v11  ;;  %v9909_v4 = vld [vmem:[#allocation2 + $0x3b4] sm:$0xf0]  ;;  %v8409_v6 = vor.u32 %v9898_v0, %v8406_v24  ;;  %v9894_v11 = vld [vmem:[#allocation2 + $0x344] sm:$0xf] }
 0x337   : > { %v13380_v34 = vpop.permute.xlu2 %1698  ;;  %v1679_v29 = vpop.permute.xlu1 %1678  ;;  %3900 = vmatpush.bf16.msra.mxu1 %v8477_v42  ;;  %v8421_v42 = vor.u32 %v9904_v33, %v8420_v60  ;;  %v8393_v24 = vor.u32 %v9894_v11, %v8390_v3  ;;  %v8372_v11 = vld [vmem:[#allocation2 + $0x320] sm:$0xf] }
 0x338   : > { %v1707_v17 = vsel %vm16451_vm12, %v1679_v29, %v13339_v27  ;;  %v1711_v40 = vsel %vm16451_vm12, %v13365_v31, %v1679_v29  ;;  %v13388_v52 = vpop.permute.xlu0 %1676  ;;  %v9789_v29 = vld [vmem:[#allocation8 + $0x68] sm:$0xf0] }
 0x339   : > { %v1723_v8 = vmul.f32 %v13371_v62, %v1711_v40  ;;  %v1724_v37 = vmul.f32 %v13376_v16, %v1707_v17  ;;  %3636 = vmatpush.bf16.msra.mxu3 %v8437_v53  ;;  %3769 = vmatpush.bf16.msra.mxu2 %v8441_v15  ;;  %v13392_v28 = vor.u32 %v9789_v29, %v7968_v35  ;;  %v8388_v17 = vld [vmem:[#allocation2 + $0x340] sm:$0xf]  ;;  %v9896_v40 = vld [vmem:[#allocation2 + $0x34c] sm:$0xf0]  ;;  %v8374_v35 = vld [vmem:[#allocation2 + $0x330] sm:$0xf0] }
 0x33a   : > { %v8405_v53 = vor.u32 %v9900_v49, %v8404_v18  ;;  %v8445_v15 = vor.u32 %v9909_v4, %v8444_v38  ;;  %v8412_v18 = vld [vmem:[#allocation2 + $0x368] sm:$0xf]  ;;  %v9901_v38 = vld [vmem:[#allocation2 + $0x374] sm:$0xf0] }
 0x33b   : > { %v1739_v21 = vpack.c.bf16 %v1724_v37, %v1723_v8  ;;  %3901 = vmatpush.bf16.msra.mxu1 %v8461_v32  ;;  %8835 = vmatmul.msk.bf16.gmra.mxu2 %vm3570_vm15, %v13392_v28  ;;  %v8389_v37 = vor.u32 %v9896_v40, %v8388_v17  ;;  %v8429_v32 = vor.u32 %v9905_v30, %v8428_v39  ;;  %v13406_v29 = vld [vmem:[#allocation6 + $0x58] sm:$0xff] }
 0x33c   : > { %v13409_v39 = vperm.slane %v13406_v29, 0  ;;  %v9897_v17 = vld [vmem:[#allocation2 + $0x354] sm:$0xf0]  ;;  %v1717_v40 = vsel %vm16451_vm12, %v13380_v34, %v13260_v56  ;;  %v1712_v30 = vsel %vm16451_vm12, %v13363_v20, %v13306_v7 }
 0x33d   : > { %1747 = vst [vmem:[#allocation2 + $0x400] sm:$0xff] %v1739_v21  ;;  %3637 = vmatpush.bf16.msra.mxu3 %v8421_v42  ;;  %3770 = vmatpush.bf16.msra.mxu2 %v8425_v36  ;;  %v8413_v42 = vor.u32 %v9901_v38, %v8412_v18  ;;  %v9892_v36 = vld [vmem:[#allocation2 + $0x32c] sm:$0xf0]  ;;  %v8086_v18 = vld [vmem:[#allocation2 + $0xf0] sm:$0xf0] }
 0x33e   : > { %16609 = vst [vmem:[#allocation111_spill] sm:$0xff] %v13409_v39  ;;  %v1734_v38 = vmul.f32 %v13409_v39, %v1717_v40  ;;  %v9821_v40 = vld [vmem:[#allocation2 + $0xf4] sm:$0xf0] }
 0x33f   : > { %v1685_v33 = vpop.permute.xlu1 %1684  ;;  %3902 = vmatpush.bf16.msra.mxu1 %v8445_v15  ;;  %v13402_v4 = vpop.permute.xlu2 %1757  ;;  %v8396_v15 = vld [vmem:[#allocation2 + $0x348] sm:$0xf] }
 0x340   : > { %v1710_v60 = vsel %vm16451_vm12, %v1685_v33, %v13361_v47  ;;  %v1714_v48 = vsel %vm16451_vm12, %v13388_v52, %v1685_v33  ;;  %v1683_v8 = vpop.permute.xlu0 %1682  ;;  %v9890_v33 = vld [vmem:[#allocation2 + $0x324] sm:$0xf] }
 0x341   : > { %v1735_v49 = vmul.f32 %v13371_v62, %v1714_v48  ;;  %v1736_v0 = vmul.f32 %v13376_v16, %v1710_v60  ;;  %3638 = vmatpush.bf16.msra.mxu3 %v8405_v53  ;;  %3771 = vmatpush.bf16.msra.mxu2 %v8409_v6  ;;  %v1713_v3 = vsel %vm16451_vm12, %v13260_v56, %v1683_v8  ;;  %v13418_v53 = vld [vmem:[#allocation6 + $0x50] sm:$0xff] }
 0x342   : > { %v13421_v6 = vperm.slane %v13418_v53, 0  ;;  %v8373_v56 = vor.u32 %v9892_v36, %v8372_v11  ;;  %v8377_v48 = vor.u32 %v9890_v33, %v8374_v35  ;;  %v8092_v33 = vld [vmem:[#allocation2 + $0xe8] sm:$0xf] }
 0x343   : > { %v1745_v21 = vpack.c.bf16 %v1736_v0, %v1735_v49  ;;  %3903 = vmatpush.bf16.msra.mxu1 %v8429_v32  ;;  %v8397_v32 = vor.u32 %v9897_v17, %v8396_v15  ;;  %v1731_v49 = vmul.f32 %v13371_v62, %v1713_v3  ;;  %v9818_v17 = vld [vmem:[#allocation2 + $0xe4] sm:$0xf]  ;;  %v7926_v3 = vld [vmem:[#allocation8 + $0x24] sm:$0xf0]  ;;  %v8093_v61 = vor.u32 %v9821_v40, %v8092_v33  ;;  %v9813_v40 = vld [vmem:[#allocation2 + $0xb4] sm:$0xf0] }
 0x344   : > { %16610 = vst [vmem:[#allocation112_spill] sm:$0xff] %v13421_v6  ;;  %8837 = vmatmul.msk.bf16.gmra.mxu1 %vm3570_vm15, %v13392_v28  ;;  %v8089_v58 = vor.u32 %v9818_v17, %v8086_v18  ;;  %v8038_v33 = vld [vmem:[#allocation2 + $0x90] sm:$0xf0] }
 0x345   : > { %1753 = vst [vmem:[#allocation2 + $0x430] sm:$0xff] %v1745_v21  ;;  %3639 = vmatpush.bf16.msra.mxu3 %v8389_v37  ;;  %3772 = vmatpush.bf16.msra.mxu2 %v8393_v24  ;;  %v9888_v37 = vld [vmem:[#allocation2 + $0x30c] sm:$0xf0] }
 0x346   : > { %v8357_v63 = vor.u32 %v9888_v37, %v8356_v9 }
 0x347   : > { %v1691_v60 = vpop.permute.xlu1 %1690  ;;  %3904 = vmatpush.bf16.msra.mxu1 %v8413_v42  ;;  %v8358_v42 = vld [vmem:[#allocation2 + $0x310] sm:$0xf0] }
 0x348   : > { %v1705_v0 = vsel %vm16451_vm12, %v1691_v60, %v13380_v34  ;;  %v1709_v24 = vsel %vm16451_vm12, %v1683_v8, %v1691_v60  ;;  %v1689_v21 = vpop.permute.xlu0 %1688  ;;  %v9777_v34 = vld [vmem:[#allocation8 + $0xc] sm:$0xf]  ;;  %v1727_v8 = vmul.f32 %v13371_v62, %v1712_v30  ;;  %v9893_v60 = vld [vmem:[#allocation2 + $0x334] sm:$0xf0]  ;;  %v8361_v1 = vor.u32 %v9886_v54, %v8358_v42  ;;  %v8364_v30 = vld [vmem:[#allocation2 + $0x308] sm:$0xf] }
 0x349   : > { %v1732_v36 = vmul.f32 %v13376_v16, %v1709_v24  ;;  %v1733_v35 = vmul.f32 %v13421_v6, %v1705_v0  ;;  %v1708_v15 = vsel %vm16451_vm12, %v13306_v7, %v1689_v21  ;;  %3640 = vmatpush.bf16.msra.mxu3 %v8373_v56  ;;  %3773 = vmatpush.bf16.msra.mxu2 %v8377_v48  ;;  %v13443_v24 = vpop.permute.xlu2 %1763  ;;  %v9814_v7 = vld [vmem:[#allocation2 + $0xc4] sm:$0xf]  ;;  %v8076_v56 = vld [vmem:[#allocation2 + $0xc8] sm:$0xf]  ;;  %v9817_v48 = vld [vmem:[#allocation2 + $0xd4] sm:$0xf0] }
 0x34a   : > { %v1728_v11 = vmul.f32 %v13376_v16, %v1708_v15  ;;  %v9889_v62 = vld [vmem:[#allocation2 + $0x314] sm:$0xf0]  ;;  %v13445_v15 = vor.u32 %v9777_v34, %v7926_v3  ;;  %v8381_v16 = vor.u32 %v9893_v60, %v8380_v5  ;;  %v8094_v54 = vld [vmem:[#allocation2 + $0xf8] sm:$0xf0]  ;;  %v8073_v37 = vor.u32 %v9814_v7, %v8070_v12  ;;  %v9810_v12 = vld [vmem:[#allocation2 + $0xa4] sm:$0xf] }
 0x34b   : > { %v1743_v0 = vpack.c.bf16 %v1732_v36, %v1731_v49  ;;  %v1744_v51 = vpack.c.bf16 %v1734_v38, %v1733_v35  ;;  %3905 = vmatpush.bf16.msra.mxu1 %v8397_v32  ;;  %v8077_v32 = vor.u32 %v9817_v48, %v8076_v56  ;;  %v8365_v18 = vor.u32 %v9889_v62, %v8364_v30  ;;  %v7916_v38 = vld [vmem:[#allocation8] sm:$0xf]  ;;  %v9779_v49 = vld [vmem:[#allocation8 + $0x18] sm:$0xf0]  ;;  %v9819_v62 = vld [vmem:[#allocation2 + $0xec] sm:$0xf] }
 0x34c   : > { %v1741_v55 = vpack.c.bf16 %v1728_v11, %v1727_v8  ;;  %v8054_v36 = vld [vmem:[#allocation2 + $0xb0] sm:$0xf0]  ;;  %v8097_v35 = vor.u32 %v9819_v62, %v8094_v54  ;;  %v9815_v34 = vld [vmem:[#allocation2 + $0xcc] sm:$0xf]  ;;  %v9809_v60 = vld [vmem:[#allocation2 + $0x94] sm:$0xf0] }
 0x34d   : > { %1751 = vst [vmem:[#allocation2 + $0x420] sm:$0xff] %v1743_v0  ;;  %3641 = vmatpush.bf16.msra.mxu3 %v8357_v63  ;;  %3774 = vmatpush.bf16.msra.mxu2 %v8361_v1  ;;  %v9806_v56 = vld [vmem:[#allocation2 + $0x84] sm:$0xf]  ;;  %v8044_v48 = vld [vmem:[#allocation2 + $0x88] sm:$0xf] }
 0x34e   : > { %1752 = vst [vmem:[#allocation2 + $0x428] sm:$0xff] %v1744_v51  ;;  %v8022_v30 = vld [vmem:[#allocation2 + $0x70] sm:$0xf0]  ;;  %v9811_v54 = vld [vmem:[#allocation2 + $0xac] sm:$0xf] }
 0x34f   : > { %1749 = vst [vmem:[#allocation2 + $0x410] sm:$0xff] %v1741_v55  ;;  %v1697_v9 = vpop.permute.xlu1 %1696  ;;  %3906 = vmatpush.bf16.msra.mxu1 %v8381_v16  ;;  %v13454_v55 = vor.u32 %v9779_v49, %v7916_v38  ;;  %v8028_v38 = vld [vmem:[#allocation2 + $0x68] sm:$0xf]  ;;  %v9805_v49 = vld [vmem:[#allocation2 + $0x74] sm:$0xf0] }
 0x350   : > { %v1704_v42 = vsel %vm16451_vm12, %v1689_v21, %v1697_v9  ;;  %v1716_v63 = vsel %vm16451_vm12, %v1697_v9, %v13363_v20  ;;  %v1695_v5 = vpop.permute.xlu0 %1694  ;;  %3642 = vmatmul.bf16.vlgmr.msra.gmra.mxu3 %v13445_v15  ;;  %3775 = vmatmul.bf16.vlgmr.msra.gmra.mxu2 %v13445_v15  ;;  %v8060_v20 = vld [vmem:[#allocation2 + $0xa8] sm:$0xf] }
 0x351   : > { %3710 = vmatpush.bf16.msrb.mxu3 %v8089_v58  ;;  %3843 = vmatpush.bf16.msrb.mxu2 %v8093_v61  ;;  %v1729_v61 = vmul.f32 %v13421_v6, %v1704_v42  ;;  %v1730_v58 = vmul.f32 %v13409_v39, %v1716_v63  ;;  %v1703_v1 = vsel %vm16451_vm12, %v13339_v27, %v1695_v5  ;;  %v8078_v27 = vld [vmem:[#allocation2 + $0xd8] sm:$0xf0]  ;;  %v13467_v11 = vpop.permute.xlu2 %1769 }
 0x352   : > { %v1715_v51 = vsel %vm16451_vm12, %v1695_v5, %v13365_v31  ;;  %v1725_v16 = vmul.f32 %v13421_v6, %v1703_v1  ;;  %3585 = vmatmul.bf16.vlgmr.msra.gmra.mxu0 %v13454_v55  ;;  %v8057_v31 = vor.u32 %v9810_v12, %v8054_v36  ;;  %v8061_v8 = vor.u32 %v9813_v40, %v8060_v20  ;;  %v8062_v5 = vld [vmem:[#allocation2 + $0xb8] sm:$0xf0]  ;;  %v9798_v36 = vld [vmem:[#allocation2 + $0x44] sm:$0xf] }
 0x353   : > { %v1726_v21 = vmul.f32 %v13409_v39, %v1715_v51  ;;  %v1742_v17 = vpack.c.bf16 %v1730_v58, %v1729_v61  ;;  %3907 = vmatpush.bf16.msra.mxu1 %v8365_v18  ;;  %v8081_v0 = vor.u32 %v9815_v34, %v8078_v27  ;;  %v9802_v18 = vld [vmem:[#allocation2 + $0x64] sm:$0xf]  ;;  %v7954_v58 = vld [vmem:[#allocation8 + $0x5c] sm:$0xf0]  ;;  %v8065_v12 = vor.u32 %v9811_v54, %v8062_v5  ;;  %v8046_v20 = vld [vmem:[#allocation2 + $0x98] sm:$0xf0] }
 0x354   : > { %v9784_v61 = vld [vmem:[#allocation8 + $0x44] sm:$0xf]  ;;  %v7944_v34 = vld [vmem:[#allocation8 + $0x38] sm:$0xf]  ;;  %v9786_v27 = vld [vmem:[#allocation8 + $0x50] sm:$0xf0] }
 0x355   : > { %3711 = vmatpush.bf16.msrb.mxu3 %v8073_v37  ;;  %3844 = vmatpush.bf16.msrb.mxu2 %v8077_v32  ;;  %v1740_v3 = vpack.c.bf16 %v1726_v21, %v1725_v16  ;;  %1750 = vst [vmem:[#allocation2 + $0x418] sm:$0xff] %v1742_v17  ;;  %v8041_v37 = vor.u32 %v9806_v56, %v8038_v33  ;;  %v9807_v17 = vld [vmem:[#allocation2 + $0x8c] sm:$0xf]  ;;  %v7990_v54 = vld [vmem:[#allocation2 + $0x30] sm:$0xf0] }
 0x356   : > { %3908 = vmatmul.bf16.vlgmr.msra.gmra.mxu1 %v13445_v15  ;;  %v8045_v32 = vor.u32 %v9809_v60, %v8044_v48  ;;  %v8025_v16 = vor.u32 %v9802_v18, %v8022_v30  ;;  %v8029_v21 = vor.u32 %v9805_v49, %v8028_v38  ;;  %v8049_v40 = vor.u32 %v9807_v17, %v8046_v20  ;;  %v9803_v33 = vld [vmem:[#allocation2 + $0x6c] sm:$0xf]  ;;  %v8030_v60 = vld [vmem:[#allocation2 + $0x78] sm:$0xf0]  ;;  %v7996_v18 = vld [vmem:[#allocation2 + $0x28] sm:$0xf] }
 0x357   : > { %3976 = vmatpush.bf16.msrb.mxu1 %v8097_v35  ;;  %1748 = vst [vmem:[#allocation2 + $0x408] sm:$0xff] %v1740_v3  ;;  %v13469_v7 = vpop.permute.xlu1 %1755  ;;  %v8006_v35 = vld [vmem:[#allocation2 + $0x50] sm:$0xf0]  ;;  %v9799_v49 = vld [vmem:[#allocation2 + $0x4c] sm:$0xf] }
 0x358   : > { %v1701_v9 = vpop.permute.xlu0 %1700  ;;  %v8009_v48 = vor.u32 %v9798_v36, %v8006_v35  ;;  %v7974_v38 = vld [vmem:[#allocation2 + $0x10] sm:$0xf0]  ;;  %v9790_v5 = vld [vmem:[#allocation2 + $0x4] sm:$0xf]  ;;  %v13501_v36 = vperm.slane %v13368_v45, 1 }
 0x359   : > { %3712 = vmatpush.bf16.msrb.mxu3 %v8057_v31  ;;  %3845 = vmatpush.bf16.msrb.mxu2 %v8061_v8  ;;  %v1706_v42 = vsel %vm16451_vm12, %v13361_v47, %v1701_v9  ;;  %v1718_v63 = vsel %vm16451_vm12, %v1701_v9, %v13388_v52  ;;  %v13480_v47 = vor.u32 %v9784_v61, %v7954_v58  ;;  %v8012_v52 = vld [vmem:[#allocation2 + $0x48] sm:$0xf]  ;;  %v13482_v3 = vpop.permute.xlu2 %1775  ;;  %v9801_v8 = vld [vmem:[#allocation2 + $0x54] sm:$0xf0]  ;;  %vm1787_vm12 = vcmp.lt.s32.totalorder %v10953_v19, 119 }
 0x35a   : > { %v1737_v1 = vmul.f32 %v13421_v6, %v1706_v42  ;;  %v1738_v51 = vmul.f32 %v13409_v39, %v1718_v63  ;;  %v8013_v30 = vor.u32 %v9801_v8, %v8012_v52  ;;  %v9797_v9 = vld [vmem:[#allocation2 + $0x34] sm:$0xf0]  ;;  %v7980_v61 = vld [vmem:[#allocation2 + $0x8] sm:$0xf]  ;;  %v7977_v52 = vor.u32 %v9790_v5, %v7974_v38  ;;  %v9946_v17 = vld [vmem:[#allocation2 + $0x4e4] sm:$0xf] }
 0x35b   : > { %3977 = vmatpush.bf16.msrb.mxu1 %v8081_v0  ;;  %v13486_v0 = vor.u32 %v9786_v27, %v7944_v34  ;;  %v7997_v63 = vor.u32 %v9797_v9, %v7996_v18  ;;  %v9793_v58 = vld [vmem:[#allocation2 + $0x14] sm:$0xf0]  ;;  %v10644_v34 = vmov 0   ;;  %v9795_v9 = vld [vmem:[#allocation2 + $0x2c] sm:$0xf] }
 0x35c   : > { %v1746_v62 = vpack.c.bf16 %v1738_v51, %v1737_v1  ;;  %v13494_v1 = vperm.slane %v13373_v41, 1  ;;  %v8014_v51 = vld [vmem:[#allocation2 + $0x58] sm:$0xf0]  ;;  %v7981_v41 = vor.u32 %v9793_v58, %v7980_v61  ;;  %10341 = vset.pattern.permute.xlu0 %v10644_v34  ;;  %10342 = vset.pattern.permute.xlu1 %v10644_v34  ;;  %v9942_v38 = vld [vmem:[#allocation2 + $0x4c4] sm:$0xf] }
 0x35d   : > { %3713 = vmatpush.bf16.msrb.mxu3 %v8041_v37  ;;  %3846 = vmatpush.bf16.msrb.mxu2 %v8045_v32  ;;  %v9794_v37 = vld [vmem:[#allocation2 + $0x24] sm:$0xf]  ;;  %v8033_v32 = vor.u32 %v9803_v33, %v8030_v60  ;;  %v8017_v20 = vor.u32 %v9799_v49, %v8014_v51  ;;  %v8582_v49 = vld [vmem:[#allocation2 + $0x4d0] sm:$0xf0]  ;;  %v9791_v61 = vld [vmem:[#allocation2 + $0xc] sm:$0xf] }
 0x35e   : > { %1754 = vst [vmem:[#allocation2 + $0x438] sm:$0xff] %v1746_v62  ;;  %v7993_v42 = vor.u32 %v9794_v37, %v7990_v54  ;;  %v8604_v62 = vld [vmem:[#allocation2 + $0x4e8] sm:$0xf]  ;;  %v7982_v37 = vld [vmem:[#allocation2 + $0x18] sm:$0xf0]  ;;  %10340 = vset.pattern.permute.xlu2 %v10644_v34 }
 0x35f   : > { %3978 = vmatpush.bf16.msrb.mxu1 %v8065_v12  ;;  %v13484_v31 = vpop.permute.xlu1 %1761  ;;  %v8598_v12 = vld [vmem:[#allocation2 + $0x4f0] sm:$0xf0]  ;;  %v9941_v58 = vld [vmem:[#allocation2 + $0x4b4] sm:$0xf0] }
 0x360   : > { %v13488_v56 = vpop.permute.xlu0 %1759  ;;  %3647 = vmatmul.bf16.gmra.mxu3 %v13480_v47  ;;  %3780 = vmatmul.bf16.gmra.mxu2 %v13480_v47  ;;  %v8601_v45 = vor.u32 %v9946_v17, %v8598_v12  ;;  %v9945_v12 = vld [vmem:[#allocation2 + $0x4d4] sm:$0xf0]  ;;  %v7985_v17 = vor.u32 %v9791_v61, %v7982_v37  ;;  %v8590_v61 = vld [vmem:[#allocation2 + $0x4d8] sm:$0xf0] }
 0x361   : > { %3714 = vmatpush.bf16.msrb.mxu3 %v8025_v16  ;;  %3847 = vmatpush.bf16.msrb.mxu2 %v8029_v21  ;;  %v9949_v16 = vld [vmem:[#allocation2 + $0x4f4] sm:$0xf0]  ;;  %v2397_v21 = vld [vmem:[%s16243_s3 + $0x8] sm:$0xff]  ;;  %v1782_v60 = vpop.permute.xlu2 %1781 }
 0x362   : > { %3590 = vmatmul.bf16.gmra.mxu0 %v13486_v0  ;;  %2407 = vperm.xlu0 %10341, %v2397_v21   ;;  %v8605_v54 = vor.u32 %v9949_v16, %v8604_v62  ;;  %v1801_v51 = vsel %vm1787_vm12, %v1782_v60, %v13402_v4  ;;  %v8606_v62 = vld [vmem:[#allocation2 + $0x4f8] sm:$0xf0] }
 0x363   : > { %3979 = vmatpush.bf16.msrb.mxu1 %v8049_v40  ;;  %v7998_v40 = vld [vmem:[#allocation2 + $0x38] sm:$0xf0] }
 0x364   : > { %v8001_v18 = vor.u32 %v9795_v9, %v7998_v40  ;;  %v9943_v9 = vld [vmem:[#allocation2 + $0x4cc] sm:$0xf] }
 0x365   : > { %3715 = vmatpush.bf16.msrb.mxu3 %v8009_v48  ;;  %3848 = vmatpush.bf16.msrb.mxu2 %v8013_v30 }
 0x366   : > { %3913 = vmatmul.bf16.gmra.mxu1 %v13480_v47 }
 0x367   : > { %3980 = vmatpush.bf16.msrb.mxu1 %v8033_v32  ;;  %v1768_v35 = vpop.permute.xlu1 %1767  ;;  %v9938_v32 = vld [vmem:[#allocation2 + $0x4a4] sm:$0xf] }
 0x368   : > { %v1794_v27 = vsel %vm1787_vm12, %v1768_v35, %v13482_v3  ;;  %v1798_v8 = vsel %vm1787_vm12, %v13488_v56, %v1768_v35  ;;  %v1766_v33 = vpop.permute.xlu0 %1765  ;;  %v13522_v35 = vperm.slane %v13418_v53, 1 }
 0x369   : > { %3716 = vmatpush.bf16.msrb.mxu3 %v7993_v42  ;;  %3849 = vmatpush.bf16.msrb.mxu2 %v7997_v63  ;;  %v1816_v48 = vmul.f32 %v13501_v36, %v1798_v8  ;;  %v1817_v30 = vmul.f32 %v13494_v1, %v1794_v27  ;;  %v8588_v42 = vld [vmem:[#allocation2 + $0x4c8] sm:$0xf]  ;;  %v13513_v63 = vperm.slane %v13406_v29, 1  ;;  %v1797_v16 = vsel %vm1787_vm12, %v13402_v4, %v1766_v33 }
 0x36a   : > { %v8585_v29 = vor.u32 %v9942_v38, %v8582_v49  ;;  %v8589_v21 = vor.u32 %v9945_v12, %v8588_v42  ;;  %16612 = vst [vmem:[#allocation114_spill] sm:$0xff] %v13522_v35  ;;  %v1796_v27 = vsel %vm1787_vm12, %v13469_v7, %v13443_v24  ;;  %v8550_v38 = vld [vmem:[#allocation2 + $0x490] sm:$0xf0]  ;;  %v8556_v42 = vld [vmem:[#allocation2 + $0x488] sm:$0xf] }
 0x36b   : > { %3981 = vmatpush.bf16.msrb.mxu1 %v8017_v20  ;;  %16611 = vst [vmem:[#allocation113_spill] sm:$0xff] %v13513_v63  ;;  %v1828_v5 = vpack.c.bf16 %v1817_v30, %v1816_v48  ;;  %v9947_v20 = vld [vmem:[#allocation2 + $0x4ec] sm:$0xf]  ;;  %v1815_v8 = vmul.f32 %v13513_v63, %v1801_v51  ;;  %v1812_v48 = vmul.f32 %v13501_v36, %v1797_v16 }
 0x36d   : > { %3717 = vmatpush.bf16.msrb.mxu3 %v7977_v52  ;;  %3850 = vmatpush.bf16.msrb.mxu2 %v7981_v41  ;;  %1836 = vst [vmem:[#allocation2 + $0x460] sm:$0xff] %v1828_v5  ;;  %v8566_v52 = vld [vmem:[#allocation2 + $0x4b0] sm:$0xf0]  ;;  %v8572_v41 = vld [vmem:[#allocation2 + $0x4a8] sm:$0xf] }
 0x36e   : > { %v8569_v40 = vor.u32 %v9938_v32, %v8566_v52  ;;  %v8573_v34 = vor.u32 %v9941_v58, %v8572_v41  ;;  %v9937_v5 = vld [vmem:[#allocation2 + $0x494] sm:$0xf0]  ;;  %v1799_v52 = vsel %vm1787_vm12, %v13484_v31, %v13467_v11 }
 0x36f   : > { %3982 = vmatpush.bf16.msrb.mxu1 %v8001_v18  ;;  %v1774_v4 = vpop.permute.xlu1 %1773 }
 0x370   : > { %v1789_v53 = vsel %vm1787_vm12, %v1774_v4, %v1782_v60  ;;  %v1793_v30 = vsel %vm1787_vm12, %v1766_v33, %v1774_v4  ;;  %3718 = vmatmul.bf16.vlgmr.msrb.gmra.mxu3 %v13454_v55  ;;  %v2398_v60 = vld [vmem:[%s16243_s3 + $0x10] sm:$0xff]  ;;  %3851 = vmatmul.bf16.vlgmr.msrb.gmra.mxu2 %v13454_v55  ;;  %v1808_v33 = vmul.f32 %v13501_v36, %v1796_v27  ;;  %v8558_v4 = vld [vmem:[#allocation2 + $0x498] sm:$0xf0] }
 0x371   : > { %3786 = vmatpush.bf16.msra.mxu3 %v8601_v45  ;;  %3919 = vmatpush.bf16.msra.mxu2 %v8605_v54  ;;  %v8609_v45 = vor.u32 %v9947_v20, %v8606_v62  ;;  %v1772_v54 = vpop.permute.xlu0 %1771  ;;  %v1813_v37 = vmul.f32 %v13494_v1, %v1793_v30  ;;  %v1814_v32 = vmul.f32 %v13522_v35, %v1789_v53  ;;  %v9934_v20 = vld [vmem:[#allocation2 + $0x484] sm:$0xf]  ;;  %v8574_v62 = vld [vmem:[#allocation2 + $0x4b8] sm:$0xf0] }
 0x372   : > { %v1792_v18 = vsel %vm1787_vm12, %v13443_v24, %v1772_v54  ;;  %2412 = vperm.xlu1 %10342, %v2398_v60   ;;  %v8593_v24 = vor.u32 %v9943_v9, %v8590_v61  ;;  %v8553_v16 = vor.u32 %v9934_v20, %v8550_v38  ;;  %v1820_v30 = vmul.f32 %v13501_v36, %v1799_v52 }
 0x373   : > { %3983 = vmatpush.bf16.msrb.mxu1 %v7985_v17  ;;  %v1809_v49 = vmul.f32 %v13494_v1, %v1792_v18  ;;  %v1826_v58 = vpack.c.bf16 %v1813_v37, %v1812_v48  ;;  %v1827_v51 = vpack.c.bf16 %v1815_v8, %v1814_v32  ;;  %v9935_v8 = vld [vmem:[#allocation2 + $0x48c] sm:$0xf] }
 0x374   : > { %v8561_v37 = vor.u32 %v9935_v8, %v8558_v4 }
 0x375   : > { %3787 = vmatpush.bf16.msra.mxu3 %v8585_v29  ;;  %3920 = vmatpush.bf16.msra.mxu2 %v8589_v21  ;;  %v1824_v12 = vpack.c.bf16 %v1809_v49, %v1808_v33  ;;  %1834 = vst [vmem:[#allocation2 + $0x450] sm:$0xff] %v1826_v58  ;;  %v8557_v29 = vor.u32 %v9937_v5, %v8556_v42  ;;  %v9939_v21 = vld [vmem:[#allocation2 + $0x4ac] sm:$0xf] }
 0x376   : > { %1835 = vst [vmem:[#allocation2 + $0x458] sm:$0xff] %v1827_v51  ;;  %v8577_v17 = vor.u32 %v9939_v21, %v8574_v62  ;;  %3984 = vmatmul.bf16.vlgmr.msrb.gmra.mxu1 %v13454_v55  ;;  %v8532_v51 = vld [vmem:[#allocation2 + $0x460] sm:$0xf] }
 0x377   : > { %4052 = vmatpush.bf16.msra.mxu1 %v8609_v45  ;;  %1832 = vst [vmem:[#allocation2 + $0x440] sm:$0xff] %v1824_v12  ;;  %v1780_v41 = vpop.permute.xlu1 %1779 }
 0x379   : > { %3788 = vmatpush.bf16.msra.mxu3 %v8569_v40  ;;  %3921 = vmatpush.bf16.msra.mxu2 %v8573_v34  ;;  %v1788_v40 = vsel %vm1787_vm12, %v1772_v54, %v1780_v41  ;;  %v1800_v34 = vsel %vm1787_vm12, %v1780_v41, %v13469_v7  ;;  %v1778_v27 = vpop.permute.xlu0 %1777  ;;  %v2396_v7 = vld [vmem:[%s16243_s3] sm:$0xff] }
 0x37a   : > { %v1810_v45 = vmul.f32 %v13522_v35, %v1788_v40  ;;  %v1811_v48 = vmul.f32 %v13513_v63, %v1800_v34  ;;  %v1795_v53 = vsel %vm1787_vm12, %v13467_v11, %v1778_v27  ;;  %2402 = vperm.xlu2 %10340, %v2396_v7   ;;  %v9922_v40 = vld [vmem:[#allocation2 + $0x424] sm:$0xf]  ;;  %v2399_v34 = vld [vmem:[%s16243_s3 + $0x18] sm:$0xff] }
 0x37b   : > { %4053 = vmatpush.bf16.msra.mxu1 %v8593_v24  ;;  %v1821_v54 = vmul.f32 %v13494_v1, %v1795_v53  ;;  %v9930_v24 = vld [vmem:[#allocation2 + $0x464] sm:$0xf] }
 0x37c   : > { %v1825_v9 = vpack.c.bf16 %v1811_v48, %v1810_v45  ;;  %v8502_v45 = vld [vmem:[#allocation2 + $0x430] sm:$0xf0] }
 0x37d   : > { %3789 = vmatpush.bf16.msra.mxu3 %v8553_v16  ;;  %3922 = vmatpush.bf16.msra.mxu2 %v8557_v29  ;;  %v1830_v32 = vpack.c.bf16 %v1821_v54, %v1820_v30  ;;  %v9928_v16 = vld [vmem:[#allocation2 + $0x44c] sm:$0xf0]  ;;  %v8505_v54 = vor.u32 %v9922_v40, %v8502_v45 }
 0x37e   : > { %1833 = vst [vmem:[#allocation2 + $0x448] sm:$0xff] %v1825_v9  ;;  %v8516_v29 = vld [vmem:[#allocation2 + $0x440] sm:$0xf]  ;;  %v9926_v21 = vld [vmem:[#allocation2 + $0x444] sm:$0xf] }
 0x37f   : > { %4054 = vmatpush.bf16.msra.mxu1 %v8577_v17  ;;  %1838 = vst [vmem:[#allocation2 + $0x470] sm:$0xff] %v1830_v32  ;;  %v1786_v18 = vpop.permute.xlu1 %1785  ;;  %v8517_v52 = vor.u32 %v9928_v16, %v8516_v29  ;;  %v8500_v17 = vld [vmem:[#allocation2 + $0x420] sm:$0xf]  ;;  %v9850_v32 = vld [vmem:[#allocation2 + $0x1e4] sm:$0xf] }
 0x380   : > { %v1791_v11 = vsel %vm1787_vm12, %v1778_v27, %v1786_v18  ;;  %v1803_v38 = vsel %vm1787_vm12, %v1786_v18, %v13484_v31  ;;  %3723 = vmatmul.bf16.gmra.mxu3 %v13486_v0  ;;  %3856 = vmatmul.bf16.gmra.mxu2 %v13486_v0  ;;  %v9924_v27 = vld [vmem:[#allocation2 + $0x42c] sm:$0xf0]  ;;  %v8214_v18 = vld [vmem:[#allocation2 + $0x1f0] sm:$0xf0]  ;;  %v9925_v16 = vld [vmem:[#allocation2 + $0x434] sm:$0xf0] }
 0x381   : > { %v1784_v60 = vpop.permute.xlu0 %1783  ;;  %v1822_v55 = vmul.f32 %v13522_v35, %v1791_v11  ;;  %v1823_v33 = vmul.f32 %v13513_v63, %v1803_v38  ;;  %v8501_v30 = vor.u32 %v9924_v27, %v8500_v17  ;;  %v9853_v11 = vld [vmem:[#allocation2 + $0x1f4] sm:$0xf0]  ;;  %v7932_v38 = vld [vmem:[#allocation8 + $0x10] sm:$0xf]  ;;  %v8510_v29 = vld [vmem:[#allocation2 + $0x438] sm:$0xf0] }
 0x382   : > { %v1790_v49 = vsel %vm1787_vm12, %v13482_v3, %v1784_v60  ;;  %v1802_v42 = vsel %vm1787_vm12, %v1784_v60, %v13488_v56  ;;  %v8518_v56 = vld [vmem:[#allocation2 + $0x450] sm:$0xf0]  ;;  %2417 = vperm.xlu2 %10340, %v2399_v34   ;;  %v9849_v27 = vld [vmem:[#allocation2 + $0x1d4] sm:$0xf0] }
 0x383   : > { %4055 = vmatpush.bf16.msra.mxu1 %v8561_v37  ;;  %v1818_v5 = vmul.f32 %v13522_v35, %v1790_v49  ;;  %v1819_v31 = vmul.f32 %v13513_v63, %v1802_v42  ;;  %v1831_v61 = vpack.c.bf16 %v1823_v33, %v1822_v55  ;;  %v8521_v41 = vor.u32 %v9926_v21, %v8518_v56  ;;  %v8486_v37 = vld [vmem:[#allocation2 + $0x410] sm:$0xf0]  ;;  %v9781_v33 = vld [vmem:[#allocation8 + $0x28] sm:$0xf0]  ;;  %v8484_v49 = vld [vmem:[#allocation2 + $0x400] sm:$0xf] }
 0x384   : > { %v9918_v42 = vld [vmem:[#allocation2 + $0x404] sm:$0xf]  ;;  %v8204_v56 = vld [vmem:[#allocation2 + $0x1c8] sm:$0xf]  ;;  %v8198_v34 = vld [vmem:[#allocation2 + $0x1d0] sm:$0xf0] }
 0x385   : > { %v1829_v58 = vpack.c.bf16 %v1819_v31, %v1818_v5  ;;  %1839 = vst [vmem:[#allocation2 + $0x478] sm:$0xff] %v1831_v61  ;;  %v8524_v60 = vld [vmem:[#allocation2 + $0x448] sm:$0xf]  ;;  %v9927_v55 = vld [vmem:[#allocation2 + $0x44c] sm:$0xf]  ;;  %v8489_v61 = vor.u32 %v9918_v42, %v8486_v37  ;;  %v8205_v45 = vor.u32 %v9849_v27, %v8204_v56 }
 0x386   : > { %v9932_v12 = vld [vmem:[#allocation2 + $0x46c] sm:$0xf0]  ;;  %v8534_v20 = vld [vmem:[#allocation2 + $0x470] sm:$0xf0]  ;;  %3989 = vmatmul.bf16.gmra.mxu1 %v13486_v0  ;;  %v8220_v5 = vld [vmem:[#allocation2 + $0x1e8] sm:$0xf] }
 0x387   : > { %1837 = vst [vmem:[#allocation2 + $0x468] sm:$0xff] %v1829_v58  ;;  %v8533_v62 = vor.u32 %v9932_v12, %v8532_v51  ;;  %v8537_v3 = vor.u32 %v9930_v24, %v8534_v20  ;;  %v9920_v0 = vld [vmem:[#allocation2 + $0x40c] sm:$0xf0]  ;;  %v9929_v58 = vld [vmem:[#allocation2 + $0x454] sm:$0xf0]  ;;  %v13587_v20 = vor.u32 %v9781_v33, %v7932_v38 }
 0x388   : > { %v8485_v31 = vor.u32 %v9920_v0, %v8484_v49  ;;  %v8526_v51 = vld [vmem:[#allocation2 + $0x458] sm:$0xf0]  ;;  %v8525_v24 = vor.u32 %v9929_v58, %v8524_v60  ;;  %v9846_v21 = vld [vmem:[#allocation2 + $0x1c4] sm:$0xf]  ;;  %v8172_v42 = vld [vmem:[#allocation2 + $0x188] sm:$0xf] }
 0x389   : > { %3657 = vmatpush.bf16.msrb.mxu0 %v8533_v62  ;;  %3790 = vmatpush.bf16.msra.mxu3 %v8537_v3  ;;  %v8529_v12 = vor.u32 %v9927_v55, %v8526_v51  ;;  %v8217_v62 = vor.u32 %v9850_v32, %v8214_v18  ;;  %v8221_v3 = vor.u32 %v9853_v11, %v8220_v5  ;;  %v8222_v0 = vld [vmem:[#allocation2 + $0x1f8] sm:$0xf0]  ;;  %v9842_v18 = vld [vmem:[#allocation2 + $0x1a4] sm:$0xf]  ;;  %v8188_v11 = vld [vmem:[#allocation2 + $0x1a8] sm:$0xf] }
 0x38a   : > { %v8166_v55 = vld [vmem:[#allocation2 + $0x190] sm:$0xf0]  ;;  %v9838_v49 = vld [vmem:[#allocation2 + $0x184] sm:$0xf]  ;;  %v9841_v5 = vld [vmem:[#allocation2 + $0x194] sm:$0xf0] }
 0x38b   : > { %v8173_v58 = vor.u32 %v9841_v5, %v8172_v42  ;;  %v8206_v51 = vld [vmem:[#allocation2 + $0x1d8] sm:$0xf0]  ;;  %v9837_v56 = vld [vmem:[#allocation2 + $0x174] sm:$0xf0]  ;;  %v8134_v27 = vld [vmem:[#allocation2 + $0x150] sm:$0xf0] }
 0x38c   : > { %v9933_v8 = vld [vmem:[#allocation2 + $0x474] sm:$0xf0]  ;;  %v8542_v4 = vld [vmem:[#allocation2 + $0x478] sm:$0xf0]  ;;  %v9978_v5 = vld [vmem:[#allocation2 + $0x5e4] sm:$0xf] }
 0x38d   : > { %3658 = vmatpush.bf16.msrb.mxu0 %v8517_v52  ;;  %3791 = vmatpush.bf16.msra.mxu3 %v8521_v41  ;;  %v8508_v52 = vld [vmem:[#allocation2 + $0x428] sm:$0xf]  ;;  %v9923_v41 = vld [vmem:[#allocation2 + $0x42c] sm:$0xf]  ;;  %v8142_v42 = vld [vmem:[#allocation2 + $0x158] sm:$0xf0] }
 0x38e   : > { %v8540_v48 = vld [vmem:[#allocation2 + $0x468] sm:$0xf]  ;;  %v9931_v53 = vld [vmem:[#allocation2 + $0x46c] sm:$0xf]  ;;  %v8509_v17 = vor.u32 %v9925_v16, %v8508_v52  ;;  %v8513_v40 = vor.u32 %v9923_v41, %v8510_v29  ;;  %v8190_v29 = vld [vmem:[#allocation2 + $0x1b8] sm:$0xf0] }
 0x38f   : > { %v8541_v7 = vor.u32 %v9933_v8, %v8540_v48  ;;  %v8545_v9 = vor.u32 %v9931_v53, %v8542_v4  ;;  %v9921_v8 = vld [vmem:[#allocation2 + $0x414] sm:$0xf0]  ;;  %v8201_v4 = vor.u32 %v9846_v21, %v8198_v34  ;;  %v8492_v48 = vld [vmem:[#allocation2 + $0x408] sm:$0xf]  ;;  %v9919_v53 = vld [vmem:[#allocation2 + $0x40c] sm:$0xf] }
 0x390   : > { %v8493_v37 = vor.u32 %v9921_v8, %v8492_v48  ;;  %v8156_v16 = vld [vmem:[#allocation2 + $0x168] sm:$0xf]  ;;  %v8150_v21 = vld [vmem:[#allocation2 + $0x170] sm:$0xf0]  ;;  %v9833_v8 = vld [vmem:[#allocation2 + $0x154] sm:$0xf0] }
 0x391   : > { %3659 = vmatpush.bf16.msrb.mxu0 %v8501_v30  ;;  %3792 = vmatpush.bf16.msra.mxu3 %v8505_v54  ;;  %v8494_v30 = vld [vmem:[#allocation2 + $0x418] sm:$0xf0]  ;;  %v8182_v54 = vld [vmem:[#allocation2 + $0x1b0] sm:$0xf0]  ;;  %v9830_v48 = vld [vmem:[#allocation2 + $0x144] sm:$0xf] }
 0x392   : > { %3923 = vmatpush.bf16.msra.mxu2 %v8541_v7  ;;  %4056 = vmatpush.bf16.msra.mxu1 %v8545_v9  ;;  %v9845_v7 = vld [vmem:[#allocation2 + $0x1b4] sm:$0xf0]  ;;  %v9851_v9 = vld [vmem:[#allocation2 + $0x1ec] sm:$0xf]  ;;  %v8497_v32 = vor.u32 %v9919_v53, %v8494_v30  ;;  %v8185_v38 = vor.u32 %v9842_v18, %v8182_v54  ;;  %v8140_v53 = vld [vmem:[#allocation2 + $0x148] sm:$0xf]  ;;  %v8137_v30 = vor.u32 %v9830_v48, %v8134_v27 }
 0x393   : > { %v8189_v60 = vor.u32 %v9845_v7, %v8188_v11  ;;  %v8225_v33 = vor.u32 %v9851_v9, %v8222_v0  ;;  %v8141_v54 = vor.u32 %v9833_v8, %v8140_v53  ;;  %v8118_v7 = vld [vmem:[#allocation2 + $0x130] sm:$0xf0]  ;;  %v9826_v0 = vld [vmem:[#allocation2 + $0x124] sm:$0xf]  ;;  %v9835_v18 = vld [vmem:[#allocation2 + $0x16c] sm:$0xf] }
 0x394   : > { %v8121_v11 = vor.u32 %v9826_v0, %v8118_v7  ;;  %v9823_v48 = vld [vmem:[#allocation2 + $0x10c] sm:$0xf]  ;;  %v8694_v53 = vld [vmem:[#allocation2 + $0x5b0] sm:$0xf0]  ;;  %v9970_v0 = vld [vmem:[#allocation2 + $0x5a4] sm:$0xf] }
 0x395   : > { %3660 = vmatpush.bf16.msrb.mxu0 %v8485_v31  ;;  %3793 = vmatpush.bf16.msra.mxu3 %v8489_v61  ;;  %v9847_v31 = vld [vmem:[#allocation2 + $0x1cc] sm:$0xf]  ;;  %v8169_v61 = vor.u32 %v9838_v49, %v8166_v55  ;;  %v8108_v49 = vld [vmem:[#allocation2 + $0x108] sm:$0xf] }
 0x396   : > { %3924 = vmatpush.bf16.msra.mxu2 %v8525_v24  ;;  %4057 = vmatpush.bf16.msra.mxu1 %v8529_v12  ;;  %v7960_v24 = vld [vmem:[#allocation8 + $0x48] sm:$0xf]  ;;  %v9788_v12 = vld [vmem:[#allocation8 + $0x60] sm:$0xf0]  ;;  %v9979_v7 = vld [vmem:[#allocation2 + $0x5ec] sm:$0xf] }
 0x397   : > { %v13592_v52 = vor.u32 %v9788_v12, %v7960_v24 }
 0x398   : > { %3661 = vmatmul.bf16.vlgmr.msrb.gmra.mxu0 %v13587_v20  ;;  %3794 = vmatmul.bf16.vlgmr.msra.gmra.mxu3 %v13587_v20 }
 0x399   : > { %3729 = vmatpush.bf16.msra.mxu0 %v8217_v62  ;;  %3862 = vmatpush.bf16.msrb.mxu3 %v8221_v3  ;;  %v8209_v62 = vor.u32 %v9847_v31, %v8206_v51  ;;  %v9834_v3 = vld [vmem:[#allocation2 + $0x164] sm:$0xf]  ;;  %v8726_v31 = vld [vmem:[#allocation2 + $0x5f0] sm:$0xf0]  ;;  %v8732_v51 = vld [vmem:[#allocation2 + $0x5e8] sm:$0xf] }
 0x39a   : > { %3925 = vmatpush.bf16.msra.mxu2 %v8509_v17  ;;  %4058 = vmatpush.bf16.msra.mxu1 %v8513_v40  ;;  %v8153_v41 = vor.u32 %v9834_v3, %v8150_v21  ;;  %v8157_v17 = vor.u32 %v9837_v56, %v8156_v16  ;;  %v9843_v40 = vld [vmem:[#allocation2 + $0x1ac] sm:$0xf]  ;;  %v8729_v16 = vor.u32 %v9978_v5, %v8726_v31  ;;  %v9969_v5 = vld [vmem:[#allocation2 + $0x594] sm:$0xf0] }
 0x39b   : > { %v8193_v34 = vor.u32 %v9843_v40, %v8190_v29  ;;  %v9981_v29 = vld [vmem:[#allocation2 + $0x5f4] sm:$0xf0]  ;;  %v9827_v56 = vld [vmem:[#allocation2 + $0x12c] sm:$0xf] }
 0x39c   : > { %v8733_v21 = vor.u32 %v9981_v29, %v8732_v51  ;;  %v9977_v40 = vld [vmem:[#allocation2 + $0x5d4] sm:$0xf0]  ;;  %v9975_v31 = vld [vmem:[#allocation2 + $0x5cc] sm:$0xf]  ;;  %v9962_v51 = vld [vmem:[#allocation2 + $0x564] sm:$0xf] }
 0x39d   : > { %3730 = vmatpush.bf16.msra.mxu0 %v8201_v4  ;;  %3863 = vmatpush.bf16.msrb.mxu3 %v8205_v45  ;;  %v9839_v4 = vld [vmem:[#allocation2 + $0x18c] sm:$0xf]  ;;  %v8174_v45 = vld [vmem:[#allocation2 + $0x198] sm:$0xf0]  ;;  %v8668_v29 = vld [vmem:[#allocation2 + $0x568] sm:$0xf] }
 0x39e   : > { %3926 = vmatpush.bf16.msra.mxu2 %v8493_v37  ;;  %4059 = vmatpush.bf16.msra.mxu1 %v8497_v32  ;;  %v8177_v9 = vor.u32 %v9839_v4, %v8174_v45  ;;  %v8124_v37 = vld [vmem:[#allocation2 + $0x128] sm:$0xf]  ;;  %v9829_v32 = vld [vmem:[#allocation2 + $0x134] sm:$0xf0] }
 0x39f   : > { %v8716_v4 = vld [vmem:[#allocation2 + $0x5c8] sm:$0xf] }
 0x3a0   : > { %v8717_v45 = vor.u32 %v9977_v40, %v8716_v4  ;;  %v9961_v40 = vld [vmem:[#allocation2 + $0x554] sm:$0xf0]  ;;  %v8686_v4 = vld [vmem:[#allocation2 + $0x598] sm:$0xf0] }
 0x3a1   : > { %3731 = vmatpush.bf16.msra.mxu0 %v8185_v38  ;;  %3864 = vmatpush.bf16.msrb.mxu3 %v8189_v60  ;;  %v8125_v38 = vor.u32 %v9829_v32, %v8124_v37  ;;  %v8158_v60 = vld [vmem:[#allocation2 + $0x178] sm:$0xf0]  ;;  %v8697_v32 = vor.u32 %v9970_v0, %v8694_v53  ;;  %v9954_v53 = vld [vmem:[#allocation2 + $0x524] sm:$0xf]  ;;  %v9957_v0 = vld [vmem:[#allocation2 + $0x534] sm:$0xf0] }
 0x3a2   : > { %3995 = vmatpush.bf16.msrb.mxu2 %v8225_v33  ;;  %v8161_v55 = vor.u32 %v9835_v18, %v8158_v60  ;;  %v9822_v33 = vld [vmem:[#allocation2 + $0x104] sm:$0xf]  ;;  %v8734_v18 = vld [vmem:[#allocation2 + $0x5f8] sm:$0xf0] }
 0x3a3   : > { %3927 = vmatmul.bf16.vlgmr.msra.gmra.mxu2 %v13587_v20  ;;  %v9966_v60 = vld [vmem:[#allocation2 + $0x584] sm:$0xf] }
 0x3a5   : > { %3732 = vmatpush.bf16.msra.mxu0 %v8169_v61  ;;  %3865 = vmatpush.bf16.msrb.mxu3 %v8173_v58  ;;  %v8102_v61 = vld [vmem:[#allocation2 + $0x110] sm:$0xf0]  ;;  %v9825_v58 = vld [vmem:[#allocation2 + $0x114] sm:$0xf0] }
 0x3a6   : > { %3996 = vmatpush.bf16.msrb.mxu2 %v8209_v62  ;;  %v8105_v24 = vor.u32 %v9822_v33, %v8102_v61  ;;  %v8109_v12 = vor.u32 %v9825_v58, %v8108_v49  ;;  %v9831_v62 = vld [vmem:[#allocation2 + $0x14c] sm:$0xf]  ;;  %v8684_v33 = vld [vmem:[#allocation2 + $0x588] sm:$0xf]  ;;  %v8718_v49 = vld [vmem:[#allocation2 + $0x5d8] sm:$0xf0] }
 0x3a7   : > { %v8145_v3 = vor.u32 %v9831_v62, %v8142_v42  ;;  %v8685_v61 = vor.u32 %v9969_v5, %v8684_v33  ;;  %v8721_v58 = vor.u32 %v9975_v31, %v8718_v49  ;;  %v8702_v62 = vld [vmem:[#allocation2 + $0x5b8] sm:$0xf0]  ;;  %v8614_v49 = vld [vmem:[#allocation2 + $0x510] sm:$0xf0]  ;;  %v9883_v5 = vld [vmem:[#allocation2 + $0x2ec] sm:$0xf] }
 0x3a8   : > { %3666 = vmatmul.bf16.gmra.mxu0 %v13592_v52  ;;  %3799 = vmatmul.bf16.gmra.mxu3 %v13592_v52  ;;  %v8654_v33 = vld [vmem:[#allocation2 + $0x558] sm:$0xf0] }
 0x3a9   : > { %3733 = vmatpush.bf16.msra.mxu0 %v8153_v41  ;;  %3866 = vmatpush.bf16.msrb.mxu3 %v8157_v17  ;;  %v8126_v41 = vld [vmem:[#allocation2 + $0x138] sm:$0xf0]  ;;  %v9974_v17 = vld [vmem:[#allocation2 + $0x5c4] sm:$0xf] }
 0x3aa   : > { %3997 = vmatpush.bf16.msrb.mxu2 %v8193_v34  ;;  %v8710_v34 = vld [vmem:[#allocation2 + $0x5d0] sm:$0xf0]  ;;  %v8129_v27 = vor.u32 %v9827_v56, %v8126_v41 }
 0x3ab   : > { %v8713_v8 = vor.u32 %v9974_v17, %v8710_v34  ;;  %v8646_v41 = vld [vmem:[#allocation2 + $0x550] sm:$0xf0]  ;;  %v8652_v17 = vld [vmem:[#allocation2 + $0x548] sm:$0xf]  ;;  %v9967_v34 = vld [vmem:[#allocation2 + $0x58c] sm:$0xf] }
 0x3ad   : > { %3734 = vmatpush.bf16.msra.mxu0 %v8137_v30  ;;  %3867 = vmatpush.bf16.msrb.mxu3 %v8141_v54  ;;  %v8700_v30 = vld [vmem:[#allocation2 + $0x5a8] sm:$0xf]  ;;  %v9973_v54 = vld [vmem:[#allocation2 + $0x5b4] sm:$0xf0] }
 0x3ae   : > { %3998 = vmatpush.bf16.msrb.mxu2 %v8177_v9  ;;  %v8110_v9 = vld [vmem:[#allocation2 + $0x118] sm:$0xf0] }
 0x3af   : > { %v8113_v37 = vor.u32 %v9823_v48, %v8110_v9  ;;  %v8689_v48 = vor.u32 %v9967_v34, %v8686_v4  ;;  %v9879_v34 = vld [vmem:[#allocation2 + $0x2cc] sm:$0xf] }
 0x3b1   : > { %3735 = vmatpush.bf16.msra.mxu0 %v8121_v11  ;;  %3868 = vmatpush.bf16.msrb.mxu3 %v8125_v38  ;;  %v8701_v11 = vor.u32 %v9973_v54, %v8700_v30  ;;  %v8737_v38 = vor.u32 %v9979_v7, %v8734_v18  ;;  %v8630_v30 = vld [vmem:[#allocation2 + $0x530] sm:$0xf0]  ;;  %v13600_v54 = vpop.f32.mrf.mxu1  ;;  %v8670_v7 = vld [vmem:[#allocation2 + $0x578] sm:$0xf0] }
 0x3b2   : > { %3999 = vmatpush.bf16.msrb.mxu2 %v8161_v55  ;;  %v8678_v55 = vld [vmem:[#allocation2 + $0x590] sm:$0xf0]  ;;  %v8633_v9 = vor.u32 %v9954_v53, %v8630_v30  ;;  %v8318_v53 = vld [vmem:[#allocation2 + $0x2b8] sm:$0xf0]  ;;  %v9951_v30 = vld [vmem:[#allocation2 + $0x50c] sm:$0xf] }
 0x3b3   : > { %3932 = vmatmul.bf16.gmra.mxu2 %v13592_v52  ;;  %v8681_v42 = vor.u32 %v9966_v60, %v8678_v55  ;;  %v9953_v60 = vld [vmem:[#allocation2 + $0x514] sm:$0xf0]  ;;  %v9959_v55 = vld [vmem:[#allocation2 + $0x54c] sm:$0xf] }
 0x3b5   : > { %3736 = vmatpush.bf16.msra.mxu0 %v8105_v24  ;;  %3869 = vmatpush.bf16.msrb.mxu3 %v8109_v12  ;;  %v9965_v24 = vld [vmem:[#allocation2 + $0x574] sm:$0xf0]  ;;  %v9971_v12 = vld [vmem:[#allocation2 + $0x5ac] sm:$0xf] }
 0x3b6   : > { %4000 = vmatpush.bf16.msrb.mxu2 %v8145_v3  ;;  %v8662_v3 = vld [vmem:[#allocation2 + $0x570] sm:$0xf0]  ;;  %v8705_v56 = vor.u32 %v9971_v12, %v8702_v62  ;;  %v8350_v12 = vld [vmem:[#allocation2 + $0x2f8] sm:$0xf0] }
 0x3b8   : > { %3737 = vmatmul.bf16.vlgmr.msra.gmra.mxu0 %v12800_v10  ;;  %3870 = vmatmul.bf16.vlgmr.msrb.gmra.mxu3 %v12800_v10 }
 0x3b9   : > { %3805 = vmatpush.bf16.msrb.mxu0 %v8729_v16  ;;  %3938 = vmatpush.bf16.msra.mxu3 %v8733_v21  ;;  %v8665_v16 = vor.u32 %v9962_v51, %v8662_v3  ;;  %v8669_v21 = vor.u32 %v9965_v24, %v8668_v29  ;;  %v8657_v51 = vor.u32 %v9959_v55, %v8654_v33  ;;  %v9885_v24 = vld [vmem:[#allocation2 + $0x2f4] sm:$0xf0]  ;;  %v13606_v29 = vpop.f32.mrf.mxu1 }
 0x3ba   : > { %4001 = vmatpush.bf16.msrb.mxu2 %v8129_v27  ;;  %v9958_v27 = vld [vmem:[#allocation2 + $0x544] sm:$0xf]  ;;  %v8353_v3 = vor.u32 %v9883_v5, %v8350_v12  ;;  %4060 = vmatmul.bf16.vlgmr.msra.gmra.mxu1 %v13587_v20  ;;  %v9875_v20 = vld [vmem:[#allocation2 + $0x2ac] sm:$0xf]  ;;  %v9873_v55 = vld [vmem:[#allocation2 + $0x294] sm:$0xf0] }
 0x3bb   : > { %v8286_v5 = vld [vmem:[#allocation2 + $0x278] sm:$0xf0] }
 0x3bd   : > { %3806 = vmatpush.bf16.msrb.mxu0 %v8713_v8  ;;  %3939 = vmatpush.bf16.msra.mxu3 %v8717_v45  ;;  %v8649_v8 = vor.u32 %v9958_v27, %v8646_v41  ;;  %v8653_v45 = vor.u32 %v9961_v40, %v8652_v17  ;;  %v8638_v41 = vld [vmem:[#allocation2 + $0x538] sm:$0xf0]  ;;  %v8332_v40 = vld [vmem:[#allocation2 + $0x2c8] sm:$0xf] }
 0x3be   : > { %4002 = vmatpush.bf16.msrb.mxu2 %v8113_v37  ;;  %v9963_v37 = vld [vmem:[#allocation2 + $0x56c] sm:$0xf] }
 0x3bf   : > { %v8673_v18 = vor.u32 %v9963_v37, %v8670_v7  ;;  %v9877_v7 = vld [vmem:[#allocation2 + $0x2b4] sm:$0xf0] }
 0x3c1   : > { %3807 = vmatpush.bf16.msrb.mxu0 %v8697_v32  ;;  %3940 = vmatpush.bf16.msra.mxu3 %v8701_v11  ;;  %v9950_v11 = vld [vmem:[#allocation2 + $0x504] sm:$0xf]  ;;  %v13614_v37 = vpop.f32.mrf.mxu1 }
 0x3c2   : > { %4071 = vmatpush.bf16.msra.mxu2 %v8737_v38  ;;  %v13604_v38 = vpop.f32.mrf.mxu2  ;;  %v8617_v31 = vor.u32 %v9950_v11, %v8614_v49  ;;  %v8302_v11 = vld [vmem:[#allocation2 + $0x298] sm:$0xf0] }
 0x3c3   : > { %4003 = vmatmul.bf16.vlgmr.msrb.gmra.mxu2 %v12800_v10  ;;  %v8636_v10 = vld [vmem:[#allocation2 + $0x528] sm:$0xf] }
 0x3c4   : > { %v8637_v32 = vor.u32 %v9957_v0, %v8636_v10  ;;  %v8316_v10 = vld [vmem:[#allocation2 + $0x2a8] sm:$0xf]  ;;  %v8321_v0 = vor.u32 %v9875_v20, %v8318_v53  ;;  %v8238_v53 = vld [vmem:[#allocation2 + $0x218] sm:$0xf0] }
 0x3c5   : > { %3808 = vmatpush.bf16.msrb.mxu0 %v8681_v42  ;;  %3941 = vmatpush.bf16.msra.mxu3 %v8685_v61  ;;  %v8348_v42 = vld [vmem:[#allocation2 + $0x2e8] sm:$0xf] }
 0x3c6   : > { %4072 = vmatpush.bf16.msra.mxu2 %v8721_v58  ;;  %v8620_v61 = vld [vmem:[#allocation2 + $0x508] sm:$0xf]  ;;  %v8349_v62 = vor.u32 %v9885_v24, %v8348_v42 }
 0x3c7   : > { %v8621_v58 = vor.u32 %v9953_v60, %v8620_v61  ;;  %v9867_v61 = vld [vmem:[#allocation2 + $0x26c] sm:$0xf] }
 0x3c8   : > { %3742 = vmatmul.bf16.gmra.mxu0 %v12866_v14  ;;  %3875 = vmatmul.bf16.gmra.mxu3 %v12866_v14 }
 0x3c9   : > { %3809 = vmatpush.bf16.msrb.mxu0 %v8665_v16  ;;  %3942 = vmatpush.bf16.msra.mxu3 %v8669_v21  ;;  %v9955_v16 = vld [vmem:[#allocation2 + $0x52c] sm:$0xf]  ;;  %v9881_v21 = vld [vmem:[#allocation2 + $0x2d4] sm:$0xf0]  ;;  %v13622_v24 = vpop.f32.mrf.mxu1 }
 0x3ca   : > { %4073 = vmatpush.bf16.msra.mxu2 %v8705_v56  ;;  %v8334_v56 = vld [vmem:[#allocation2 + $0x2d8] sm:$0xf0]  ;;  %v8641_v17 = vor.u32 %v9955_v16, %v8638_v41  ;;  %v13609_v27 = vpop.f32.mrf.mxu2  ;;  %4065 = vmatmul.bf16.gmra.mxu1 %v13592_v52  ;;  %v8268_v16 = vld [vmem:[#allocation2 + $0x248] sm:$0xf] }
 0x3cb   : > { %v8337_v4 = vor.u32 %v9879_v34, %v8334_v56  ;;  %v8254_v52 = vld [vmem:[#allocation2 + $0x238] sm:$0xf0] }
 0x3cd   : > { %3810 = vmatpush.bf16.msrb.mxu0 %v8649_v8  ;;  %3943 = vmatpush.bf16.msra.mxu3 %v8653_v45  ;;  %v8333_v8 = vor.u32 %v9881_v21, %v8332_v40  ;;  %v8622_v45 = vld [vmem:[#allocation2 + $0x518] sm:$0xf0]  ;;  %v9865_v21 = vld [vmem:[#allocation2 + $0x254] sm:$0xf0]  ;;  %v9859_v40 = vld [vmem:[#allocation2 + $0x22c] sm:$0xf] }
 0x3ce   : > { %4074 = vmatpush.bf16.msra.mxu2 %v8689_v48 }
 0x3d1   : > { %3811 = vmatpush.bf16.msrb.mxu0 %v8633_v9  ;;  %3944 = vmatpush.bf16.msra.mxu3 %v8637_v32  ;;  %v8625_v9 = vor.u32 %v9951_v30, %v8622_v45  ;;  %v8317_v32 = vor.u32 %v9877_v7, %v8316_v10  ;;  %v8257_v45 = vor.u32 %v9859_v40, %v8254_v52  ;;  %v9857_v30 = vld [vmem:[#allocation2 + $0x214] sm:$0xf0]  ;;  %v9855_v10 = vld [vmem:[#allocation2 + $0x20c] sm:$0xf]  ;;  %v8828_v7 = vld [vmem:[#allocation2 + $0x6a8] sm:$0xf] }
 0x3d2   : > { %4075 = vmatpush.bf16.msra.mxu2 %v8673_v18  ;;  %v8300_v18 = vld [vmem:[#allocation2 + $0x288] sm:$0xf]  ;;  %v13618_v60 = vpop.f32.mrf.mxu2 }
 0x3d3   : > { %4008 = vmatmul.bf16.gmra.mxu2 %v12866_v14  ;;  %v13612_v48 = vpop.f32.mrf.mxu3  ;;  %v9871_v14 = vld [vmem:[#allocation2 + $0x28c] sm:$0xf]  ;;  %v8301_v42 = vor.u32 %v9873_v55, %v8300_v18 }
 0x3d4   : > { %v8305_v33 = vor.u32 %v9871_v14, %v8302_v11  ;;  %v10005_v11 = vld [vmem:[#allocation2 + $0x6b4] sm:$0xf0] }
 0x3d5   : > { %3812 = vmatpush.bf16.msrb.mxu0 %v8617_v31  ;;  %3945 = vmatpush.bf16.msra.mxu3 %v8621_v58  ;;  %v9869_v31 = vld [vmem:[#allocation2 + $0x274] sm:$0xf0]  ;;  %v8284_v58 = vld [vmem:[#allocation2 + $0x268] sm:$0xf] }
 0x3d6   : > { %4076 = vmatpush.bf16.msra.mxu2 %v8657_v51  ;;  %v8289_v51 = vor.u32 %v9867_v61, %v8286_v5  ;;  %v8285_v12 = vor.u32 %v9869_v31, %v8284_v58  ;;  %v8814_v5 = vld [vmem:[#allocation2 + $0x698] sm:$0xf0]  ;;  %v13636_v31 = vpop.f32.mrf.mxu0  ;;  %v10001_v61 = vld [vmem:[#allocation2 + $0x694] sm:$0xf0] }
 0x3d8   : > { %3813 = vmatmul.bf16.vlgmr.msrb.gmra.mxu0 %v12912_v46  ;;  %3946 = vmatmul.bf16.vlgmr.msra.gmra.mxu3 %v12912_v46 }
 0x3d9   : > { %3881 = vmatpush.bf16.msra.mxu0 %v8349_v62  ;;  %4014 = vmatpush.bf16.msrb.mxu3 %v8353_v3  ;;  %v9863_v62 = vld [vmem:[#allocation2 + $0x24c] sm:$0xf]  ;;  %v8270_v3 = vld [vmem:[#allocation2 + $0x258] sm:$0xf0] }
 0x3da   : > { %4077 = vmatpush.bf16.msra.mxu2 %v8641_v17  ;;  %v8273_v56 = vor.u32 %v9863_v62, %v8270_v3  ;;  %v8269_v17 = vor.u32 %v9865_v21, %v8268_v16  ;;  %v13628_v34 = vpop.f32.mrf.mxu2  ;;  %v9995_v16 = vld [vmem:[#allocation2 + $0x66c] sm:$0xf]  ;;  %v8798_v21 = vld [vmem:[#allocation2 + $0x678] sm:$0xf0] }
 0x3db   : > { %v13620_v49 = vpop.f32.mrf.mxu3 }
 0x3dd   : > { %3882 = vmatpush.bf16.msra.mxu0 %v8333_v8  ;;  %4015 = vmatpush.bf16.msrb.mxu3 %v8337_v4  ;;  %v8252_v8 = vld [vmem:[#allocation2 + $0x228] sm:$0xf]  ;;  %v9861_v4 = vld [vmem:[#allocation2 + $0x234] sm:$0xf0] }
 0x3de   : > { %4078 = vmatpush.bf16.msra.mxu2 %v8625_v9  ;;  %v8253_v20 = vor.u32 %v9861_v4, %v8252_v8  ;;  %v8236_v9 = vld [vmem:[#allocation2 + $0x208] sm:$0xf]  ;;  %v8801_v8 = vor.u32 %v9995_v16, %v8798_v21  ;;  %v9991_v4 = vld [vmem:[#allocation2 + $0x64c] sm:$0xf] }
 0x3df   : > { %v8237_v18 = vor.u32 %v9857_v30, %v8236_v9  ;;  %v3588_v30 = vpop.f32.mrf.mxu0  ;;  %v8766_v9 = vld [vmem:[#allocation2 + $0x638] sm:$0xf0] }
 0x3e1   : > { %4016 = vmatpush.bf16.msrb.mxu3 %v8321_v0  ;;  %3883 = vmatpush.bf16.msra.mxu0 %v8317_v32  ;;  %v8241_v0 = vor.u32 %v9855_v10, %v8238_v53  ;;  %v8830_v32 = vld [vmem:[#allocation2 + $0x6b8] sm:$0xf0] }
 0x3e2   : > { %v13638_v58 = vpop.f32.mrf.mxu2  ;;  %v8782_v53 = vld [vmem:[#allocation2 + $0x658] sm:$0xf0] }
 0x3e3   : > { %4079 = vmatmul.bf16.vlgmr.msra.gmra.mxu2 %v12912_v46  ;;  %v13626_v41 = vpop.f32.mrf.mxu3  ;;  %v10003_v46 = vld [vmem:[#allocation2 + $0x6ac] sm:$0xf]  ;;  %v8785_v10 = vor.u32 %v9991_v4, %v8782_v53  ;;  %v13655_v4 = vpop.permute.xlu2 %2402 }
 0x3e4   : > { %v8833_v55 = vor.u32 %v10003_v46, %v8830_v32  ;;  %v9993_v46 = vld [vmem:[#allocation2 + $0x654] sm:$0xf0]  ;;  %v9987_v32 = vld [vmem:[#allocation2 + $0x62c] sm:$0xf] }
 0x3e5   : > { %4017 = vmatpush.bf16.msrb.mxu3 %v8305_v33  ;;  %3884 = vmatpush.bf16.msra.mxu0 %v8301_v42  ;;  %v13634_v33 = vpop.f32.mrf.mxu1  ;;  %v8829_v42 = vor.u32 %v10005_v11, %v8828_v7  ;;  %v8769_v11 = vor.u32 %v9987_v32, %v8766_v9  ;;  %v3587_v9 = vadd.f32 %v13636_v31, %v13655_v4  ;;  %v8414_v31 = vld [vmem:[#allocation2 + $0x378] sm:$0xf0] }
 0x3e8   : > { %3818 = vmatmul.bf16.gmra.mxu0 %v13205_v2  ;;  %3951 = vmatmul.bf16.gmra.mxu3 %v13205_v2 }
 0x3e9   : > { %4018 = vmatpush.bf16.msrb.mxu3 %v8289_v51  ;;  %3885 = vmatpush.bf16.msra.mxu0 %v8285_v12  ;;  %v9999_v51 = vld [vmem:[#allocation2 + $0x68c] sm:$0xf]  ;;  %v8812_v12 = vld [vmem:[#allocation2 + $0x688] sm:$0xf] }
 0x3ea   : > { %v8817_v62 = vor.u32 %v9999_v51, %v8814_v5  ;;  %v8813_v3 = vor.u32 %v10001_v61, %v8812_v12  ;;  %v13645_v7 = vpop.f32.mrf.mxu2  ;;  %v9983_v5 = vld [vmem:[#allocation2 + $0x60c] sm:$0xf]  ;;  %v8750_v61 = vld [vmem:[#allocation2 + $0x618] sm:$0xf0]  ;;  %v8748_v51 = vld [vmem:[#allocation2 + $0x608] sm:$0xf] }
 0x3eb   : > { %v13632_v14 = vpop.f32.mrf.mxu3  ;;  %v9985_v12 = vld [vmem:[#allocation2 + $0x614] sm:$0xf0] }
 0x3ec   : > { %v8749_v21 = vor.u32 %v9985_v12, %v8748_v51  ;;  %v8430_v51 = vld [vmem:[#allocation2 + $0x398] sm:$0xf0]  ;;  %v9899_v12 = vld [vmem:[#allocation2 + $0x36c] sm:$0xf] }
 0x3ed   : > { %4019 = vmatpush.bf16.msrb.mxu3 %v8273_v56  ;;  %3886 = vmatpush.bf16.msra.mxu0 %v8269_v17  ;;  %v8796_v56 = vld [vmem:[#allocation2 + $0x668] sm:$0xf]  ;;  %v9997_v17 = vld [vmem:[#allocation2 + $0x674] sm:$0xf0] }
 0x3ee   : > { %v8797_v52 = vor.u32 %v9997_v17, %v8796_v56  ;;  %v8478_v56 = vld [vmem:[#allocation2 + $0x3f8] sm:$0xf0]  ;;  %v3591_v17 = vpop.f32.mrf.mxu0 }
 0x3f1   : > { %4020 = vmatpush.bf16.msrb.mxu3 %v8257_v45  ;;  %3887 = vmatpush.bf16.msra.mxu0 %v8253_v20  ;;  %v8780_v45 = vld [vmem:[#allocation2 + $0x648] sm:$0xf]  ;;  %v13643_v20 = vpop.f32.mrf.mxu1 }
 0x3f3   : > { %4084 = vmatmul.bf16.gmra.mxu2 %v13205_v2  ;;  %v13641_v40 = vpop.f32.mrf.mxu3  ;;  %v8781_v2 = vor.u32 %v9993_v46, %v8780_v45  ;;  %v9911_v45 = vld [vmem:[#allocation2 + $0x3cc] sm:$0xf] }
 0x3f5   : > { %4021 = vmatpush.bf16.msrb.mxu3 %v8241_v0  ;;  %3888 = vmatpush.bf16.msra.mxu0 %v8237_v18  ;;  %v9989_v0 = vld [vmem:[#allocation2 + $0x634] sm:$0xf0]  ;;  %v8764_v18 = vld [vmem:[#allocation2 + $0x628] sm:$0xf] }
 0x3f8   : > { %3889 = vmatmul.bf16.vlgmr.msra.gmra.mxu0 %v13218_v59  ;;  %4022 = vmatmul.bf16.vlgmr.msrb.gmra.mxu3 %v13218_v59 }
 0x3f9   : > { %4092 = vmatpush.bf16.msra.mxu3 %v8833_v55  ;;  %3959 = vmatpush.bf16.msrb.mxu0 %v8829_v42  ;;  %v8765_v42 = vor.u32 %v9989_v0, %v8764_v18  ;;  %v13651_v16 = vpop.f32.mrf.mxu1  ;;  %v13664_v18 = vpop.permute.xlu0 %2407 }
 0x3fb   : > { %v13649_v55 = vpop.f32.mrf.mxu3 }
 0x3fd   : > { %4093 = vmatpush.bf16.msra.mxu3 %v8817_v62  ;;  %3960 = vmatpush.bf16.msrb.mxu0 %v8813_v3  ;;  %v9915_v62 = vld [vmem:[#allocation2 + $0x3ec] sm:$0xf]  ;;  %v8753_v3 = vor.u32 %v9983_v5, %v8750_v61  ;;  %v3593_v5 = vpop.f32.mrf.mxu0 }
 0x3fe   : > { %v8481_v59 = vor.u32 %v9915_v62, %v8478_v56  ;;  %v8417_v56 = vor.u32 %v9899_v12, %v8414_v31 }
 0x401   : > { %4094 = vmatpush.bf16.msra.mxu3 %v8801_v8  ;;  %3961 = vmatpush.bf16.msrb.mxu0 %v8797_v52  ;;  %v13653_v8 = vpop.f32.mrf.mxu2  ;;  %v8462_v52 = vld [vmem:[#allocation2 + $0x3d8] sm:$0xf0]  ;;  %v13662_v32 = vpop.f32.mrf.mxu1 }
 0x402   : > { %v8465_v53 = vor.u32 %v9911_v45, %v8462_v52  ;;  %v9895_v52 = vld [vmem:[#allocation2 + $0x34c] sm:$0xf]  ;;  %v13674_v45 = vpop.permute.xlu1 %2412 }
 0x403   : > { %v13657_v46 = vpop.f32.mrf.mxu3 }
 0x405   : > { %4095 = vmatpush.bf16.msra.mxu3 %v8785_v10  ;;  %3962 = vmatpush.bf16.msrb.mxu0 %v8781_v2  ;;  %v9907_v10 = vld [vmem:[#allocation2 + $0x3ac] sm:$0xf]  ;;  %v8446_v2 = vld [vmem:[#allocation2 + $0x3b8] sm:$0xf0] }
 0x406   : > { %v8449_v0 = vor.u32 %v9907_v10, %v8446_v2 }
 0x408   : > { %3894 = vmatmul.bf16.gmra.mxu0 %v13301_v22  ;;  %4027 = vmatmul.bf16.gmra.mxu3 %v13301_v22 }
 0x409   : > { %4096 = vmatpush.bf16.msra.mxu3 %v8769_v11  ;;  %3963 = vmatpush.bf16.msrb.mxu0 %v8765_v42  ;;  %v9903_v11 = vld [vmem:[#allocation2 + $0x38c] sm:$0xf]  ;;  %v3606_v42 = vadd.f32 %v13600_v54, %v3587_v9  ;;  %v13668_v61 = vpop.f32.mrf.mxu2  ;;  %v8398_v54 = vld [vmem:[#allocation2 + $0x358] sm:$0xf0]  ;;  %v13678_v9 = vpop.f32.mrf.mxu1 }
 0x40a   : > { %v8433_v62 = vor.u32 %v9903_v11, %v8430_v51  ;;  %v8401_v2 = vor.u32 %v9895_v52, %v8398_v54  ;;  %v8382_v11 = vld [vmem:[#allocation2 + $0x338] sm:$0xf0]  ;;  %v3592_v51 = vadd.f32 %v3591_v17, %v13674_v45  ;;  %v13696_v17 = vpop.permute.xlu2 %2417 }
 0x40d   : > { %4097 = vmatpush.bf16.msra.mxu3 %v8753_v3  ;;  %3964 = vmatpush.bf16.msrb.mxu0 %v8749_v21  ;;  %v3589_v3 = vadd.f32 %v3588_v30, %v13664_v18  ;;  %v3625_v21 = vadd.f32 %v13604_v38, %v3606_v42 }
 0x40f   : > { %v3644_v22 = vadd.f32 %v13612_v48, %v3625_v21  ;;  %v8366_v21 = vld [vmem:[#allocation2 + $0x318] sm:$0xf0] }
 0x411   : > { %4033 = vmatpush.bf16.msra.mxu0 %v8481_v59  ;;  %v13672_v59 = vpop.f32.mrf.mxu3  ;;  %v3759_v54 = vpop.f32.mrf.mxu1 }
 0x415   : > { %4034 = vmatpush.bf16.msra.mxu0 %v8465_v53  ;;  %v3608_v53 = vadd.f32 %v13606_v29, %v3589_v3  ;;  %v3662_v10 = vpop.f32.mrf.mxu0  ;;  %v9891_v29 = vld [vmem:[#allocation2 + $0x32c] sm:$0xf] }
 0x416   : > { %v3663_v30 = vadd.f32 %v3662_v10, %v3644_v22  ;;  %v8385_v12 = vor.u32 %v9891_v29, %v8382_v11  ;;  %v3594_v22 = vadd.f32 %v3593_v5, %v13696_v17 }
 0x417   : > { %v3627_v42 = vadd.f32 %v13609_v27, %v3608_v53  ;;  %v3611_v27 = vadd.f32 %v13614_v37, %v3592_v51 }
 0x418   : > { %v3682_v38 = vadd.f32 %v13634_v33, %v3663_v30  ;;  %8838 = vmatmul.msk.bf16.vlgmr.msrb.gmra.mxu0 %vm3570_vm15, %v13357_v26  ;;  %v9887_v33 = vld [vmem:[#allocation2 + $0x30c] sm:$0xf]  ;;  %8840 = vmatmul.msk.bf16.vlgmr.msra.gmra.mxu3 %vm3570_vm15, %v13357_v26 }
 0x419   : > { %4035 = vmatpush.bf16.msra.mxu0 %v8449_v0  ;;  %v13680_v0 = vpop.f32.mrf.mxu2  ;;  %v3646_v3 = vadd.f32 %v13620_v49, %v3627_v42  ;;  %v8369_v52 = vor.u32 %v9887_v33, %v8366_v21  ;;  %v3630_v53 = vadd.f32 %v13618_v60, %v3611_v27  ;;  %v3762_v5 = vpop.f32.mrf.mxu1 }
 0x41a   : > { %v3701_v48 = vadd.f32 %v13638_v58, %v3682_v38 }
 0x41b   : > { %v13688_v31 = vpop.f32.mrf.mxu3  ;;  %v3649_v38 = vadd.f32 %v13626_v41, %v3630_v53 }
 0x41d   : > { %4036 = vmatpush.bf16.msra.mxu0 %v8433_v62  ;;  %v13690_v62 = vmax.f32 %v3701_v48, 0.0  ;;  %v3664_v58 = vpop.f32.mrf.mxu0 }
 0x41f   : > { %4125 = vrot.lane.b32.xlu1 %v13690_v62, %s10627_s1 }
 0x421   : > { %4037 = vmatpush.bf16.msra.mxu0 %v8417_v56  ;;  %v3665_v56 = vadd.f32 %v3664_v58, %v3646_v3  ;;  %v3778_v37 = vpop.f32.mrf.mxu2 }
 0x423   : > { %v3684_v49 = vadd.f32 %v13643_v20, %v3665_v56  ;;  %v3797_v10 = vpop.f32.mrf.mxu3 }
 0x425   : > { %4038 = vmatpush.bf16.msra.mxu0 %v8401_v2  ;;  %v3703_v26 = vadd.f32 %v13645_v7, %v3684_v49  ;;  %v3613_v2 = vadd.f32 %v13622_v24, %v3594_v22  ;;  %v3667_v11 = vpop.f32.mrf.mxu0 }
 0x426   : > { %v3668_v42 = vadd.f32 %v3667_v11, %v3649_v38 }
 0x427   : > { %v13705_v30 = vmax.f32 %v3703_v26, 0.0  ;;  %v3632_v60 = vadd.f32 %v13628_v34, %v3613_v2  ;;  %v3722_v2 = vadd.f32 %v13649_v55, %v13664_v18 }
 0x428   : > { %v3687_v20 = vadd.f32 %v13651_v16, %v3668_v42  ;;  %8839 = vmatmul.msk.bf16.gmra.mxu0 %vm3570_vm15, %v13392_v28  ;;  %8841 = vmatmul.msk.bf16.gmra.mxu3 %vm3570_vm15, %v13392_v28 }
 0x429   : > { %4039 = vmatpush.bf16.msra.mxu0 %v8385_v12  ;;  %4127 = vrot.lane.b32.xlu2 %v13705_v30, %s10627_s1  ;;  %v3781_v24 = vpop.f32.mrf.mxu2  ;;  %v3651_v41 = vadd.f32 %v13632_v14, %v3632_v60 }
 0x42a   : > { %v3706_v51 = vadd.f32 %v13653_v8, %v3687_v20  ;;  %v3764_v8 = vpop.f32.mrf.mxu1 }
 0x42b   : > { %v3800_v29 = vpop.f32.mrf.mxu3 }
 0x42c   : > { %v13715_v7 = vmax.f32 %v3706_v51, 0.0 }
 0x42d   : > { %4040 = vmatpush.bf16.msra.mxu0 %v8369_v52  ;;  %v3669_v48 = vpop.f32.mrf.mxu0  ;;  %v3720_v52 = vadd.f32 %v13641_v40, %v13655_v4 }
 0x42e   : > { %v3670_v12 = vadd.f32 %v3669_v48, %v3651_v41  ;;  %4129 = vrot.lane.b32.xlu0 %v13715_v7, %s10627_s1  ;;  %v3725_v41 = vadd.f32 %v13657_v46, %v13674_v45 }
 0x430   : > { %v3689_v34 = vadd.f32 %v13662_v32, %v3670_v12 }
 0x431   : > { %v3783_v33 = vpop.f32.mrf.mxu2 }
 0x432   : > { %v3708_v16 = vadd.f32 %v13668_v61, %v3689_v34  ;;  %v3833_v28 = vpop.f32.mrf.mxu1 }
 0x433   : > { %v13728_v14 = vpop.f32.mrf.mxu3 }
 0x434   : > { %v13724_v3 = vmax.f32 %v3708_v16, 0.0 }
 0x435   : > { %v3738_v21 = vpop.f32.mrf.mxu0 }
 0x436   : > { %4131 = vrot.lane.b32.xlu1 %v13724_v3, %s10627_s1  ;;  %v3739_v49 = vadd.f32 %v3738_v21, %v3720_v52 }
 0x438   : > { %4041 = vmatmul.bf16.vlgmr.msra.gmra.mxu0 %v13445_v15  ;;  %v3758_v15 = vadd.f32 %v13678_v9, %v3739_v49 }
 0x439   : > { %v13731_v58 = vpop.f32.mrf.mxu2 }
 0x43a   : > { %v3835_v61 = vpop.f32.mrf.mxu1  ;;  %v3777_v42 = vadd.f32 %v13680_v0, %v3758_v15 }
 0x43b   : > { %v13733_v56 = vpop.f32.mrf.mxu3 }
 0x43c   : > { %v3796_v51 = vadd.f32 %v13688_v31, %v3777_v42  ;;  %v5165_v31 = vmul.f32 %v13690_v62, %v13243_v44 }
 0x43d   : > { %v3740_v27 = vpop.f32.mrf.mxu0 }
 0x43e   : > { %v3741_v11 = vadd.f32 %v3740_v27, %v3722_v2 }
 0x440   : > { %v3760_v60 = vadd.f32 %v3759_v54, %v3741_v11 }
 0x441   : > { %v13737_v22 = vpop.f32.mrf.mxu2 }
 0x442   : > { %v3838_v38 = vpop.f32.mrf.mxu1  ;;  %v3779_v34 = vadd.f32 %v3778_v37, %v3760_v60  ;;  %v3727_v37 = vadd.f32 %v13672_v59, %v13696_v17  ;;  %v5169_v60 = vmul.f32 %v13705_v30, %v13243_v44 }
 0x443   : > { %v13740_v53 = vpop.f32.mrf.mxu3 }
 0x444   : > { %v3798_v54 = vadd.f32 %v3797_v10, %v3779_v34 }
 0x445   : > { %v3743_v32 = vpop.f32.mrf.mxu0 }
 0x446   : > { %v3744_v48 = vadd.f32 %v3743_v32, %v3725_v41 }
 0x448   : > { %4046 = vmatmul.bf16.gmra.mxu0 %v13480_v47  ;;  %v3763_v0 = vadd.f32 %v3762_v5, %v3744_v48 }
 0x449   : > { %v13746_v20 = vpop.f32.mrf.mxu2 }
 0x44a   : > { %v3840_v55 = vpop.f32.mrf.mxu1  ;;  %v3782_v15 = vadd.f32 %v3781_v24, %v3763_v0 }
 0x44b   : > { %v13748_v40 = vpop.f32.mrf.mxu3 }
 0x44c   : > { %v3801_v42 = vadd.f32 %v3800_v29, %v3782_v15 }
 0x44d   : > { %v3745_v26 = vpop.f32.mrf.mxu0 }
 0x44e   : > { %v3746_v49 = vadd.f32 %v3745_v26, %v3727_v37 }
 0x450   : > { %v3765_v11 = vadd.f32 %v3764_v8, %v3746_v49  ;;  %v5173_v8 = vmul.f32 %v13715_v7, %v13243_v44 }
 0x451   : > { %v13755_v21 = vpop.f32.mrf.mxu2 }
 0x452   : > { %v3909_v10 = vpop.f32.mrf.mxu1 }
 0x453   : > { %v13763_v32 = vpop.f32.mrf.mxu3 }
 0x455   : > { %v3814_v47 = vpop.f32.mrf.mxu0 }
 0x456   : > { %v3815_v9 = vadd.f32 %v3814_v47, %v3796_v51 }
 0x458   : > { %v3834_v12 = vadd.f32 %v3833_v28, %v3815_v9  ;;  %v3784_v9 = vadd.f32 %v3783_v33, %v3765_v11 }
 0x459   : > { %v3928_v47 = vpop.f32.mrf.mxu2 }
 0x45a   : > { %v13753_v16 = vmax.f32 %v3834_v12, 0.0  ;;  %v3803_v29 = vadd.f32 %v13728_v14, %v3784_v9  ;;  %v3911_v0 = vpop.f32.mrf.mxu1  ;;  %v5177_v14 = vmul.f32 %v13724_v3, %v13243_v44 }
 0x45b   : > { %v3947_v24 = vpop.f32.mrf.mxu3 }
 0x45c   : > { %4133 = vrot.lane.b32.xlu2 %v13753_v16, %s10627_s1  ;;  %v5166_v46 = vmul.f32 %v13753_v16, %v13246_v13 }
 0x45d   : > { %v3816_v27 = vpop.f32.mrf.mxu0 }
 0x45e   : > { %v3817_v28 = vadd.f32 %v3816_v27, %v3798_v54  ;;  %v5181_v52 = vpack.c.bf16 %v5166_v46, %v5165_v31 }
 0x460   : > { %v3836_v5 = vadd.f32 %v3835_v61, %v3817_v28  ;;  %5189 = vst [vmem:[#allocation2 + $0x340] sm:$0xff] %v5181_v52 }
 0x462   : > { %v13767_v2 = vmax.f32 %v3836_v5, 0.0  ;;  %v3914_v49 = vpop.f32.mrf.mxu1 }
 0x463   : > { %v3949_v46 = vpop.f32.mrf.mxu3 }
 0x464   : > { %4135 = vrot.lane.b32.xlu0 %v13767_v2, %s10627_s1  ;;  %v5170_v59 = vmul.f32 %v13767_v2, %v13246_v13 }
 0x465   : > { %v3819_v51 = vpop.f32.mrf.mxu0 }
 0x466   : > { %v3820_v26 = vadd.f32 %v3819_v51, %v3801_v42  ;;  %v5183_v61 = vpack.c.bf16 %v5170_v59, %v5169_v60  ;;  %v3853_v42 = vadd.f32 %v13731_v58, %v13655_v4  ;;  %v3858_v58 = vadd.f32 %v13746_v20, %v13674_v45 }
 0x468   : > { %v3839_v41 = vadd.f32 %v3838_v38, %v3820_v26  ;;  %5191 = vst [vmem:[#allocation2 + $0x350] sm:$0xff] %v5183_v61  ;;  %v3930_v38 = vpop.f32.mrf.mxu2  ;;  %v3872_v26 = vadd.f32 %v13733_v56, %v3853_v42 }
 0x46a   : > { %v13775_v48 = vmax.f32 %v3839_v41, 0.0  ;;  %v3916_v11 = vpop.f32.mrf.mxu1 }
 0x46b   : > { %v3952_v15 = vpop.f32.mrf.mxu3 }
 0x46c   : > { %4137 = vrot.lane.b32.xlu1 %v13775_v48, %s10627_s1  ;;  %v5174_v12 = vmul.f32 %v13775_v48, %v13246_v13 }
 0x46d   : > { %v3821_v34 = vpop.f32.mrf.mxu0 }
 0x46e   : > { %v3822_v54 = vadd.f32 %v3821_v34, %v3803_v29  ;;  %v5185_v31 = vpack.c.bf16 %v5174_v12, %v5173_v8 }
 0x470   : > { %v3841_v33 = vadd.f32 %v3840_v55, %v3822_v54  ;;  %5193 = vst [vmem:[#allocation2 + $0x360] sm:$0xff] %v5185_v31  ;;  %v3933_v5 = vpop.f32.mrf.mxu2 }
 0x472   : > { %v13784_v27 = vmax.f32 %v3841_v33, 0.0  ;;  %v3985_v61 = vpop.f32.mrf.mxu1 }
 0x473   : > { %v3954_v59 = vpop.f32.mrf.mxu3 }
 0x474   : > { %4139 = vrot.lane.b32.xlu2 %v13784_v27, %s10627_s1  ;;  %v5178_v37 = vmul.f32 %v13784_v27, %v13246_v13  ;;  %v3855_v13 = vadd.f32 %v13737_v22, %v13664_v18 }
 0x475   : > { %v3890_v28 = vpop.f32.mrf.mxu0 }
 0x476   : > { %v5187_v52 = vpack.c.bf16 %v5178_v37, %v5177_v14  ;;  %v3891_v44 = vadd.f32 %v3890_v28, %v3872_v26  ;;  %v3874_v8 = vadd.f32 %v13740_v53, %v3855_v13  ;;  %v3877_v37 = vadd.f32 %v13748_v40, %v3858_v58 }
 0x477   : > { %v3860_v53 = vadd.f32 %v13755_v21, %v13696_v17 }
 0x478   : > { %5195 = vst [vmem:[#allocation2 + $0x370] sm:$0xff] %v5187_v52  ;;  %v3935_v60 = vpop.f32.mrf.mxu2  ;;  %v3910_v41 = vadd.f32 %v3909_v10, %v3891_v44 }
 0x47a   : > { %v3929_v54 = vadd.f32 %v3928_v47, %v3910_v41  ;;  %v3987_v14 = vpop.f32.mrf.mxu1 }
 0x47b   : > { %v4023_v12 = vpop.f32.mrf.mxu3 }
 0x47c   : > { %v3948_v33 = vadd.f32 %v3947_v24, %v3929_v54 }
 0x47d   : > { %v3892_v55 = vpop.f32.mrf.mxu0 }
 0x47e   : > { %v3893_v34 = vadd.f32 %v3892_v55, %v3874_v8 }
 0x480   : > { %v4004_v9 = vpop.f32.mrf.mxu2  ;;  %v3912_v31 = vadd.f32 %v3911_v0, %v3893_v34  ;;  %v3879_v0 = vadd.f32 %v13763_v32, %v3860_v53 }
 0x482   : > { %v3931_v42 = vadd.f32 %v3930_v38, %v3912_v31  ;;  %v3990_v40 = vpop.f32.mrf.mxu1 }
 0x483   : > { %v4025_v26 = vpop.f32.mrf.mxu3 }
 0x484   : > { %v3950_v47 = vadd.f32 %v3949_v46, %v3931_v42 }
 0x485   : > { %v3895_v51 = vpop.f32.mrf.mxu0 }
 0x486   : > { %v3896_v52 = vadd.f32 %v3895_v51, %v3877_v37 }
 0x488   : > { %v4006_v22 = vpop.f32.mrf.mxu2  ;;  %v3915_v20 = vadd.f32 %v3914_v49, %v3896_v52  ;;  %v3988_v52 = vadd.f32 %v3987_v14, %v13664_v18 }
 0x48a   : > { %v3934_v51 = vadd.f32 %v3933_v5, %v3915_v20  ;;  %v3992_v58 = vpop.f32.mrf.mxu1 }
 0x48b   : > { %v4028_v38 = vpop.f32.mrf.mxu3 }
 0x48c   : > { %v3953_v8 = vadd.f32 %v3952_v15, %v3934_v51 }
 0x48d   : > { %v3897_v29 = vpop.f32.mrf.mxu0 }
 0x48e   : > { %v3898_v44 = vadd.f32 %v3897_v29, %v3879_v0  ;;  %v3986_v29 = vadd.f32 %v3985_v61, %v13655_v4 }
 0x490   : > { %v4009_v41 = vpop.f32.mrf.mxu2  ;;  %v3917_v21 = vadd.f32 %v3916_v11, %v3898_v44  ;;  %v4005_v37 = vadd.f32 %v4004_v9, %v3986_v29  ;;  %v3991_v9 = vadd.f32 %v3990_v40, %v13674_v45  ;;  %v3993_v40 = vadd.f32 %v3992_v58, %v13696_v17 }
 0x492   : > { %v3936_v46 = vadd.f32 %v3935_v60, %v3917_v21  ;;  %v4061_v15 = vpop.f32.mrf.mxu1  ;;  %v4024_v60 = vadd.f32 %v4023_v12, %v4005_v37  ;;  %v4010_v12 = vadd.f32 %v4009_v41, %v3991_v9 }
 0x493   : > { %v4030_v31 = vpop.f32.mrf.mxu3 }
 0x494   : > { %v3955_v5 = vadd.f32 %v3954_v59, %v3936_v46 }
 0x495   : > { %v3966_v56 = vpop.f32.mrf.mxu0 }
 0x496   : > { %v3967_v28 = vadd.f32 %v3966_v56, %v3948_v33 }
 0x498   : > { %v13801_v10 = vmax.f32 %v3967_v28, 0.0  ;;  %v4011_v32 = vpop.f32.mrf.mxu2 }
 0x49a   : > { %4141 = vrot.lane.b32.xlu0 %v13801_v10, %s10627_s1  ;;  %v4063_v61 = vpop.f32.mrf.mxu1  ;;  %v5167_v18 = vmul.f32 %v13801_v10, %v13272_v57 }
 0x49b   : > { %v4099_v42 = vpop.f32.mrf.mxu3 }
 0x49d   : > { %v3968_v24 = vpop.f32.mrf.mxu0 }
 0x49e   : > { %v3969_v55 = vadd.f32 %v3968_v24, %v3950_v47  ;;  %v4007_v47 = vadd.f32 %v4006_v22, %v3988_v52 }
 0x4a0   : > { %v13808_v13 = vmax.f32 %v3969_v55, 0.0  ;;  %v4080_v11 = vpop.f32.mrf.mxu2  ;;  %v4026_v24 = vadd.f32 %v4025_v26, %v4007_v47  ;;  %v4029_v26 = vadd.f32 %v4028_v38, %v4010_v12 }
 0x4a2   : > { %4143 = vrot.lane.b32.xlu1 %v13808_v13, %s10627_s1  ;;  %v4066_v46 = vpop.f32.mrf.mxu1 }
 0x4a5   : > { %v3971_v34 = vpop.f32.mrf.mxu0 }
 0x4a6   : > { %v3972_v54 = vadd.f32 %v3971_v34, %v3953_v8  ;;  %v4101_v8 = vpop.f32.mrf.mxu3 }
 0x4a8   : > { %v13812_v49 = vmax.f32 %v3972_v54, 0.0  ;;  %v4082_v55 = vpop.f32.mrf.mxu2 }
 0x4aa   : > { %4145 = vrot.lane.b32.xlu2 %v13812_v49, %s10627_s1 }
 0x4ad   : > { %v3973_v33 = vpop.f32.mrf.mxu0 }
 0x4ae   : > { %v3974_v56 = vadd.f32 %v3973_v33, %v3955_v5  ;;  %v4104_v17 = vpop.f32.mrf.mxu3 }
 0x4b0   : > { %v13817_v28 = vmax.f32 %v3974_v56, 0.0  ;;  %v4085_v33 = vpop.f32.mrf.mxu2  ;;  %v4012_v56 = vadd.f32 %v4011_v32, %v3993_v40 }
 0x4b2   : > { %4147 = vrot.lane.b32.xlu0 %v13817_v28, %s10627_s1 }
 0x4b5   : > { %v4042_v53 = vpop.f32.mrf.mxu0 }
 0x4b6   : > { %v4043_v20 = vadd.f32 %v4042_v53, %v4024_v60  ;;  %v4031_v60 = vadd.f32 %v4030_v31, %v4012_v56 }
 0x4b8   : > { %v4062_v4 = vadd.f32 %v4061_v15, %v4043_v20  ;;  %v5171_v15 = vmul.f32 %v13808_v13, %v13272_v57  ;;  %v4068_v20 = vpop.f32.mrf.mxu1 }
 0x4ba   : > { %v4081_v59 = vadd.f32 %v4080_v11, %v4062_v4  ;;  %v4087_v4 = vpop.f32.mrf.mxu2 }
 0x4bc   : > { %v4100_v0 = vadd.f32 %v4099_v42, %v4081_v59  ;;  %v5175_v59 = vmul.f32 %v13812_v49, %v13272_v57 }
 0x4bd   : > { %v4044_v44 = vpop.f32.mrf.mxu0 }
 0x4be   : > { %v13823_v51 = vmax.f32 %v4100_v0, 0.0  ;;  %v4045_v21 = vadd.f32 %v4044_v44, %v4026_v24  ;;  %v4106_v24 = vpop.f32.mrf.mxu3  ;;  %v5179_v44 = vmul.f32 %v13817_v28, %v13272_v57  ;;  %v4128_v57 = vpop.permute.xlu2 %4127 }
 0x4c0   : > { %v4064_v34 = vadd.f32 %v4063_v61, %v4045_v21  ;;  %4149 = vrot.lane.b32.xlu1 %v13823_v51, %s10627_s1  ;;  %v5168_v14 = vmul.f32 %v13823_v51, %v13283_v50 }
 0x4c2   : > { %v4083_v22 = vadd.f32 %v4082_v55, %v4064_v34  ;;  %v5182_v45 = vpack.c.bf16 %v5168_v14, %v5167_v18  ;;  %v13890_v18 = vpop.permute.xlu0 %4129 }
 0x4c4   : > { %v4102_v54 = vadd.f32 %v4101_v8, %v4083_v22  ;;  %5190 = vst [vmem:[#allocation2 + $0x348] sm:$0xff] %v5182_v45 }
 0x4c5   : > { %v4047_v29 = vpop.f32.mrf.mxu0 }
 0x4c6   : > { %v13832_v41 = vmax.f32 %v4102_v54, 0.0  ;;  %v4048_v5 = vadd.f32 %v4047_v29, %v4029_v26  ;;  %v4134_v12 = vpop.permute.xlu2 %4133 }
 0x4c8   : > { %v4067_v37 = vadd.f32 %v4066_v46, %v4048_v5  ;;  %4151 = vrot.lane.b32.xlu2 %v13832_v41, %s10627_s1  ;;  %v5172_v38 = vmul.f32 %v13832_v41, %v13283_v50 }
 0x4ca   : > { %v4086_v58 = vadd.f32 %v4085_v33, %v4067_v37  ;;  %v5184_v11 = vpack.c.bf16 %v5172_v38, %v5171_v15 }
 0x4cc   : > { %v4105_v52 = vadd.f32 %v4104_v17, %v4086_v58  ;;  %5192 = vst [vmem:[#allocation2 + $0x358] sm:$0xff] %v5184_v11 }
 0x4cd   : > { %v4049_v42 = vpop.f32.mrf.mxu0 }
 0x4ce   : > { %v13840_v53 = vmax.f32 %v4105_v52, 0.0  ;;  %v4050_v32 = vadd.f32 %v4049_v42, %v4031_v60  ;;  %v4140_v14 = vpop.permute.xlu2 %4139 }
 0x4d0   : > { %v4069_v47 = vadd.f32 %v4068_v20, %v4050_v32  ;;  %4153 = vrot.lane.b32.xlu0 %v13840_v53, %s10627_s1  ;;  %4205 = vrot.lane.b32.xlu2 %v13690_v62, %s10628_s27  ;;  %v5176_v31 = vmul.f32 %v13840_v53, %v13283_v50 }
 0x4d2   : > { %v4088_v61 = vadd.f32 %v4087_v4, %v4069_v47  ;;  %v5186_v9 = vpack.c.bf16 %v5176_v31, %v5175_v59  ;;  %v16613_v4 = vld [vmem:[#allocation17_spill] sm:$0xff] }
 0x4d3   : > { %v16614_v31 = vld [vmem:[#allocation21_spill] sm:$0xff] }
 0x4d4   : > { %v4107_v0 = vadd.f32 %v4106_v24, %v4088_v61  ;;  %5194 = vst [vmem:[#allocation2 + $0x368] sm:$0xff] %v5186_v9 }
 0x4d6   : > { %v13850_v55 = vmax.f32 %v4107_v0, 0.0  ;;  %v4136_v26 = vpop.permute.xlu0 %4135  ;;  %v16615_v0 = vld [vmem:[#allocation16_spill] sm:$0xff] }
 0x4d7   : > { %v4166_v58 = vsel %vm391_vm0, %v4128_v57, %v4136_v26 }
 0x4d8   : > { %4155 = vrot.lane.b32.xlu1 %v13850_v55, %s10627_s1  ;;  %4207 = vrot.lane.b32.xlu0 %v13705_v30, %s10628_s27  ;;  %v5180_v21 = vmul.f32 %v13850_v55, %v13283_v50  ;;  %v13874_v50 = vpop.permute.xlu1 %4125  ;;  %v5521_v52 = vmul.f32 %v4166_v58, %v10977_v25  ;;  %v4178_v59 = vmul.f32 %v4166_v58, %v16613_v4  ;;  %s16670_s1 = smov 127  }
 0x4d9   : > { %4211 = vrot.lane.b32.xlu2 %v13724_v3, %s10628_s27  ;;  %v4165_v33 = vsel %vm391_vm0, %v13874_v50, %v4134_v12 }
 0x4da   : > { %v5188_v8 = vpack.c.bf16 %v5180_v21, %v5179_v44  ;;  %v5517_v15 = vmul.f32 %v4165_v33, %v10977_v25  ;;  %v16616_v21 = vld [vmem:[#allocation19_spill] sm:$0xff] }
 0x4dc   : > { %5196 = vst [vmem:[#allocation2 + $0x378] sm:$0xff] %v5188_v8 }
 0x4e0   : > { %4209 = vrot.lane.b32.xlu1 %v13715_v7, %s10628_s27  ;;  %4213 = vrot.lane.b32.xlu0 %v13753_v16, %s10628_s27  ;;  %v13882_v34 = vpop.permute.xlu1 %4131 }
 0x4e1   : > { %4217 = vrot.lane.b32.xlu2 %v13775_v48, %s10628_s27  ;;  %v13954_v20 = vsel %vm391_vm0, %v13882_v34, %v4140_v14 }
 0x4e8   : > { %4215 = vrot.lane.b32.xlu1 %v13767_v2, %s10628_s27  ;;  %4219 = vrot.lane.b32.xlu0 %v13784_v27, %s10628_s27  ;;  %v4138_v22 = vpop.permute.xlu1 %4137 }
 0x4e9   : > { %4223 = vrot.lane.b32.xlu2 %v13808_v13, %s10628_s27  ;;  %v13901_v45 = vsel %vm391_vm0, %v13890_v18, %v4138_v22 }
 0x4ea   : > { %v5525_v46 = vmul.f32 %v13901_v45, %v10977_v25 }
 0x4f0   : > { %4221 = vrot.lane.b32.xlu1 %v13801_v10, %s10628_s27  ;;  %4225 = vrot.lane.b32.xlu0 %v13812_v49, %s10628_s27 }
 0x4f1   : > { %4229 = vrot.lane.b32.xlu2 %v13823_v51, %s10628_s27 }
 0x4f8   : > { %4227 = vrot.lane.b32.xlu1 %v13817_v28, %s10628_s27  ;;  %4231 = vrot.lane.b32.xlu0 %v13832_v41, %s10628_s27 }
 0x4f9   : > { %4235 = vrot.lane.b32.xlu2 %v13850_v55, %s10628_s27 }
 0x500   : > { %4233 = vrot.lane.b32.xlu1 %v13840_v53, %s10628_s27  ;;  %4285 = vrot.lane.b32.xlu0 %v13690_v62, %s10629_s8  ;;  %s16678_s27 = smov 9  }
 0x501   : > { %4289 = vrot.lane.b32.xlu2 %v13715_v7, %s10629_s8 }
 0x504   : > { %v13903_v40 = vpop.permute.xlu2 %4145 }
 0x505   : > { %v13908_v54 = vsel %vm391_vm0, %v4138_v22, %v13903_v40 }
 0x506   : > { %v5526_v29 = vmul.f32 %v13908_v54, %v10963_v23 }
 0x508   : > { %v5537_v5 = vpack.c.bf16 %v5526_v29, %v5525_v46  ;;  %4287 = vrot.lane.b32.xlu1 %v13705_v30, %s10629_s8  ;;  %4291 = vrot.lane.b32.xlu0 %v13724_v3, %s10629_s8 }
 0x509   : > { %4295 = vrot.lane.b32.xlu2 %v13767_v2, %s10629_s8 }
 0x50a   : > { %5545 = vst [vmem:[#allocation2 + $0x4a0] sm:$0xff] %v5537_v5 }
 0x50c   : > { %v4142_v56 = vpop.permute.xlu0 %4141 }
 0x50d   : > { %v4161_v37 = vsel %vm391_vm0, %v4134_v12, %v4142_v56  ;;  %v16617_v12 = vld [vmem:[#allocation20_spill] sm:$0xff] }
 0x50e   : > { %v5518_v38 = vmul.f32 %v4161_v37, %v10963_v23 }
 0x510   : > { %v5533_v17 = vpack.c.bf16 %v5518_v38, %v5517_v15  ;;  %4293 = vrot.lane.b32.xlu1 %v13753_v16, %s10629_s8  ;;  %4297 = vrot.lane.b32.xlu0 %v13775_v48, %s10629_s8 }
 0x511   : > { %4301 = vrot.lane.b32.xlu2 %v13801_v10, %s10629_s8 }
 0x512   : > { %5541 = vst [vmem:[#allocation2 + $0x480] sm:$0xff] %v5533_v17 }
 0x514   : > { %v4144_v11 = vpop.permute.xlu1 %4143 }
 0x515   : > { %v4162_v60 = vsel %vm391_vm0, %v4136_v26, %v4144_v11  ;;  %v16618_v26 = vld [vmem:[#allocation18_spill] sm:$0xff] }
 0x516   : > { %v5522_v42 = vmul.f32 %v4162_v60, %v10963_v23  ;;  %v4179_v61 = vmul.f32 %v4162_v60, %v16614_v31  ;;  %v4175_v60 = vmul.f32 %v4161_v37, %v16614_v31 }
 0x518   : > { %v5535_v32 = vpack.c.bf16 %v5522_v42, %v5521_v52  ;;  %4299 = vrot.lane.b32.xlu1 %v13784_v27, %s10629_s8  ;;  %4303 = vrot.lane.b32.xlu0 %v13808_v13, %s10629_s8 }
 0x519   : > { %4307 = vrot.lane.b32.xlu2 %v13817_v28, %s10629_s8 }
 0x51a   : > { %5543 = vst [vmem:[#allocation2 + $0x490] sm:$0xff] %v5535_v32 }
 0x520   : > { %4305 = vrot.lane.b32.xlu1 %v13812_v49, %s10629_s8  ;;  %4309 = vrot.lane.b32.xlu0 %v13823_v51, %s10629_s8 }
 0x521   : > { %4313 = vrot.lane.b32.xlu2 %v13840_v53, %s10629_s8 }
 0x522   : > { %v4152_v47 = vpop.permute.xlu2 %4151 }
 0x523   : > { %v4158_v24 = vsel %vm391_vm0, %v4144_v11, %v4152_v47  ;;  %v4170_v9 = vsel %vm391_vm0, %v4152_v47, %v4128_v57  ;;  %v5529_v57 = vmul.f32 %v13954_v20, %v10977_v25  ;;  %v4174_v25 = vmul.f32 %v4165_v33, %v16613_v4 }
 0x524   : > { %v4177_v44 = vmul.f32 %v4170_v9, %v16615_v0  ;;  %v4180_v8 = vmul.f32 %v4158_v24, %v16616_v21  ;;  %v5523_v22 = vmul.f32 %v4158_v24, %v16617_v12  ;;  %v5524_v46 = vmul.f32 %v4170_v9, %v16618_v26  ;;  %v13966_v29 = vpop.permute.xlu0 %4147 }
 0x525   : > { %v13971_v5 = vsel %vm391_vm0, %v4140_v14, %v13966_v29 }
 0x526   : > { %v4191_v15 = vpack.c.bf16 %v4178_v59, %v4177_v44  ;;  %v4192_v38 = vpack.c.bf16 %v4180_v8, %v4179_v61  ;;  %v5536_v17 = vpack.c.bf16 %v5524_v46, %v5523_v22  ;;  %v5530_v58 = vmul.f32 %v13971_v5, %v10963_v23 }
 0x527   : > { %v4182_v44 = vmul.f32 %v13901_v45, %v16613_v4  ;;  %v4183_v8 = vmul.f32 %v13908_v54, %v16614_v31 }
 0x528   : > { %4199 = vst [vmem:[#allocation2 + $0x10] sm:$0xff] %v4191_v15  ;;  %4311 = vrot.lane.b32.xlu1 %v13832_v41, %s10629_s8  ;;  %4315 = vrot.lane.b32.xlu0 %v13850_v55, %s10629_s8  ;;  %v5539_v11 = vpack.c.bf16 %v5530_v58, %v5529_v57  ;;  %s16689_s8 = smov 1  }
 0x529   : > { %4200 = vst [vmem:[#allocation2 + $0x18] sm:$0xff] %v4192_v38  ;;  %4367 = vrot.lane.b32.xlu2 %v13705_v30, %s10630_s30 }
 0x52a   : > { %5544 = vst [vmem:[#allocation2 + $0x498] sm:$0xff] %v5536_v17  ;;  %v13983_v14 = vpop.permute.xlu2 %4205 }
 0x52b   : > { %5547 = vst [vmem:[#allocation2 + $0x4b0] sm:$0xff] %v5539_v11 }
 0x530   : > { %4365 = vrot.lane.b32.xlu1 %v13690_v62, %s10630_s30  ;;  %4369 = vrot.lane.b32.xlu0 %v13715_v7, %s10630_s30 }
 0x531   : > { %4373 = vrot.lane.b32.xlu2 %v13753_v16, %s10630_s30 }
 0x532   : > { %v4150_v23 = vpop.permute.xlu1 %4149 }
 0x533   : > { %v4157_v52 = vsel %vm391_vm0, %v4142_v56, %v4150_v23  ;;  %v4169_v42 = vsel %vm391_vm0, %v4150_v23, %v13874_v50  ;;  %v13998_v32 = vpop.permute.xlu2 %4211  ;;  %v4186_v23 = vmul.f32 %v13954_v20, %v16613_v4 }
 0x534   : > { %v4173_v47 = vmul.f32 %v4169_v42, %v16615_v0  ;;  %v4176_v59 = vmul.f32 %v4157_v52, %v16616_v21  ;;  %v5519_v61 = vmul.f32 %v4157_v52, %v16617_v12  ;;  %v5520_v24 = vmul.f32 %v4169_v42, %v16618_v26 }
 0x536   : > { %v4189_v33 = vpack.c.bf16 %v4174_v25, %v4173_v47  ;;  %v4190_v9 = vpack.c.bf16 %v4176_v59, %v4175_v60  ;;  %v5534_v37 = vpack.c.bf16 %v5520_v24, %v5519_v61  ;;  %v4187_v25 = vmul.f32 %v13971_v5, %v16614_v31 }
 0x538   : > { %4197 = vst [vmem:[#allocation2] sm:$0xff] %v4189_v33  ;;  %4371 = vrot.lane.b32.xlu1 %v13724_v3, %s10630_s30  ;;  %4375 = vrot.lane.b32.xlu0 %v13767_v2, %s10630_s30  ;;  %v16620_v33 = vld [vmem:[#allocation25_spill] sm:$0xff] }
 0x539   : > { %4198 = vst [vmem:[#allocation2 + $0x8] sm:$0xff] %v4190_v9  ;;  %4379 = vrot.lane.b32.xlu2 %v13784_v27, %s10630_s30 }
 0x53a   : > { %5542 = vst [vmem:[#allocation2 + $0x488] sm:$0xff] %v5534_v37 }
 0x53b   : > { %v14010_v50 = vpop.permute.xlu2 %4217 }
 0x540   : > { %4377 = vrot.lane.b32.xlu1 %v13775_v48, %s10630_s30  ;;  %4381 = vrot.lane.b32.xlu0 %v13801_v10, %s10630_s30 }
 0x541   : > { %4385 = vrot.lane.b32.xlu2 %v13812_v49, %s10630_s30 }
 0x542   : > { %v4154_v56 = vpop.permute.xlu0 %4153 }
 0x543   : > { %v4159_v22 = vsel %vm391_vm0, %v13903_v40, %v4154_v56  ;;  %v4171_v46 = vsel %vm391_vm0, %v4154_v56, %v13890_v18  ;;  %v14028_v15 = vpop.permute.xlu2 %4223 }
 0x544   : > { %v4181_v38 = vmul.f32 %v4171_v46, %v16615_v0  ;;  %v4184_v17 = vmul.f32 %v4159_v22, %v16616_v21  ;;  %v5527_v57 = vmul.f32 %v4159_v22, %v16617_v12  ;;  %v5528_v45 = vmul.f32 %v4171_v46, %v16618_v26 }
 0x546   : > { %v4193_v58 = vpack.c.bf16 %v4182_v44, %v4181_v38  ;;  %v4194_v54 = vpack.c.bf16 %v4184_v17, %v4183_v8  ;;  %v5538_v11 = vpack.c.bf16 %v5528_v45, %v5527_v57  ;;  %v16621_v17 = vld [vmem:[#allocation23_spill] sm:$0xff]  ;;  %v16622_v45 = vld [vmem:[#allocation22_spill] sm:$0xff] }
 0x548   : > { %4201 = vst [vmem:[#allocation2 + $0x20] sm:$0xff] %v4193_v58  ;;  %4383 = vrot.lane.b32.xlu1 %v13808_v13, %s10630_s30  ;;  %4387 = vrot.lane.b32.xlu0 %v13817_v28, %s10630_s30 }
 0x549   : > { %4202 = vst [vmem:[#allocation2 + $0x28] sm:$0xff] %v4194_v54  ;;  %4391 = vrot.lane.b32.xlu2 %v13832_v41, %s10630_s30 }
 0x54a   : > { %5546 = vst [vmem:[#allocation2 + $0x4a8] sm:$0xff] %v5538_v11  ;;  %v4156_v18 = vpop.permute.xlu1 %4155  ;;  %v14040_v40 = vpop.permute.xlu0 %4207 }
 0x54b   : > { %v4160_v60 = vsel %vm391_vm0, %v13966_v29, %v4156_v18  ;;  %v4172_v52 = vsel %vm391_vm0, %v4156_v18, %v13882_v34  ;;  %v4230_v42 = vpop.permute.xlu2 %4229  ;;  %v16619_v29 = vld [vmem:[#allocation24_spill] sm:$0xff]  ;;  %vm16723_vm0 = vcmp.lt.s32.totalorder %v10953_v19, 1 }
 0x54c   : > { %v4185_v47 = vmul.f32 %v4172_v52, %v16615_v0  ;;  %v4188_v59 = vmul.f32 %v4160_v60, %v16616_v21  ;;  %v5531_v61 = vmul.f32 %v4160_v60, %v16617_v12  ;;  %v5532_v20 = vmul.f32 %v4172_v52, %v16618_v26 }
 0x54d   : > { %v4249_v34 = vsel %vm476_vm1, %v4230_v42, %v13983_v14 }
 0x54e   : > { %v4195_v4 = vpack.c.bf16 %v4186_v23, %v4185_v47  ;;  %v4196_v24 = vpack.c.bf16 %v4188_v59, %v4187_v25  ;;  %v5540_v31 = vpack.c.bf16 %v5532_v20, %v5531_v61  ;;  %v4253_v5 = vmul.f32 %v4249_v34, %v16619_v29 }
 0x550   : > { %4203 = vst [vmem:[#allocation2 + $0x30] sm:$0xff] %v4195_v4  ;;  %4389 = vrot.lane.b32.xlu1 %v13823_v51, %s10630_s30  ;;  %4393 = vrot.lane.b32.xlu0 %v13840_v53, %s10630_s30 }
 0x551   : > { %4204 = vst [vmem:[#allocation2 + $0x38] sm:$0xff] %v4196_v24  ;;  %4445 = vrot.lane.b32.xlu2 %v13690_v62, %s10631_s9 }
 0x552   : > { %5548 = vst [vmem:[#allocation2 + $0x4b8] sm:$0xff] %v5540_v31  ;;  %v14065_v0 = vpop.permute.xlu1 %4209  ;;  %v4214_v21 = vpop.permute.xlu0 %4213  ;;  %v16624_v31 = vld [vmem:[#allocation27_spill] sm:$0xff] }
 0x553   : > { %v4245_v12 = vsel %vm476_vm1, %v13983_v14, %v4214_v21  ;;  %v4236_v26 = vpop.permute.xlu2 %4235  ;;  %v4247_v60 = vsel %vm476_vm1, %v14065_v0, %v14010_v50 }
 0x554   : > { %v4254_v9 = vmul.f32 %v4245_v12, %v16620_v33  ;;  %v4252_v14 = vsel %vm476_vm1, %v4236_v26, %v13998_v32  ;;  %v5549_v59 = vmul.f32 %v4245_v12, %v16621_v17 }
 0x555   : > { %v4265_v54 = vmul.f32 %v4252_v14, %v16619_v29 }
 0x556   : > { %v4269_v37 = vpack.c.bf16 %v4254_v9, %v4253_v5  ;;  %v16625_v5 = vld [vmem:[#allocation28_spill] sm:$0xff] }
 0x558   : > { %4277 = vst [vmem:[#allocation2 + $0x40] sm:$0xff] %v4269_v37  ;;  %4395 = vrot.lane.b32.xlu1 %v13850_v55, %s10630_s30  ;;  %4447 = vrot.lane.b32.xlu0 %v13705_v30, %s10631_s9  ;;  %s16702_s30 = smov 119  }
 0x559   : > { %4451 = vrot.lane.b32.xlu2 %v13724_v3, %s10631_s9 }
 0x55a   : > { %v4216_v56 = vpop.permute.xlu1 %4215  ;;  %v4220_v44 = vpop.permute.xlu0 %4219 }
 0x55b   : > { %v4242_v8 = vsel %vm476_vm1, %v4216_v56, %v14028_v15  ;;  %v4246_v22 = vsel %vm476_vm1, %v14040_v40, %v4216_v56  ;;  %v4248_v46 = vsel %vm476_vm1, %v13998_v32, %v4220_v44  ;;  %v14090_v38 = vpop.permute.xlu2 %4289  ;;  %v16623_v32 = vld [vmem:[#allocation26_spill] sm:$0xff]  ;;  %v16626_v56 = vld [vmem:[#allocation29_spill] sm:$0xff] }
 0x55c   : > { %v5553_v57 = vmul.f32 %v4246_v22, %v16621_v17  ;;  %v5554_v58 = vmul.f32 %v4242_v8, %v16622_v45  ;;  %v4266_v11 = vmul.f32 %v4248_v46, %v16620_v33  ;;  %v5552_v25 = vmul.f32 %v4249_v34, %v16623_v32 }
 0x55e   : > { %v5567_v18 = vpack.c.bf16 %v5554_v58, %v5553_v57  ;;  %v4275_v23 = vpack.c.bf16 %v4266_v11, %v4265_v54  ;;  %v5557_v57 = vmul.f32 %v4247_v60, %v16621_v17 }
 0x560   : > { %5575 = vst [vmem:[#allocation2 + $0x4d0] sm:$0xff] %v5567_v18  ;;  %4449 = vrot.lane.b32.xlu1 %v13715_v7, %s10631_s9  ;;  %4453 = vrot.lane.b32.xlu0 %v13753_v16, %s10631_s9  ;;  %v4258_v18 = vmul.f32 %v4246_v22, %v16620_v33 }
 0x561   : > { %4283 = vst [vmem:[#allocation2 + $0x70] sm:$0xff] %v4275_v23  ;;  %4457 = vrot.lane.b32.xlu2 %v13775_v48, %s10631_s9  ;;  %v5561_v23 = vmul.f32 %v4248_v46, %v16621_v17 }
 0x562   : > { %v4222_v52 = vpop.permute.xlu1 %4221  ;;  %v4226_v47 = vpop.permute.xlu0 %4225 }
 0x563   : > { %v4237_v61 = vsel %vm476_vm1, %v4222_v52, %v4230_v42  ;;  %v4241_v20 = vsel %vm476_vm1, %v4214_v21, %v4222_v52  ;;  %v4243_v4 = vsel %vm476_vm1, %v14010_v50, %v4226_v47  ;;  %v14115_v24 = vpop.permute.xlu2 %4295  ;;  %v5564_v50 = vmul.f32 %v4252_v14, %v16623_v32 }
 0x564   : > { %v4255_v34 = vmul.f32 %v4241_v20, %v16624_v31  ;;  %v4256_v9 = vmul.f32 %v4237_v61, %v16625_v5  ;;  %v5550_v37 = vmul.f32 %v4241_v20, %v16622_v45  ;;  %v5551_v12 = vmul.f32 %v4237_v61, %v16626_v56 }
 0x565   : > { %v5558_v42 = vmul.f32 %v4243_v4, %v16622_v45 }
 0x566   : > { %v4270_v58 = vpack.c.bf16 %v4256_v9, %v4255_v34  ;;  %v5565_v21 = vpack.c.bf16 %v5550_v37, %v5549_v59  ;;  %v5566_v54 = vpack.c.bf16 %v5552_v25, %v5551_v12 }
 0x567   : > { %v5569_v11 = vpack.c.bf16 %v5558_v42, %v5557_v57 }
 0x568   : > { %4278 = vst [vmem:[#allocation2 + $0x48] sm:$0xff] %v4270_v58  ;;  %4455 = vrot.lane.b32.xlu1 %v13767_v2, %s10631_s9  ;;  %4459 = vrot.lane.b32.xlu0 %v13784_v27, %s10631_s9 }
 0x569   : > { %5573 = vst [vmem:[#allocation2 + $0x4c0] sm:$0xff] %v5565_v21  ;;  %4463 = vrot.lane.b32.xlu2 %v13808_v13, %s10631_s9 }
 0x56a   : > { %5574 = vst [vmem:[#allocation2 + $0x4c8] sm:$0xff] %v5566_v54  ;;  %v4228_v25 = vpop.permute.xlu1 %4227  ;;  %v4232_v52 = vpop.permute.xlu0 %4231 }
 0x56b   : > { %5577 = vst [vmem:[#allocation2 + $0x4e0] sm:$0xff] %v5569_v11  ;;  %v4240_v59 = vsel %vm476_vm1, %v4228_v25, %v4236_v26  ;;  %v4244_v61 = vsel %vm476_vm1, %v4220_v44, %v4228_v25  ;;  %v4238_v20 = vsel %vm476_vm1, %v14028_v15, %v4232_v52  ;;  %v4250_v14 = vsel %vm476_vm1, %v4232_v52, %v14040_v40  ;;  %v14142_v22 = vpop.permute.xlu2 %4301 }
 0x56c   : > { %v4267_v46 = vmul.f32 %v4244_v61, %v16624_v31  ;;  %v4268_v17 = vmul.f32 %v4240_v59, %v16625_v5  ;;  %v5562_v34 = vmul.f32 %v4244_v61, %v16622_v45  ;;  %v5563_v26 = vmul.f32 %v4240_v59, %v16626_v56 }
 0x56d   : > { %v4257_v44 = vmul.f32 %v4250_v14, %v16619_v29  ;;  %v4260_v9 = vmul.f32 %v4238_v20, %v16625_v5  ;;  %v5555_v15 = vmul.f32 %v4238_v20, %v16626_v56  ;;  %v5556_v37 = vmul.f32 %v4250_v14, %v16623_v32 }
 0x56e   : > { %v4259_v40 = vmul.f32 %v4242_v8, %v16624_v31  ;;  %v4276_v12 = vpack.c.bf16 %v4268_v17, %v4267_v46  ;;  %v5571_v57 = vpack.c.bf16 %v5562_v34, %v5561_v23  ;;  %v5572_v42 = vpack.c.bf16 %v5564_v50, %v5563_v26  ;;  %v16627_v34 = vld [vmem:[#allocation30_spill] sm:$0xff] }
 0x56f   : > { %v4271_v58 = vpack.c.bf16 %v4258_v18, %v4257_v44  ;;  %v5568_v45 = vpack.c.bf16 %v5556_v37, %v5555_v15  ;;  %v4262_v11 = vmul.f32 %v4247_v60, %v16620_v33  ;;  %v4263_v50 = vmul.f32 %v4243_v4, %v16624_v31  ;;  %v16628_v44 = vld [vmem:[#allocation31_spill] sm:$0xff]  ;;  %v16629_v15 = vld [vmem:[#allocation32_spill] sm:$0xff] }
 0x570   : > { %4284 = vst [vmem:[#allocation2 + $0x78] sm:$0xff] %v4276_v12  ;;  %v4272_v21 = vpack.c.bf16 %v4260_v9, %v4259_v40  ;;  %4461 = vrot.lane.b32.xlu1 %v13801_v10, %s10631_s9  ;;  %4465 = vrot.lane.b32.xlu0 %v13812_v49, %s10631_s9  ;;  %v16630_v40 = vld [vmem:[#allocation33_spill] sm:$0xff] }
 0x571   : > { %5579 = vst [vmem:[#allocation2 + $0x4f0] sm:$0xff] %v5571_v57  ;;  %4469 = vrot.lane.b32.xlu2 %v13823_v51, %s10631_s9 }
 0x572   : > { %5580 = vst [vmem:[#allocation2 + $0x4f8] sm:$0xff] %v5572_v42  ;;  %v4234_v54 = vpop.permute.xlu1 %4233  ;;  %v14159_v8 = vpop.permute.xlu0 %4285 }
 0x573   : > { %4279 = vst [vmem:[#allocation2 + $0x50] sm:$0xff] %v4271_v58  ;;  %v4239_v18 = vsel %vm476_vm1, %v4226_v47, %v4234_v54  ;;  %v4251_v23 = vsel %vm476_vm1, %v4234_v54, %v14065_v0  ;;  %v14168_v25 = vpop.permute.xlu2 %4307  ;;  %vm16724_vm1 = vmmov %vm16723_vm0 }
 0x574   : > { %4280 = vst [vmem:[#allocation2 + $0x58] sm:$0xff] %v4272_v21  ;;  %v4261_v52 = vmul.f32 %v4251_v23, %v16619_v29  ;;  %v4264_v59 = vmul.f32 %v4239_v18, %v16625_v5  ;;  %v5559_v61 = vmul.f32 %v4239_v18, %v16626_v56  ;;  %v5560_v33 = vmul.f32 %v4251_v23, %v16623_v32 }
 0x575   : > { %5576 = vst [vmem:[#allocation2 + $0x4d8] sm:$0xff] %v5568_v45 }
 0x576   : > { %v4273_v60 = vpack.c.bf16 %v4262_v11, %v4261_v52  ;;  %v4274_v4 = vpack.c.bf16 %v4264_v59, %v4263_v50  ;;  %v5570_v31 = vpack.c.bf16 %v5560_v33, %v5559_v61 }
 0x578   : > { %4281 = vst [vmem:[#allocation2 + $0x60] sm:$0xff] %v4273_v60  ;;  %4467 = vrot.lane.b32.xlu1 %v13817_v28, %s10631_s9  ;;  %4471 = vrot.lane.b32.xlu0 %v13832_v41, %s10631_s9 }
 0x579   : > { %4282 = vst [vmem:[#allocation2 + $0x68] sm:$0xff] %v4274_v4  ;;  %4475 = vrot.lane.b32.xlu2 %v13850_v55, %s10631_s9 }
 0x57a   : > { %5578 = vst [vmem:[#allocation2 + $0x4e8] sm:$0xff] %v5570_v31  ;;  %v14180_v0 = vpop.permute.xlu1 %4287  ;;  %v14182_v29 = vpop.permute.xlu0 %4291 }
 0x57b   : > { %v4314_v32 = vpop.permute.xlu2 %4313 }
 0x57c   : > { %v4331_v47 = vsel %vm561_vm2, %v4314_v32, %v14090_v38 }
 0x57d   : > { %v4341_v37 = vmul.f32 %v4331_v47, %v16629_v15 }
 0x580   : > { %4473 = vrot.lane.b32.xlu1 %v13840_v53, %s10631_s9  ;;  %4525 = vrot.lane.b32.xlu0 %v13690_v62, %s10632_s12  ;;  %s16712_s9 = smov 120  }
 0x581   : > { %4529 = vrot.lane.b32.xlu2 %v13715_v7, %s10632_s12 }
 0x582   : > { %v4294_v5 = vpop.permute.xlu1 %4293  ;;  %v4298_v56 = vpop.permute.xlu0 %4297 }
 0x583   : > { %v4321_v20 = vsel %vm561_vm2, %v4294_v5, %v14142_v22  ;;  %v4325_v14 = vsel %vm561_vm2, %v14159_v8, %v4294_v5  ;;  %v4327_v46 = vsel %vm561_vm2, %v14090_v38, %v4298_v56  ;;  %v14202_v17 = vpop.permute.xlu2 %4367  ;;  %v4326_v38 = vsel %vm561_vm2, %v14180_v0, %v14115_v24 }
 0x584   : > { %v5581_v26 = vmul.f32 %v4325_v14, %v16627_v34  ;;  %v5582_v9 = vmul.f32 %v4321_v20, %v16628_v44  ;;  %v4342_v12 = vmul.f32 %v4327_v46, %v16630_v40  ;;  %v5585_v52 = vmul.f32 %v4326_v38, %v16627_v34 }
 0x585   : > { %v4334_v4 = vmul.f32 %v4325_v14, %v16630_v40  ;;  %v5589_v31 = vmul.f32 %v4327_v46, %v16627_v34  ;;  %v16632_v14 = vld [vmem:[#allocation35_spill] sm:$0xff] }
 0x586   : > { %v5597_v57 = vpack.c.bf16 %v5582_v9, %v5581_v26  ;;  %v4353_v42 = vpack.c.bf16 %v4342_v12, %v4341_v37 }
 0x588   : > { %5605 = vst [vmem:[#allocation2 + $0x500] sm:$0xff] %v5597_v57  ;;  %4527 = vrot.lane.b32.xlu1 %v13705_v30, %s10632_s12  ;;  %4531 = vrot.lane.b32.xlu0 %v13724_v3, %s10632_s12 }
 0x589   : > { %4361 = vst [vmem:[#allocation2 + $0xa0] sm:$0xff] %v4353_v42  ;;  %4535 = vrot.lane.b32.xlu2 %v13767_v2, %s10632_s12 }
 0x58a   : > { %v4300_v58 = vpop.permute.xlu1 %4299  ;;  %v4304_v21 = vpop.permute.xlu0 %4303 }
 0x58b   : > { %v14221_v45 = vsel %vm561_vm2, %v4300_v58, %v14168_v25  ;;  %v4328_v54 = vsel %vm561_vm2, %v14182_v29, %v4300_v58  ;;  %v4322_v11 = vsel %vm561_vm2, %v14115_v24, %v4304_v21  ;;  %v14229_v50 = vpop.permute.xlu2 %4373  ;;  %v16631_v24 = vld [vmem:[#allocation34_spill] sm:$0xff] }
 0x58c   : > { %v5593_v18 = vmul.f32 %v4328_v54, %v16627_v34  ;;  %v5594_v23 = vmul.f32 %v14221_v45, %v16628_v44  ;;  %v5586_v59 = vmul.f32 %v4322_v11, %v16628_v44  ;;  %v5592_v60 = vmul.f32 %v4331_v47, %v16631_v24  ;;  %v16633_v34 = vld [vmem:[#allocation36_spill] sm:$0xff] }
 0x58e   : > { %v5603_v61 = vpack.c.bf16 %v5594_v23, %v5593_v18  ;;  %v5599_v33 = vpack.c.bf16 %v5586_v59, %v5585_v52 }
 0x590   : > { %5611 = vst [vmem:[#allocation2 + $0x530] sm:$0xff] %v5603_v61  ;;  %4533 = vrot.lane.b32.xlu1 %v13753_v16, %s10632_s12  ;;  %4537 = vrot.lane.b32.xlu0 %v13775_v48, %s10632_s12 }
 0x591   : > { %5607 = vst [vmem:[#allocation2 + $0x510] sm:$0xff] %v5599_v33  ;;  %4541 = vrot.lane.b32.xlu2 %v13801_v10, %s10632_s12 }
 0x592   : > { %v4306_v5 = vpop.permute.xlu1 %4305  ;;  %v4310_v26 = vpop.permute.xlu0 %4309 }
 0x593   : > { %v4319_v9 = vsel %vm561_vm2, %v4306_v5, %v4314_v32  ;;  %v4323_v37 = vsel %vm561_vm2, %v4298_v56, %v4306_v5  ;;  %v4317_v12 = vsel %vm561_vm2, %v14142_v22, %v4310_v26  ;;  %v4329_v47 = vsel %vm561_vm2, %v4310_v26, %v14159_v8  ;;  %v14255_v57 = vpop.permute.xlu2 %4379  ;;  %v16634_v32 = vld [vmem:[#allocation37_spill] sm:$0xff] }
 0x594   : > { %v4343_v46 = vmul.f32 %v4323_v37, %v16632_v14  ;;  %v4344_v42 = vmul.f32 %v4319_v9, %v16633_v34  ;;  %v5590_v58 = vmul.f32 %v4323_v37, %v16628_v44  ;;  %v5591_v18 = vmul.f32 %v4319_v9, %v16634_v32 }
 0x595   : > { %v4333_v56 = vmul.f32 %v4329_v47, %v16629_v15  ;;  %v4336_v23 = vmul.f32 %v4317_v12, %v16633_v34  ;;  %v5583_v22 = vmul.f32 %v4317_v12, %v16634_v32  ;;  %v5584_v52 = vmul.f32 %v4329_v47, %v16631_v24 }
 0x596   : > { %v4335_v8 = vmul.f32 %v4321_v20, %v16632_v14  ;;  %v4354_v59 = vpack.c.bf16 %v4344_v42, %v4343_v46  ;;  %v5601_v61 = vpack.c.bf16 %v5590_v58, %v5589_v31  ;;  %v5602_v33 = vpack.c.bf16 %v5592_v60, %v5591_v18 }
 0x597   : > { %v4349_v5 = vpack.c.bf16 %v4334_v4, %v4333_v56  ;;  %v5598_v44 = vpack.c.bf16 %v5584_v52, %v5583_v22  ;;  %v4338_v9 = vmul.f32 %v4326_v38, %v16630_v40  ;;  %v4346_v20 = vmul.f32 %v4328_v54, %v16630_v40 }
 0x598   : > { %4362 = vst [vmem:[#allocation2 + $0xa8] sm:$0xff] %v4354_v59  ;;  %v4350_v26 = vpack.c.bf16 %v4336_v23, %v4335_v8  ;;  %4539 = vrot.lane.b32.xlu1 %v13784_v27, %s10632_s12  ;;  %4543 = vrot.lane.b32.xlu0 %v13808_v13, %s10632_s12  ;;  %v4339_v60 = vmul.f32 %v4322_v11, %v16632_v14 }
 0x599   : > { %5609 = vst [vmem:[#allocation2 + $0x520] sm:$0xff] %v5601_v61  ;;  %4547 = vrot.lane.b32.xlu2 %v13817_v28, %s10632_s12  ;;  %v4347_v58 = vmul.f32 %v14221_v45, %v16632_v14 }
 0x59a   : > { %5610 = vst [vmem:[#allocation2 + $0x528] sm:$0xff] %v5602_v33  ;;  %v4312_v4 = vpop.permute.xlu1 %4311  ;;  %v4316_v31 = vpop.permute.xlu0 %4315  ;;  %v16635_v33 = vld [vmem:[#allocation40_spill] sm:$0xff] }
 0x59b   : > { %4357 = vst [vmem:[#allocation2 + $0x80] sm:$0xff] %v4349_v5  ;;  %v4318_v37 = vsel %vm561_vm2, %v4304_v21, %v4312_v4  ;;  %v4330_v12 = vsel %vm561_vm2, %v4312_v4, %v14180_v0  ;;  %v4320_v47 = vsel %vm561_vm2, %v14168_v25, %v4316_v31  ;;  %v4332_v40 = vsel %vm561_vm2, %v4316_v31, %v14182_v29  ;;  %v14286_v38 = vpop.permute.xlu2 %4385  ;;  %vm16730_vm2 = vmmov %vm16723_vm0 }
 0x59c   : > { %4358 = vst [vmem:[#allocation2 + $0x88] sm:$0xff] %v4350_v26  ;;  %v4337_v54 = vmul.f32 %v4330_v12, %v16629_v15  ;;  %v4340_v11 = vmul.f32 %v4318_v37, %v16633_v34  ;;  %v5587_v21 = vmul.f32 %v4318_v37, %v16634_v32  ;;  %v5588_v46 = vmul.f32 %v4330_v12, %v16631_v24  ;;  %v16636_v26 = vld [vmem:[#allocation41_spill] sm:$0xff] }
 0x59d   : > { %5606 = vst [vmem:[#allocation2 + $0x508] sm:$0xff] %v5598_v44  ;;  %v4345_v0 = vmul.f32 %v4332_v40, %v16629_v15  ;;  %v4348_v25 = vmul.f32 %v4320_v47, %v16633_v34  ;;  %v5595_v42 = vmul.f32 %v4320_v47, %v16634_v32  ;;  %v5596_v29 = vmul.f32 %v4332_v40, %v16631_v24  ;;  %v16637_v47 = vld [vmem:[#allocation38_spill] sm:$0xff] }
 0x59e   : > { %v4351_v18 = vpack.c.bf16 %v4338_v9, %v4337_v54  ;;  %v4352_v56 = vpack.c.bf16 %v4340_v11, %v4339_v60  ;;  %v5600_v23 = vpack.c.bf16 %v5588_v46, %v5587_v21  ;;  %v16638_v54 = vld [vmem:[#allocation39_spill] sm:$0xff] }
 0x59f   : > { %v4355_v22 = vpack.c.bf16 %v4346_v20, %v4345_v0  ;;  %v4356_v52 = vpack.c.bf16 %v4348_v25, %v4347_v58  ;;  %v5604_v15 = vpack.c.bf16 %v5596_v29, %v5595_v42 }
 0x5a0   : > { %4359 = vst [vmem:[#allocation2 + $0x90] sm:$0xff] %v4351_v18  ;;  %4545 = vrot.lane.b32.xlu1 %v13812_v49, %s10632_s12  ;;  %4549 = vrot.lane.b32.xlu0 %v13823_v51, %s10632_s12 }
 0x5a1   : > { %4360 = vst [vmem:[#allocation2 + $0x98] sm:$0xff] %v4352_v56  ;;  %4553 = vrot.lane.b32.xlu2 %v13840_v53, %s10632_s12 }
 0x5a2   : > { %5608 = vst [vmem:[#allocation2 + $0x518] sm:$0xff] %v5600_v23  ;;  %v14304_v24 = vpop.permute.xlu1 %4365  ;;  %v14306_v45 = vpop.permute.xlu0 %4369 }
 0x5a3   : > { %4363 = vst [vmem:[#allocation2 + $0xb0] sm:$0xff] %v4355_v22  ;;  %v4392_v14 = vpop.permute.xlu2 %4391 }
 0x5a4   : > { %4364 = vst [vmem:[#allocation2 + $0xb8] sm:$0xff] %v4356_v52  ;;  %v4410_v34 = vsel %vm646_vm3, %v4392_v14, %v14202_v17 }
 0x5a5   : > { %5612 = vst [vmem:[#allocation2 + $0x538] sm:$0xff] %v5604_v15  ;;  %v4417_v5 = vmul.f32 %v4410_v34, %v16635_v33 }
 0x5a8   : > { %4551 = vrot.lane.b32.xlu1 %v13832_v41, %s10632_s12  ;;  %4555 = vrot.lane.b32.xlu0 %v13850_v55, %s10632_s12 }
 0x5a9   : > { %4607 = vrot.lane.b32.xlu2 %v13705_v30, %s10633_s13 }
 0x5aa   : > { %v14317_v32 = vpop.permute.xlu1 %4371  ;;  %v4376_v8 = vpop.permute.xlu0 %4375 }
 0x5ab   : > { %v4406_v59 = vsel %vm646_vm3, %v14202_v17, %v4376_v8  ;;  %v14322_v61 = vpop.permute.xlu2 %4445  ;;  %v4405_v17 = vsel %vm646_vm3, %v14304_v24, %v14229_v50  ;;  %v4408_v29 = vsel %vm646_vm3, %v14317_v32, %v14255_v57 }
 0x5ac   : > { %v4418_v44 = vmul.f32 %v4406_v59, %v16636_v26  ;;  %v5613_v21 = vmul.f32 %v4405_v17, %v16637_v47  ;;  %v5617_v56 = vmul.f32 %v4406_v59, %v16637_v47 }
 0x5ae   : > { %v4431_v9 = vpack.c.bf16 %v4418_v44, %v4417_v5  ;;  %v16641_v44 = vld [vmem:[#allocation43_spill] sm:$0xff] }
 0x5b0   : > { %4439 = vst [vmem:[#allocation2 + $0xd0] sm:$0xff] %v4431_v9  ;;  %4605 = vrot.lane.b32.xlu1 %v13690_v62, %s10633_s13  ;;  %4609 = vrot.lane.b32.xlu0 %v13715_v7, %s10633_s13 }
 0x5b1   : > { %4613 = vrot.lane.b32.xlu2 %v13753_v16, %s10633_s13 }
 0x5b2   : > { %v4378_v20 = vpop.permute.xlu1 %4377  ;;  %v4382_v60 = vpop.permute.xlu0 %4381 }
 0x5b3   : > { %v4403_v4 = vsel %vm646_vm3, %v4378_v20, %v14286_v38  ;;  %v4407_v31 = vsel %vm646_vm3, %v14306_v45, %v4378_v20  ;;  %v4401_v37 = vsel %vm646_vm3, %v14229_v50, %v4382_v60  ;;  %v14345_v12 = vpop.permute.xlu2 %4451  ;;  %v16639_v50 = vld [vmem:[#allocation42_spill] sm:$0xff] }
 0x5b4   : > { %v5621_v40 = vmul.f32 %v4407_v31, %v16637_v47  ;;  %v5622_v11 = vmul.f32 %v4403_v4, %v16638_v54  ;;  %v5614_v46 = vmul.f32 %v4401_v37, %v16638_v54  ;;  %v5620_v42 = vmul.f32 %v4410_v34, %v16639_v50  ;;  %v16640_v34 = vld [vmem:[#allocation45_spill] sm:$0xff] }
 0x5b6   : > { %v5633_v0 = vpack.c.bf16 %v5622_v11, %v5621_v40  ;;  %v5629_v25 = vpack.c.bf16 %v5614_v46, %v5613_v21  ;;  %v16642_v40 = vld [vmem:[#allocation44_spill] sm:$0xff]  ;;  %v5625_v11 = vmul.f32 %v4408_v29, %v16637_v47  ;;  %v4422_v47 = vmul.f32 %v4407_v31, %v16636_v26 }
 0x5b8   : > { %5641 = vst [vmem:[#allocation2 + $0x560] sm:$0xff] %v5633_v0  ;;  %4611 = vrot.lane.b32.xlu1 %v13724_v3, %s10633_s13  ;;  %4615 = vrot.lane.b32.xlu0 %v13767_v2, %s10633_s13 }
 0x5b9   : > { %5637 = vst [vmem:[#allocation2 + $0x540] sm:$0xff] %v5629_v25  ;;  %4619 = vrot.lane.b32.xlu2 %v13784_v27, %s10633_s13 }
 0x5ba   : > { %v4384_v58 = vpop.permute.xlu1 %4383  ;;  %v4388_v18 = vpop.permute.xlu0 %4387 }
 0x5bb   : > { %v4398_v23 = vsel %vm646_vm3, %v4384_v58, %v4392_v14  ;;  %v4402_v22 = vsel %vm646_vm3, %v4376_v8, %v4384_v58  ;;  %v4404_v52 = vsel %vm646_vm3, %v14255_v57, %v4388_v18  ;;  %v14370_v15 = vpop.permute.xlu2 %4457  ;;  %v4414_v57 = vmul.f32 %v4405_v17, %v16636_v26 }
 0x5bc   : > { %v4419_v5 = vmul.f32 %v4402_v22, %v16640_v34  ;;  %v4420_v9 = vmul.f32 %v4398_v23, %v16641_v44  ;;  %v5618_v20 = vmul.f32 %v4402_v22, %v16638_v54  ;;  %v5619_v59 = vmul.f32 %v4398_v23, %v16642_v40 }
 0x5bd   : > { %v5626_v14 = vmul.f32 %v4404_v52, %v16638_v54  ;;  %v4415_v54 = vmul.f32 %v4401_v37, %v16640_v34 }
 0x5be   : > { %v4432_v21 = vpack.c.bf16 %v4420_v9, %v4419_v5  ;;  %v5631_v8 = vpack.c.bf16 %v5618_v20, %v5617_v56  ;;  %v5632_v46 = vpack.c.bf16 %v5620_v42, %v5619_v59 }
 0x5bf   : > { %v5635_v0 = vpack.c.bf16 %v5626_v14, %v5625_v11 }
 0x5c0   : > { %4440 = vst [vmem:[#allocation2 + $0xd8] sm:$0xff] %v4432_v21  ;;  %4617 = vrot.lane.b32.xlu1 %v13775_v48, %s10633_s13  ;;  %4621 = vrot.lane.b32.xlu0 %v13801_v10, %s10633_s13 }
 0x5c1   : > { %5639 = vst [vmem:[#allocation2 + $0x550] sm:$0xff] %v5631_v8  ;;  %4625 = vrot.lane.b32.xlu2 %v13812_v49, %s10633_s13 }
 0x5c2   : > { %5640 = vst [vmem:[#allocation2 + $0x558] sm:$0xff] %v5632_v46  ;;  %v4390_v25 = vpop.permute.xlu1 %4389  ;;  %v4394_v42 = vpop.permute.xlu0 %4393 }
 0x5c3   : > { %5643 = vst [vmem:[#allocation2 + $0x570] sm:$0xff] %v5635_v0  ;;  %v4397_v58 = vsel %vm646_vm3, %v4382_v60, %v4390_v25  ;;  %v4409_v56 = vsel %vm646_vm3, %v4390_v25, %v14304_v24  ;;  %v4399_v23 = vsel %vm646_vm3, %v14286_v38, %v4394_v42  ;;  %v4411_v17 = vsel %vm646_vm3, %v4394_v42, %v14306_v45  ;;  %v14398_v31 = vpop.permute.xlu2 %4463 }
 0x5c4   : > { %v4413_v37 = vmul.f32 %v4409_v56, %v16635_v33  ;;  %v4416_v22 = vmul.f32 %v4397_v58, %v16641_v44  ;;  %v5615_v60 = vmul.f32 %v4397_v58, %v16642_v40  ;;  %v5616_v5 = vmul.f32 %v4409_v56, %v16639_v50 }
 0x5c5   : > { %v4421_v24 = vmul.f32 %v4411_v17, %v16635_v33  ;;  %v4424_v9 = vmul.f32 %v4399_v23, %v16641_v44  ;;  %v5623_v38 = vmul.f32 %v4399_v23, %v16642_v40  ;;  %v5624_v20 = vmul.f32 %v4411_v17, %v16639_v50 }
 0x5c6   : > { %v4423_v45 = vmul.f32 %v4403_v4, %v16640_v34  ;;  %v4429_v59 = vpack.c.bf16 %v4414_v57, %v4413_v37  ;;  %v4430_v11 = vpack.c.bf16 %v4416_v22, %v4415_v54  ;;  %v5630_v14 = vpack.c.bf16 %v5616_v5, %v5615_v60  ;;  %v16644_v37 = vld [vmem:[#allocation49_spill] sm:$0xff] }
 0x5c7   : > { %v4433_v21 = vpack.c.bf16 %v4422_v47, %v4421_v24  ;;  %v5634_v46 = vpack.c.bf16 %v5624_v20, %v5623_v38  ;;  %v4426_v57 = vmul.f32 %v4408_v29, %v16636_v26  ;;  %v4427_v47 = vmul.f32 %v4404_v52, %v16640_v34 }
 0x5c8   : > { %4437 = vst [vmem:[#allocation2 + $0xc0] sm:$0xff] %v4429_v59  ;;  %v4434_v8 = vpack.c.bf16 %v4424_v9, %v4423_v45  ;;  %4623 = vrot.lane.b32.xlu1 %v13808_v13, %s10633_s13  ;;  %4627 = vrot.lane.b32.xlu0 %v13817_v28, %s10633_s13 }
 0x5c9   : > { %4438 = vst [vmem:[#allocation2 + $0xc8] sm:$0xff] %v4430_v11  ;;  %4631 = vrot.lane.b32.xlu2 %v13832_v41, %s10633_s13 }
 0x5ca   : > { %5638 = vst [vmem:[#allocation2 + $0x548] sm:$0xff] %v5630_v14  ;;  %v4396_v0 = vpop.permute.xlu1 %4395  ;;  %v14415_v4 = vpop.permute.xlu0 %4447 }
 0x5cb   : > { %4441 = vst [vmem:[#allocation2 + $0xe0] sm:$0xff] %v4433_v21  ;;  %v4400_v54 = vsel %vm646_vm3, %v4388_v18, %v4396_v0  ;;  %v4412_v25 = vsel %vm646_vm3, %v4396_v0, %v14317_v32  ;;  %v14424_v42 = vpop.permute.xlu2 %4469  ;;  %vm16731_vm3 = vmmov %vm16723_vm0 }
 0x5cc   : > { %4442 = vst [vmem:[#allocation2 + $0xe8] sm:$0xff] %v4434_v8  ;;  %v4425_v58 = vmul.f32 %v4412_v25, %v16635_v33  ;;  %v4428_v56 = vmul.f32 %v4400_v54, %v16641_v44  ;;  %v5627_v23 = vmul.f32 %v4400_v54, %v16642_v40  ;;  %v5628_v26 = vmul.f32 %v4412_v25, %v16639_v50  ;;  %v16643_v40 = vld [vmem:[#allocation48_spill] sm:$0xff]  ;;  %v10046_v8 = vld [vmem:[#allocation2 + $0xcc] sm:$0xf0] }
 0x5cd   : > { %5642 = vst [vmem:[#allocation2 + $0x568] sm:$0xff] %v5634_v46  ;;  %v4489_v32 = vsel %vm731_vm4, %v14424_v42, %v14322_v61  ;;  %v16645_v46 = vld [vmem:[#allocation47_spill] sm:$0xff] }
 0x5ce   : > { %v4435_v29 = vpack.c.bf16 %v4426_v57, %v4425_v58  ;;  %v4436_v52 = vpack.c.bf16 %v4428_v56, %v4427_v47  ;;  %v5636_v34 = vpack.c.bf16 %v5628_v26, %v5627_v23  ;;  %v4493_v17 = vmul.f32 %v4489_v32, %v16643_v40  ;;  %v16646_v57 = vld [vmem:[#allocation46_spill] sm:$0xff] }
 0x5cf   : > { %v10042_v56 = vld [vmem:[#allocation2 + $0xac] sm:$0xf0] }
 0x5d0   : > { %4443 = vst [vmem:[#allocation2 + $0xf0] sm:$0xff] %v4435_v29  ;;  %4629 = vrot.lane.b32.xlu1 %v13823_v51, %s10633_s13  ;;  %4633 = vrot.lane.b32.xlu0 %v13840_v53, %s10633_s13  ;;  %v8980_v29 = vld [vmem:[#allocation2 + $0xa0] sm:$0xf] }
 0x5d1   : > { %4444 = vst [vmem:[#allocation2 + $0xf8] sm:$0xff] %v4436_v52  ;;  %4685 = vrot.lane.b32.xlu2 %v13690_v62, %s10634_s20  ;;  %v10038_v52 = vld [vmem:[#allocation2 + $0x8c] sm:$0xf0] }
 0x5d2   : > { %5644 = vst [vmem:[#allocation2 + $0x578] sm:$0xff] %v5636_v34  ;;  %v14440_v33 = vpop.permute.xlu1 %4449  ;;  %v4454_v50 = vpop.permute.xlu0 %4453  ;;  %v9012_v5 = vld [vmem:[#allocation2 + $0xe0] sm:$0xf] }
 0x5d3   : > { %v4485_v18 = vsel %vm731_vm4, %v14322_v61, %v4454_v50  ;;  %v14445_v44 = vpop.permute.xlu2 %4475  ;;  %v8996_v61 = vld [vmem:[#allocation2 + $0xc0] sm:$0xf] }
 0x5d4   : > { %v4494_v22 = vmul.f32 %v4485_v18, %v16644_v37  ;;  %v4492_v38 = vsel %vm731_vm4, %v14445_v44, %v14345_v12  ;;  %v8997_v54 = vor.u32 %v10046_v8, %v8996_v61  ;;  %v8964_v34 = vld [vmem:[#allocation2 + $0x80] sm:$0xf]  ;;  %v5645_v61 = vmul.f32 %v4485_v18, %v16645_v46 }
 0x5d5   : > { %v4505_v25 = vmul.f32 %v4492_v38, %v16643_v40 }
 0x5d6   : > { %v4509_v60 = vpack.c.bf16 %v4494_v22, %v4493_v17  ;;  %v16647_v17 = vld [vmem:[#allocation50_spill] sm:$0xff] }
 0x5d7   : > { %v10050_v24 = vld [vmem:[#allocation2 + $0xec] sm:$0xf0]  ;;  %v5648_v22 = vmul.f32 %v4489_v32, %v16647_v17 }
 0x5d8   : > { %4517 = vst [vmem:[#allocation2 + $0x100] sm:$0xff] %v4509_v60  ;;  %4635 = vrot.lane.b32.xlu1 %v13850_v55, %s10633_s13  ;;  %4687 = vrot.lane.b32.xlu0 %v13705_v30, %s10634_s20  ;;  %v9013_v9 = vor.u32 %v10050_v24, %v9012_v5  ;;  %v14491_v60 = vsel %vm731_vm4, %v14440_v33, %v14370_v15 }
 0x5d9   : > { %4691 = vrot.lane.b32.xlu2 %v13724_v3, %s10634_s20 }
 0x5da   : > { %v4456_v20 = vpop.permute.xlu1 %4455  ;;  %v14459_v45 = vpop.permute.xlu0 %4459  ;;  %7217 = vmatpush.bf16.msrb.mxu0 %v9013_v9  ;;  %v8965_v9 = vor.u32 %v10038_v52, %v8964_v34 }
 0x5db   : > { %v14464_v59 = vsel %vm731_vm4, %v4456_v20, %v14398_v31  ;;  %v4486_v11 = vsel %vm731_vm4, %v14415_v4, %v4456_v20  ;;  %v4488_v14 = vsel %vm731_vm4, %v14345_v12, %v14459_v45  ;;  %v14473_v21 = vpop.permute.xlu2 %4529  ;;  %v8981_v12 = vor.u32 %v10042_v56, %v8980_v29  ;;  %v16650_v56 = vld [vmem:[#allocation53_spill] sm:$0xff] }
 0x5dc   : > { %v5649_v0 = vmul.f32 %v4486_v11, %v16645_v46  ;;  %v5650_v47 = vmul.f32 %v14464_v59, %v16646_v57  ;;  %v4506_v58 = vmul.f32 %v4488_v14, %v16644_v37 }
 0x5de   : > { %v5663_v23 = vpack.c.bf16 %v5650_v47, %v5649_v0  ;;  %7218 = vmatpush.bf16.msrb.mxu0 %v8997_v54  ;;  %v4515_v26 = vpack.c.bf16 %v4506_v58, %v4505_v25  ;;  %v16648_v47 = vld [vmem:[#allocation51_spill] sm:$0xff]  ;;  %v16649_v25 = vld [vmem:[#allocation52_spill] sm:$0xff] }
 0x5e0   : > { %5671 = vst [vmem:[#allocation2 + $0x590] sm:$0xff] %v5663_v23  ;;  %4689 = vrot.lane.b32.xlu1 %v13715_v7, %s10634_s20  ;;  %4693 = vrot.lane.b32.xlu0 %v13753_v16, %s10634_s20 }
 0x5e1   : > { %4523 = vst [vmem:[#allocation2 + $0x130] sm:$0xff] %v4515_v26  ;;  %4697 = vrot.lane.b32.xlu2 %v13775_v48, %s10634_s20  ;;  %v8948_v26 = vld [vmem:[#allocation2 + $0x60] sm:$0xf] }
 0x5e2   : > { %v4462_v5 = vpop.permute.xlu1 %4461  ;;  %v14493_v24 = vpop.permute.xlu0 %4465  ;;  %7219 = vmatpush.bf16.msrb.mxu0 %v8981_v12  ;;  %v10030_v12 = vld [vmem:[#allocation2 + $0x4c] sm:$0xf0] }
 0x5e3   : > { %v4477_v20 = vsel %vm731_vm4, %v4462_v5, %v14424_v42  ;;  %v4481_v32 = vsel %vm731_vm4, %v4454_v50, %v4462_v5  ;;  %v14505_v8 = vsel %vm731_vm4, %v14370_v15, %v14493_v24  ;;  %v14507_v0 = vpop.permute.xlu2 %4535  ;;  %v5653_v42 = vmul.f32 %v14491_v60, %v16645_v46  ;;  %v10034_v5 = vld [vmem:[#allocation2 + $0x6c] sm:$0xf0] }
 0x5e4   : > { %v4495_v54 = vmul.f32 %v4481_v32, %v16648_v47  ;;  %v4496_v58 = vmul.f32 %v4477_v20, %v16649_v25  ;;  %v5646_v18 = vmul.f32 %v4481_v32, %v16646_v57  ;;  %v5647_v23 = vmul.f32 %v4477_v20, %v16650_v56  ;;  %v8932_v32 = vld [vmem:[#allocation2 + $0x40] sm:$0xf] }
 0x5e5   : > { %v5654_v50 = vmul.f32 %v14505_v8, %v16646_v57  ;;  %v8949_v20 = vor.u32 %v10034_v5, %v8948_v26 }
 0x5e6   : > { %v4510_v29 = vpack.c.bf16 %v4496_v58, %v4495_v54  ;;  %v5661_v15 = vpack.c.bf16 %v5646_v18, %v5645_v61  ;;  %v5662_v52 = vpack.c.bf16 %v5648_v22, %v5647_v23  ;;  %7220 = vmatpush.bf16.msrb.mxu0 %v8965_v9  ;;  %v8933_v54 = vor.u32 %v10030_v12, %v8932_v32  ;;  %v8900_v32 = vld [vmem:[#allocation2] sm:$0xf] }
 0x5e7   : > { %v5665_v34 = vpack.c.bf16 %v5654_v50, %v5653_v42  ;;  %v5660_v22 = vmul.f32 %v4492_v38, %v16647_v17  ;;  %v4498_v9 = vmul.f32 %v4486_v11, %v16644_v37  ;;  %v5657_v61 = vmul.f32 %v4488_v14, %v16645_v46 }
 0x5e8   : > { %4518 = vst [vmem:[#allocation2 + $0x108] sm:$0xff] %v4510_v29  ;;  %4695 = vrot.lane.b32.xlu1 %v13767_v2, %s10634_s20  ;;  %4699 = vrot.lane.b32.xlu0 %v13784_v27, %s10634_s20 }
 0x5e9   : > { %5669 = vst [vmem:[#allocation2 + $0x580] sm:$0xff] %v5661_v15  ;;  %4703 = vrot.lane.b32.xlu2 %v13808_v13, %s10634_s20 }
 0x5ea   : > { %5670 = vst [vmem:[#allocation2 + $0x588] sm:$0xff] %v5662_v52  ;;  %v4468_v58 = vpop.permute.xlu1 %4467  ;;  %v4472_v18 = vpop.permute.xlu0 %4471  ;;  %7221 = vmatpush.bf16.msrb.mxu0 %v8949_v20  ;;  %v10026_v52 = vld [vmem:[#allocation2 + $0x2c] sm:$0xf0] }
 0x5eb   : > { %5673 = vst [vmem:[#allocation2 + $0x5a0] sm:$0xff] %v5665_v34  ;;  %v4480_v23 = vsel %vm731_vm4, %v4468_v58, %v14445_v44  ;;  %v4484_v42 = vsel %vm731_vm4, %v14459_v45, %v4468_v58  ;;  %v4478_v38 = vsel %vm731_vm4, %v14398_v31, %v4472_v18  ;;  %v4490_v11 = vsel %vm731_vm4, %v4472_v18, %v14415_v4  ;;  %v14538_v14 = vpop.permute.xlu2 %4541 }
 0x5ec   : > { %v4507_v46 = vmul.f32 %v4484_v42, %v16648_v47  ;;  %v4508_v50 = vmul.f32 %v4480_v23, %v16649_v25  ;;  %v5658_v44 = vmul.f32 %v4484_v42, %v16646_v57  ;;  %v5659_v26 = vmul.f32 %v4480_v23, %v16650_v56  ;;  %v8916_v57 = vld [vmem:[#allocation2 + $0x20] sm:$0xf] }
 0x5ed   : > { %v4497_v45 = vmul.f32 %v4490_v11, %v16643_v40  ;;  %v4500_v29 = vmul.f32 %v4478_v38, %v16649_v25  ;;  %v5651_v31 = vmul.f32 %v4478_v38, %v16650_v56  ;;  %v5652_v15 = vmul.f32 %v4490_v11, %v16647_v17 }
 0x5ee   : > { %v4499_v4 = vmul.f32 %v14464_v59, %v16648_v47  ;;  %v4516_v12 = vpack.c.bf16 %v4508_v50, %v4507_v46  ;;  %v5667_v34 = vpack.c.bf16 %v5658_v44, %v5657_v61  ;;  %v5668_v5 = vpack.c.bf16 %v5660_v22, %v5659_v26  ;;  %7222 = vmatpush.bf16.msrb.mxu0 %v8933_v54  ;;  %v10022_v59 = vld [vmem:[#allocation2 + $0xc] sm:$0xf0] }
 0x5ef   : > { %v4511_v20 = vpack.c.bf16 %v4498_v9, %v4497_v45  ;;  %v8917_v18 = vor.u32 %v10026_v52, %v8916_v57  ;;  %v5664_v23 = vpack.c.bf16 %v5652_v15, %v5651_v31  ;;  %v8901_v9 = vor.u32 %v10022_v59, %v8900_v32  ;;  %v10178_v61 = vld [vmem:[#allocation2 + $0x4ec] sm:$0xf0]  ;;  %v9508_v31 = vld [vmem:[#allocation2 + $0x4c0] sm:$0xf] }
 0x5f0   : > { %4524 = vst [vmem:[#allocation2 + $0x138] sm:$0xff] %v4516_v12  ;;  %v4512_v58 = vpack.c.bf16 %v4500_v29, %v4499_v4  ;;  %4701 = vrot.lane.b32.xlu1 %v13801_v10, %s10634_s20  ;;  %4705 = vrot.lane.b32.xlu0 %v13812_v49, %s10634_s20  ;;  %v4502_v42 = vmul.f32 %v14491_v60, %v16644_v37  ;;  %v9492_v52 = vld [vmem:[#allocation2 + $0x4a0] sm:$0xf]  ;;  %v10166_v12 = vld [vmem:[#allocation2 + $0x48c] sm:$0xf0] }
 0x5f1   : > { %5675 = vst [vmem:[#allocation2 + $0x5b0] sm:$0xff] %v5667_v34  ;;  %4709 = vrot.lane.b32.xlu2 %v13823_v51, %s10634_s20  ;;  %v4503_v38 = vmul.f32 %v14505_v8, %v16648_v47  ;;  %v9524_v8 = vld [vmem:[#allocation2 + $0x4e0] sm:$0xf] }
 0x5f2   : > { %5676 = vst [vmem:[#allocation2 + $0x5b8] sm:$0xff] %v5668_v5  ;;  %v4474_v54 = vpop.permute.xlu1 %4473  ;;  %v14556_v22 = vpop.permute.xlu0 %4525  ;;  %7223 = vmatpush.bf16.msrb.mxu0 %v8917_v18  ;;  %v9525_v47 = vor.u32 %v10178_v61, %v9524_v8  ;;  %v9476_v34 = vld [vmem:[#allocation2 + $0x480] sm:$0xf]  ;;  %v16652_v61 = vld [vmem:[#allocation55_spill] sm:$0xff] }
 0x5f3   : > { %4519 = vst [vmem:[#allocation2 + $0x110] sm:$0xff] %v4511_v20  ;;  %v4479_v11 = vsel %vm731_vm4, %v14493_v24, %v4474_v54  ;;  %v4491_v46 = vsel %vm731_vm4, %v4474_v54, %v14440_v33  ;;  %v14568_v50 = vpop.permute.xlu2 %4547  ;;  %v10174_v33 = vld [vmem:[#allocation2 + $0x4cc] sm:$0xf0]  ;;  %v9477_v5 = vor.u32 %v10166_v12, %v9476_v34  ;;  %vm16739_vm4 = vmmov %vm16723_vm0 }
 0x5f4   : > { %4520 = vst [vmem:[#allocation2 + $0x118] sm:$0xff] %v4512_v58  ;;  %v4501_v44 = vmul.f32 %v4491_v46, %v16643_v40  ;;  %v4504_v26 = vmul.f32 %v4479_v11, %v16649_v25  ;;  %v5655_v37 = vmul.f32 %v4479_v11, %v16650_v56  ;;  %v5656_v60 = vmul.f32 %v4491_v46, %v16647_v17  ;;  %v10170_v56 = vld [vmem:[#allocation2 + $0x4ac] sm:$0xf0]  ;;  %v16654_v46 = vld [vmem:[#allocation57_spill] sm:$0xff] }
 0x5f5   : > { %5672 = vst [vmem:[#allocation2 + $0x598] sm:$0xff] %v5664_v23  ;;  %v9509_v40 = vor.u32 %v10174_v33, %v9508_v31  ;;  %v9493_v4 = vor.u32 %v10170_v56, %v9492_v52  ;;  %v16651_v54 = vld [vmem:[#allocation54_spill] sm:$0xff] }
 0x5f6   : > { %v4513_v45 = vpack.c.bf16 %v4502_v42, %v4501_v44  ;;  %v4514_v24 = vpack.c.bf16 %v4504_v26, %v4503_v38  ;;  %v5666_v29 = vpack.c.bf16 %v5656_v60, %v5655_v37  ;;  %7224 = vmatpush.bf16.msrb.mxu0 %v8901_v9  ;;  %v16653_v38 = vld [vmem:[#allocation56_spill] sm:$0xff] }
 0x5f8   : > { %4521 = vst [vmem:[#allocation2 + $0x120] sm:$0xff] %v4513_v45  ;;  %4707 = vrot.lane.b32.xlu1 %v13817_v28, %s10634_s20  ;;  %4711 = vrot.lane.b32.xlu0 %v13832_v41, %s10634_s20 }
 0x5f9   : > { %4522 = vst [vmem:[#allocation2 + $0x128] sm:$0xff] %v4514_v24  ;;  %4715 = vrot.lane.b32.xlu2 %v13850_v55, %s10634_s20 }
 0x5fa   : > { %7293 = vmatpush.bf16.msra.mxu0 %v9525_v47  ;;  %5674 = vst [vmem:[#allocation2 + $0x5a8] sm:$0xff] %v5666_v29  ;;  %v14580_v17 = vpop.permute.xlu1 %4527  ;;  %v14582_v25 = vpop.permute.xlu0 %4531 }
 0x5fb   : > { %v4554_v15 = vpop.permute.xlu2 %4553 }
 0x5fc   : > { %v4571_v20 = vsel %vm816_vm5, %v4554_v15, %v14473_v21 }
 0x5fd   : > { %v4581_v11 = vmul.f32 %v4571_v20, %v16653_v38 }
 0x5fe   : > { %7294 = vmatpush.bf16.msra.mxu0 %v9509_v40 }
 0x600   : > { %4713 = vrot.lane.b32.xlu1 %v13840_v53, %s10634_s20  ;;  %4765 = vrot.lane.b32.xlu0 %v13690_v62, %s10635_s26 }
 0x601   : > { %4769 = vrot.lane.b32.xlu2 %v13715_v7, %s10635_s26 }
 0x602   : > { %7295 = vmatpush.bf16.msra.mxu0 %v9493_v4  ;;  %v4534_v57 = vpop.permute.xlu1 %4533  ;;  %v4538_v32 = vpop.permute.xlu0 %4537 }
 0x603   : > { %v4561_v58 = vsel %vm816_vm5, %v4534_v57, %v14538_v14  ;;  %v4565_v18 = vsel %vm816_vm5, %v14556_v22, %v4534_v57  ;;  %v4567_v23 = vsel %vm816_vm5, %v14473_v21, %v4538_v32  ;;  %v14602_v59 = vpop.permute.xlu2 %4607  ;;  %v4566_v21 = vsel %vm816_vm5, %v14580_v17, %v14507_v0 }
 0x604   : > { %v5677_v9 = vmul.f32 %v4565_v18, %v16651_v54  ;;  %v5678_v42 = vmul.f32 %v4561_v58, %v16652_v61  ;;  %v4582_v44 = vmul.f32 %v4567_v23, %v16654_v46  ;;  %v5681_v40 = vmul.f32 %v4566_v21, %v16651_v54 }
 0x605   : > { %v4574_v34 = vmul.f32 %v4565_v18, %v16654_v46  ;;  %v16656_v18 = vld [vmem:[#allocation59_spill] sm:$0xff] }
 0x606   : > { %7296 = vmatpush.bf16.msra.mxu0 %v9477_v5  ;;  %v5693_v26 = vpack.c.bf16 %v5678_v42, %v5677_v9  ;;  %v4593_v37 = vpack.c.bf16 %v4582_v44, %v4581_v11  ;;  %v5685_v5 = vmul.f32 %v4567_v23, %v16651_v54 }
 0x608   : > { %5701 = vst [vmem:[#allocation2 + $0x5c0] sm:$0xff] %v5693_v26  ;;  %4767 = vrot.lane.b32.xlu1 %v13705_v30, %s10635_s26  ;;  %4771 = vrot.lane.b32.xlu0 %v13724_v3, %s10635_s26 }
 0x609   : > { %4601 = vst [vmem:[#allocation2 + $0x160] sm:$0xff] %v4593_v37  ;;  %4775 = vrot.lane.b32.xlu2 %v13767_v2, %s10635_s26 }
 0x60a   : > { %v4540_v60 = vpop.permute.xlu1 %4539  ;;  %v4544_v8 = vpop.permute.xlu0 %4543 }
 0x60b   : > { %v14621_v47 = vsel %vm816_vm5, %v4540_v60, %v14568_v50  ;;  %v4568_v45 = vsel %vm816_vm5, %v14582_v25, %v4540_v60  ;;  %v4562_v24 = vsel %vm816_vm5, %v14507_v0, %v4544_v8  ;;  %v14629_v29 = vpop.permute.xlu2 %4613  ;;  %v16655_v0 = vld [vmem:[#allocation58_spill] sm:$0xff] }
 0x60c   : > { %v5689_v31 = vmul.f32 %v4568_v45, %v16651_v54  ;;  %v5690_v33 = vmul.f32 %v14621_v47, %v16652_v61  ;;  %v5682_v56 = vmul.f32 %v4562_v24, %v16652_v61  ;;  %v5688_v12 = vmul.f32 %v4571_v20, %v16655_v0  ;;  %v16657_v54 = vld [vmem:[#allocation60_spill] sm:$0xff] }
 0x60e   : > { %v5699_v52 = vpack.c.bf16 %v5690_v33, %v5689_v31  ;;  %v5695_v4 = vpack.c.bf16 %v5682_v56, %v5681_v40 }
 0x610   : > { %5707 = vst [vmem:[#allocation2 + $0x5f0] sm:$0xff] %v5699_v52  ;;  %4773 = vrot.lane.b32.xlu1 %v13753_v16, %s10635_s26  ;;  %5009 = vrot.lane.b32.xlu0 %v13715_v7, %s10638_s7 }
 0x611   : > { %5703 = vst [vmem:[#allocation2 + $0x5d0] sm:$0xff] %v5695_v4  ;;  %5017 = vrot.lane.b32.xlu2 %v13775_v48, %s10638_s7 }
 0x612   : > { %v4546_v57 = vpop.permute.xlu1 %4545  ;;  %v4550_v9 = vpop.permute.xlu0 %4549 }
 0x613   : > { %v4559_v42 = vsel %vm816_vm5, %v4546_v57, %v4554_v15  ;;  %v4563_v11 = vsel %vm816_vm5, %v4538_v32, %v4546_v57  ;;  %v4557_v44 = vsel %vm816_vm5, %v14538_v14, %v4550_v9  ;;  %v4569_v20 = vsel %vm816_vm5, %v4550_v9, %v14556_v22  ;;  %v14655_v26 = vpop.permute.xlu2 %4619  ;;  %v16658_v15 = vld [vmem:[#allocation61_spill] sm:$0xff] }
 0x614   : > { %v4583_v23 = vmul.f32 %v4563_v11, %v16656_v18  ;;  %v4584_v37 = vmul.f32 %v4559_v42, %v16657_v54  ;;  %v5686_v60 = vmul.f32 %v4563_v11, %v16652_v61  ;;  %v5687_v31 = vmul.f32 %v4559_v42, %v16658_v15 }
 0x615   : > { %v4573_v32 = vmul.f32 %v4569_v20, %v16653_v38  ;;  %v4576_v33 = vmul.f32 %v4557_v44, %v16657_v54  ;;  %v5679_v14 = vmul.f32 %v4557_v44, %v16658_v15  ;;  %v5680_v40 = vmul.f32 %v4569_v20, %v16655_v0 }
 0x616   : > { %v4575_v22 = vmul.f32 %v4561_v58, %v16656_v18  ;;  %v4594_v56 = vpack.c.bf16 %v4584_v37, %v4583_v23  ;;  %v5697_v52 = vpack.c.bf16 %v5686_v60, %v5685_v5  ;;  %v5698_v4 = vpack.c.bf16 %v5688_v12, %v5687_v31 }
 0x617   : > { %v4589_v57 = vpack.c.bf16 %v4574_v34, %v4573_v32  ;;  %v5694_v61 = vpack.c.bf16 %v5680_v40, %v5679_v14  ;;  %v4578_v42 = vmul.f32 %v4566_v21, %v16654_v46  ;;  %v4586_v58 = vmul.f32 %v4568_v45, %v16654_v46 }
 0x618   : > { %4602 = vst [vmem:[#allocation2 + $0x168] sm:$0xff] %v4594_v56  ;;  %v4590_v9 = vpack.c.bf16 %v4576_v33, %v4575_v22  ;;  %5011 = vrot.lane.b32.xlu1 %v13724_v3, %s10638_s7  ;;  %5019 = vrot.lane.b32.xlu0 %v13784_v27, %s10638_s7  ;;  %v4579_v12 = vmul.f32 %v4562_v24, %v16656_v18 }
 0x619   : > { %5705 = vst [vmem:[#allocation2 + $0x5e0] sm:$0xff] %v5697_v52  ;;  %5035 = vrot.lane.b32.xlu2 %v13850_v55, %s10638_s7  ;;  %v4587_v60 = vmul.f32 %v14621_v47, %v16656_v18 }
 0x61a   : > { %5706 = vst [vmem:[#allocation2 + $0x5e8] sm:$0xff] %v5698_v4  ;;  %v4552_v34 = vpop.permute.xlu1 %4551  ;;  %v4556_v5 = vpop.permute.xlu0 %4555 }
 0x61b   : > { %4597 = vst [vmem:[#allocation2 + $0x140] sm:$0xff] %v4589_v57  ;;  %v4558_v11 = vsel %vm816_vm5, %v4544_v8, %v4552_v34  ;;  %v4570_v44 = vsel %vm816_vm5, %v4552_v34, %v14580_v17  ;;  %v4560_v20 = vsel %vm816_vm5, %v14568_v50, %v4556_v5  ;;  %v4572_v46 = vsel %vm816_vm5, %v4556_v5, %v14582_v25  ;;  %v14686_v21 = vpop.permute.xlu2 %4625  ;;  %v16659_v57 = vld [vmem:[#allocation64_spill] sm:$0xff]  ;;  %vm16740_vm5 = vmmov %vm16723_vm0 }
 0x61c   : > { %4598 = vst [vmem:[#allocation2 + $0x148] sm:$0xff] %v4590_v9  ;;  %v4577_v45 = vmul.f32 %v4570_v44, %v16653_v38  ;;  %v4580_v24 = vmul.f32 %v4558_v11, %v16657_v54  ;;  %v5683_v8 = vmul.f32 %v4558_v11, %v16658_v15  ;;  %v5684_v23 = vmul.f32 %v4570_v44, %v16655_v0  ;;  %v16660_v44 = vld [vmem:[#allocation62_spill] sm:$0xff] }
 0x61d   : > { %5702 = vst [vmem:[#allocation2 + $0x5c8] sm:$0xff] %v5694_v61  ;;  %v4585_v17 = vmul.f32 %v4572_v46, %v16653_v38  ;;  %v4588_v50 = vmul.f32 %v4560_v20, %v16657_v54  ;;  %v5691_v37 = vmul.f32 %v4560_v20, %v16658_v15  ;;  %v5692_v25 = vmul.f32 %v4572_v46, %v16655_v0  ;;  %v16661_v46 = vld [vmem:[#allocation63_spill] sm:$0xff] }
 0x61e   : > { %v4591_v31 = vpack.c.bf16 %v4578_v42, %v4577_v45  ;;  %v4592_v32 = vpack.c.bf16 %v4580_v24, %v4579_v12  ;;  %v5696_v33 = vpack.c.bf16 %v5684_v23, %v5683_v8 }
 0x61f   : > { %v4595_v14 = vpack.c.bf16 %v4586_v58, %v4585_v17  ;;  %v4596_v40 = vpack.c.bf16 %v4588_v50, %v4587_v60  ;;  %v5700_v38 = vpack.c.bf16 %v5692_v25, %v5691_v37 }
 0x620   : > { %4599 = vst [vmem:[#allocation2 + $0x150] sm:$0xff] %v4591_v31  ;;  %5033 = vrot.lane.b32.xlu1 %v13840_v53, %s10638_s7  ;;  %5281 = vrot.lane.b32.xlu0 %v13715_v7, %s10641_s16 }
 0x621   : > { %4600 = vst [vmem:[#allocation2 + $0x158] sm:$0xff] %v4592_v32  ;;  %5289 = vrot.lane.b32.xlu2 %v13775_v48, %s10641_s16 }
 0x622   : > { %5704 = vst [vmem:[#allocation2 + $0x5d8] sm:$0xff] %v5696_v33  ;;  %v14704_v0 = vpop.permute.xlu1 %4605  ;;  %v14706_v47 = vpop.permute.xlu0 %4609 }
 0x623   : > { %4603 = vst [vmem:[#allocation2 + $0x170] sm:$0xff] %v4595_v14  ;;  %v4632_v18 = vpop.permute.xlu2 %4631 }
 0x624   : > { %4604 = vst [vmem:[#allocation2 + $0x178] sm:$0xff] %v4596_v40  ;;  %v4650_v54 = vsel %vm901_vm6, %v4632_v18, %v14602_v59 }
 0x625   : > { %5708 = vst [vmem:[#allocation2 + $0x5f8] sm:$0xff] %v5700_v38  ;;  %v4657_v4 = vmul.f32 %v4650_v54, %v12026_v43  ;;  %v16663_v38 = vld [vmem:[#allocation68_spill] sm:$0xff] }
 0x628   : > { %5283 = vrot.lane.b32.xlu1 %v13724_v3, %s10641_s16  ;;  %5291 = vrot.lane.b32.xlu0 %v13784_v27, %s10641_s16 }
 0x629   : > { %5299 = vrot.lane.b32.xlu2 %v13817_v28, %s10641_s16 }
 0x62a   : > { %v14717_v15 = vpop.permute.xlu1 %4611  ;;  %v4616_v22 = vpop.permute.xlu0 %4615 }
 0x62b   : > { %v4646_v56 = vsel %vm901_vm6, %v14602_v59, %v4616_v22  ;;  %v14722_v52 = vpop.permute.xlu2 %4685  ;;  %v4645_v59 = vsel %vm901_vm6, %v14704_v0, %v14629_v29  ;;  %v4648_v37 = vsel %vm901_vm6, %v14717_v15, %v14655_v26 }
 0x62c   : > { %v4658_v9 = vmul.f32 %v4646_v56, %v16659_v57  ;;  %v5709_v24 = vmul.f32 %v4645_v59, %v16660_v44  ;;  %v5713_v31 = vmul.f32 %v4646_v56, %v16660_v44 }
 0x62e   : > { %v4671_v61 = vpack.c.bf16 %v4658_v9, %v4657_v4  ;;  %v16664_v4 = vld [vmem:[#allocation66_spill] sm:$0xff] }
 0x630   : > { %4679 = vst [vmem:[#allocation2 + $0x190] sm:$0xff] %v4671_v61  ;;  %5297 = vrot.lane.b32.xlu1 %v13812_v49, %s10641_s16  ;;  %5005 = vrot.lane.b32.xlu0 %v13690_v62, %s10638_s7 }
 0x631   : > { %5013 = vrot.lane.b32.xlu2 %v13753_v16, %s10638_s7 }
 0x632   : > { %v4618_v42 = vpop.permute.xlu1 %4617  ;;  %v4622_v58 = vpop.permute.xlu0 %4621 }
 0x633   : > { %v4643_v12 = vsel %vm901_vm6, %v4618_v42, %v14686_v21  ;;  %v4647_v34 = vsel %vm901_vm6, %v14706_v47, %v4618_v42  ;;  %v4641_v5 = vsel %vm901_vm6, %v14629_v29, %v4622_v58  ;;  %v14745_v11 = vpop.permute.xlu2 %4691  ;;  %v16662_v29 = vld [vmem:[#allocation65_spill] sm:$0xff]  ;;  %v16665_v42 = vld [vmem:[#allocation67_spill] sm:$0xff] }
 0x634   : > { %v5717_v20 = vmul.f32 %v4647_v34, %v16660_v44  ;;  %v5718_v45 = vmul.f32 %v4643_v12, %v16661_v46  ;;  %v5710_v8 = vmul.f32 %v4641_v5, %v16661_v46  ;;  %v5716_v50 = vmul.f32 %v4650_v54, %v16662_v29 }
 0x636   : > { %v5729_v23 = vpack.c.bf16 %v5718_v45, %v5717_v20  ;;  %v5725_v17 = vpack.c.bf16 %v5710_v8, %v5709_v24  ;;  %v5721_v20 = vmul.f32 %v4648_v37, %v16660_v44  ;;  %v4662_v44 = vmul.f32 %v4647_v34, %v16659_v57 }
 0x638   : > { %5737 = vst [vmem:[#allocation2 + $0x620] sm:$0xff] %v5729_v23  ;;  %5007 = vrot.lane.b32.xlu1 %v13705_v30, %s10638_s7  ;;  %5015 = vrot.lane.b32.xlu0 %v13767_v2, %s10638_s7 }
 0x639   : > { %5733 = vst [vmem:[#allocation2 + $0x600] sm:$0xff] %v5725_v17  ;;  %5031 = vrot.lane.b32.xlu2 %v13832_v41, %s10638_s7 }
 0x63a   : > { %v4624_v25 = vpop.permute.xlu1 %4623  ;;  %v4628_v60 = vpop.permute.xlu0 %4627 }
 0x63b   : > { %v4638_v32 = vsel %vm901_vm6, %v4624_v25, %v4632_v18  ;;  %v4642_v33 = vsel %vm901_vm6, %v4616_v22, %v4624_v25  ;;  %v4644_v14 = vsel %vm901_vm6, %v14655_v26, %v4628_v60  ;;  %v14770_v40 = vpop.permute.xlu2 %4697  ;;  %v4654_v26 = vmul.f32 %v4645_v59, %v16659_v57 }
 0x63c   : > { %v4659_v54 = vmul.f32 %v4642_v33, %v16663_v38  ;;  %v4660_v9 = vmul.f32 %v4638_v32, %v16664_v4  ;;  %v5714_v61 = vmul.f32 %v4642_v33, %v16661_v46  ;;  %v5715_v56 = vmul.f32 %v4638_v32, %v16665_v42 }
 0x63d   : > { %v5722_v18 = vmul.f32 %v4644_v14, %v16661_v46  ;;  %v4655_v46 = vmul.f32 %v4641_v5, %v16663_v38 }
 0x63e   : > { %v4672_v45 = vpack.c.bf16 %v4660_v9, %v4659_v54  ;;  %v5727_v22 = vpack.c.bf16 %v5714_v61, %v5713_v31  ;;  %v5728_v24 = vpack.c.bf16 %v5716_v50, %v5715_v56 }
 0x63f   : > { %v5731_v8 = vpack.c.bf16 %v5722_v18, %v5721_v20 }
 0x640   : > { %4680 = vst [vmem:[#allocation2 + $0x198] sm:$0xff] %v4672_v45  ;;  %5029 = vrot.lane.b32.xlu1 %v13823_v51, %s10638_s7  ;;  %5277 = vrot.lane.b32.xlu0 %v13690_v62, %s10641_s16 }
 0x641   : > { %5735 = vst [vmem:[#allocation2 + $0x610] sm:$0xff] %v5727_v22  ;;  %5285 = vrot.lane.b32.xlu2 %v13753_v16, %s10641_s16 }
 0x642   : > { %5736 = vst [vmem:[#allocation2 + $0x618] sm:$0xff] %v5728_v24  ;;  %v4630_v23 = vpop.permute.xlu1 %4629  ;;  %v4634_v17 = vpop.permute.xlu0 %4633 }
 0x643   : > { %5739 = vst [vmem:[#allocation2 + $0x630] sm:$0xff] %v5731_v8  ;;  %v4637_v50 = vsel %vm901_vm6, %v4622_v58, %v4630_v23  ;;  %v4649_v25 = vsel %vm901_vm6, %v4630_v23, %v14704_v0  ;;  %v4639_v31 = vsel %vm901_vm6, %v14686_v21, %v4634_v17  ;;  %v4651_v59 = vsel %vm901_vm6, %v4634_v17, %v14706_v47  ;;  %v14798_v34 = vpop.permute.xlu2 %4703 }
 0x644   : > { %v4653_v5 = vmul.f32 %v4649_v25, %v12026_v43  ;;  %v4656_v32 = vmul.f32 %v4637_v50, %v16664_v4  ;;  %v5711_v58 = vmul.f32 %v4637_v50, %v16665_v42  ;;  %v5712_v33 = vmul.f32 %v4649_v25, %v16662_v29 }
 0x645   : > { %v4661_v0 = vmul.f32 %v4651_v59, %v12026_v43  ;;  %v4664_v54 = vmul.f32 %v4639_v31, %v16664_v4  ;;  %v5719_v21 = vmul.f32 %v4639_v31, %v16665_v42  ;;  %v5720_v9 = vmul.f32 %v4651_v59, %v16662_v29  ;;  %v16667_v59 = vld [vmem:[#allocation72_spill] sm:$0xff] }
 0x646   : > { %v4663_v47 = vmul.f32 %v4643_v12, %v16663_v38  ;;  %v4669_v61 = vpack.c.bf16 %v4654_v26, %v4653_v5  ;;  %v4670_v56 = vpack.c.bf16 %v4656_v32, %v4655_v46  ;;  %v5726_v20 = vpack.c.bf16 %v5712_v33, %v5711_v58 }
 0x647   : > { %v4673_v18 = vpack.c.bf16 %v4662_v44, %v4661_v0  ;;  %v5730_v22 = vpack.c.bf16 %v5720_v9, %v5719_v21  ;;  %v4666_v8 = vmul.f32 %v4648_v37, %v16659_v57  ;;  %v4667_v26 = vmul.f32 %v4644_v14, %v16663_v38 }
 0x648   : > { %4677 = vst [vmem:[#allocation2 + $0x180] sm:$0xff] %v4669_v61  ;;  %v4674_v45 = vpack.c.bf16 %v4664_v54, %v4663_v47  ;;  %5279 = vrot.lane.b32.xlu1 %v13705_v30, %s10641_s16  ;;  %5287 = vrot.lane.b32.xlu0 %v13767_v2, %s10641_s16  ;;  %v16668_v47 = vld [vmem:[#allocation70_spill] sm:$0xff] }
 0x649   : > { %4678 = vst [vmem:[#allocation2 + $0x188] sm:$0xff] %v4670_v56  ;;  %5295 = vrot.lane.b32.xlu2 %v13808_v13, %s10641_s16  ;;  %v16669_v56 = vld [vmem:[#allocation69_spill] sm:$0xff] }
 0x64a   : > { %5734 = vst [vmem:[#allocation2 + $0x608] sm:$0xff] %v5726_v20  ;;  %v4636_v24 = vpop.permute.xlu1 %4635  ;;  %v14815_v12 = vpop.permute.xlu0 %4687 }
 0x64b   : > { %4681 = vst [vmem:[#allocation2 + $0x1a0] sm:$0xff] %v4673_v18  ;;  %v4640_v44 = vsel %vm901_vm6, %v4628_v60, %v4636_v24  ;;  %v4652_v46 = vsel %vm901_vm6, %v4636_v24, %v14717_v15  ;;  %v4710_v23 = vpop.permute.xlu2 %4709  ;;  %vm16741_vm6 = vmmov %vm16723_vm0 }
 0x64c   : > { %4682 = vst [vmem:[#allocation2 + $0x1a8] sm:$0xff] %v4674_v45  ;;  %v4665_v17 = vmul.f32 %v4652_v46, %v12026_v43  ;;  %v4668_v50 = vmul.f32 %v4640_v44, %v16664_v4  ;;  %v5723_v25 = vmul.f32 %v4640_v44, %v16665_v42  ;;  %v5724_v57 = vmul.f32 %v4652_v46, %v16662_v29  ;;  %v16666_v42 = vld [vmem:[#allocation71_spill] sm:$0xff] }
 0x64d   : > { %5738 = vst [vmem:[#allocation2 + $0x628] sm:$0xff] %v5730_v22  ;;  %v4729_v43 = vsel %vm986_vm7, %v4710_v23, %v14722_v52 }
 0x64e   : > { %v4675_v37 = vpack.c.bf16 %v4666_v8, %v4665_v17  ;;  %v4676_v14 = vpack.c.bf16 %v4668_v50, %v4667_v26  ;;  %v5732_v38 = vpack.c.bf16 %v5724_v57, %v5723_v25  ;;  %v4733_v31 = vmul.f32 %v4729_v43, %v16666_v42 }
 0x650   : > { %4683 = vst [vmem:[#allocation2 + $0x1b0] sm:$0xff] %v4675_v37  ;;  %5293 = vrot.lane.b32.xlu1 %v13801_v10, %s10641_s16  ;;  %4929 = vrot.lane.b32.xlu0 %v13715_v7, %s10637_s11 }
 0x651   : > { %4684 = vst [vmem:[#allocation2 + $0x1b8] sm:$0xff] %v4676_v14  ;;  %4937 = vrot.lane.b32.xlu2 %v13775_v48, %s10637_s11  ;;  %v16672_v14 = vld [vmem:[#allocation74_spill] sm:$0xff] }
 0x652   : > { %5740 = vst [vmem:[#allocation2 + $0x638] sm:$0xff] %v5732_v38  ;;  %v14837_v15 = vpop.permute.xlu1 %4689  ;;  %v4694_v29 = vpop.permute.xlu0 %4693 }
 0x653   : > { %v4725_v60 = vsel %vm986_vm7, %v14722_v52, %v4694_v29  ;;  %v4716_v4 = vpop.permute.xlu2 %4715  ;;  %v4727_v26 = vsel %vm986_vm7, %v14837_v15, %v14770_v40 }
 0x654   : > { %v4734_v5 = vmul.f32 %v4725_v60, %v16667_v59  ;;  %v4732_v52 = vsel %vm986_vm7, %v4716_v4, %v14745_v11  ;;  %v5741_v17 = vmul.f32 %v4725_v60, %v16668_v47 }
 0x655   : > { %v4745_v18 = vmul.f32 %v4732_v52, %v16666_v42 }
 0x656   : > { %v4749_v32 = vpack.c.bf16 %v4734_v5, %v4733_v31 }
 0x658   : > { %4757 = vst [vmem:[#allocation2 + $0x1c0] sm:$0xff] %v4749_v32  ;;  %4931 = vrot.lane.b32.xlu1 %v13724_v3, %s10637_s11  ;;  %4939 = vrot.lane.b32.xlu0 %v13784_v27, %s10637_s11  ;;  %v16674_v32 = vld [vmem:[#allocation76_spill] sm:$0xff] }
 0x659   : > { %4955 = vrot.lane.b32.xlu2 %v13850_v55, %s10637_s11 }
 0x65a   : > { %v4696_v58 = vpop.permute.xlu1 %4695  ;;  %v4700_v33 = vpop.permute.xlu0 %4699 }
 0x65b   : > { %v4722_v0 = vsel %vm986_vm7, %v4696_v58, %v14798_v34  ;;  %v4726_v54 = vsel %vm986_vm7, %v14815_v12, %v4696_v58  ;;  %v4728_v21 = vsel %vm986_vm7, %v14745_v11, %v4700_v33  ;;  %v14862_v9 = vpop.permute.xlu2 %4769  ;;  %v16671_v11 = vld [vmem:[#allocation73_spill] sm:$0xff]  ;;  %v5749_v58 = vmul.f32 %v4727_v26, %v16668_v47 }
 0x65c   : > { %v5745_v61 = vmul.f32 %v4726_v54, %v16668_v47  ;;  %v5746_v20 = vmul.f32 %v4722_v0, %v16669_v56  ;;  %v4746_v45 = vmul.f32 %v4728_v21, %v16667_v59  ;;  %v5744_v8 = vmul.f32 %v4729_v43, %v16671_v11  ;;  %v16673_v43 = vld [vmem:[#allocation75_spill] sm:$0xff] }
 0x65e   : > { %v5759_v22 = vpack.c.bf16 %v5746_v20, %v5745_v61  ;;  %v4755_v24 = vpack.c.bf16 %v4746_v45, %v4745_v18  ;;  %v4738_v45 = vmul.f32 %v4726_v54, %v16667_v59 }
 0x660   : > { %5767 = vst [vmem:[#allocation2 + $0x650] sm:$0xff] %v5759_v22  ;;  %4953 = vrot.lane.b32.xlu1 %v13840_v53, %s10637_s11  ;;  %5201 = vrot.lane.b32.xlu0 %v13715_v7, %s16670_s1  ;;  %v5753_v22 = vmul.f32 %v4728_v21, %v16668_v47 }
 0x661   : > { %4763 = vst [vmem:[#allocation2 + $0x1f0] sm:$0xff] %v4755_v24  ;;  %5209 = vrot.lane.b32.xlu2 %v13775_v48, %s16670_s1 }
 0x662   : > { %v4702_v44 = vpop.permute.xlu1 %4701  ;;  %v4706_v46 = vpop.permute.xlu0 %4705 }
 0x663   : > { %v4717_v50 = vsel %vm986_vm7, %v4702_v44, %v4710_v23  ;;  %v4721_v25 = vsel %vm986_vm7, %v4694_v29, %v4702_v44  ;;  %v4723_v57 = vsel %vm986_vm7, %v14770_v40, %v4706_v46  ;;  %v14887_v37 = vpop.permute.xlu2 %4775  ;;  %v5756_v40 = vmul.f32 %v4732_v52, %v16671_v11 }
 0x664   : > { %v4735_v38 = vmul.f32 %v4721_v25, %v16672_v14  ;;  %v4736_v31 = vmul.f32 %v4717_v50, %v16673_v43  ;;  %v5742_v5 = vmul.f32 %v4721_v25, %v16669_v56  ;;  %v5743_v60 = vmul.f32 %v4717_v50, %v16674_v32 }
 0x665   : > { %v5750_v23 = vmul.f32 %v4723_v57, %v16669_v56 }
 0x666   : > { %v4750_v61 = vpack.c.bf16 %v4736_v31, %v4735_v38  ;;  %v5757_v29 = vpack.c.bf16 %v5742_v5, %v5741_v17  ;;  %v5758_v20 = vpack.c.bf16 %v5744_v8, %v5743_v60 }
 0x667   : > { %v5761_v18 = vpack.c.bf16 %v5750_v23, %v5749_v58 }
 0x668   : > { %4758 = vst [vmem:[#allocation2 + $0x1c8] sm:$0xff] %v4750_v61  ;;  %5203 = vrot.lane.b32.xlu1 %v13724_v3, %s16670_s1  ;;  %5211 = vrot.lane.b32.xlu0 %v13784_v27, %s16670_s1 }
 0x669   : > { %5765 = vst [vmem:[#allocation2 + $0x640] sm:$0xff] %v5757_v29  ;;  %5219 = vrot.lane.b32.xlu2 %v13817_v28, %s16670_s1 }
 0x66a   : > { %5766 = vst [vmem:[#allocation2 + $0x648] sm:$0xff] %v5758_v20  ;;  %v4708_v24 = vpop.permute.xlu1 %4707  ;;  %v4712_v8 = vpop.permute.xlu0 %4711  ;;  %v4742_v20 = vmul.f32 %v4727_v26, %v16667_v59 }
 0x66b   : > { %5769 = vst [vmem:[#allocation2 + $0x660] sm:$0xff] %v5761_v18  ;;  %v4720_v44 = vsel %vm986_vm7, %v4708_v24, %v4716_v4  ;;  %v4724_v17 = vsel %vm986_vm7, %v4700_v33, %v4708_v24  ;;  %v4718_v50 = vsel %vm986_vm7, %v14798_v34, %v4712_v8  ;;  %v4730_v52 = vsel %vm986_vm7, %v4712_v8, %v14815_v12  ;;  %v14914_v54 = vpop.permute.xlu2 %5017 }
 0x66c   : > { %v4747_v21 = vmul.f32 %v4724_v17, %v16672_v14  ;;  %v4748_v47 = vmul.f32 %v4720_v44, %v16673_v43  ;;  %v5754_v25 = vmul.f32 %v4724_v17, %v16669_v56  ;;  %v5755_v4 = vmul.f32 %v4720_v44, %v16674_v32 }
 0x66d   : > { %v4737_v33 = vmul.f32 %v4730_v52, %v16666_v42  ;;  %v4740_v38 = vmul.f32 %v4718_v50, %v16673_v43  ;;  %v5747_v34 = vmul.f32 %v4718_v50, %v16674_v32  ;;  %v5748_v31 = vmul.f32 %v4730_v52, %v16671_v11 }
 0x66e   : > { %v4739_v12 = vmul.f32 %v4722_v0, %v16672_v14  ;;  %v4756_v5 = vpack.c.bf16 %v4748_v47, %v4747_v21  ;;  %v5763_v60 = vpack.c.bf16 %v5754_v25, %v5753_v22  ;;  %v5764_v58 = vpack.c.bf16 %v5756_v40, %v5755_v4  ;;  %v9124_v47 = vld [vmem:[#allocation2 + $0x1c0] sm:$0xf]  ;;  %v10074_v4 = vld [vmem:[#allocation2 + $0x1ac] sm:$0xf0] }
 0x66f   : > { %v4751_v23 = vpack.c.bf16 %v4738_v45, %v4737_v33  ;;  %v5760_v56 = vpack.c.bf16 %v5748_v31, %v5747_v34  ;;  %v4743_v18 = vmul.f32 %v4723_v57, %v16672_v14  ;;  %v9108_v33 = vld [vmem:[#allocation2 + $0x1a0] sm:$0xf] }
 0x670   : > { %4764 = vst [vmem:[#allocation2 + $0x1f8] sm:$0xff] %v4756_v5  ;;  %v4752_v61 = vpack.c.bf16 %v4740_v38, %v4739_v12  ;;  %5217 = vrot.lane.b32.xlu1 %v13812_v49, %s16670_s1  ;;  %4925 = vrot.lane.b32.xlu0 %v13690_v62, %s10637_s11  ;;  %v9109_v38 = vor.u32 %v10074_v4, %v9108_v33  ;;  %v9092_v34 = vld [vmem:[#allocation2 + $0x180] sm:$0xf]  ;;  %v10058_v33 = vld [vmem:[#allocation2 + $0x12c] sm:$0xf0] }
 0x671   : > { %5771 = vst [vmem:[#allocation2 + $0x670] sm:$0xff] %v5763_v60  ;;  %4933 = vrot.lane.b32.xlu2 %v13753_v16, %s10637_s11 }
 0x672   : > { %5772 = vst [vmem:[#allocation2 + $0x678] sm:$0xff] %v5764_v58  ;;  %v4714_v29 = vpop.permute.xlu1 %4713  ;;  %v14931_v0 = vpop.permute.xlu0 %4765 }
 0x673   : > { %4759 = vst [vmem:[#allocation2 + $0x1d0] sm:$0xff] %v4751_v23  ;;  %v4719_v40 = vsel %vm986_vm7, %v4706_v46, %v4714_v29  ;;  %v4731_v45 = vsel %vm986_vm7, %v4714_v29, %v14837_v15  ;;  %v14940_v22 = vpop.permute.xlu2 %5035  ;;  %v10070_v23 = vld [vmem:[#allocation2 + $0x18c] sm:$0xf0]  ;;  %vm16743_vm7 = vmmov %vm16723_vm0 }
 0x674   : > { %4760 = vst [vmem:[#allocation2 + $0x1d8] sm:$0xff] %v4752_v61  ;;  %v4741_v24 = vmul.f32 %v4731_v45, %v16666_v42  ;;  %v4744_v8 = vmul.f32 %v4719_v40, %v16673_v43  ;;  %v5751_v44 = vmul.f32 %v4719_v40, %v16674_v32  ;;  %v5752_v59 = vmul.f32 %v4731_v45, %v16671_v11  ;;  %v10082_v43 = vld [vmem:[#allocation2 + $0x1ec] sm:$0xf0]  ;;  %v16676_v61 = vld [vmem:[#allocation93_spill] sm:$0xff] }
 0x675   : > { %5768 = vst [vmem:[#allocation2 + $0x658] sm:$0xff] %v5760_v56  ;;  %v16677_v29 = vld [vmem:[#allocation94_spill] sm:$0xff] }
 0x676   : > { %v4753_v26 = vpack.c.bf16 %v4742_v20, %v4741_v24  ;;  %v4754_v57 = vpack.c.bf16 %v4744_v8, %v4743_v18  ;;  %v5762_v14 = vpack.c.bf16 %v5752_v59, %v5751_v44  ;;  %v9093_v18 = vor.u32 %v10070_v23, %v9092_v34  ;;  %v10066_v40 = vld [vmem:[#allocation2 + $0x16c] sm:$0xf0]  ;;  %v9076_v24 = vld [vmem:[#allocation2 + $0x160] sm:$0xf] }
 0x677   : > { %v9077_v8 = vor.u32 %v10066_v40, %v9076_v24  ;;  %v10062_v59 = vld [vmem:[#allocation2 + $0x14c] sm:$0xf0] }
 0x678   : > { %4761 = vst [vmem:[#allocation2 + $0x1e0] sm:$0xff] %v4753_v26  ;;  %4927 = vrot.lane.b32.xlu1 %v13705_v30, %s10637_s11  ;;  %4935 = vrot.lane.b32.xlu0 %v13767_v2, %s10637_s11 }
 0x679   : > { %4762 = vst [vmem:[#allocation2 + $0x1e8] sm:$0xff] %v4754_v57  ;;  %4951 = vrot.lane.b32.xlu2 %v13832_v41, %s10637_s11 }
 0x67a   : > { %5770 = vst [vmem:[#allocation2 + $0x668] sm:$0xff] %v5762_v14  ;;  %v14952_v15 = vpop.permute.xlu1 %4767  ;;  %v14954_v42 = vpop.permute.xlu0 %4771  ;;  %v10078_v17 = vld [vmem:[#allocation2 + $0x1cc] sm:$0xf0] }
 0x67b   : > { %v14956_v11 = vpop.permute.xlu2 %5289  ;;  %v9125_v25 = vor.u32 %v10078_v17, %v9124_v47 }
 0x67f   : > { %v9140_v46 = vld [vmem:[#allocation2 + $0x1e0] sm:$0xf] }
 0x680   : > { %4949 = vrot.lane.b32.xlu1 %v13823_v51, %s10637_s11  ;;  %5197 = vrot.lane.b32.xlu0 %v13690_v62, %s16670_s1  ;;  %v9141_v32 = vor.u32 %v10082_v43, %v9140_v46  ;;  %v9060_v43 = vld [vmem:[#allocation2 + $0x140] sm:$0xf] }
 0x681   : > { %5205 = vrot.lane.b32.xlu2 %v13753_v16, %s16670_s1  ;;  %v9061_v47 = vor.u32 %v10062_v59, %v9060_v43  ;;  %v10206_v43 = vld [vmem:[#allocation2 + $0x5cc] sm:$0xf0] }
 0x682   : > { %v14964_v50 = vpop.permute.xlu1 %4773  ;;  %v5010_v52 = vpop.permute.xlu0 %5009  ;;  %7236 = vmatpush.bf16.msrb.mxu1 %v9141_v32 }
 0x683   : > { %v14966_v21 = vpop.permute.xlu2 %5299  ;;  %v5047_v44 = vsel %vm1326_vm11, %v5010_v52, %v14914_v54 }
 0x684   : > { %16675 = vst [vmem:[#allocation17_spill] sm:$0xff] %v14966_v21  ;;  %v5062_v32 = vmul.f32 %v5047_v44, %v16677_v29  ;;  %v10210_v44 = vld [vmem:[#allocation2 + $0x5ec] sm:$0xf0] }
 0x686   : > { %7237 = vmatpush.bf16.msrb.mxu1 %v9125_v25  ;;  %v9044_v25 = vld [vmem:[#allocation2 + $0x120] sm:$0xf] }
 0x688   : > { %5199 = vrot.lane.b32.xlu1 %v13705_v30, %s16670_s1  ;;  %5207 = vrot.lane.b32.xlu0 %v13767_v2, %s16670_s1 }
 0x689   : > { %5215 = vrot.lane.b32.xlu2 %v13808_v13, %s16670_s1 }
 0x68a   : > { %v5012_v31 = vpop.permute.xlu1 %5011  ;;  %v14974_v12 = vpop.permute.xlu0 %5019  ;;  %7238 = vmatpush.bf16.msrb.mxu1 %v9109_v38  ;;  %v10054_v38 = vld [vmem:[#allocation2 + $0x10c] sm:$0xf0] }
 0x68b   : > { %v5052_v5 = vsel %vm1326_vm11, %v14940_v22, %v5012_v31  ;;  %v5048_v60 = vsel %vm1326_vm11, %v5012_v31, %v14974_v12  ;;  %v14982_v58 = vpop.permute.xlu2 %5013 }
 0x68c   : > { %v5065_v56 = vmul.f32 %v5052_v5, %v16676_v61  ;;  %v5066_v20 = vmul.f32 %v5048_v60, %v16677_v29  ;;  %v9652_v5 = vld [vmem:[#allocation2 + $0x5e0] sm:$0xf] }
 0x68d   : > { %v9653_v59 = vor.u32 %v10210_v44, %v9652_v5  ;;  %v9620_v44 = vld [vmem:[#allocation2 + $0x5a0] sm:$0xf] }
 0x68e   : > { %v5075_v45 = vpack.c.bf16 %v5066_v20, %v5065_v56  ;;  %7239 = vmatpush.bf16.msrb.mxu1 %v9093_v18  ;;  %v9028_v20 = vld [vmem:[#allocation2 + $0x100] sm:$0xf]  ;;  %v16682_v18 = vld [vmem:[#allocation105_spill] sm:$0xff] }
 0x690   : > { %5083 = vst [vmem:[#allocation2 + $0x2f0] sm:$0xff] %v5075_v45  ;;  %5213 = vrot.lane.b32.xlu1 %v13801_v10, %s16670_s1  ;;  %4849 = vrot.lane.b32.xlu0 %v13715_v7, %s16678_s27  ;;  %v16683_v45 = vld [vmem:[#allocation106_spill] sm:$0xff] }
 0x691   : > { %4857 = vrot.lane.b32.xlu2 %v13775_v48, %s16678_s27 }
 0x692   : > { %v14995_v26 = vpop.permute.xlu1 %5033  ;;  %v14997_v57 = vpop.permute.xlu0 %5281  ;;  %7240 = vmatpush.bf16.msrb.mxu1 %v9077_v8  ;;  %v9029_v8 = vor.u32 %v10054_v38, %v9028_v20 }
 0x693   : > { %16679 = vst [vmem:[#allocation21_spill] sm:$0xff] %v14997_v57  ;;  %v5051_v14 = vsel %vm1326_vm11, %v14995_v26, %v5010_v52  ;;  %v15002_v46 = vpop.permute.xlu2 %5031  ;;  %v9045_v52 = vor.u32 %v10058_v33, %v9044_v25  ;;  %v5319_v38 = vsel %vm1617_vm14, %v14997_v57, %v14956_v11 }
 0x694   : > { %16680 = vst [vmem:[#allocation16_spill] sm:$0xff] %v15002_v46  ;;  %v5061_v17 = vmul.f32 %v5051_v14, %v16676_v61 }
 0x696   : > { %v5073_v4 = vpack.c.bf16 %v5062_v32, %v5061_v17  ;;  %7241 = vmatpush.bf16.msrb.mxu1 %v9061_v47  ;;  %v10006_v32 = vld [vmem:[#allocation9 + $0x4] sm:$0xf]  ;;  %v8846_v17 = vld [vmem:[#allocation9 + $0x1c] sm:$0xf0] }
 0x697   : > { %v10114_v25 = vld [vmem:[#allocation2 + $0x2ec] sm:$0xf0] }
 0x698   : > { %5081 = vst [vmem:[#allocation2 + $0x2e0] sm:$0xff] %v5073_v4  ;;  %4851 = vrot.lane.b32.xlu1 %v13724_v3, %s16678_s27  ;;  %4859 = vrot.lane.b32.xlu0 %v13784_v27, %s16678_s27  ;;  %v15024_v4 = vor.u32 %v10006_v32, %v8846_v17 }
 0x699   : > { %4875 = vrot.lane.b32.xlu2 %v13850_v55, %s16678_s27 }
 0x69a   : > { %v15012_v34 = vpop.permute.xlu1 %5283  ;;  %v5292_v31 = vpop.permute.xlu0 %5291  ;;  %7242 = vmatpush.bf16.msrb.mxu1 %v9045_v52  ;;  %16684 = vst [vmem:[#allocation20_spill] sm:$0xff] %v15024_v4  ;;  %v9636_v52 = vld [vmem:[#allocation2 + $0x5c0] sm:$0xf] }
 0x69b   : > { %16681 = vst [vmem:[#allocation19_spill] sm:$0xff] %v15012_v34  ;;  %v5316_v60 = vsel %vm1617_vm14, %v5292_v31, %v14966_v21  ;;  %v5320_v23 = vsel %vm1617_vm14, %v15012_v34, %v5292_v31  ;;  %v15020_v56 = vpop.permute.xlu2 %5285  ;;  %v9637_v31 = vor.u32 %v10206_v43, %v9636_v52  ;;  %v9604_v43 = vld [vmem:[#allocation2 + $0x580] sm:$0xf] }
 0x69c   : > { %v5337_v40 = vmul.f32 %v5320_v23, %v16682_v18  ;;  %v5338_v24 = vmul.f32 %v5316_v60, %v16683_v45  ;;  %v10202_v23 = vld [vmem:[#allocation2 + $0x5ac] sm:$0xf0] }
 0x69e   : > { %v5347_v14 = vpack.c.bf16 %v5338_v24, %v5337_v40  ;;  %7243 = vmatpush.bf16.msrb.mxu1 %v9029_v8  ;;  %v5333_v24 = vmul.f32 %v5319_v38, %v16682_v18 }
 0x69f   : > { %v9268_v47 = vld [vmem:[#allocation2 + $0x2e0] sm:$0xf] }
 0x6a0   : > { %5355 = vst [vmem:[#allocation2 + $0x3f0] sm:$0xff] %v5347_v14  ;;  %4873 = vrot.lane.b32.xlu1 %v13840_v53, %s16678_s27  ;;  %4845 = vrot.lane.b32.xlu0 %v13690_v62, %s16678_s27  ;;  %v9269_v33 = vor.u32 %v10114_v25, %v9268_v47  ;;  %v10194_v25 = vld [vmem:[#allocation2 + $0x56c] sm:$0xf0] }
 0x6a1   : > { %4853 = vrot.lane.b32.xlu2 %v13753_v16, %s16678_s27  ;;  %7244 = vmatmul.bf16.vlgmr.msrb.gmra.mxu1 %v15024_v4  ;;  %v16700_v4 = vld [vmem:[#allocation101_spill] sm:$0xff] }
 0x6a2   : > { %7312 = vmatpush.bf16.msra.mxu1 %v9653_v59  ;;  %v15037_v5 = vpop.permute.xlu1 %5297  ;;  %v5006_v60 = vpop.permute.xlu0 %5005  ;;  %7255 = vmatpush.bf16.msrb.mxu2 %v9269_v33  ;;  %v9621_v59 = vor.u32 %v10202_v23, %v9620_v44  ;;  %v10190_v44 = vld [vmem:[#allocation2 + $0x54c] sm:$0xf0] }
 0x6a3   : > { %v5315_v20 = vsel %vm1617_vm14, %v14956_v11, %v15037_v5  ;;  %v15043_v40 = vpop.permute.xlu2 %5295  ;;  %v10198_v11 = vld [vmem:[#allocation2 + $0x58c] sm:$0xf0] }
 0x6a4   : > { %v5334_v8 = vmul.f32 %v5315_v20, %v16683_v45  ;;  %v9605_v32 = vor.u32 %v10198_v11, %v9604_v43  ;;  %v9588_v20 = vld [vmem:[#allocation2 + $0x560] sm:$0xf] }
 0x6a5   : > { %v9572_v11 = vld [vmem:[#allocation2 + $0x540] sm:$0xf] }
 0x6a6   : > { %7313 = vmatpush.bf16.msra.mxu1 %v9637_v31  ;;  %v5345_v14 = vpack.c.bf16 %v5334_v8, %v5333_v24  ;;  %v9589_v24 = vor.u32 %v10194_v25, %v9588_v20 }
 0x6a8   : > { %5353 = vst [vmem:[#allocation2 + $0x3e0] sm:$0xff] %v5345_v14  ;;  %4847 = vrot.lane.b32.xlu1 %v13705_v30, %s16678_s27  ;;  %4855 = vrot.lane.b32.xlu0 %v13767_v2, %s16678_s27  ;;  %v10146_v14 = vld [vmem:[#allocation2 + $0x3ec] sm:$0xf0] }
 0x6a9   : > { %4871 = vrot.lane.b32.xlu2 %v13832_v41, %s16678_s27 }
 0x6aa   : > { %7314 = vmatpush.bf16.msra.mxu1 %v9621_v59  ;;  %v5008_v17 = vpop.permute.xlu1 %5007  ;;  %v15053_v47 = vpop.permute.xlu0 %5015 }
 0x6ab   : > { %16685 = vst [vmem:[#allocation18_spill] sm:$0xff] %v15053_v47  ;;  %v5050_v33 = vsel %vm1326_vm11, %v15002_v46, %v5008_v17  ;;  %v5046_v52 = vsel %vm1326_vm11, %v5008_v17, %v15053_v47  ;;  %v15061_v38 = vpop.permute.xlu2 %4937  ;;  %v9573_v17 = vor.u32 %v10190_v44, %v9572_v11  ;;  %v10112_v11 = vld [vmem:[#allocation2 + $0x2e4] sm:$0xf]  ;;  %v16733_v47 = vld [vmem:[#allocation78_spill] sm:$0xff] }
 0x6ac   : > { %16686 = vst [vmem:[#allocation24_spill] sm:$0xff] %v15061_v38  ;;  %v5057_v31 = vmul.f32 %v5050_v33, %v16676_v61  ;;  %v5058_v23 = vmul.f32 %v5046_v52, %v16677_v29  ;;  %v9556_v52 = vld [vmem:[#allocation2 + $0x520] sm:$0xf] }
 0x6ae   : > { %7315 = vmatpush.bf16.msra.mxu1 %v9605_v32  ;;  %v5071_v8 = vpack.c.bf16 %v5058_v23, %v5057_v31  ;;  %v5045_v32 = vsel %vm1326_vm11, %v5006_v60, %v14982_v58 }
 0x6af   : > { %v9396_v59 = vld [vmem:[#allocation2 + $0x3e0] sm:$0xf]  ;;  %v5054_v20 = vmul.f32 %v5045_v32, %v16677_v29 }
 0x6b0   : > { %5079 = vst [vmem:[#allocation2 + $0x2d0] sm:$0xff] %v5071_v8  ;;  %4869 = vrot.lane.b32.xlu1 %v13823_v51, %s16678_s27  ;;  %4777 = vrot.lane.b32.xlu0 %v13775_v48, %s10635_s26  ;;  %v9397_v43 = vor.u32 %v10146_v14, %v9396_v59  ;;  %v10186_v8 = vld [vmem:[#allocation2 + $0x52c] sm:$0xf0] }
 0x6b1   : > { %4793 = vrot.lane.b32.xlu2 %v13840_v53, %s10635_s26  ;;  %v9557_v59 = vor.u32 %v10186_v8, %v9556_v52  ;;  %v10182_v14 = vld [vmem:[#allocation2 + $0x50c] sm:$0xf0] }
 0x6b2   : > { %7316 = vmatpush.bf16.msra.mxu1 %v9589_v24  ;;  %v15074_v25 = vpop.permute.xlu1 %5029  ;;  %v15076_v33 = vpop.permute.xlu0 %5277  ;;  %7274 = vmatpush.bf16.msrb.mxu3 %v9397_v43  ;;  %v9270_v43 = vld [vmem:[#allocation2 + $0x2f0] sm:$0xf0] }
 0x6b3   : > { %16687 = vst [vmem:[#allocation25_spill] sm:$0xff] %v15076_v33  ;;  %v5049_v31 = vsel %vm1326_vm11, %v15074_v25, %v5006_v60  ;;  %v15081_v23 = vpop.permute.xlu2 %4955  ;;  %v9540_v60 = vld [vmem:[#allocation2 + $0x500] sm:$0xf] }
 0x6b4   : > { %16688 = vst [vmem:[#allocation23_spill] sm:$0xff] %v15081_v23  ;;  %v5053_v24 = vmul.f32 %v5049_v31, %v16676_v61  ;;  %v9541_v29 = vor.u32 %v10182_v14, %v9540_v60 }
 0x6b6   : > { %7317 = vmatpush.bf16.msra.mxu1 %v9573_v17  ;;  %v5069_v44 = vpack.c.bf16 %v5054_v20, %v5053_v24  ;;  %v9273_v17 = vor.u32 %v10112_v11, %v9270_v43 }
 0x6b7   : > { %v9254_v60 = vld [vmem:[#allocation2 + $0x2d0] sm:$0xf0] }
 0x6b8   : > { %5077 = vst [vmem:[#allocation2 + $0x2c0] sm:$0xff] %v5069_v44  ;;  %4779 = vrot.lane.b32.xlu1 %v13784_v27, %s10635_s26  ;;  %4795 = vrot.lane.b32.xlu0 %v13850_v55, %s10635_s26  ;;  %v10110_v44 = vld [vmem:[#allocation2 + $0x2cc] sm:$0xf0] }
 0x6b9   : > { %5091 = vrot.lane.b32.xlu2 %v13724_v3, %s16689_s8 }
 0x6ba   : > { %7318 = vmatpush.bf16.msra.mxu1 %v9557_v59  ;;  %v15091_v61 = vpop.permute.xlu1 %5279  ;;  %v5288_v32 = vpop.permute.xlu0 %5287 }
 0x6bb   : > { %v5314_v52 = vsel %vm1617_vm14, %v5288_v32, %v15043_v40  ;;  %v5318_v31 = vsel %vm1617_vm14, %v15091_v61, %v5288_v32  ;;  %v15099_v20 = vpop.permute.xlu2 %5209 }
 0x6bc   : > { %v5329_v24 = vmul.f32 %v5318_v31, %v16682_v18  ;;  %v5330_v8 = vmul.f32 %v5314_v52, %v16683_v45 }
 0x6be   : > { %7319 = vmatpush.bf16.msra.mxu1 %v9541_v29  ;;  %v5343_v59 = vpack.c.bf16 %v5330_v8, %v5329_v24  ;;  %v5317_v29 = vsel %vm1617_vm14, %v15076_v33, %v15020_v56 }
 0x6bf   : > { %v9252_v14 = vld [vmem:[#allocation2 + $0x2c0] sm:$0xf]  ;;  %v10108_v11 = vld [vmem:[#allocation2 + $0x2c4] sm:$0xf]  ;;  %v5325_v8 = vmul.f32 %v5317_v29, %v16682_v18 }
 0x6c0   : > { %5351 = vst [vmem:[#allocation2 + $0x3d0] sm:$0xff] %v5343_v59  ;;  %5089 = vrot.lane.b32.xlu1 %v13715_v7, %s16689_s8  ;;  %5097 = vrot.lane.b32.xlu0 %v13775_v48, %s16689_s8  ;;  %v9253_v43 = vor.u32 %v10110_v44, %v9252_v14  ;;  %v9257_v32 = vor.u32 %v10108_v11, %v9254_v60  ;;  %v16694_v60 = vld [vmem:[#allocation89_spill] sm:$0xff] }
 0x6c1   : > { %5113 = vrot.lane.b32.xlu2 %v13840_v53, %s16689_s8 }
 0x6c2   : > { %7388 = vmatpush.bf16.msrb.mxu1 %v9273_v17  ;;  %v15113_v17 = vpop.permute.xlu1 %5293  ;;  %v4930_v52 = vpop.permute.xlu0 %4929  ;;  %7256 = vmatpush.bf16.msrb.mxu2 %v9253_v43 }
 0x6c3   : > { %16690 = vst [vmem:[#allocation22_spill] sm:$0xff] %v15113_v17  ;;  %v5313_v31 = vsel %vm1617_vm14, %v15020_v56, %v15113_v17  ;;  %v15119_v24 = vpop.permute.xlu2 %5219 }
 0x6c4   : > { %16691 = vst [vmem:[#allocation26_spill] sm:$0xff] %v15119_v24  ;;  %v5326_v59 = vmul.f32 %v5313_v31, %v16683_v45 }
 0x6c6   : > { %7389 = vmatpush.bf16.msrb.mxu1 %v9257_v32  ;;  %v5341_v44 = vpack.c.bf16 %v5326_v59, %v5325_v8  ;;  %v16695_v32 = vld [vmem:[#allocation90_spill] sm:$0xff] }
 0x6c7   : > { %v10142_v59 = vld [vmem:[#allocation2 + $0x3cc] sm:$0xf0] }
 0x6c8   : > { %5349 = vst [vmem:[#allocation2 + $0x3c0] sm:$0xff] %v5341_v44  ;;  %5099 = vrot.lane.b32.xlu1 %v13784_v27, %s16689_s8  ;;  %5115 = vrot.lane.b32.xlu0 %v13850_v55, %s16689_s8 }
 0x6c9   : > { %4791 = vrot.lane.b32.xlu2 %v13832_v41, %s10635_s26 }
 0x6ca   : > { %v4932_v14 = vpop.permute.xlu1 %4931  ;;  %v15129_v11 = vpop.permute.xlu0 %4939 }
 0x6cb   : > { %16692 = vst [vmem:[#allocation27_spill] sm:$0xff] %v15129_v11  ;;  %v4972_v56 = vsel %vm1241_vm10, %v15081_v23, %v4932_v14  ;;  %v4968_v18 = vsel %vm1241_vm10, %v4932_v14, %v15129_v11  ;;  %v15137_v45 = vpop.permute.xlu2 %4933  ;;  %v4967_v14 = vsel %vm1241_vm10, %v4930_v52, %v15061_v38 }
 0x6cc   : > { %16693 = vst [vmem:[#allocation28_spill] sm:$0xff] %v15137_v45  ;;  %v4985_v43 = vmul.f32 %v4972_v56, %v16694_v60  ;;  %v4986_v29 = vmul.f32 %v4968_v18, %v16695_v32 }
 0x6ce   : > { %v4995_v31 = vpack.c.bf16 %v4986_v29, %v4985_v43 }
 0x6cf   : > { %v9380_v8 = vld [vmem:[#allocation2 + $0x3c0] sm:$0xf] }
 0x6d0   : > { %5003 = vst [vmem:[#allocation2 + $0x2b0] sm:$0xff] %v4995_v31  ;;  %4789 = vrot.lane.b32.xlu1 %v13823_v51, %s10635_s26  ;;  %5085 = vrot.lane.b32.xlu0 %v13690_v62, %s16689_s8  ;;  %v9381_v44 = vor.u32 %v10142_v59, %v9380_v8  ;;  %v4982_v31 = vmul.f32 %v4967_v14, %v16695_v32 }
 0x6d1   : > { %5093 = vrot.lane.b32.xlu2 %v13753_v16, %s16689_s8 }
 0x6d2   : > { %v15150_v56 = vpop.permute.xlu1 %4953  ;;  %v15152_v18 = vpop.permute.xlu0 %5201  ;;  %7275 = vmatpush.bf16.msrb.mxu3 %v9381_v44 }
 0x6d3   : > { %16696 = vst [vmem:[#allocation29_spill] sm:$0xff] %v15150_v56  ;;  %v4971_v43 = vsel %vm1241_vm10, %v15150_v56, %v4930_v52  ;;  %v15157_v29 = vpop.permute.xlu2 %4951 }
 0x6d4   : > { %16697 = vst [vmem:[#allocation30_spill] sm:$0xff] %v15157_v29  ;;  %v4981_v8 = vmul.f32 %v4971_v43, %v16694_v60 }
 0x6d6   : > { %v4993_v59 = vpack.c.bf16 %v4982_v31, %v4981_v8  ;;  %v16699_v8 = vld [vmem:[#allocation102_spill] sm:$0xff] }
 0x6d7   : > { %v10106_v11 = vld [vmem:[#allocation2 + $0x2ac] sm:$0xf0]  ;;  %v9238_v56 = vld [vmem:[#allocation2 + $0x2b0] sm:$0xf0] }
 0x6d8   : > { %5001 = vst [vmem:[#allocation2 + $0x2a0] sm:$0xff] %v4993_v59  ;;  %5087 = vrot.lane.b32.xlu1 %v13705_v30, %s16689_s8  ;;  %5095 = vrot.lane.b32.xlu0 %v13767_v2, %s16689_s8 }
 0x6d9   : > { %5111 = vrot.lane.b32.xlu2 %v13832_v41, %s16689_s8 }
 0x6da   : > { %v15167_v44 = vpop.permute.xlu1 %5203  ;;  %v5212_v52 = vpop.permute.xlu0 %5211 }
 0x6db   : > { %16698 = vst [vmem:[#allocation31_spill] sm:$0xff] %v15167_v44  ;;  %v5236_v14 = vsel %vm1532_vm13, %v5212_v52, %v15119_v24  ;;  %v5240_v43 = vsel %vm1532_vm13, %v15167_v44, %v5212_v52  ;;  %v15175_v31 = vpop.permute.xlu2 %5205 }
 0x6dc   : > { %v5257_v59 = vmul.f32 %v5240_v43, %v16699_v8  ;;  %v5258_v39 = vmul.f32 %v5236_v14, %v16700_v4  ;;  %v5239_v43 = vsel %vm1532_vm13, %v15152_v18, %v15099_v20 }
 0x6de   : > { %v5267_v6 = vpack.c.bf16 %v5258_v39, %v5257_v59 }
 0x6df   : > { %v9236_v23 = vld [vmem:[#allocation2 + $0x2a0] sm:$0xf]  ;;  %v10104_v38 = vld [vmem:[#allocation2 + $0x2a4] sm:$0xf] }
 0x6e0   : > { %5275 = vst [vmem:[#allocation2 + $0x3b0] sm:$0xff] %v5267_v6  ;;  %5109 = vrot.lane.b32.xlu1 %v13823_v51, %s16689_s8  ;;  %4785 = vrot.lane.b32.xlu0 %v13812_v49, %s10635_s26  ;;  %v9237_v24 = vor.u32 %v10106_v11, %v9236_v23  ;;  %v9241_v52 = vor.u32 %v10104_v38, %v9238_v56 }
 0x6e1   : > { %4781 = vrot.lane.b32.xlu2 %v13801_v10, %s10635_s26  ;;  %v5253_v38 = vmul.f32 %v5239_v43, %v16699_v8 }
 0x6e2   : > { %v15189_v39 = vpop.permute.xlu1 %5217  ;;  %v4926_v14 = vpop.permute.xlu0 %4925  ;;  %7257 = vmatpush.bf16.msrb.mxu2 %v9237_v24  ;;  %7390 = vmatpush.bf16.msrb.mxu1 %v9241_v52 }
 0x6e3   : > { %v5235_v6 = vsel %vm1532_vm13, %v15099_v20, %v15189_v39  ;;  %v15195_v23 = vpop.permute.xlu2 %5215 }
 0x6e4   : > { %16701 = vst [vmem:[#allocation32_spill] sm:$0xff] %v15195_v23  ;;  %v5254_v11 = vmul.f32 %v5235_v6, %v16700_v4 }
 0x6e6   : > { %v5265_v56 = vpack.c.bf16 %v5254_v11, %v5253_v38 }
 0x6e7   : > { %v10138_v44 = vld [vmem:[#allocation2 + $0x3ac] sm:$0xf0] }
 0x6e8   : > { %5273 = vst [vmem:[#allocation2 + $0x3a0] sm:$0xff] %v5265_v56  ;;  %4787 = vrot.lane.b32.xlu1 %v13817_v28, %s10635_s26  ;;  %4783 = vrot.lane.b32.xlu0 %v13808_v13, %s10635_s26 }
 0x6e9   : > { %5443 = vrot.lane.b32.xlu2 %v13724_v3, %s16702_s30 }
 0x6ea   : > { %v4928_v24 = vpop.permute.xlu1 %4927  ;;  %v15205_v59 = vpop.permute.xlu0 %4935 }
 0x6eb   : > { %16703 = vst [vmem:[#allocation33_spill] sm:$0xff] %v15205_v59  ;;  %v4970_v20 = vsel %vm1241_vm10, %v15157_v29, %v4928_v24  ;;  %v4966_v52 = vsel %vm1241_vm10, %v4928_v24, %v15205_v59  ;;  %v15213_v43 = vpop.permute.xlu2 %4857  ;;  %v4965_v24 = vsel %vm1241_vm10, %v4926_v14, %v15137_v45  ;;  %v16738_v59 = vld [vmem:[#allocation81_spill] sm:$0xff] }
 0x6ec   : > { %16704 = vst [vmem:[#allocation34_spill] sm:$0xff] %v15213_v43  ;;  %v4977_v6 = vmul.f32 %v4970_v20, %v16694_v60  ;;  %v4978_v38 = vmul.f32 %v4966_v52, %v16695_v32 }
 0x6ee   : > { %v4991_v11 = vpack.c.bf16 %v4978_v38, %v4977_v6 }
 0x6ef   : > { %v9364_v56 = vld [vmem:[#allocation2 + $0x3a0] sm:$0xf] }
 0x6f0   : > { %4999 = vst [vmem:[#allocation2 + $0x290] sm:$0xff] %v4991_v11  ;;  %5441 = vrot.lane.b32.xlu1 %v13715_v7, %s16702_s30  ;;  %5449 = vrot.lane.b32.xlu0 %v13775_v48, %s16702_s30  ;;  %v9365_v33 = vor.u32 %v10138_v44, %v9364_v56  ;;  %v4974_v44 = vmul.f32 %v4965_v24, %v16695_v32 }
 0x6f1   : > { %5457 = vrot.lane.b32.xlu2 %v13812_v49, %s16702_s30 }
 0x6f2   : > { %v15226_v20 = vpop.permute.xlu1 %4949  ;;  %v15228_v52 = vpop.permute.xlu0 %5197  ;;  %7276 = vmatpush.bf16.msrb.mxu3 %v9365_v33 }
 0x6f3   : > { %16705 = vst [vmem:[#allocation35_spill] sm:$0xff] %v15226_v20  ;;  %v4969_v6 = vsel %vm1241_vm10, %v15226_v20, %v4926_v14  ;;  %v15233_v38 = vpop.permute.xlu2 %4875 }
 0x6f4   : > { %16706 = vst [vmem:[#allocation36_spill] sm:$0xff] %v15228_v52  ;;  %v4973_v11 = vmul.f32 %v4969_v6, %v16694_v60 }
 0x6f5   : > { %16707 = vst [vmem:[#allocation37_spill] sm:$0xff] %v15233_v38 }
 0x6f6   : > { %v4989_v56 = vpack.c.bf16 %v4974_v44, %v4973_v11 }
 0x6f7   : > { %v9222_v17 = vld [vmem:[#allocation2 + $0x290] sm:$0xf0] }
 0x6f8   : > { %4997 = vst [vmem:[#allocation2 + $0x280] sm:$0xff] %v4989_v56  ;;  %5451 = vrot.lane.b32.xlu1 %v13784_v27, %s16702_s30  ;;  %5459 = vrot.lane.b32.xlu0 %v13817_v28, %s16702_s30  ;;  %v10102_v56 = vld [vmem:[#allocation2 + $0x28c] sm:$0xf0] }
 0x6f9   : > { %5439 = vrot.lane.b32.xlu2 %v13705_v30, %s16702_s30 }
 0x6fa   : > { %v15243_v33 = vpop.permute.xlu1 %5199  ;;  %v5208_v14 = vpop.permute.xlu0 %5207 }
 0x6fb   : > { %16708 = vst [vmem:[#allocation40_spill] sm:$0xff] %v15243_v33  ;;  %v5234_v32 = vsel %vm1532_vm13, %v5208_v14, %v15195_v23  ;;  %v5238_v60 = vsel %vm1532_vm13, %v15243_v33, %v5208_v14  ;;  %v15251_v24 = vpop.permute.xlu2 %4853 }
 0x6fc   : > { %16709 = vst [vmem:[#allocation41_spill] sm:$0xff] %v15251_v24  ;;  %v5249_v6 = vmul.f32 %v5238_v60, %v16699_v8  ;;  %v5250_v44 = vmul.f32 %v5234_v32, %v16700_v4  ;;  %v5237_v60 = vsel %vm1532_vm13, %v15228_v52, %v15175_v31 }
 0x6fe   : > { %v5263_v11 = vpack.c.bf16 %v5250_v44, %v5249_v6 }
 0x6ff   : > { %v9220_v45 = vld [vmem:[#allocation2 + $0x280] sm:$0xf]  ;;  %v10100_v20 = vld [vmem:[#allocation2 + $0x284] sm:$0xf] }
 0x700   : > { %5271 = vst [vmem:[#allocation2 + $0x390] sm:$0xff] %v5263_v11  ;;  %5437 = vrot.lane.b32.xlu1 %v13690_v62, %s16702_s30  ;;  %5445 = vrot.lane.b32.xlu0 %v13753_v16, %s16702_s30  ;;  %v9221_v23 = vor.u32 %v10102_v56, %v9220_v45  ;;  %v9225_v14 = vor.u32 %v10100_v20, %v9222_v17 }
 0x701   : > { %5453 = vrot.lane.b32.xlu2 %v13801_v10, %s16702_s30  ;;  %v5245_v17 = vmul.f32 %v5237_v60, %v16699_v8 }
 0x702   : > { %v15265_v32 = vpop.permute.xlu1 %5213  ;;  %v4850_v6 = vpop.permute.xlu0 %4849  ;;  %7258 = vmatpush.bf16.msrb.mxu2 %v9221_v23  ;;  %7391 = vmatpush.bf16.msrb.mxu1 %v9225_v14  ;;  %v16714_v14 = vld [vmem:[#allocation85_spill] sm:$0xff] }
 0x703   : > { %16710 = vst [vmem:[#allocation38_spill] sm:$0xff] %v15265_v32  ;;  %v5233_v44 = vsel %vm1532_vm13, %v15175_v31, %v15265_v32  ;;  %v15271_v45 = vpop.permute.xlu2 %4871  ;;  %v9316_v32 = vld [vmem:[#allocation2 + $0x340] sm:$0xf] }
 0x704   : > { %16711 = vst [vmem:[#allocation39_spill] sm:$0xff] %v15271_v45  ;;  %v5246_v20 = vmul.f32 %v5233_v44, %v16700_v4  ;;  %v16715_v44 = vld [vmem:[#allocation86_spill] sm:$0xff] }
 0x706   : > { %v5261_v11 = vpack.c.bf16 %v5246_v20, %v5245_v17 }
 0x708   : > { %5269 = vst [vmem:[#allocation2 + $0x380] sm:$0xff] %v5261_v11  ;;  %5447 = vrot.lane.b32.xlu1 %v13767_v2, %s16702_s30  ;;  %5455 = vrot.lane.b32.xlu0 %v13808_v13, %s16702_s30 }
 0x709   : > { %5363 = vrot.lane.b32.xlu2 %v13724_v3, %s16712_s9  ;;  %v10134_v3 = vld [vmem:[#allocation2 + $0x38c] sm:$0xf0] }
 0x70a   : > { %v4852_v23 = vpop.permute.xlu1 %4851  ;;  %v15281_v56 = vpop.permute.xlu0 %4859 }
 0x70b   : > { %16713 = vst [vmem:[#allocation42_spill] sm:$0xff] %v15281_v56  ;;  %v4892_v31 = vsel %vm1156_vm9, %v15233_v38, %v4852_v23  ;;  %v4888_v4 = vsel %vm1156_vm9, %v4852_v23, %v15281_v56  ;;  %v15289_v8 = vpop.permute.xlu2 %4793  ;;  %v4887_v23 = vsel %vm1156_vm9, %v4850_v6, %v15213_v43  ;;  %v10126_v43 = vld [vmem:[#allocation2 + $0x34c] sm:$0xf0] }
 0x70c   : > { %v4905_v60 = vmul.f32 %v4892_v31, %v16714_v14  ;;  %v4906_v17 = vmul.f32 %v4888_v4, %v16715_v44  ;;  %v10130_v31 = vld [vmem:[#allocation2 + $0x36c] sm:$0xf0] }
 0x70d   : > { %v16727_v56 = vld [vmem:[#allocation98_spill] sm:$0xff] }
 0x70e   : > { %v4915_v20 = vpack.c.bf16 %v4906_v17, %v4905_v60 }
 0x70f   : > { %v9348_v11 = vld [vmem:[#allocation2 + $0x380] sm:$0xf] }
 0x710   : > { %4923 = vst [vmem:[#allocation2 + $0x270] sm:$0xff] %v4915_v20  ;;  %5361 = vrot.lane.b32.xlu1 %v13715_v7, %s16712_s9  ;;  %5369 = vrot.lane.b32.xlu0 %v13775_v48, %s16712_s9  ;;  %v9349_v33 = vor.u32 %v10134_v3, %v9348_v11  ;;  %v9332_v48 = vld [vmem:[#allocation2 + $0x360] sm:$0xf]  ;;  %v4902_v20 = vmul.f32 %v4887_v23, %v16715_v44 }
 0x711   : > { %5377 = vrot.lane.b32.xlu2 %v13812_v49, %s16712_s9  ;;  %v9333_v3 = vor.u32 %v10130_v31, %v9332_v48 }
 0x712   : > { %v15302_v4 = vpop.permute.xlu1 %4873  ;;  %v4846_v60 = vpop.permute.xlu0 %4845  ;;  %7277 = vmatpush.bf16.msrb.mxu3 %v9349_v33  ;;  %v9317_v33 = vor.u32 %v10126_v43, %v9316_v32 }
 0x713   : > { %16716 = vst [vmem:[#allocation45_spill] sm:$0xff] %v15302_v4  ;;  %v4891_v7 = vsel %vm1156_vm9, %v15302_v4, %v4850_v6  ;;  %v15307_v17 = vpop.permute.xlu2 %5091 }
 0x714   : > { %v4901_v11 = vmul.f32 %v4891_v7, %v16714_v14 }
 0x716   : > { %v4913_v52 = vpack.c.bf16 %v4902_v20, %v4901_v11  ;;  %7278 = vmatpush.bf16.msrb.mxu3 %v9333_v3  ;;  %v15333_v3 = vsel %vm1071_vm8, %v15289_v8, %v14862_v9 }
 0x717   : > { %v9206_v11 = vld [vmem:[#allocation2 + $0x270] sm:$0xf0] }
 0x718   : > { %4921 = vst [vmem:[#allocation2 + $0x260] sm:$0xff] %v4913_v52  ;;  %5371 = vrot.lane.b32.xlu1 %v13784_v27, %s16712_s9  ;;  %5379 = vrot.lane.b32.xlu0 %v13817_v28, %s16712_s9 }
 0x719   : > { %5359 = vrot.lane.b32.xlu2 %v13705_v30, %s16712_s9  ;;  %v10098_v30 = vld [vmem:[#allocation2 + $0x26c] sm:$0xf0] }
 0x71a   : > { %v4848_v6 = vpop.permute.xlu1 %4847  ;;  %v15317_v23 = vpop.permute.xlu0 %4855  ;;  %7279 = vmatpush.bf16.msrb.mxu3 %v9317_v33 }
 0x71b   : > { %16717 = vst [vmem:[#allocation43_spill] sm:$0xff] %v15317_v23  ;;  %v4890_v31 = vsel %vm1156_vm9, %v15271_v45, %v4848_v6  ;;  %v4886_v52 = vsel %vm1156_vm9, %v4848_v6, %v15317_v23  ;;  %v15325_v27 = vpop.permute.xlu2 %5113 }
 0x71c   : > { %16718 = vst [vmem:[#allocation44_spill] sm:$0xff] %v15325_v27  ;;  %v4897_v7 = vmul.f32 %v4890_v31, %v16714_v14  ;;  %v4898_v43 = vmul.f32 %v4886_v52, %v16715_v44  ;;  %v4885_v31 = vsel %vm1156_vm9, %v4846_v60, %v15251_v24  ;;  %v15348_v52 = vsel %vm1071_vm8, %v14952_v15, %v14887_v37  ;;  %v10009_v24 = vld [vmem:[#allocation9 + $0x18] sm:$0xf0] }
 0x71e   : > { %v4911_v32 = vpack.c.bf16 %v4898_v43, %v4897_v7 }
 0x71f   : > { %v9204_v48 = vld [vmem:[#allocation2 + $0x260] sm:$0xf]  ;;  %v10096_v20 = vld [vmem:[#allocation2 + $0x264] sm:$0xf] }
 0x720   : > { %4919 = vst [vmem:[#allocation2 + $0x250] sm:$0xff] %v4911_v32  ;;  %5357 = vrot.lane.b32.xlu1 %v13690_v62, %s16712_s9  ;;  %5365 = vrot.lane.b32.xlu0 %v13753_v16, %s16712_s9  ;;  %v9205_v33 = vor.u32 %v10098_v30, %v9204_v48  ;;  %v9209_v6 = vor.u32 %v10096_v20, %v9206_v11  ;;  %v16720_v16 = vld [vmem:[#allocation79_spill] sm:$0xff] }
 0x721   : > { %5373 = vrot.lane.b32.xlu2 %v13801_v10, %s16712_s9  ;;  %v4821_v43 = vmul.f32 %v15333_v3, %v16720_v16  ;;  %v4894_v20 = vmul.f32 %v4885_v31, %v16715_v44 }
 0x722   : > { %v15350_v7 = vpop.permute.xlu1 %4869  ;;  %v15352_v62 = vpop.permute.xlu0 %4777  ;;  %7259 = vmatpush.bf16.msrb.mxu2 %v9205_v33  ;;  %7392 = vmatpush.bf16.msrb.mxu1 %v9209_v6  ;;  %v16721_v33 = vld [vmem:[#allocation80_spill] sm:$0xff] }
 0x723   : > { %16719 = vst [vmem:[#allocation48_spill] sm:$0xff] %v15350_v7  ;;  %v4889_v32 = vsel %vm1156_vm9, %v15350_v7, %v4846_v60  ;;  %v15363_v30 = vsel %vm1071_vm8, %v14862_v9, %v15352_v62  ;;  %v15365_v48 = vpop.permute.xlu2 %4791  ;;  %v4818_v23 = vmul.f32 %v15348_v52, %v16721_v33 }
 0x724   : > { %v4893_v11 = vmul.f32 %v4889_v32, %v16714_v14  ;;  %v4822_v6 = vmul.f32 %v15363_v30, %v16721_v33  ;;  %v15375_v60 = vsel %vm1071_vm8, %v15365_v48, %v14952_v15 }
 0x725   : > { %v4817_v9 = vmul.f32 %v15375_v60, %v16720_v16 }
 0x726   : > { %v4909_v45 = vpack.c.bf16 %v4894_v20, %v4893_v11  ;;  %v4833_v4 = vpack.c.bf16 %v4822_v6, %v4821_v43 }
 0x727   : > { %v4831_v44 = vpack.c.bf16 %v4818_v23, %v4817_v9  ;;  %v10094_v32 = vld [vmem:[#allocation2 + $0x24c] sm:$0xf0]  ;;  %v9190_v20 = vld [vmem:[#allocation2 + $0x250] sm:$0xf0] }
 0x728   : > { %4917 = vst [vmem:[#allocation2 + $0x240] sm:$0xff] %v4909_v45  ;;  %5367 = vrot.lane.b32.xlu1 %v13767_v2, %s16712_s9  ;;  %5375 = vrot.lane.b32.xlu0 %v13808_v13, %s16712_s9  ;;  %v8844_v9 = vld [vmem:[#allocation9] sm:$0xf] }
 0x729   : > { %4841 = vst [vmem:[#allocation2 + $0x220] sm:$0xff] %v4833_v4  ;;  %5027 = vrot.lane.b32.xlu2 %v13817_v28, %s10638_s7 }
 0x72a   : > { %4839 = vst [vmem:[#allocation2 + $0x210] sm:$0xff] %v4831_v44  ;;  %v15387_v15 = vpop.permute.xlu1 %4779  ;;  %v15389_v14 = vpop.permute.xlu0 %4795 }
 0x72b   : > { %v15395_v45 = vsel %vm1071_vm8, %v14954_v42, %v15387_v15  ;;  %v15401_v2 = vsel %vm1071_vm8, %v15389_v14, %v14954_v42  ;;  %v15403_v4 = vpop.permute.xlu2 %5093 }
 0x72c   : > { %v4826_v23 = vmul.f32 %v15395_v45, %v16721_v33  ;;  %v4825_v31 = vmul.f32 %v15401_v2, %v16720_v16 }
 0x72e   : > { %v4835_v43 = vpack.c.bf16 %v4826_v23, %v4825_v31  ;;  %v15417_v31 = vor.u32 %v10009_v24, %v8844_v9 }
 0x72f   : > { %v9188_v11 = vld [vmem:[#allocation2 + $0x240] sm:$0xf]  ;;  %v10092_v6 = vld [vmem:[#allocation2 + $0x244] sm:$0xf] }
 0x730   : > { %4843 = vst [vmem:[#allocation2 + $0x230] sm:$0xff] %v4835_v43  ;;  %5025 = vrot.lane.b32.xlu1 %v13812_v49, %s10638_s7  ;;  %5305 = vrot.lane.b32.xlu0 %v13840_v53, %s10641_s16  ;;  %v9189_v42 = vor.u32 %v10094_v32, %v9188_v11  ;;  %v9193_v44 = vor.u32 %v10092_v6, %v9190_v20  ;;  %v16726_v11 = vld [vmem:[#allocation97_spill] sm:$0xff]  ;;  %v10088_v9 = vld [vmem:[#allocation2 + $0x224] sm:$0xf] }
 0x731   : > { %5021 = vrot.lane.b32.xlu2 %v13801_v10, %s10638_s7  ;;  %7225 = vmatmul.bf16.vlgmr.msrb.gmra.mxu0 %v15417_v31 }
 0x732   : > { %v5090_v7 = vpop.permute.xlu1 %5089  ;;  %v15415_v23 = vpop.permute.xlu0 %5097  ;;  %7260 = vmatpush.bf16.msrb.mxu2 %v9189_v42  ;;  %7393 = vmatpush.bf16.msrb.mxu1 %v9193_v44  ;;  %v9172_v44 = vld [vmem:[#allocation2 + $0x220] sm:$0xf] }
 0x733   : > { %16722 = vst [vmem:[#allocation49_spill] sm:$0xff] %v15415_v23  ;;  %v5131_v43 = vsel %vm16723_vm0, %v15325_v27, %v5090_v7  ;;  %v5127_v32 = vsel %vm16724_vm1, %v5090_v7, %v15415_v23  ;;  %v15425_v20 = vpop.permute.xlu2 %5111  ;;  %v16732_v27 = vld [vmem:[#allocation77_spill] sm:$0xff] }
 0x734   : > { %16725 = vst [vmem:[#allocation47_spill] sm:$0xff] %v15425_v20  ;;  %v5141_v6 = vmul.f32 %v5131_v43, %v16726_v11  ;;  %v5142_v38 = vmul.f32 %v5127_v32, %v16727_v56 }
 0x736   : > { %v5153_v42 = vpack.c.bf16 %v5142_v38, %v5141_v6  ;;  %v4805_v38 = vsel %vm1071_vm8, %v14931_v0, %v14964_v50 }
 0x737   : > { %v10090_v24 = vld [vmem:[#allocation2 + $0x22c] sm:$0xf0]  ;;  %v9174_v63 = vld [vmem:[#allocation2 + $0x230] sm:$0xf0]  ;;  %v5773_v35 = vmul.f32 %v4805_v38, %v16732_v27 }
 0x738   : > { %5161 = vst [vmem:[#allocation2 + $0x320] sm:$0xff] %v5153_v42  ;;  %5307 = vrot.lane.b32.xlu1 %v13850_v55, %s10641_s16  ;;  %5023 = vrot.lane.b32.xlu0 %v13808_v13, %s10638_s7  ;;  %v9173_v7 = vor.u32 %v10090_v24, %v9172_v44  ;;  %v9177_v23 = vor.u32 %v10088_v9, %v9174_v63 }
 0x739   : > { %5303 = vrot.lane.b32.xlu2 %v13832_v41, %s10641_s16 }
 0x73a   : > { %v15440_v43 = vpop.permute.xlu1 %5099  ;;  %v15442_v32 = vpop.permute.xlu0 %5115  ;;  %7261 = vmatpush.bf16.msrb.mxu2 %v9173_v7  ;;  %7394 = vmatpush.bf16.msrb.mxu1 %v9177_v23  ;;  %v10013_v23 = vld [vmem:[#allocation9 + $0x3c] sm:$0xf]  ;;  %v8874_v7 = vld [vmem:[#allocation9 + $0x54] sm:$0xf0] }
 0x73b   : > { %16728 = vst [vmem:[#allocation46_spill] sm:$0xff] %v15440_v43  ;;  %v5128_v6 = vsel %vm16730_vm2, %v15307_v17, %v15440_v43  ;;  %v5132_v63 = vsel %vm16731_vm3, %v15442_v32, %v15307_v17  ;;  %v4782_v42 = vpop.permute.xlu2 %4781  ;;  %v15459_v46 = vor.u32 %v10013_v23, %v8874_v7  ;;  %v8872_v17 = vld [vmem:[#allocation9 + $0x38] sm:$0xf] }
 0x73c   : > { %16729 = vst [vmem:[#allocation50_spill] sm:$0xff] %v15442_v32  ;;  %v5146_v44 = vmul.f32 %v5128_v6, %v16727_v56  ;;  %v5145_v24 = vmul.f32 %v5132_v63, %v16726_v11  ;;  %v4801_v9 = vsel %vm1071_vm8, %v14964_v50, %v4782_v42  ;;  %v10016_v6 = vld [vmem:[#allocation9 + $0x50] sm:$0xf0] }
 0x73d   : > { %v5774_v43 = vmul.f32 %v4801_v9, %v16733_v47  ;;  %16734 = vst [vmem:[#allocation51_spill] sm:$0xff] %v15459_v46  ;;  %7249 = vmatmul.bf16.gmra.mxu1 %v15459_v46  ;;  %v15466_v50 = vor.u32 %v10016_v6, %v8872_v17  ;;  %v16736_v17 = vld [vmem:[#allocation83_spill] sm:$0xff]  ;;  %v16737_v32 = vld [vmem:[#allocation84_spill] sm:$0xff] }
 0x73e   : > { %v5155_v34 = vpack.c.bf16 %v5146_v44, %v5145_v24 }
 0x73f   : > { %v5789_v21 = vpack.c.bf16 %v5774_v43, %v5773_v35  ;;  %v4814_v35 = vmul.f32 %v4805_v38, %v16721_v33  ;;  %v16735_v43 = vld [vmem:[#allocation82_spill] sm:$0xff] }
 0x740   : > { %5163 = vst [vmem:[#allocation2 + $0x330] sm:$0xff] %v5155_v34  ;;  %5301 = vrot.lane.b32.xlu1 %v13823_v51, %s10641_s16  ;;  %4945 = vrot.lane.b32.xlu0 %v13812_v49, %s10637_s11  ;;  %v4815_v24 = vmul.f32 %v4801_v9, %v16735_v43  ;;  %s10563_s16 = scalar_lea.hbm %s16246_s6, 256 }
 0x741   : > { %5797 = vst [vmem:[#allocation2 + $0x680] sm:$0xff] %v5789_v21  ;;  %5225 = vrot.lane.b32.xlu2 %v13840_v53, %s16670_s1  ;;  %7230 = vmatmul.bf16.gmra.mxu0 %v15466_v50 }
 0x742   : > { %v4790_v63 = vpop.permute.xlu1 %4789  ;;  %v5086_v44 = vpop.permute.xlu0 %5085 }
 0x743   : > { %v4797_v34 = vsel %vm1071_vm8, %v4782_v42, %v4790_v63  ;;  %v4809_v23 = vsel %vm1071_vm8, %v4790_v63, %v14931_v0  ;;  %v15477_v7 = vpop.permute.xlu2 %5443  ;;  %v9300_v42 = vld [vmem:[#allocation2 + $0x320] sm:$0xf] }
 0x744   : > { %v4813_v21 = vmul.f32 %v4809_v23, %v16720_v16  ;;  %v4816_v6 = vmul.f32 %v4797_v34, %v16736_v17  ;;  %v5775_v46 = vmul.f32 %v4797_v34, %v16737_v32  ;;  %v5776_v29 = vmul.f32 %v4809_v23, %v16738_v59  ;;  %v10008_v34 = vld [vmem:[#allocation9 + $0x14] sm:$0xf]  ;;  %v8862_v23 = vld [vmem:[#allocation9 + $0x2c] sm:$0xf0] }
 0x746   : > { %v4829_v33 = vpack.c.bf16 %v4814_v35, %v4813_v21  ;;  %v4830_v38 = vpack.c.bf16 %v4816_v6, %v4815_v24  ;;  %v5790_v9 = vpack.c.bf16 %v5776_v29, %v5775_v46  ;;  %v15502_v21 = vor.u32 %v10008_v34, %v8862_v23 }
 0x747   : > { %v10122_v57 = vld [vmem:[#allocation2 + $0x32c] sm:$0xf0] }
 0x748   : > { %4837 = vst [vmem:[#allocation2 + $0x200] sm:$0xff] %v4829_v33  ;;  %4947 = vrot.lane.b32.xlu1 %v13817_v28, %s10637_s11  ;;  %5227 = vrot.lane.b32.xlu0 %v13850_v55, %s16670_s1  ;;  %v9301_v0 = vor.u32 %v10122_v57, %v9300_v42  ;;  %v10086_v33 = vld [vmem:[#allocation2 + $0x20c] sm:$0xf0] }
 0x749   : > { %4838 = vst [vmem:[#allocation2 + $0x208] sm:$0xff] %v4830_v38  ;;  %4943 = vrot.lane.b32.xlu2 %v13808_v13, %s10637_s11  ;;  %v8852_v38 = vld [vmem:[#allocation9 + $0x8] sm:$0xf] }
 0x74a   : > { %5798 = vst [vmem:[#allocation2 + $0x688] sm:$0xff] %v5790_v9  ;;  %v5088_v16 = vpop.permute.xlu1 %5087  ;;  %v15490_v63 = vpop.permute.xlu0 %5095  ;;  %7280 = vmatpush.bf16.msrb.mxu3 %v9301_v0  ;;  %v10010_v9 = vld [vmem:[#allocation9 + $0x20] sm:$0xf0] }
 0x74b   : > { %v5130_v46 = vsel %vm16739_vm4, %v15425_v20, %v5088_v16  ;;  %v5126_v29 = vsel %vm16740_vm5, %v5088_v16, %v15490_v63  ;;  %v15498_v35 = vpop.permute.xlu2 %5457  ;;  %v9158_v20 = vld [vmem:[#allocation2 + $0x210] sm:$0xf0]  ;;  %v5125_v16 = vsel %vm16741_vm6, %v5086_v44, %v15403_v4 }
 0x74c   : > { %v5137_v57 = vmul.f32 %v5130_v46, %v16726_v11  ;;  %v5138_v24 = vmul.f32 %v5126_v29, %v16727_v56 }
 0x74d   : > { %7320 = vmatmul.bf16.vlgmr.msra.gmra.mxu1 %v15502_v21 }
 0x74e   : > { %v5151_v6 = vpack.c.bf16 %v5138_v24, %v5137_v57  ;;  %v15514_v57 = vor.u32 %v10010_v9, %v8852_v38  ;;  %v5781_v24 = vmul.f32 %v15363_v30, %v16732_v27 }
 0x74f   : > { %v9156_v42 = vld [vmem:[#allocation2 + $0x200] sm:$0xf]  ;;  %v10084_v0 = vld [vmem:[#allocation2 + $0x204] sm:$0xf] }
 0x750   : > { %5159 = vst [vmem:[#allocation2 + $0x310] sm:$0xff] %v5151_v6  ;;  %4941 = vrot.lane.b32.xlu1 %v13801_v10, %s10637_s11  ;;  %5221 = vrot.lane.b32.xlu0 %v13823_v51, %s16670_s1  ;;  %v9157_v46 = vor.u32 %v10086_v33, %v9156_v42  ;;  %v9161_v29 = vor.u32 %v10084_v0, %v9158_v20 }
 0x751   : > { %5465 = vrot.lane.b32.xlu2 %v13840_v53, %s16702_s30  ;;  %16742 = vst [vmem:[#allocation52_spill] sm:$0xff] %v15514_v57  ;;  %v5134_v6 = vmul.f32 %v5125_v16, %v16727_v56 }
 0x752   : > { %v15518_v34 = vpop.permute.xlu1 %5109  ;;  %v4786_v23 = vpop.permute.xlu0 %4785  ;;  %7262 = vmatpush.bf16.msrb.mxu2 %v9157_v46  ;;  %7395 = vmatpush.bf16.msrb.mxu1 %v9161_v29 }
 0x753   : > { %v5129_v33 = vsel %vm16743_vm7, %v15518_v34, %v5086_v44  ;;  %v4799_v20 = vsel %vm1071_vm8, %v4786_v23, %v15289_v8  ;;  %v4803_v38 = vsel %vm1071_vm8, %v15352_v62, %v4786_v23  ;;  %v15530_v30 = vpop.permute.xlu2 %5439  ;;  %v5784_v44 = vmul.f32 %v15333_v3, %v16738_v59 }
 0x754   : > { %v5133_v9 = vmul.f32 %v5129_v33, %v16726_v11  ;;  %v4823_v42 = vmul.f32 %v4803_v38, %v16735_v43  ;;  %v4824_v56 = vmul.f32 %v4799_v20, %v16736_v17  ;;  %v5782_v0 = vmul.f32 %v4803_v38, %v16733_v47 }
 0x755   : > { %v5783_v16 = vmul.f32 %v4799_v20, %v16737_v32  ;;  %7263 = vmatmul.bf16.vlgmr.msrb.gmra.mxu2 %v15514_v57  ;;  %v5785_v3 = vmul.f32 %v15395_v45, %v16732_v27  ;;  %v5788_v11 = vmul.f32 %v15401_v2, %v16738_v59 }
 0x756   : > { %v5149_v8 = vpack.c.bf16 %v5134_v6, %v5133_v9  ;;  %v4834_v46 = vpack.c.bf16 %v4824_v56, %v4823_v42  ;;  %v5793_v62 = vpack.c.bf16 %v5782_v0, %v5781_v24 }
 0x757   : > { %v5794_v29 = vpack.c.bf16 %v5784_v44, %v5783_v16  ;;  %v9014_v44 = vld [vmem:[#allocation2 + $0xf0] sm:$0xf0]  ;;  %v5777_v16 = vmul.f32 %v15348_v52, %v16732_v27 }
 0x758   : > { %5157 = vst [vmem:[#allocation2 + $0x300] sm:$0xff] %v5149_v8  ;;  %5223 = vrot.lane.b32.xlu1 %v13832_v41, %s16670_s1  ;;  %5467 = vrot.lane.b32.xlu0 %v13850_v55, %s16702_s30  ;;  %s16104_s1 = scalar_lea.vmem [#allocation11], %s16825_s29 }
 0x759   : > { %4842 = vst [vmem:[#allocation2 + $0x228] sm:$0xff] %v4834_v46  ;;  %4867 = vrot.lane.b32.xlu2 %v13817_v28, %s16678_s27  ;;  %s7794_s12 = sshll.u32 %s16104_s1, 4  ;;  %s7795_s12 = int_to_ptr.vmem [resolvable:$true] %s7794_s12 }
 0x75a   : > { %5801 = vst [vmem:[#allocation2 + $0x6a0] sm:$0xff] %v5793_v62  ;;  %v4788_v24 = vpop.permute.xlu1 %4787  ;;  %v4784_v23 = vpop.permute.xlu0 %4783 }
 0x75b   : > { %5802 = vst [vmem:[#allocation2 + $0x6a8] sm:$0xff] %v5794_v29  ;;  %v4800_v6 = vsel %vm1071_vm8, %v4788_v24, %v15389_v14  ;;  %v4804_v33 = vsel %vm1071_vm8, %v15387_v15, %v4788_v24  ;;  %v4798_v20 = vsel %vm1071_vm8, %v4784_v23, %v15365_v48  ;;  %v4802_v45 = vsel %vm1071_vm8, %v14887_v37, %v4784_v23  ;;  %v15562_v2 = vpop.permute.xlu2 %5453  ;;  %v8880_v37 = vld [vmem:[#allocation9 + $0x40] sm:$0xf]  ;;  %v10017_v29 = vld [vmem:[#allocation9 + $0x58] sm:$0xf0] }
 0x75c   : > { %v4827_v38 = vmul.f32 %v4804_v33, %v16735_v43  ;;  %v4828_v9 = vmul.f32 %v4800_v6, %v16736_v17  ;;  %v5786_v14 = vmul.f32 %v4804_v33, %v16733_v47  ;;  %v5787_v42 = vmul.f32 %v4800_v6, %v16737_v32  ;;  %v10007_v24 = vld [vmem:[#allocation9 + $0xc] sm:$0xf]  ;;  %v8854_v23 = vld [vmem:[#allocation9 + $0x24] sm:$0xf0]  ;;  %v10118_v33 = vld [vmem:[#allocation2 + $0x30c] sm:$0xf0] }
 0x75d   : > { %v4819_v15 = vmul.f32 %v4802_v45, %v16735_v43  ;;  %v4820_v56 = vmul.f32 %v4798_v20, %v16736_v17  ;;  %v5778_v48 = vmul.f32 %v4802_v45, %v16733_v47  ;;  %v5779_v0 = vmul.f32 %v4798_v20, %v16737_v32  ;;  %v10048_v47 = vld [vmem:[#allocation2 + $0xe4] sm:$0xf] }
 0x75e   : > { %v4836_v8 = vpack.c.bf16 %v4828_v9, %v4827_v38  ;;  %v5795_v46 = vpack.c.bf16 %v5786_v14, %v5785_v3  ;;  %v5796_v62 = vpack.c.bf16 %v5788_v11, %v5787_v42  ;;  %v5780_v43 = vmul.f32 %v15375_v60, %v16738_v59  ;;  %v10044_v45 = vld [vmem:[#allocation2 + $0xc4] sm:$0xf] }
 0x75f   : > { %v4832_v6 = vpack.c.bf16 %v4820_v56, %v4819_v15  ;;  %v9284_v17 = vld [vmem:[#allocation2 + $0x300] sm:$0xf]  ;;  %v5791_v32 = vpack.c.bf16 %v5778_v48, %v5777_v16  ;;  %v9017_v52 = vor.u32 %v10048_v47, %v9014_v44  ;;  %v15582_v59 = vor.u32 %v10017_v29, %v8880_v37  ;;  %v8998_v56 = vld [vmem:[#allocation2 + $0xd0] sm:$0xf0] }
 0x760   : > { %4844 = vst [vmem:[#allocation2 + $0x238] sm:$0xff] %v4836_v8  ;;  %4865 = vrot.lane.b32.xlu1 %v13812_v49, %s16678_s27  ;;  %5461 = vrot.lane.b32.xlu0 %v13823_v51, %s16702_s30  ;;  %v9285_v27 = vor.u32 %v10118_v33, %v9284_v17  ;;  %v5792_v3 = vpack.c.bf16 %v5780_v43, %v5779_v0  ;;  %v8982_v16 = vld [vmem:[#allocation2 + $0xb0] sm:$0xf0]  ;;  %vm16746_vm8 = vcmp.lt.s32.totalorder %v10953_v19, 120 }
 0x761   : > { %5803 = vst [vmem:[#allocation2 + $0x6b0] sm:$0xff] %v5795_v46  ;;  %4861 = vrot.lane.b32.xlu2 %v13801_v10, %s16678_s27  ;;  %v15584_v60 = vor.u32 %v10007_v24, %v8854_v23  ;;  %v9001_v48 = vor.u32 %v10044_v45, %v8998_v56  ;;  %v9748_v44 = vld [vmem:[#allocation2 + $0x6a0] sm:$0xf]  ;;  %v10232_v37 = vld [vmem:[#allocation2 + $0x6a4] sm:$0xf]  ;;  %vm16747_vm0 = vmmov %vm16746_vm8 }
 0x762   : > { %16744 = vst [vmem:[#allocation53_spill] sm:$0xff] %v15582_v59  ;;  %v15586_v11 = vpop.permute.xlu1 %5441  ;;  %v5450_v20 = vpop.permute.xlu0 %5449  ;;  %7281 = vmatpush.bf16.msrb.mxu3 %v9285_v27  ;;  %v10040_v24 = vld [vmem:[#allocation2 + $0xa4] sm:$0xf]  ;;  %v8966_v27 = vld [vmem:[#allocation2 + $0x90] sm:$0xf0]  ;;  %vm16752_vm1 = vmmov %vm16747_vm0 }
 0x763   : > { %16745 = vst [vmem:[#allocation54_spill] sm:$0xff] %v15584_v60  ;;  %v5475_v38 = vsel %vm1787_vm12, %v5450_v20, %v15498_v35  ;;  %v5479_v9 = vsel %vm1787_vm12, %v15586_v11, %v5450_v20  ;;  %v15594_v14 = vpop.permute.xlu2 %5363  ;;  %v9732_v20 = vld [vmem:[#allocation2 + $0x680] sm:$0xf]  ;;  %v10228_v45 = vld [vmem:[#allocation2 + $0x684] sm:$0xf]  ;;  %vm16753_vm2 = vmmov %vm16747_vm0 }
 0x764   : > { %5804 = vst [vmem:[#allocation2 + $0x6b8] sm:$0xff] %v5796_v62  ;;  %v5493_v42 = vmul.f32 %v5479_v9, %v13501_v36  ;;  %v5494_v15 = vmul.f32 %v5475_v38, %v13494_v1  ;;  %vm16754_vm3 = vmmov %vm16747_vm0 }
 0x765   : > { %4840 = vst [vmem:[#allocation2 + $0x218] sm:$0xff] %v4832_v6  ;;  %7268 = vmatmul.bf16.gmra.mxu2 %v15582_v59  ;;  %7282 = vmatmul.bf16.vlgmr.msrb.gmra.mxu3 %v15584_v60  ;;  %v8985_v6 = vor.u32 %v10040_v24, %v8982_v16  ;;  %v10032_v16 = vld [vmem:[#allocation2 + $0x64] sm:$0xf]  ;;  %v8950_v24 = vld [vmem:[#allocation2 + $0x70] sm:$0xf0]  ;;  %vm16755_vm4 = vmmov %vm16747_vm0 }
 0x766   : > { %7350 = vmatpush.bf16.msra.mxu3 %v9017_v52  ;;  %5799 = vst [vmem:[#allocation2 + $0x690] sm:$0xff] %v5791_v32  ;;  %v5505_v0 = vpack.c.bf16 %v5494_v15, %v5493_v42  ;;  %v10036_v42 = vld [vmem:[#allocation2 + $0x84] sm:$0xf]  ;;  %v10226_v15 = vld [vmem:[#allocation2 + $0x66c] sm:$0xf0]  ;;  %vm16758_vm5 = vmmov %vm16747_vm0 }
 0x767   : > { %5800 = vst [vmem:[#allocation2 + $0x698] sm:$0xff] %v5792_v3  ;;  %vm16759_vm6 = vmmov %vm16747_vm0 }
 0x768   : > { %5513 = vst [vmem:[#allocation2 + $0x460] sm:$0xff] %v5505_v0  ;;  %5463 = vrot.lane.b32.xlu1 %v13832_v41, %s16702_s30  ;;  %4863 = vrot.lane.b32.xlu0 %v13808_v13, %s16678_s27  ;;  %v10234_v8 = vld [vmem:[#allocation2 + $0x6ac] sm:$0xf0]  ;;  %v9750_v46 = vld [vmem:[#allocation2 + $0x6b0] sm:$0xf0]  ;;  %s10236_s27 = sshll.u32 %s10704_s25, 5 }
 0x769   : > { %5387 = vrot.lane.b32.xlu2 %v13850_v55, %s16712_s9  ;;  %v9749_v62 = vor.u32 %v10234_v8, %v9748_v44  ;;  %v9753_v29 = vor.u32 %v10232_v37, %v9750_v46  ;;  %v9718_v0 = vld [vmem:[#allocation2 + $0x670] sm:$0xf0]  ;;  %v8882_v37 = vld [vmem:[#allocation9 + $0x5c] sm:$0xf0]  ;;  %v9716_v8 = vld [vmem:[#allocation2 + $0x660] sm:$0xf] }
 0x76a   : > { %7351 = vmatpush.bf16.msra.mxu3 %v9001_v48  ;;  %v5452_v23 = vpop.permute.xlu1 %5451  ;;  %v15606_v43 = vpop.permute.xlu0 %5459  ;;  %v8969_v48 = vor.u32 %v10036_v42, %v8966_v27  ;;  %v10014_v44 = vld [vmem:[#allocation9 + $0x44] sm:$0xf]  ;;  %v10224_v46 = vld [vmem:[#allocation2 + $0x664] sm:$0xf]  ;;  %s7782_s25 = scalar_lea.sflag [#allocation5], %s10799_s18 }
 0x76b   : > { %v5480_v17 = vsel %vm1787_vm12, %v15477_v7, %v5452_v23  ;;  %v5476_v33 = vsel %vm1787_vm12, %v5452_v23, %v15606_v43  ;;  %7333 = vmatpush.bf16.msra.mxu2 %v9749_v62  ;;  %7466 = vmatpush.bf16.msra.mxu1 %v9753_v29  ;;  %v15614_v47 = vpop.permute.xlu2 %5377  ;;  %v9717_v62 = vor.u32 %v10226_v15, %v9716_v8  ;;  %v8934_v27 = vld [vmem:[#allocation2 + $0x50] sm:$0xf0]  ;;  %v10028_v42 = vld [vmem:[#allocation2 + $0x44] sm:$0xf] }
 0x76c   : > { %v5497_v52 = vmul.f32 %v5480_v17, %v13501_v36  ;;  %v5498_v3 = vmul.f32 %v5476_v33, %v13494_v1  ;;  %v9721_v29 = vor.u32 %v10224_v46, %v9718_v0  ;;  %v15624_v23 = vor.u32 %v10014_v44, %v8882_v37  ;;  %v9686_v0 = vld [vmem:[#allocation2 + $0x630] sm:$0xf0]  ;;  %v9684_v46 = vld [vmem:[#allocation2 + $0x620] sm:$0xf] }
 0x76d   : > { %v10230_v55 = vld [vmem:[#allocation2 + $0x68c] sm:$0xf0]  ;;  %v9734_v32 = vld [vmem:[#allocation2 + $0x690] sm:$0xf0]  ;;  %v8953_v33 = vor.u32 %v10032_v16, %v8950_v24 }
 0x76e   : > { %7352 = vmatpush.bf16.msra.mxu3 %v8985_v6  ;;  %v9733_v38 = vor.u32 %v10230_v55, %v9732_v20  ;;  %v9737_v9 = vor.u32 %v10228_v45, %v9734_v32  ;;  %v5507_v56 = vpack.c.bf16 %v5498_v3, %v5497_v52  ;;  %v9700_v55 = vld [vmem:[#allocation2 + $0x640] sm:$0xf]  ;;  %v10220_v32 = vld [vmem:[#allocation2 + $0x644] sm:$0xf]  ;;  %v10222_v20 = vld [vmem:[#allocation2 + $0x64c] sm:$0xf0] }
 0x76f   : > { %v9702_v45 = vld [vmem:[#allocation2 + $0x650] sm:$0xf0]  ;;  %v9460_v44 = vld [vmem:[#allocation2 + $0x460] sm:$0xf] }
 0x770   : > { %7334 = vmatpush.bf16.msra.mxu2 %v9733_v38  ;;  %7467 = vmatpush.bf16.msra.mxu1 %v9737_v9  ;;  %5515 = vst [vmem:[#allocation2 + $0x470] sm:$0xff] %v5507_v56  ;;  %v9701_v38 = vor.u32 %v10222_v20, %v9700_v55  ;;  %v9705_v9 = vor.u32 %v10220_v32, %v9702_v45  ;;  %v8918_v16 = vld [vmem:[#allocation2 + $0x30] sm:$0xf0] }
 0x771   : > { %5385 = vrot.lane.b32.xlu1 %v13840_v53, %s16712_s9  ;;  %5105 = vrot.lane.b32.xlu0 %v13812_v49, %s16689_s8  ;;  %v8937_v56 = vor.u32 %v10028_v42, %v8934_v27  ;;  %v9668_v27 = vld [vmem:[#allocation2 + $0x600] sm:$0xf]  ;;  %v10012_v42 = vld [vmem:[#allocation9 + $0x30] sm:$0xf0] }
 0x772   : > { %7353 = vmatpush.bf16.msra.mxu3 %v8969_v48  ;;  %5381 = vrot.lane.b32.xlu2 %v13823_v51, %s16712_s9  ;;  %v15626_v6 = vpop.permute.xlu1 %5437  ;;  %v5446_v17 = vpop.permute.xlu0 %5445  ;;  %v10218_v48 = vld [vmem:[#allocation2 + $0x62c] sm:$0xf0] }
 0x773   : > { %v5473_v53 = vsel %vm1787_vm12, %v5446_v17, %v15562_v2  ;;  %v5477_v49 = vsel %vm1787_vm12, %v15626_v6, %v5446_v17  ;;  %v15634_v51 = vpop.permute.xlu2 %5359  ;;  %v10024_v17 = vld [vmem:[#allocation2 + $0x24] sm:$0xf] }
 0x774   : > { %7335 = vmatpush.bf16.msra.mxu2 %v9717_v62  ;;  %7468 = vmatpush.bf16.msra.mxu1 %v9721_v29  ;;  %v5485_v52 = vmul.f32 %v5477_v49, %v13501_v36  ;;  %v5486_v3 = vmul.f32 %v5473_v53, %v13494_v1  ;;  %v10216_v62 = vld [vmem:[#allocation2 + $0x624] sm:$0xf]  ;;  %v9685_v29 = vor.u32 %v10218_v48, %v9684_v46  ;;  %v10214_v53 = vld [vmem:[#allocation2 + $0x60c] sm:$0xf0]  ;;  %v9670_v49 = vld [vmem:[#allocation2 + $0x610] sm:$0xf0] }
 0x775   : > { %7287 = vmatmul.bf16.gmra.mxu3 %v15624_v23  ;;  %v9689_v24 = vor.u32 %v10216_v62, %v9686_v0  ;;  %v8921_v32 = vor.u32 %v10024_v17, %v8918_v16  ;;  %v8902_v48 = vld [vmem:[#allocation2 + $0x10] sm:$0xf0]  ;;  %v6037_v46 = vld [vmem:[%s16245_s5] sm:$0xff] }
 0x776   : > { %7354 = vmatpush.bf16.msra.mxu3 %v8953_v33  ;;  %v5501_v15 = vpack.c.bf16 %v5486_v3, %v5485_v52  ;;  %v10020_v52 = vld [vmem:[#allocation2 + $0x4] sm:$0xf]  ;;  %v9398_v0 = vld [vmem:[#allocation2 + $0x3f0] sm:$0xf0] }
 0x777   : > { %v10162_v37 = vld [vmem:[#allocation2 + $0x46c] sm:$0xf0]  ;;  %v10144_v3 = vld [vmem:[#allocation2 + $0x3e4] sm:$0xf]  ;;  %v8905_v16 = vor.u32 %v10020_v52, %v8902_v48 }
 0x778   : > { %7336 = vmatpush.bf16.msra.mxu2 %v9701_v38  ;;  %7469 = vmatpush.bf16.msra.mxu1 %v9705_v9  ;;  %5509 = vst [vmem:[#allocation2 + $0x440] sm:$0xff] %v5501_v15  ;;  %v9461_v8 = vor.u32 %v10162_v37, %v9460_v44  ;;  %v10212_v38 = vld [vmem:[#allocation2 + $0x604] sm:$0xf]  ;;  %v8868_v9 = vld [vmem:[#allocation9 + $0x18] sm:$0xf]  ;;  %v9669_v15 = vor.u32 %v10214_v53, %v9668_v27 }
 0x779   : > { %5107 = vrot.lane.b32.xlu1 %v13817_v28, %s16689_s8  ;;  %5383 = vrot.lane.b32.xlu0 %v13832_v41, %s16712_s9  ;;  %v9526_v44 = vld [vmem:[#allocation2 + $0x4f0] sm:$0xf0]  ;;  %v15663_v62 = vor.u32 %v10012_v42, %v8868_v9  ;;  %v10172_v17 = vld [vmem:[#allocation2 + $0x4c4] sm:$0xf]  ;;  %s7793_s9 = scalar_lea.hbm %s16246_s6, %s10236_s27 }
 0x77a   : > { %7355 = vmatpush.bf16.msra.mxu3 %v8937_v56  ;;  %5103 = vrot.lane.b32.xlu2 %v13808_v13, %s16689_s8  ;;  %v5448_v33 = vpop.permute.xlu1 %5447  ;;  %v15645_v55 = vpop.permute.xlu0 %5455  ;;  %v9673_v56 = vor.u32 %v10212_v38, %v9670_v49  ;;  %v16749_v38 = vld [vmem:[#allocation110_spill] sm:$0xff]  ;;  %s7796_s13 = sshll.u32 %s7793_s9, 4  ;;  %s7797_s13 = int_to_ptr.hbm [resolvable:$true] %s7796_s13 }
 0x77b   : > { %7297 = vmatpush.bf16.msra.mxu0 %v9461_v8  ;;  %v5478_v28 = vsel %vm1787_vm12, %v15530_v30, %v5448_v33  ;;  %v5474_v41 = vsel %vm1787_vm12, %v5448_v33, %v15645_v55  ;;  %v15653_v13 = vpop.permute.xlu2 %5373  ;;  %v9401_v8 = vor.u32 %v10144_v3, %v9398_v0  ;;  %v9382_v33 = vld [vmem:[#allocation2 + $0x3d0] sm:$0xf0]  ;;  %v10136_v3 = vld [vmem:[#allocation2 + $0x3a4] sm:$0xf]  ;;  %s10557_s20 = sshra.s32 %s7797_s13, 4  ;;  %s10558_s20 = int_to_ptr.hbm [resolvable:$true] %s10557_s20 }
 0x77c   : > { %7337 = vmatpush.bf16.msra.mxu2 %v9685_v29  ;;  %7470 = vmatpush.bf16.msra.mxu1 %v9689_v24  ;;  %v5489_v20 = vmul.f32 %v5478_v28, %v13501_v36  ;;  %v5490_v45 = vmul.f32 %v5474_v41, %v13494_v1  ;;  %v6039_v1 = vld [vmem:[%s16245_s5 + $0x10] sm:$0xff]  ;;  %v10176_v36 = vld [vmem:[#allocation2 + $0x4e4] sm:$0xf]  ;;  %s10559_s26 = scalar_lea.hbm %s10558_s20, 128  ;;  %p10564_p11 = scmp.lt.s32.totalorder %s10558_s20, %s16246_s6 }
 0x77d   : > { %v10140_v29 = vld [vmem:[#allocation2 + $0x3c4] sm:$0xf]  ;;  %v9529_v24 = vor.u32 %v10176_v36, %v9526_v44  ;;  %v9510_v28 = vld [vmem:[#allocation2 + $0x4d0] sm:$0xf0]  ;;  %p10560_p1 = scmp.ne.s32.totalorder %s10558_s20, %s10559_s26  ;;  %p10565_p9 = scmp.lt.s32.totalorder %s10563_s16, %s10559_s26 }
 0x77e   : > { %7356 = vmatpush.bf16.msra.mxu3 %v8921_v32  ;;  %v5503_v37 = vpack.c.bf16 %v5490_v45, %v5489_v20  ;;  %v9385_v49 = vor.u32 %v10140_v29, %v9382_v33  ;;  %v9513_v52 = vor.u32 %v10172_v17, %v9510_v28  ;;  %v16748_v20 = vld [vmem:[#allocation109_spill] sm:$0xff]  ;;  %v16751_v0 = vld [vmem:[#allocation96_spill] sm:$0xff]  ;;  %v9350_v28 = vld [vmem:[#allocation2 + $0x390] sm:$0xf0] }
 0x77f   : > { %v9444_v29 = vld [vmem:[#allocation2 + $0x440] sm:$0xf]  ;;  %v10132_v17 = vld [vmem:[#allocation2 + $0x384] sm:$0xf]  ;;  %p10561_p4 = pnand %p10560_p1, %p10769_p7  ;;  %p10566_p2 = por %p10565_p9, %p10564_p11 }
 0x780   : > { %7338 = vmatpush.bf16.msra.mxu2 %v9669_v15  ;;  %7471 = vmatpush.bf16.msra.mxu1 %v9673_v56  ;;  %5511 = vst [vmem:[#allocation2 + $0x450] sm:$0xff] %v5503_v37  ;;  %v16750_v56 = vld [vmem:[#allocation95_spill] sm:$0xff]  ;;  %v9366_v37 = vld [vmem:[#allocation2 + $0x3b0] sm:$0xf0] }
 0x781   : > { %5101 = vrot.lane.b32.xlu1 %v13801_v10, %s16689_s8  ;;  %6043 = vperm.xlu0 %10341, %v6037_v46   ;;  %v9369_v46 = vor.u32 %v10136_v3, %v9366_v37  ;;  %p10562_p8 = pneg %p10561_p4 }
 0x782   : > { %7357 = vmatpush.bf16.msra.mxu3 %v8905_v16  ;;  %6053 = vperm.xlu2 %10340, %v6039_v1   ;;  %v15667_v32 = vpop.permute.xlu1 %5361  ;;  %v5370_v53 = vpop.permute.xlu0 %5369  ;;  %v9494_v16 = vld [vmem:[#allocation2 + $0x4b0] sm:$0xf0]  ;;  %v10168_v1 = vld [vmem:[#allocation2 + $0x4a4] sm:$0xf] }
 0x783   : > { %9762 = vmatmul.msk.bf16.vlgmr.msra.gmra.mxu2 %vm3570_vm15, %v15663_v62  ;;  %v5395_v41 = vsel %vm16746_vm8, %v5370_v53, %v15614_v47  ;;  %v5399_v10 = vsel %vm16747_vm0, %v15667_v32, %v5370_v53  ;;  %v5028_v27 = vpop.permute.xlu2 %5027  ;;  %v9497_v33 = vor.u32 %v10168_v1, %v9494_v16  ;;  %vm16803_vm8 = vmmov %vm16743_vm7  ;;  %p10567_p10 = pnand %p10566_p2, %p10562_p8 }
 0x784   : > { %7407 = vmatpush.bf16.msrb.mxu2 %v9401_v8  ;;  %v5413_v45 = vmul.f32 %v5399_v10, %v16748_v20  ;;  %v5414_v9 = vmul.f32 %v5395_v41, %v16749_v38  ;;  %v5040_v42 = vsel %vm1326_vm11, %v5028_v27, %v14940_v22  ;;  %v5044_v15 = vsel %vm1326_vm11, %v14974_v12, %v5028_v27  ;;  %v6038_v22 = vld [vmem:[%s16245_s5 + $0x8] sm:$0xff]  ;;  %v6040_v12 = vld [vmem:[%s16245_s5 + $0x18] sm:$0xff] }
 0x785   : > { %v5067_v48 = vmul.f32 %v5044_v15, %v16750_v56  ;;  %v5068_v44 = vmul.f32 %v5040_v42, %v16751_v0  ;;  %7358 = vmatmul.bf16.vlgmr.msra.gmra.mxu3 %v15417_v31  ;;  %v9353_v27 = vor.u32 %v10132_v17, %v9350_v28  ;;  %v9334_v15 = vld [vmem:[#allocation2 + $0x370] sm:$0xf0] }
 0x786   : > { %7426 = vmatpush.bf16.msrb.mxu3 %v9529_v24  ;;  %v5425_v8 = vpack.c.bf16 %v5414_v9, %v5413_v45 }
 0x787   : > { %v5076_v36 = vpack.c.bf16 %v5068_v44, %v5067_v48  ;;  %v10158_v24 = vld [vmem:[#allocation2 + $0x44c] sm:$0xf0]  ;;  %v8896_v48 = vld [vmem:[#allocation9 + $0x50] sm:$0xf] }
 0x788   : > { %7408 = vmatpush.bf16.msrb.mxu2 %v9385_v49  ;;  %5433 = vst [vmem:[#allocation2 + $0x420] sm:$0xff] %v5425_v8  ;;  %v9445_v53 = vor.u32 %v10158_v24, %v9444_v29  ;;  %v9478_v49 = vld [vmem:[#allocation2 + $0x490] sm:$0xf0]  ;;  %v10128_v29 = vld [vmem:[#allocation2 + $0x364] sm:$0xf] }
 0x789   : > { %5084 = vst [vmem:[#allocation2 + $0x2f8] sm:$0xff] %v5076_v36  ;;  %6048 = vperm.xlu1 %10342, %v6038_v22   ;;  %6058 = vperm.xlu0 %10341, %v6040_v12   ;;  %v10015_v22 = vld [vmem:[#allocation9 + $0x4c] sm:$0xf]  ;;  %v8890_v12 = vld [vmem:[#allocation9 + $0x64] sm:$0xf0] }
 0x78a   : > { %7427 = vmatpush.bf16.msrb.mxu3 %v9513_v52  ;;  %v5372_v41 = vpop.permute.xlu1 %5371  ;;  %v15694_v10 = vpop.permute.xlu0 %5379  ;;  %7298 = vmatpush.bf16.msra.mxu0 %v9445_v53  ;;  %v10164_v52 = vld [vmem:[#allocation2 + $0x484] sm:$0xf]  ;;  %v9462_v24 = vld [vmem:[#allocation2 + $0x470] sm:$0xf0]  ;;  %v15712_v17 = vor.u32 %v10015_v22, %v8890_v12  ;;  %v9337_v53 = vor.u32 %v10128_v29, %v9334_v15  ;;  %v16757_v29 = vld [vmem:[#allocation107_spill] sm:$0xff] }
 0x78b   : > { %v5400_v3 = vsel %vm16752_vm1, %v15594_v14, %v5372_v41  ;;  %v5396_v45 = vsel %vm16753_vm2, %v5372_v41, %v15694_v10  ;;  %v5022_v9 = vpop.permute.xlu2 %5021  ;;  %v9481_v42 = vor.u32 %v10164_v52, %v9478_v49  ;;  %v10160_v49 = vld [vmem:[#allocation2 + $0x464] sm:$0xf] }
 0x78c   : > { %7409 = vmatpush.bf16.msrb.mxu2 %v9369_v46  ;;  %v5417_v44 = vmul.f32 %v5400_v3, %v16748_v20  ;;  %v5418_v37 = vmul.f32 %v5396_v45, %v16749_v38  ;;  %v5037_v16 = vsel %vm1326_vm11, %v5022_v9, %v15074_v25  ;;  %v5041_v8 = vsel %vm1326_vm11, %v14982_v58, %v5022_v9  ;;  %v10019_v46 = vld [vmem:[#allocation9 + $0x68] sm:$0xf0]  ;;  %v9318_v58 = vld [vmem:[#allocation2 + $0x350] sm:$0xf0]  ;;  %v10124_v52 = vld [vmem:[#allocation2 + $0x344] sm:$0xf] }
 0x78d   : > { %v5055_v1 = vmul.f32 %v5041_v8, %v16750_v56  ;;  %v5056_v36 = vmul.f32 %v5037_v16, %v16751_v0  ;;  %v15714_v28 = vor.u32 %v10019_v46, %v8896_v48  ;;  %7325 = vmatmul.bf16.gmra.mxu1 %v15712_v17  ;;  %v9465_v41 = vor.u32 %v10160_v49, %v9462_v24  ;;  %v9302_v16 = vld [vmem:[#allocation2 + $0x330] sm:$0xf0] }
 0x78e   : > { %7428 = vmatpush.bf16.msrb.mxu3 %v9497_v33  ;;  %v5427_v33 = vpack.c.bf16 %v5418_v37, %v5417_v44  ;;  %v9321_v9 = vor.u32 %v10124_v52, %v9318_v58  ;;  %v10116_v58 = vld [vmem:[#allocation2 + $0x304] sm:$0xf] }
 0x78f   : > { %v5070_v25 = vpack.c.bf16 %v5056_v36, %v5055_v1  ;;  %v16756_v1 = vld [vmem:[#allocation108_spill] sm:$0xff] }
 0x790   : > { %7410 = vmatpush.bf16.msrb.mxu2 %v9353_v27  ;;  %5435 = vst [vmem:[#allocation2 + $0x430] sm:$0xff] %v5427_v33  ;;  %v9446_v27 = vld [vmem:[#allocation2 + $0x450] sm:$0xf0]  ;;  %v10120_v33 = vld [vmem:[#allocation2 + $0x324] sm:$0xf] }
 0x791   : > { %5078 = vst [vmem:[#allocation2 + $0x2c8] sm:$0xff] %v5070_v25  ;;  %v9305_v25 = vor.u32 %v10120_v33, %v9302_v16  ;;  %v9428_v49 = vld [vmem:[#allocation2 + $0x420] sm:$0xf] }
 0x792   : > { %7429 = vmatpush.bf16.msrb.mxu3 %v9481_v42  ;;  %v15717_v3 = vpop.permute.xlu1 %5357  ;;  %v5366_v45 = vpop.permute.xlu0 %5365  ;;  %v10156_v42 = vld [vmem:[#allocation2 + $0x444] sm:$0xf] }
 0x793   : > { %9763 = vmatmul.msk.bf16.gmra.mxu2 %vm3570_vm15, %v15714_v28  ;;  %v5393_v15 = vsel %vm16754_vm3, %v5366_v45, %v15653_v13  ;;  %v5397_v48 = vsel %vm16755_vm4, %v15717_v3, %v5366_v45  ;;  %v5304_v44 = vpop.permute.xlu2 %5303  ;;  %v9449_v37 = vor.u32 %v10156_v42, %v9446_v27  ;;  %v9286_v42 = vld [vmem:[#allocation2 + $0x310] sm:$0xf0] }
 0x794   : > { %7411 = vmatpush.bf16.msrb.mxu2 %v9337_v53  ;;  %v5405_v8 = vmul.f32 %v5397_v48, %v16748_v20  ;;  %v5406_v46 = vmul.f32 %v5393_v15, %v16749_v38  ;;  %v5310_v22 = vsel %vm1617_vm14, %v15043_v40, %v5304_v44  ;;  %v5322_v12 = vsel %vm1617_vm14, %v5304_v44, %v15091_v61  ;;  %v10152_v40 = vld [vmem:[#allocation2 + $0x424] sm:$0xf] }
 0x795   : > { %v5331_v36 = vmul.f32 %v5310_v22, %v16756_v1  ;;  %v5332_v24 = vmul.f32 %v5322_v12, %v16757_v29  ;;  %7363 = vmatmul.bf16.gmra.mxu3 %v15466_v50  ;;  %v9289_v44 = vor.u32 %v10116_v58, %v9286_v42  ;;  %v16761_v58 = vld [vmem:[#allocation103_spill] sm:$0xff] }
 0x796   : > { %7430 = vmatpush.bf16.msrb.mxu3 %v9465_v41  ;;  %v5421_v53 = vpack.c.bf16 %v5406_v46, %v5405_v8 }
 0x797   : > { %v5344_v41 = vpack.c.bf16 %v5332_v24, %v5331_v36  ;;  %v10154_v27 = vld [vmem:[#allocation2 + $0x42c] sm:$0xf0]  ;;  %v9430_v52 = vld [vmem:[#allocation2 + $0x430] sm:$0xf0] }
 0x798   : > { %7412 = vmatpush.bf16.msrb.mxu2 %v9321_v9  ;;  %5429 = vst [vmem:[#allocation2 + $0x400] sm:$0xff] %v5421_v53  ;;  %v9429_v61 = vor.u32 %v10154_v27, %v9428_v49  ;;  %v9433_v45 = vor.u32 %v10152_v40, %v9430_v52  ;;  %v10051_v9 = vld [vmem:[#allocation2 + $0xf4] sm:$0xf0]  ;;  %v9004_v53 = vld [vmem:[#allocation2 + $0xc8] sm:$0xf] }
 0x799   : > { %5352 = vst [vmem:[#allocation2 + $0x3d8] sm:$0xff] %v5344_v41  ;;  %v10047_v40 = vld [vmem:[#allocation2 + $0xd4] sm:$0xf0] }
 0x79a   : > { %7431 = vmatpush.bf16.msrb.mxu3 %v9449_v37  ;;  %v5368_v15 = vpop.permute.xlu1 %5367  ;;  %v15738_v48 = vpop.permute.xlu0 %5375  ;;  %7299 = vmatpush.bf16.msra.mxu0 %v9429_v61  ;;  %v9020_v37 = vld [vmem:[#allocation2 + $0xe8] sm:$0xf]  ;;  %v9005_v52 = vor.u32 %v10047_v40, %v9004_v53  ;;  %v10080_v53 = vld [vmem:[#allocation2 + $0x1e4] sm:$0xf] }
 0x79b   : > { %v5398_v16 = vsel %vm16758_vm5, %v15634_v51, %v5368_v15  ;;  %v5394_v8 = vsel %vm16759_vm6, %v5368_v15, %v15738_v48  ;;  %v5226_v46 = vpop.permute.xlu2 %5225  ;;  %v9021_v22 = vor.u32 %v10051_v9, %v9020_v37  ;;  %vm16819_vm5 = vmmov %vm16755_vm4 }
 0x79c   : > { %7413 = vmatpush.bf16.msrb.mxu2 %v9305_v25  ;;  %v5409_v12 = vmul.f32 %v5398_v16, %v16748_v20  ;;  %v5410_v36 = vmul.f32 %v5394_v8, %v16749_v38  ;;  %v5231_v24 = vsel %vm1532_vm13, %v15189_v39, %v5226_v46  ;;  %v5243_v33 = vsel %vm1532_vm13, %v5226_v46, %v15152_v18  ;;  %v16760_v25 = vld [vmem:[#allocation104_spill] sm:$0xff]  ;;  %v10043_v38 = vld [vmem:[#allocation2 + $0xb4] sm:$0xf0]  ;;  %v8988_v39 = vld [vmem:[#allocation2 + $0xa8] sm:$0xf] }
 0x79d   : > { %v5255_v49 = vmul.f32 %v5231_v24, %v16760_v25  ;;  %v5256_v41 = vmul.f32 %v5243_v33, %v16761_v58  ;;  %7396 = vmatmul.bf16.vlgmr.msrb.gmra.mxu1 %v15514_v57  ;;  %v9142_v57 = vld [vmem:[#allocation2 + $0x1f0] sm:$0xf0] }
 0x79e   : > { %7432 = vmatpush.bf16.msrb.mxu3 %v9433_v45  ;;  %v5423_v27 = vpack.c.bf16 %v5410_v36, %v5409_v12  ;;  %v8989_v45 = vor.u32 %v10043_v38, %v8988_v39  ;;  %v8972_v12 = vld [vmem:[#allocation2 + $0x88] sm:$0xf]  ;;  %v10039_v36 = vld [vmem:[#allocation2 + $0x94] sm:$0xf0]  ;;  %v16766_v39 = vld [vmem:[#allocation92_spill] sm:$0xff] }
 0x79f   : > { %v5266_v20 = vpack.c.bf16 %v5256_v41, %v5255_v49  ;;  %v9148_v49 = vld [vmem:[#allocation2 + $0x1e8] sm:$0xf] }
 0x7a0   : > { %7414 = vmatpush.bf16.msrb.mxu2 %v9289_v44  ;;  %5431 = vst [vmem:[#allocation2 + $0x410] sm:$0xff] %v5423_v27  ;;  %v16762_v44 = vld [vmem:[#allocation21_spill] sm:$0xff]  ;;  %v9126_v27 = vld [vmem:[#allocation2 + $0x1d0] sm:$0xf0] }
 0x7a1   : > { %5274 = vst [vmem:[#allocation2 + $0x3a8] sm:$0xff] %v5266_v20  ;;  %v8956_v41 = vld [vmem:[#allocation2 + $0x68] sm:$0xf] }
 0x7a2   : > { %v5026_v61 = vpop.permute.xlu1 %5025  ;;  %v5306_v18 = vpop.permute.xlu0 %5305 }
 0x7a3   : > { %7415 = vmatmul.bf16.vlgmr.msrb.gmra.mxu2 %v15584_v60  ;;  %v5039_v9 = vsel %vm1326_vm11, %v5026_v61, %v14995_v26  ;;  %v5043_v42 = vsel %vm1326_vm11, %v14914_v54, %v5026_v61  ;;  %v5311_v15 = vsel %vm1617_vm14, %v15037_v5, %v5306_v18  ;;  %v5323_v37 = vsel %vm1617_vm14, %v5306_v18, %v16762_v44  ;;  %v4944_v16 = vpop.permute.xlu2 %4943  ;;  %v16763_v54 = vld [vmem:[#allocation30_spill] sm:$0xff]  ;;  %v16764_v5 = vld [vmem:[#allocation33_spill] sm:$0xff]  ;;  %v9412_v18 = vld [vmem:[#allocation2 + $0x400] sm:$0xf] }
 0x7a4   : > { %7483 = vmatpush.bf16.msra.mxu2 %v9021_v22  ;;  %v5063_v8 = vmul.f32 %v5043_v42, %v16750_v56  ;;  %v5064_v46 = vmul.f32 %v5039_v9, %v16751_v0  ;;  %v5335_v22 = vmul.f32 %v5311_v15, %v16756_v1  ;;  %v5336_v26 = vmul.f32 %v5323_v37, %v16757_v29  ;;  %v8860_v9 = vld [vmem:[#allocation9 + $0x10] sm:$0xf]  ;;  %v10011_v42 = vld [vmem:[#allocation9 + $0x28] sm:$0xf0]  ;;  %v10148_v37 = vld [vmem:[#allocation2 + $0x404] sm:$0xf] }
 0x7a5   : > { %v4958_v24 = vsel %vm1241_vm10, %v4944_v16, %v16763_v54  ;;  %v4962_v33 = vsel %vm1241_vm10, %v16764_v5, %v4944_v16  ;;  %v8973_v15 = vor.u32 %v10039_v36, %v8972_v12  ;;  %v10035_v60 = vld [vmem:[#allocation2 + $0x74] sm:$0xf0] }
 0x7a6   : > { %v5074_v40 = vpack.c.bf16 %v5064_v46, %v5063_v8  ;;  %v5346_v20 = vpack.c.bf16 %v5336_v26, %v5335_v22  ;;  %v4980_v61 = vmul.f32 %v4958_v24, %v16766_v39  ;;  %v9145_v8 = vor.u32 %v10080_v53, %v9142_v57  ;;  %v10083_v46 = vld [vmem:[#allocation2 + $0x1f4] sm:$0xf0]  ;;  %v10076_v26 = vld [vmem:[#allocation2 + $0x1c4] sm:$0xf] }
 0x7a7   : > { %v10150_v44 = vld [vmem:[#allocation2 + $0x40c] sm:$0xf0]  ;;  %v9414_v54 = vld [vmem:[#allocation2 + $0x410] sm:$0xf0]  ;;  %v15782_v22 = vor.u32 %v10011_v42, %v8860_v9  ;;  %v9149_v12 = vor.u32 %v10083_v46, %v9148_v49  ;;  %v8957_v36 = vor.u32 %v10035_v60, %v8956_v41  ;;  %v16769_v53 = vld [vmem:[#allocation16_spill] sm:$0xff] }
 0x7a8   : > { %7484 = vmatpush.bf16.msra.mxu2 %v9005_v52  ;;  %v16765_v52 = vld [vmem:[#allocation91_spill] sm:$0xff]  ;;  %5082 = vst [vmem:[#allocation2 + $0x2e8] sm:$0xff] %v5074_v40  ;;  %v9417_v5 = vor.u32 %v10148_v37, %v9414_v54  ;;  %v9129_v40 = vor.u32 %v10076_v26, %v9126_v27  ;;  %v16770_v42 = vld [vmem:[#allocation18_spill] sm:$0xff]  ;;  %v9132_v37 = vld [vmem:[#allocation2 + $0x1c8] sm:$0xf] }
 0x7a9   : > { %v4979_v38 = vmul.f32 %v4962_v33, %v16765_v52  ;;  %5354 = vst [vmem:[#allocation2 + $0x3e8] sm:$0xff] %v5346_v20  ;;  %v16768_v20 = vld [vmem:[#allocation19_spill] sm:$0xff] }
 0x7aa   : > { %v5308_v24 = vpop.permute.xlu1 %5307  ;;  %v5024_v33 = vpop.permute.xlu0 %5023  ;;  %7433 = vmatpush.bf16.msrb.mxu3 %v9417_v5  ;;  %v10031_v54 = vld [vmem:[#allocation2 + $0x54] sm:$0xf0] }
 0x7ab   : > { %v4992_v16 = vpack.c.bf16 %v4980_v61, %v4979_v38  ;;  %v10079_v38 = vld [vmem:[#allocation2 + $0x1d4] sm:$0xf0]  ;;  %v16767_v61 = vld [vmem:[#allocation17_spill] sm:$0xff]  ;;  %v5324_v57 = vsel %vm1617_vm14, %v5308_v24, %v16768_v20  ;;  %v5038_v9 = vsel %vm1326_vm11, %v5024_v33, %v16769_v53  ;;  %v5466_v49 = vpop.permute.xlu2 %5465 }
 0x7ac   : > { %7485 = vmatpush.bf16.msra.mxu2 %v8989_v45  ;;  %v9413_v45 = vor.u32 %v10150_v44, %v9412_v18  ;;  %v5312_v18 = vsel %vm1617_vm14, %v16767_v61, %v5308_v24  ;;  %v5340_v41 = vmul.f32 %v5324_v57, %v16757_v29  ;;  %v5060_v44 = vmul.f32 %v5038_v9, %v16751_v0  ;;  %v16772_v0 = vld [vmem:[#allocation113_spill] sm:$0xff]  ;;  %v10075_v61 = vld [vmem:[#allocation2 + $0x1b4] sm:$0xf0] }
 0x7ad   : > { %5000 = vst [vmem:[#allocation2 + $0x298] sm:$0xff] %v4992_v16  ;;  %v5339_v60 = vmul.f32 %v5312_v18, %v16756_v1  ;;  %v5471_v16 = vsel %vm1787_vm12, %v15498_v35, %v5466_v49  ;;  %v9133_v5 = vor.u32 %v10079_v38, %v9132_v37  ;;  %7434 = vmatmul.bf16.vlgmr.msrb.gmra.mxu3 %v15782_v22  ;;  %v9110_v35 = vld [vmem:[#allocation2 + $0x1b0] sm:$0xf0]  ;;  %v10027_v18 = vld [vmem:[#allocation2 + $0x34] sm:$0xf0] }
 0x7ae   : > { %7300 = vmatpush.bf16.msra.mxu0 %v9413_v45  ;;  %7502 = vmatpush.bf16.msra.mxu3 %v9149_v12  ;;  %v5483_v45 = vsel %vm1787_vm12, %v5466_v49, %v15586_v11  ;;  %v10072_v38 = vld [vmem:[#allocation2 + $0x1a4] sm:$0xf]  ;;  %v9116_v20 = vld [vmem:[#allocation2 + $0x1a8] sm:$0xf]  ;;  %v16773_v49 = vld [vmem:[#allocation22_spill] sm:$0xff] }
 0x7af   : > { %v5496_v24 = vmul.f32 %v5483_v45, %v16772_v0  ;;  %7401 = vmatmul.bf16.gmra.mxu1 %v15582_v59  ;;  %v9113_v9 = vor.u32 %v10072_v38, %v9110_v35  ;;  %v10023_v35 = vld [vmem:[#allocation2 + $0x14] sm:$0xf0] }
 0x7b0   : > { %7486 = vmatpush.bf16.msra.mxu2 %v8973_v15  ;;  %v5042_v15 = vsel %vm1326_vm11, %v16770_v42, %v5024_v33  ;;  %v8940_v33 = vld [vmem:[#allocation2 + $0x48] sm:$0xf]  ;;  %v9117_v42 = vor.u32 %v10075_v61, %v9116_v20  ;;  %v10179_v38 = vld [vmem:[#allocation2 + $0x4f4] sm:$0xf0]  ;;  %v9078_v20 = vld [vmem:[#allocation2 + $0x170] sm:$0xf0] }
 0x7b1   : > { %v5059_v27 = vmul.f32 %v5042_v15, %v16750_v56  ;;  %7301 = vmatmul.bf16.vlgmr.msra.gmra.mxu0 %v15782_v22  ;;  %v16771_v56 = vld [vmem:[#allocation114_spill] sm:$0xff]  ;;  %v8941_v12 = vor.u32 %v10031_v54, %v8940_v33  ;;  %v10068_v15 = vld [vmem:[#allocation2 + $0x184] sm:$0xf]  ;;  %v9100_v33 = vld [vmem:[#allocation2 + $0x188] sm:$0xf] }
 0x7b2   : > { %7369 = vmatpush.bf16.msrb.mxu0 %v9145_v8  ;;  %v5348_v8 = vpack.c.bf16 %v5340_v41, %v5339_v60  ;;  %v5495_v26 = vmul.f32 %v5471_v16, %v16771_v56  ;;  %7503 = vmatpush.bf16.msra.mxu3 %v9133_v5  ;;  %v5302_v57 = vpop.permute.xlu1 %5301  ;;  %v4946_v53 = vpop.permute.xlu0 %4945  ;;  %v16774_v41 = vld [vmem:[#allocation25_spill] sm:$0xff]  ;;  %v16776_v54 = vld [vmem:[#allocation24_spill] sm:$0xff]  ;;  %vm16792_vm11 = vmmov %vm16747_vm0 }
 0x7b3   : > { %v5072_v46 = vpack.c.bf16 %v5060_v44, %v5059_v27  ;;  %7420 = vmatmul.bf16.gmra.mxu2 %v15624_v23  ;;  %v5309_v60 = vsel %vm1617_vm14, %v16773_v49, %v5302_v57  ;;  %v5321_v27 = vsel %vm1617_vm14, %v5302_v57, %v16774_v41  ;;  %v16775_v44 = vld [vmem:[#allocation29_spill] sm:$0xff]  ;;  %v4963_v16 = vsel %vm1241_vm10, %v16776_v54, %v4946_v53  ;;  %v4868_v45 = vpop.permute.xlu2 %4867  ;;  %v10175_v57 = vld [vmem:[#allocation2 + $0x4d4] sm:$0xf0]  ;;  %v16779_v49 = vld [vmem:[#allocation88_spill] sm:$0xff] }
 0x7b4   : > { %7487 = vmatpush.bf16.msra.mxu2 %v8957_v36  ;;  %5356 = vst [vmem:[#allocation2 + $0x3f8] sm:$0xff] %v5348_v8  ;;  %v5506_v11 = vpack.c.bf16 %v5496_v24, %v5495_v26  ;;  %v8924_v36 = vld [vmem:[#allocation2 + $0x28] sm:$0xf]  ;;  %v4959_v37 = vsel %vm1241_vm10, %v4946_v53, %v16775_v44  ;;  %v5327_v5 = vmul.f32 %v5309_v60, %v16756_v1  ;;  %v9094_v24 = vld [vmem:[#allocation2 + $0x190] sm:$0xf0]  ;;  %v16780_v41 = vld [vmem:[#allocation87_spill] sm:$0xff] }
 0x7b5   : > { %5080 = vst [vmem:[#allocation2 + $0x2d8] sm:$0xff] %v5072_v46  ;;  %v5328_v8 = vmul.f32 %v5321_v27, %v16757_v29  ;;  %v4983_v46 = vmul.f32 %v4963_v16, %v16765_v52  ;;  %v4984_v26 = vmul.f32 %v4959_v37, %v16766_v39  ;;  %v16777_v61 = vld [vmem:[#allocation37_spill] sm:$0xff]  ;;  %v9097_v1 = vor.u32 %v10068_v15, %v9094_v24  ;;  %v10071_v44 = vld [vmem:[#allocation2 + $0x194] sm:$0xf0]  ;;  %v10018_v54 = vld [vmem:[#allocation9 + $0x60] sm:$0xf0] }
 0x7b6   : > { %7370 = vmatpush.bf16.msrb.mxu0 %v9129_v40  ;;  %5514 = vst [vmem:[#allocation2 + $0x468] sm:$0xff] %v5506_v11  ;;  %v8925_v40 = vor.u32 %v10027_v18, %v8924_v36  ;;  %v4880_v18 = vsel %vm1156_vm9, %v4868_v45, %v16777_v61  ;;  %v16778_v11 = vld [vmem:[#allocation42_spill] sm:$0xff]  ;;  %7504 = vmatpush.bf16.msra.mxu3 %v9117_v42  ;;  %v9532_v29 = vld [vmem:[#allocation2 + $0x4e8] sm:$0xf]  ;;  %v8888_v37 = vld [vmem:[#allocation9 + $0x48] sm:$0xf] }
 0x7b7   : > { %v4884_v36 = vsel %vm1156_vm9, %v16778_v11, %v4868_v45  ;;  %v5342_v53 = vpack.c.bf16 %v5328_v8, %v5327_v5  ;;  %v4908_v27 = vmul.f32 %v4880_v18, %v16780_v41  ;;  %v9101_v16 = vor.u32 %v10071_v44, %v9100_v33  ;;  %v9404_v59 = vld [vmem:[#allocation2 + $0x3e8] sm:$0xf]  ;;  %v10067_v42 = vld [vmem:[#allocation2 + $0x174] sm:$0xf0]  ;;  %v10064_v5 = vld [vmem:[#allocation2 + $0x164] sm:$0xf] }
 0x7b8   : > { %7488 = vmatpush.bf16.msra.mxu2 %v8941_v12  ;;  %v8908_v12 = vld [vmem:[#allocation2 + $0x8] sm:$0xf]  ;;  %v4907_v60 = vmul.f32 %v4884_v36, %v16779_v49  ;;  %v9533_v15 = vor.u32 %v10179_v38, %v9532_v29  ;;  %v9062_v36 = vld [vmem:[#allocation2 + $0x150] sm:$0xf0]  ;;  %v16782_v29 = vld [vmem:[#allocation27_spill] sm:$0xff] }
 0x7b9   : > { %v8909_v61 = vor.u32 %v10023_v35, %v8908_v12  ;;  %5350 = vst [vmem:[#allocation2 + $0x3c8] sm:$0xff] %v5342_v53  ;;  %v9516_v11 = vld [vmem:[#allocation2 + $0x4c8] sm:$0xf]  ;;  %v9081_v12 = vor.u32 %v10064_v5, %v9078_v20  ;;  %v16783_v53 = vld [vmem:[#allocation26_spill] sm:$0xff]  ;;  %vm16798_vm14 = vmmov %vm16747_vm0 }
 0x7ba   : > { %7371 = vmatpush.bf16.msrb.mxu0 %v9113_v9  ;;  %v4994_v9 = vpack.c.bf16 %v4984_v26, %v4983_v46  ;;  %7505 = vmatpush.bf16.msra.mxu3 %v9101_v16  ;;  %v9084_v8 = vld [vmem:[#allocation2 + $0x168] sm:$0xf]  ;;  %v15836_v46 = vor.u32 %v10018_v54, %v8888_v37  ;;  %v4948_v26 = vpop.permute.xlu1 %4947  ;;  %v5228_v33 = vpop.permute.xlu0 %5227  ;;  %v9517_v18 = vor.u32 %v10175_v57, %v9516_v11  ;;  %v10060_v16 = vld [vmem:[#allocation2 + $0x144] sm:$0xf] }
 0x7bb   : > { %v10147_v45 = vld [vmem:[#allocation2 + $0x3f4] sm:$0xf0]  ;;  %v9085_v35 = vor.u32 %v10067_v42, %v9084_v8  ;;  %v4964_v38 = vsel %vm1241_vm10, %v16782_v29, %v4948_v26  ;;  %v4862_v20 = vpop.permute.xlu2 %4861 }
 0x7bc   : > { %7489 = vmatpush.bf16.msra.mxu2 %v8925_v40  ;;  %v4916_v40 = vpack.c.bf16 %v4908_v27, %v4907_v60  ;;  %v9405_v24 = vor.u32 %v10147_v45, %v9404_v59  ;;  %5002 = vst [vmem:[#allocation2 + $0x2a8] sm:$0xff] %v4994_v9  ;;  %v5232_v9 = vsel %vm1532_vm13, %v16783_v53, %v5228_v33  ;;  %v16784_v60 = vld [vmem:[#allocation31_spill] sm:$0xff]  ;;  %v16785_v45 = vld [vmem:[#allocation48_spill] sm:$0xff]  ;;  %v9052_v53 = vld [vmem:[#allocation2 + $0x128] sm:$0xf] }
 0x7bd   : > { %v5244_v27 = vsel %vm1532_vm13, %v5228_v33, %v16784_v60  ;;  %v4987_v57 = vmul.f32 %v4964_v38, %v16765_v52  ;;  %v5259_v37 = vmul.f32 %v5232_v9, %v16760_v25  ;;  %v4877_v42 = vsel %vm1156_vm9, %v4862_v20, %v16785_v45  ;;  %7439 = vmatmul.bf16.gmra.mxu3 %v15836_v46  ;;  %v9068_v33 = vld [vmem:[#allocation2 + $0x148] sm:$0xf]  ;;  %v10143_v38 = vld [vmem:[#allocation2 + $0x3d4] sm:$0xf0]  ;;  %v9046_v60 = vld [vmem:[#allocation2 + $0x130] sm:$0xf0] }
 0x7be   : > { %7372 = vmatpush.bf16.msrb.mxu0 %v9097_v1  ;;  %4924 = vst [vmem:[#allocation2 + $0x278] sm:$0xff] %v4916_v40  ;;  %7540 = vmatpush.bf16.msrb.mxu1 %v9405_v24  ;;  %v16781_v1 = vld [vmem:[#allocation23_spill] sm:$0xff]  ;;  %v5260_v54 = vmul.f32 %v5244_v27, %v16761_v58  ;;  %v16786_v40 = vld [vmem:[#allocation41_spill] sm:$0xff]  ;;  %v9065_v24 = vor.u32 %v10060_v16, %v9062_v36  ;;  %v16788_v45 = vld [vmem:[#allocation28_spill] sm:$0xff] }
 0x7bf   : > { %v4960_v59 = vsel %vm1241_vm10, %v4948_v26, %v16781_v1  ;;  %7506 = vmatpush.bf16.msra.mxu3 %v9085_v35  ;;  %v4896_v26 = vmul.f32 %v4877_v42, %v16780_v41  ;;  %v10056_v1 = vld [vmem:[#allocation2 + $0x124] sm:$0xf]  ;;  %9764 = vmatmul.msk.bf16.vlgmr.msra.gmra.mxu1 %vm3570_vm15, %v15663_v62  ;;  %v9500_v36 = vld [vmem:[#allocation2 + $0x4a8] sm:$0xf]  ;;  %v10059_v27 = vld [vmem:[#allocation2 + $0x134] sm:$0xf0] }
 0x7c0   : > { %7490 = vmatpush.bf16.msra.mxu2 %v8909_v61  ;;  %v4988_v44 = vmul.f32 %v4960_v59, %v16766_v39  ;;  %v10063_v61 = vld [vmem:[#allocation2 + $0x154] sm:$0xf0]  ;;  %v5268_v5 = vpack.c.bf16 %v5260_v54, %v5259_v37  ;;  %v9388_v29 = vld [vmem:[#allocation2 + $0x3c8] sm:$0xf]  ;;  %v9053_v37 = vor.u32 %v10059_v27, %v9052_v53 }
 0x7c1   : > { %7306 = vmatmul.bf16.gmra.mxu0 %v15836_v46  ;;  %v9069_v59 = vor.u32 %v10063_v61, %v9068_v33  ;;  %v9389_v9 = vor.u32 %v10143_v38, %v9388_v29  ;;  %v9484_v54 = vld [vmem:[#allocation2 + $0x488] sm:$0xf]  ;;  %v16787_v16 = vld [vmem:[#allocation35_spill] sm:$0xff] }
 0x7c2   : > { %7373 = vmatpush.bf16.msrb.mxu0 %v9081_v12  ;;  %v4996_v11 = vpack.c.bf16 %v4988_v44, %v4987_v57  ;;  %v10171_v12 = vld [vmem:[#allocation2 + $0x4b4] sm:$0xf0]  ;;  %5276 = vst [vmem:[#allocation2 + $0x3b8] sm:$0xff] %v5268_v5  ;;  %v4942_v57 = vpop.permute.xlu1 %4941  ;;  %v9049_v44 = vor.u32 %v10056_v1, %v9046_v60  ;;  %v16793_v60 = vld [vmem:[#allocation112_spill] sm:$0xff] }
 0x7c3   : > { %7507 = vmatpush.bf16.msra.mxu3 %v9069_v59  ;;  %7541 = vmatpush.bf16.msrb.mxu1 %v9389_v9  ;;  %v4957_v61 = vsel %vm1241_vm10, %v4942_v57, %v16787_v16  ;;  %v4961_v42 = vsel %vm1241_vm10, %v16788_v45, %v4942_v57  ;;  %v5388_v5 = vpop.permute.xlu2 %5387  ;;  %v10167_v1 = vld [vmem:[#allocation2 + $0x494] sm:$0xf0]  ;;  %v9030_v59 = vld [vmem:[#allocation2 + $0x110] sm:$0xf0]  ;;  %vm16791_vm10 = vmmov %vm16747_vm0 }
 0x7c4   : > { %7559 = vmatpush.bf16.msrb.mxu2 %v9533_v15  ;;  %v4881_v15 = vsel %vm1156_vm9, %v16786_v40, %v4862_v20  ;;  %5004 = vst [vmem:[#allocation2 + $0x2b8] sm:$0xff] %v4996_v11  ;;  %v9501_v20 = vor.u32 %v10171_v12, %v9500_v36  ;;  %v16789_v40 = vld [vmem:[#allocation38_spill] sm:$0xff]  ;;  %v10055_v29 = vld [vmem:[#allocation2 + $0x114] sm:$0xf0]  ;;  %v5392_v38 = vsel %vm16791_vm10, %v15694_v10, %v5388_v5  ;;  %v9036_v16 = vld [vmem:[#allocation2 + $0x108] sm:$0xf] }
 0x7c5   : > { %v4895_v8 = vmul.f32 %v4881_v15, %v16779_v49  ;;  %7491 = vmatmul.bf16.vlgmr.msra.gmra.mxu2 %v15417_v31  ;;  %v5404_v53 = vsel %vm16792_vm11, %v5388_v5, %v15594_v14  ;;  %v5419_v27 = vmul.f32 %v5392_v38, %v16793_v60  ;;  %v9037_v45 = vor.u32 %v10055_v29, %v9036_v16  ;;  %v9654_v10 = vld [vmem:[#allocation2 + $0x5f0] sm:$0xf0] }
 0x7c6   : > { %7374 = vmatpush.bf16.msrb.mxu0 %v9065_v24  ;;  %v16790_v24 = vld [vmem:[#allocation36_spill] sm:$0xff]  ;;  %v9622_v16 = vld [vmem:[#allocation2 + $0x5b0] sm:$0xf0] }
 0x7c7   : > { %v4910_v35 = vpack.c.bf16 %v4896_v26, %v4895_v8  ;;  %v4975_v8 = vmul.f32 %v4961_v42, %v16765_v52  ;;  %v4976_v26 = vmul.f32 %v4957_v61, %v16766_v39  ;;  %7508 = vmatpush.bf16.msra.mxu3 %v9053_v37  ;;  %v9485_v52 = vor.u32 %v10167_v1, %v9484_v54  ;;  %v10211_v39 = vld [vmem:[#allocation2 + $0x5f4] sm:$0xf0]  ;;  %v9660_v42 = vld [vmem:[#allocation2 + $0x5e8] sm:$0xf] }
 0x7c8   : > { %7560 = vmatpush.bf16.msrb.mxu2 %v9517_v18  ;;  %v5222_v18 = vpop.permute.xlu0 %5221  ;;  %v9661_v37 = vor.u32 %v10211_v39, %v9660_v42  ;;  %v9372_v54 = vld [vmem:[#allocation2 + $0x3a8] sm:$0xf]  ;;  %v10200_v42 = vld [vmem:[#allocation2 + $0x5a4] sm:$0xf] }
 0x7c9   : > { %4918 = vst [vmem:[#allocation2 + $0x248] sm:$0xff] %v4910_v35  ;;  %v5229_v15 = vsel %vm1532_vm13, %v16789_v40, %v5222_v18  ;;  %v5241_v11 = vsel %vm1532_vm13, %v5222_v18, %v16790_v24  ;;  %v10208_v35 = vld [vmem:[#allocation2 + $0x5e4] sm:$0xf]  ;;  %v4990_v36 = vpack.c.bf16 %v4976_v26, %v4975_v8  ;;  %v9638_v40 = vld [vmem:[#allocation2 + $0x5d0] sm:$0xf0] }
 0x7ca   : > { %v5247_v33 = vmul.f32 %v5229_v15, %v16760_v25  ;;  %v5248_v12 = vmul.f32 %v5241_v11, %v16761_v58  ;;  %7375 = vmatpush.bf16.msrb.mxu0 %v9049_v44  ;;  %v10052_v18 = vld [vmem:[#allocation2 + $0x104] sm:$0xf]  ;;  %v9657_v44 = vor.u32 %v10208_v35, %v9654_v10  ;;  %v10139_v15 = vld [vmem:[#allocation2 + $0x3b4] sm:$0xf0]  ;;  %v5224_v5 = vpop.permute.xlu1 %5223  ;;  %v9628_v10 = vld [vmem:[#allocation2 + $0x5a8] sm:$0xf] }
 0x7cb   : > { %v9033_v61 = vor.u32 %v10052_v18, %v9030_v59  ;;  %4998 = vst [vmem:[#allocation2 + $0x288] sm:$0xff] %v4990_v36  ;;  %7509 = vmatpush.bf16.msra.mxu3 %v9037_v45  ;;  %v9373_v24 = vor.u32 %v10139_v15, %v9372_v54  ;;  %v10204_v11 = vld [vmem:[#allocation2 + $0x5c4] sm:$0xf] }
 0x7cc   : > { %7561 = vmatpush.bf16.msrb.mxu2 %v9501_v20  ;;  %v5262_v9 = vpack.c.bf16 %v5248_v12, %v5247_v33  ;;  %v16794_v20 = vld [vmem:[#allocation111_spill] sm:$0xff]  ;;  %v9641_v26 = vor.u32 %v10204_v11, %v9638_v40  ;;  %v16795_v12 = vld [vmem:[#allocation32_spill] sm:$0xff] }
 0x7cd   : > { %v5420_v57 = vmul.f32 %v5404_v53, %v16794_v20  ;;  %v10207_v33 = vld [vmem:[#allocation2 + $0x5d4] sm:$0xf0]  ;;  %v5230_v1 = vsel %vm1532_vm13, %v16795_v12, %v5224_v5  ;;  %v16796_v59 = vld [vmem:[#allocation40_spill] sm:$0xff]  ;;  %7542 = vmatpush.bf16.msrb.mxu1 %v9373_v24 }
 0x7ce   : > { %5270 = vst [vmem:[#allocation2 + $0x388] sm:$0xff] %v5262_v9  ;;  %7376 = vmatpush.bf16.msrb.mxu0 %v9033_v61  ;;  %v5242_v29 = vsel %vm1532_vm13, %v5224_v5, %v16796_v59  ;;  %v5251_v35 = vmul.f32 %v5230_v1, %v16760_v25  ;;  %vm16797_vm13 = vmmov %vm16747_vm0  ;;  %v16799_v18 = vld [vmem:[#allocation20_spill] sm:$0xff]  ;;  %v10199_v11 = vld [vmem:[#allocation2 + $0x594] sm:$0xf0] }
 0x7cf   : > { %v5428_v14 = vpack.c.bf16 %v5420_v57, %v5419_v27  ;;  %7578 = vmatpush.bf16.msrb.mxu3 %v9661_v37  ;;  %v5252_v39 = vmul.f32 %v5242_v29, %v16761_v58  ;;  %v9644_v27 = vld [vmem:[#allocation2 + $0x5c8] sm:$0xf]  ;;  %v10196_v40 = vld [vmem:[#allocation2 + $0x584] sm:$0xf]  ;;  %9765 = vmatmul.msk.bf16.gmra.mxu1 %vm3570_vm15, %v15714_v28  ;;  %v9606_v37 = vld [vmem:[#allocation2 + $0x590] sm:$0xf0] }
 0x7d0   : > { %7562 = vmatpush.bf16.msrb.mxu2 %v9485_v52  ;;  %v5468_v8 = vpop.permute.xlu0 %5467  ;;  %v5382_v52 = vpop.permute.xlu2 %5381  ;;  %7510 = vmatmul.bf16.vlgmr.msra.gmra.mxu3 %v16799_v18  ;;  %v9609_v24 = vor.u32 %v10196_v40, %v9606_v37  ;;  %v16800_v5 = vld [vmem:[#allocation45_spill] sm:$0xff] }
 0x7d1   : > { %5436 = vst [vmem:[#allocation2 + $0x438] sm:$0xff] %v5428_v14  ;;  %v5472_v38 = vsel %vm1787_vm12, %v15606_v43, %v5468_v8  ;;  %v5484_v53 = vsel %vm1787_vm12, %v5468_v8, %v15477_v7  ;;  %v5389_v57 = vsel %vm16797_vm13, %v15653_v13, %v5382_v52  ;;  %v5401_v43 = vsel %vm16798_vm14, %v5382_v52, %v15717_v3  ;;  %v10203_v14 = vld [vmem:[#allocation2 + $0x5b4] sm:$0xf0]  ;;  %v9612_v52 = vld [vmem:[#allocation2 + $0x588] sm:$0xf] }
 0x7d2   : > { %7445 = vmatpush.bf16.msra.mxu0 %v9657_v44  ;;  %v5499_v36 = vmul.f32 %v5472_v38, %v16771_v56  ;;  %v5500_v9 = vmul.f32 %v5484_v53, %v16772_v0  ;;  %v9645_v7 = vor.u32 %v10207_v33, %v9644_v27  ;;  %v5264_v25 = vpack.c.bf16 %v5252_v39, %v5251_v35  ;;  %v4866_v54 = vpop.permute.xlu1 %4865  ;;  %v16802_v39 = vld [vmem:[#allocation47_spill] sm:$0xff]  ;;  %v9590_v27 = vld [vmem:[#allocation2 + $0x570] sm:$0xf0] }
 0x7d3   : > { %7377 = vmatmul.bf16.vlgmr.msrb.gmra.mxu0 %v16799_v18  ;;  %v5407_v58 = vmul.f32 %v5389_v57, %v16793_v60  ;;  %v5408_v45 = vmul.f32 %v5401_v43, %v16794_v20  ;;  %v9625_v3 = vor.u32 %v10200_v42, %v9622_v16  ;;  %v9629_v44 = vor.u32 %v10203_v14, %v9628_v10  ;;  %v10131_v57 = vld [vmem:[#allocation2 + $0x374] sm:$0xf0]  ;;  %v9596_v42 = vld [vmem:[#allocation2 + $0x568] sm:$0xf] }
 0x7d4   : > { %v5508_v61 = vpack.c.bf16 %v5500_v9, %v5499_v36  ;;  %7579 = vmatpush.bf16.msrb.mxu3 %v9645_v7  ;;  %5272 = vst [vmem:[#allocation2 + $0x398] sm:$0xff] %v5264_v25  ;;  %v4879_v8 = vsel %vm1156_vm9, %v4866_v54, %v16800_v5  ;;  %v9613_v9 = vor.u32 %v10199_v11, %v9612_v52  ;;  %v16804_v7 = vld [vmem:[#allocation100_spill] sm:$0xff]  ;;  %v9340_v5 = vld [vmem:[#allocation2 + $0x368] sm:$0xf] }
 0x7d5   : > { %v5422_v13 = vpack.c.bf16 %v5408_v45, %v5407_v58  ;;  %7496 = vmatmul.bf16.gmra.mxu2 %v15466_v50  ;;  %v4904_v29 = vmul.f32 %v4879_v8, %v16780_v41  ;;  %v10195_v58 = vld [vmem:[#allocation2 + $0x574] sm:$0xf0]  ;;  %v9574_v45 = vld [vmem:[#allocation2 + $0x550] sm:$0xf0]  ;;  %v9356_v40 = vld [vmem:[#allocation2 + $0x388] sm:$0xf] }
 0x7d6   : > { %7446 = vmatpush.bf16.msra.mxu0 %v9641_v26  ;;  %5516 = vst [vmem:[#allocation2 + $0x478] sm:$0xff] %v5508_v61  ;;  %v16801_v26 = vld [vmem:[#allocation34_spill] sm:$0xff]  ;;  %v10192_v61 = vld [vmem:[#allocation2 + $0x564] sm:$0xf] }
 0x7d7   : > { %5430 = vst [vmem:[#allocation2 + $0x408] sm:$0xff] %v5422_v13  ;;  %v4883_v33 = vsel %vm1156_vm9, %v16801_v26, %v4866_v54  ;;  %v9597_v54 = vor.u32 %v10195_v58, %v9596_v42  ;;  %v10188_v11 = vld [vmem:[#allocation2 + $0x544] sm:$0xf]  ;;  %v9542_v58 = vld [vmem:[#allocation2 + $0x510] sm:$0xf0] }
 0x7d8   : > { %v5462_v15 = vpop.permute.xlu0 %5461  ;;  %7580 = vmatpush.bf16.msrb.mxu3 %v9629_v44  ;;  %v5104_v1 = vpop.permute.xlu2 %5103  ;;  %v4903_v59 = vmul.f32 %v4883_v33, %v16779_v49  ;;  %v9468_v44 = vld [vmem:[#allocation2 + $0x468] sm:$0xf]  ;;  %v9577_v26 = vor.u32 %v10188_v11, %v9574_v45  ;;  %v10180_v42 = vld [vmem:[#allocation2 + $0x504] sm:$0xf] }
 0x7d9   : > { %v5469_v12 = vsel %vm1787_vm12, %v15562_v2, %v5462_v15  ;;  %v5481_v38 = vsel %vm1787_vm12, %v5462_v15, %v15626_v6  ;;  %v5118_v36 = vsel %vm16743_vm7, %v5104_v1, %v16802_v39  ;;  %v5122_v2 = vsel %vm16803_vm8, %v15490_v63, %v5104_v1  ;;  %v16805_v6 = vld [vmem:[#allocation99_spill] sm:$0xff]  ;;  %v9580_v33 = vld [vmem:[#allocation2 + $0x548] sm:$0xf] }
 0x7da   : > { %7447 = vmatpush.bf16.msra.mxu0 %v9625_v3  ;;  %v5487_v53 = vmul.f32 %v5469_v12, %v16771_v56  ;;  %v5488_v35 = vmul.f32 %v5481_v38, %v16772_v0  ;;  %v4914_v43 = vpack.c.bf16 %v4904_v29, %v4903_v59  ;;  %v5139_v16 = vmul.f32 %v5122_v2, %v16804_v7  ;;  %v16806_v29 = vld [vmem:[#allocation39_spill] sm:$0xff] }
 0x7db   : > { %v5140_v25 = vmul.f32 %v5118_v36, %v16805_v6  ;;  %v10135_v13 = vld [vmem:[#allocation2 + $0x394] sm:$0xf0]  ;;  %v9593_v63 = vor.u32 %v10192_v61, %v9590_v27  ;;  %v9341_v12 = vor.u32 %v10131_v57, %v9340_v5  ;;  %v10184_v27 = vld [vmem:[#allocation2 + $0x524] sm:$0xf]  ;;  %v9324_v61 = vld [vmem:[#allocation2 + $0x348] sm:$0xf] }
 0x7dc   : > { %v5502_v10 = vpack.c.bf16 %v5488_v35, %v5487_v53  ;;  %7581 = vmatpush.bf16.msrb.mxu3 %v9613_v9  ;;  %4922 = vst [vmem:[#allocation2 + $0x268] sm:$0xff] %v4914_v43  ;;  %v9357_v14 = vor.u32 %v10135_v13, %v9356_v40  ;;  %v16807_v53 = vld [vmem:[#allocation43_spill] sm:$0xff]  ;;  %v9276_v13 = vld [vmem:[#allocation2 + $0x2e8] sm:$0xf]  ;;  %v16811_v5 = vld [vmem:[#allocation44_spill] sm:$0xff] }
 0x7dd   : > { %v5152_v3 = vpack.c.bf16 %v5140_v25, %v5139_v16  ;;  %v10163_v37 = vld [vmem:[#allocation2 + $0x474] sm:$0xf0] }
 0x7de   : > { %7448 = vmatpush.bf16.msra.mxu0 %v9609_v24  ;;  %5510 = vst [vmem:[#allocation2 + $0x448] sm:$0xff] %v5502_v10  ;;  %v9469_v15 = vor.u32 %v10163_v37, %v9468_v44  ;;  %v5464_v24 = vpop.permute.xlu1 %5463  ;;  %7543 = vmatpush.bf16.msrb.mxu1 %v9357_v14  ;;  %v10191_v2 = vld [vmem:[#allocation2 + $0x554] sm:$0xf0]  ;;  %v9545_v44 = vor.u32 %v10180_v42, %v9542_v58  ;;  %v10113_v37 = vld [vmem:[#allocation2 + $0x2ec] sm:$0xf] }
 0x7df   : > { %5160 = vst [vmem:[#allocation2 + $0x318] sm:$0xff] %v5152_v3  ;;  %v5470_v1 = vsel %vm1787_vm12, %v15645_v55, %v5464_v24  ;;  %v5482_v59 = vsel %vm1787_vm12, %v5464_v24, %v15530_v30  ;;  %v9581_v9 = vor.u32 %v10191_v2, %v9580_v33  ;;  %v16808_v30 = vld [vmem:[#allocation51_spill] sm:$0xff]  ;;  %vm16810_vm12 = vmmov %vm16747_vm0 }
 0x7e0   : > { %v4864_v8 = vpop.permute.xlu0 %4863  ;;  %7582 = vmatpush.bf16.msrb.mxu3 %v9597_v54  ;;  %v5491_v35 = vmul.f32 %v5470_v1, %v16771_v56  ;;  %v5492_v39 = vmul.f32 %v5482_v59, %v16772_v0  ;;  %7563 = vmatpush.bf16.msrb.mxu2 %v9469_v15  ;;  %v10127_v57 = vld [vmem:[#allocation2 + $0x354] sm:$0xf0]  ;;  %v9558_v56 = vld [vmem:[#allocation2 + $0x530] sm:$0xf0]  ;;  %v15968_v54 = vpop.f32.mrf.mxu2 }
 0x7e1   : > { %v4878_v38 = vsel %vm1156_vm9, %v4864_v8, %v16806_v29  ;;  %v4882_v52 = vsel %vm1156_vm9, %v16807_v53, %v4864_v8  ;;  %v10187_v25 = vld [vmem:[#allocation2 + $0x534] sm:$0xf0]  ;;  %7515 = vmatmul.bf16.gmra.mxu3 %v16808_v30  ;;  %v9561_v0 = vor.u32 %v10184_v27, %v9558_v56  ;;  %vm16809_vm9 = vmmov %vm16747_vm0  ;;  %v16813_v8 = vld [vmem:[#allocation49_spill] sm:$0xff] }
 0x7e2   : > { %7449 = vmatpush.bf16.msra.mxu0 %v9593_v63  ;;  %v4899_v36 = vmul.f32 %v4882_v52, %v16779_v49  ;;  %v4900_v55 = vmul.f32 %v4878_v38, %v16780_v41  ;;  %v5504_v43 = vpack.c.bf16 %v5492_v39, %v5491_v35  ;;  %7544 = vmatpush.bf16.msrb.mxu1 %v9341_v12  ;;  %v9564_v49 = vld [vmem:[#allocation2 + $0x528] sm:$0xf]  ;;  %v10183_v40 = vld [vmem:[#allocation2 + $0x514] sm:$0xf0]  ;;  %vm16812_vm0 = vmmov %vm16743_vm7  ;;  %v15980_v35 = vpop.f32.mrf.mxu1 }
 0x7e3   : > { %7382 = vmatmul.bf16.gmra.mxu0 %v16808_v30  ;;  %v9325_v41 = vor.u32 %v10127_v57, %v9324_v61  ;;  %v9565_v45 = vor.u32 %v10187_v25, %v9564_v49  ;;  %vm16814_vm1 = vmmov %vm16812_vm0  ;;  %v10115_v33 = vld [vmem:[#allocation2 + $0x2f4] sm:$0xf0]  ;;  %v9278_v29 = vld [vmem:[#allocation2 + $0x2f8] sm:$0xf0] }
 0x7e4   : > { %v4912_v16 = vpack.c.bf16 %v4900_v55, %v4899_v36  ;;  %7583 = vmatpush.bf16.msrb.mxu3 %v9581_v9  ;;  %5512 = vst [vmem:[#allocation2 + $0x458] sm:$0xff] %v5504_v43  ;;  %v9277_v59 = vor.u32 %v10115_v33, %v9276_v13  ;;  %v9281_v53 = vor.u32 %v10113_v37, %v9278_v29  ;;  %v10111_v52 = vld [vmem:[#allocation2 + $0x2d4] sm:$0xf0]  ;;  %v9262_v36 = vld [vmem:[#allocation2 + $0x2d8] sm:$0xf0]  ;;  %vm16816_vm2 = vmmov %vm16812_vm0 }
 0x7e5   : > { %v9452_v55 = vld [vmem:[#allocation2 + $0x448] sm:$0xf]  ;;  %v10107_v61 = vld [vmem:[#allocation2 + $0x2b4] sm:$0xf0]  ;;  %vm16818_vm3 = vmmov %vm16812_vm0 }
 0x7e6   : > { %7450 = vmatpush.bf16.msra.mxu0 %v9577_v26  ;;  %4920 = vst [vmem:[#allocation2 + $0x258] sm:$0xff] %v4912_v16  ;;  %v5386_v10 = vpop.permute.xlu1 %5385  ;;  %7545 = vmatpush.bf16.msrb.mxu1 %v9325_v41  ;;  %v9548_v26 = vld [vmem:[#allocation2 + $0x508] sm:$0xf]  ;;  %v10109_v16 = vld [vmem:[#allocation2 + $0x2cc] sm:$0xf]  ;;  %v16817_v41 = vld [vmem:[#allocation46_spill] sm:$0xff] }
 0x7e7   : > { %v5391_v3 = vsel %vm16809_vm9, %v15614_v47, %v5386_v10  ;;  %v5403_v63 = vsel %vm16810_vm12, %v5386_v10, %v15667_v32  ;;  %v9549_v1 = vor.u32 %v10183_v40, %v9548_v26  ;;  %v9260_v27 = vld [vmem:[#allocation2 + $0x2c8] sm:$0xf]  ;;  %v9265_v25 = vor.u32 %v10109_v16, %v9262_v36  ;;  %v9246_v10 = vld [vmem:[#allocation2 + $0x2b8] sm:$0xf0]  ;;  %v10155_v33 = vld [vmem:[#allocation2 + $0x434] sm:$0xf0] }
 0x7e8   : > { %7584 = vmatpush.bf16.msrb.mxu3 %v9565_v45  ;;  %v5106_v14 = vpop.permute.xlu0 %5105  ;;  %v5415_v15 = vmul.f32 %v5391_v3, %v16793_v60  ;;  %v5416_v11 = vmul.f32 %v5403_v63, %v16794_v20  ;;  %v15982_v9 = vpop.f32.mrf.mxu3  ;;  %v9261_v43 = vor.u32 %v10111_v52, %v9260_v27  ;;  %v9244_v63 = vld [vmem:[#allocation2 + $0x2a8] sm:$0xf]  ;;  %vm16820_vm6 = vmmov %vm16812_vm0  ;;  %v10099_v36 = vld [vmem:[#allocation2 + $0x274] sm:$0xf0] }
 0x7e9   : > { %v5119_v24 = vsel %vm16812_vm0, %v5106_v14, %v16811_v5  ;;  %v5123_v47 = vsel %vm16814_vm1, %v16813_v8, %v5106_v14  ;;  %v9245_v37 = vor.u32 %v10107_v61, %v9244_v63  ;;  %v9228_v8 = vld [vmem:[#allocation2 + $0x288] sm:$0xf]  ;;  %vm16821_vm10 = vmmov %vm16812_vm0 }
 0x7ea   : > { %7451 = vmatpush.bf16.msra.mxu0 %v9561_v0  ;;  %v5143_v32 = vmul.f32 %v5123_v47, %v16804_v7  ;;  %v5144_v12 = vmul.f32 %v5119_v24, %v16805_v6  ;;  %v5426_v38 = vpack.c.bf16 %v5416_v11, %v5415_v15  ;;  %v16815_v0 = vld [vmem:[#allocation50_spill] sm:$0xff]  ;;  %v10105_v15 = vld [vmem:[#allocation2 + $0x2ac] sm:$0xf]  ;;  %v16001_v11 = vpop.f32.mrf.mxu2  ;;  %v9212_v29 = vld [vmem:[#allocation2 + $0x268] sm:$0xf] }
 0x7eb   : > { %v10159_v2 = vld [vmem:[#allocation2 + $0x454] sm:$0xf0]  ;;  %v9249_v24 = vor.u32 %v10105_v15, %v9246_v10  ;;  %v9213_v27 = vor.u32 %v10099_v36, %v9212_v29  ;;  %v9758_v29 = vld [vmem:[#allocation2 + $0x6b8] sm:$0xf0]  ;;  %v9756_v36 = vld [vmem:[#allocation2 + $0x6a8] sm:$0xf] }
 0x7ec   : > { %v5154_v39 = vpack.c.bf16 %v5144_v12, %v5143_v32  ;;  %7585 = vmatpush.bf16.msrb.mxu3 %v9549_v1  ;;  %5434 = vst [vmem:[#allocation2 + $0x428] sm:$0xff] %v5426_v38  ;;  %v9453_v57 = vor.u32 %v10159_v2, %v9452_v55  ;;  %v16005_v32 = vpop.f32.mrf.mxu1  ;;  %v9230_v1 = vld [vmem:[#allocation2 + $0x298] sm:$0xf0] }
 0x7ed   : > { %v10095_v16 = vld [vmem:[#allocation2 + $0x254] sm:$0xf0]  ;;  %v9198_v61 = vld [vmem:[#allocation2 + $0x258] sm:$0xf0] }
 0x7ee   : > { %7452 = vmatpush.bf16.msra.mxu0 %v9545_v44  ;;  %5162 = vst [vmem:[#allocation2 + $0x328] sm:$0xff] %v5154_v39  ;;  %v5108_v56 = vpop.permute.xlu1 %5107  ;;  %7564 = vmatpush.bf16.msrb.mxu2 %v9453_v57  ;;  %v9214_v57 = vld [vmem:[#allocation2 + $0x278] sm:$0xf0] }
 0x7ef   : > { %v5120_v49 = vsel %vm16816_vm2, %v5108_v56, %v16815_v0  ;;  %v5124_v58 = vsel %vm16818_vm3, %v16817_v41, %v5108_v56 }
 0x7f0   : > { %7654 = vmatpush.bf16.msra.mxu3 %v9281_v53  ;;  %v5384_v45 = vpop.permute.xlu0 %5383  ;;  %v5147_v42 = vmul.f32 %v5124_v58, %v16804_v7  ;;  %v5148_v40 = vmul.f32 %v5120_v49, %v16805_v6  ;;  %v10097_v53 = vld [vmem:[#allocation2 + $0x26c] sm:$0xf] }
 0x7f1   : > { %v5390_v13 = vsel %vm16755_vm4, %v15738_v48, %v5384_v45  ;;  %v5402_v3 = vsel %vm16819_vm5, %v5384_v45, %v15634_v51  ;;  %v10101_v48 = vld [vmem:[#allocation2 + $0x28c] sm:$0xf]  ;;  %v16003_v51 = vpop.f32.mrf.mxu3  ;;  %7586 = vmatmul.bf16.vlgmr.msrb.gmra.mxu3 %v15502_v21 }
 0x7f2   : > { %7521 = vmatpush.bf16.msrb.mxu0 %v9277_v59  ;;  %v5411_v14 = vmul.f32 %v5390_v13, %v16793_v60  ;;  %v5412_v44 = vmul.f32 %v5402_v3, %v16794_v20  ;;  %v5156_v5 = vpack.c.bf16 %v5148_v40, %v5147_v42  ;;  %v10103_v60 = vld [vmem:[#allocation2 + $0x294] sm:$0xf0]  ;;  %v9233_v59 = vor.u32 %v10101_v48, %v9230_v1  ;;  %v10093_v45 = vld [vmem:[#allocation2 + $0x24c] sm:$0xf]  ;;  %v9150_v42 = vld [vmem:[#allocation2 + $0x1f8] sm:$0xf0] }
 0x7f3   : > { %7453 = vmatmul.bf16.vlgmr.msra.gmra.mxu0 %v15502_v21  ;;  %v9436_v26 = vld [vmem:[#allocation2 + $0x428] sm:$0xf]  ;;  %v9229_v12 = vor.u32 %v10103_v60, %v9228_v8  ;;  %v9201_v40 = vor.u32 %v10093_v45, %v9198_v61  ;;  %v10091_v3 = vld [vmem:[#allocation2 + $0x234] sm:$0xf0]  ;;  %v9166_v60 = vld [vmem:[#allocation2 + $0x218] sm:$0xf0] }
 0x7f4   : > { %7655 = vmatpush.bf16.msra.mxu3 %v9265_v25  ;;  %v5424_v47 = vpack.c.bf16 %v5412_v44, %v5411_v14  ;;  %5164 = vst [vmem:[#allocation2 + $0x338] sm:$0xff] %v5156_v5  ;;  %v9437_v20 = vor.u32 %v10155_v33, %v9436_v26  ;;  %v10081_v25 = vld [vmem:[#allocation2 + $0x1ec] sm:$0xf]  ;;  %v16020_v63 = vpop.f32.mrf.mxu1  ;;  %v9182_v14 = vld [vmem:[#allocation2 + $0x238] sm:$0xf0]  ;;  %v16822_v45 = vld [vmem:[#allocation54_spill] sm:$0xff] }
 0x7f5   : > { %v9308_v0 = vld [vmem:[#allocation2 + $0x328] sm:$0xf]  ;;  %v9153_v13 = vor.u32 %v10081_v25, %v9150_v42  ;;  %v9134_v44 = vld [vmem:[#allocation2 + $0x1d8] sm:$0xf0]  ;;  %v10089_v5 = vld [vmem:[#allocation2 + $0x22c] sm:$0xf] }
 0x7f6   : > { %7522 = vmatpush.bf16.msrb.mxu0 %v9261_v43  ;;  %5432 = vst [vmem:[#allocation2 + $0x418] sm:$0xff] %v5424_v47  ;;  %7565 = vmatpush.bf16.msrb.mxu2 %v9437_v20  ;;  %v5102_v38 = vpop.permute.xlu1 %5101  ;;  %v9217_v43 = vor.u32 %v10097_v53, %v9214_v57  ;;  %v9185_v8 = vor.u32 %v10089_v5, %v9182_v14  ;;  %v10087_v48 = vld [vmem:[#allocation2 + $0x214] sm:$0xf0]  ;;  %v9022_v26 = vld [vmem:[#allocation2 + $0xf8] sm:$0xf0] }
 0x7f7   : > { %v5117_v52 = vsel %vm16820_vm6, %v5102_v38, %v15518_v34  ;;  %v5121_v39 = vsel %vm16821_vm10, %v15403_v4, %v5102_v38  ;;  %v16016_v34 = vpop.f32.mrf.mxu2  ;;  %v9196_v4 = vld [vmem:[#allocation2 + $0x248] sm:$0xf]  ;;  %v10235_v20 = vld [vmem:[#allocation2 + $0x6b4] sm:$0xf0]  ;;  %v10233_v57 = vld [vmem:[#allocation2 + $0x6ac] sm:$0xf] }
 0x7f8   : > { %7656 = vmatpush.bf16.msra.mxu3 %v9249_v24  ;;  %v5135_v55 = vmul.f32 %v5121_v39, %v16804_v7  ;;  %v5136_v2 = vmul.f32 %v5117_v52, %v16805_v6  ;;  %v9420_v7 = vld [vmem:[#allocation2 + $0x408] sm:$0xf]  ;;  %v9197_v6 = vor.u32 %v10095_v16, %v9196_v4  ;;  %v10077_v24 = vld [vmem:[#allocation2 + $0x1cc] sm:$0xf]  ;;  %v9761_v25 = vor.u32 %v10233_v57, %v9758_v29  ;;  %v9742_v4 = vld [vmem:[#allocation2 + $0x698] sm:$0xf0] }
 0x7f9   : > { %v16018_v19 = vpop.f32.mrf.mxu3  ;;  %v9137_v47 = vor.u32 %v10077_v24, %v9134_v44  ;;  %v9164_v33 = vld [vmem:[#allocation2 + $0x208] sm:$0xf]  ;;  %v10085_v52 = vld [vmem:[#allocation2 + $0x20c] sm:$0xf]  ;;  %v9102_v14 = vld [vmem:[#allocation2 + $0x198] sm:$0xf0] }
 0x7fa   : > { %7523 = vmatpush.bf16.msrb.mxu0 %v9245_v37  ;;  %v5150_v56 = vpack.c.bf16 %v5136_v2, %v5135_v55  ;;  %v9180_v37 = vld [vmem:[#allocation2 + $0x228] sm:$0xf]  ;;  %v9165_v53 = vor.u32 %v10087_v48, %v9164_v33  ;;  %v9118_v55 = vld [vmem:[#allocation2 + $0x1b8] sm:$0xf0]  ;;  %v9169_v2 = vor.u32 %v10085_v52, %v9166_v60  ;;  %v10073_v61 = vld [vmem:[#allocation2 + $0x1ac] sm:$0xf] }
 0x7fb   : > { %v10123_v49 = vld [vmem:[#allocation2 + $0x334] sm:$0xf0]  ;;  %v9181_v15 = vor.u32 %v10091_v3, %v9180_v37  ;;  %v10229_v42 = vld [vmem:[#allocation2 + $0x68c] sm:$0xf]  ;;  %v9724_v44 = vld [vmem:[#allocation2 + $0x668] sm:$0xf] }
 0x7fc   : > { %7657 = vmatpush.bf16.msra.mxu3 %v9233_v59  ;;  %v9309_v41 = vor.u32 %v10123_v49, %v9308_v0  ;;  %5158 = vst [vmem:[#allocation2 + $0x308] sm:$0xff] %v5150_v56  ;;  %v10119_v59 = vld [vmem:[#allocation2 + $0x314] sm:$0xf0]  ;;  %v16029_v16 = vpop.f32.mrf.mxu1  ;;  %v9121_v49 = vor.u32 %v10073_v61, %v9118_v55  ;;  %v8990_v5 = vld [vmem:[#allocation2 + $0xb8] sm:$0xf0] }
 0x7fd   : > { %v10151_v58 = vld [vmem:[#allocation2 + $0x414] sm:$0xf0]  ;;  %v10041_v33 = vld [vmem:[#allocation2 + $0xac] sm:$0xf]  ;;  %v9708_v55 = vld [vmem:[#allocation2 + $0x648] sm:$0xf] }
 0x7fe   : > { %7524 = vmatpush.bf16.msrb.mxu0 %v9229_v12  ;;  %v9421_v10 = vor.u32 %v10151_v58, %v9420_v7  ;;  %7546 = vmatpush.bf16.msrb.mxu1 %v9309_v41  ;;  %v10231_v0 = vld [vmem:[#allocation2 + $0x694] sm:$0xf0]  ;;  %v10045_v41 = vld [vmem:[#allocation2 + $0xcc] sm:$0xf]  ;;  %v9740_v7 = vld [vmem:[#allocation2 + $0x688] sm:$0xf] }
 0x7ff   : > { %v16024_v12 = vpop.f32.mrf.mxu2  ;;  %v10069_v58 = vld [vmem:[#allocation2 + $0x18c] sm:$0xf]  ;;  %v10227_v24 = vld [vmem:[#allocation2 + $0x674] sm:$0xf0] }
 0x800   : > { %7658 = vmatpush.bf16.msra.mxu3 %v9217_v43  ;;  %7566 = vmatpush.bf16.msrb.mxu2 %v9421_v10  ;;  %v10049_v43 = vld [vmem:[#allocation2 + $0xec] sm:$0xf]  ;;  %v9741_v10 = vor.u32 %v10231_v0, %v9740_v7  ;;  %v9105_v37 = vor.u32 %v10069_v58, %v9102_v14  ;;  %v9725_v48 = vor.u32 %v10227_v24, %v9724_v44  ;;  %v10223_v29 = vld [vmem:[#allocation2 + $0x654] sm:$0xf0]  ;;  %v9694_v7 = vld [vmem:[#allocation2 + $0x638] sm:$0xf0] }
 0x801   : > { %v16026_v38 = vpop.f32.mrf.mxu3  ;;  %7591 = vmatmul.bf16.gmra.mxu3 %v15712_v17  ;;  %v9025_v56 = vor.u32 %v10049_v43, %v9022_v26  ;;  %v9726_v26 = vld [vmem:[#allocation2 + $0x678] sm:$0xf0]  ;;  %v9709_v57 = vor.u32 %v10223_v29, %v9708_v55  ;;  %v10221_v43 = vld [vmem:[#allocation2 + $0x64c] sm:$0xf] }
 0x802   : > { %7525 = vmatpush.bf16.msrb.mxu0 %v9213_v27  ;;  %v9757_v27 = vor.u32 %v10235_v20, %v9756_v36  ;;  %v8974_v36 = vld [vmem:[#allocation2 + $0x98] sm:$0xf0]  ;;  %v10061_v0 = vld [vmem:[#allocation2 + $0x14c] sm:$0xf] }
 0x803   : > { %7458 = vmatmul.bf16.gmra.mxu0 %v15712_v17  ;;  %7567 = vmatmul.bf16.vlgmr.msrb.gmra.mxu2 %v15782_v22  ;;  %v9292_v1 = vld [vmem:[#allocation2 + $0x308] sm:$0xf]  ;;  %v10033_v58 = vld [vmem:[#allocation2 + $0x6c] sm:$0xf] }
 0x804   : > { %7659 = vmatpush.bf16.msra.mxu3 %v9201_v40  ;;  %7635 = vmatpush.bf16.msra.mxu2 %v9153_v13  ;;  %v9293_v39 = vor.u32 %v10119_v59, %v9292_v1  ;;  %v9006_v40 = vld [vmem:[#allocation2 + $0xd8] sm:$0xf0]  ;;  %v9745_v13 = vor.u32 %v10229_v42, %v9742_v4  ;;  %v8993_v1 = vor.u32 %v10041_v33, %v8990_v5  ;;  %v10065_v59 = vld [vmem:[#allocation2 + $0x16c] sm:$0xf]  ;;  %v10215_v33 = vld [vmem:[#allocation2 + $0x614] sm:$0xf0] }
 0x805   : > { %v9009_v3 = vor.u32 %v10045_v41, %v9006_v40  ;;  %v10057_v42 = vld [vmem:[#allocation2 + $0x12c] sm:$0xf] }
 0x806   : > { %7526 = vmatpush.bf16.msrb.mxu0 %v9197_v6  ;;  %7547 = vmatpush.bf16.msrb.mxu1 %v9293_v39  ;;  %v16031_v6 = vpop.f32.mrf.mxu0  ;;  %v9710_v39 = vld [vmem:[#allocation2 + $0x658] sm:$0xf0] }
 0x808   : > { %7660 = vmatpush.bf16.msra.mxu3 %v9185_v8  ;;  %7636 = vmatpush.bf16.msra.mxu2 %v9137_v47  ;;  %v9086_v8 = vld [vmem:[#allocation2 + $0x178] sm:$0xf0]  ;;  %v16034_v47 = vpop.f32.mrf.mxu2 }
 0x809   : > { %7548 = vmatmul.bf16.vlgmr.msrb.gmra.mxu1 %v16822_v45  ;;  %v16036_v60 = vpop.f32.mrf.mxu3  ;;  %v9089_v52 = vor.u32 %v10065_v59, %v9086_v8  ;;  %v10213_v8 = vld [vmem:[#allocation2 + $0x60c] sm:$0xf] }
 0x80a   : > { %7527 = vmatpush.bf16.msrb.mxu0 %v9181_v15  ;;  %7616 = vmatpush.bf16.msra.mxu1 %v9025_v56  ;;  %v10225_v15 = vld [vmem:[#allocation2 + $0x66c] sm:$0xf]  ;;  %v9713_v56 = vor.u32 %v10221_v43, %v9710_v39 }
 0x80b   : > { %v9729_v20 = vor.u32 %v10225_v15, %v9726_v26  ;;  %v9676_v15 = vld [vmem:[#allocation2 + $0x608] sm:$0xf]  ;;  %v10029_v39 = vld [vmem:[#allocation2 + $0x4c] sm:$0xf] }
 0x80c   : > { %7661 = vmatpush.bf16.msra.mxu3 %v9169_v2  ;;  %7637 = vmatpush.bf16.msra.mxu2 %v9121_v49  ;;  %v9070_v2 = vld [vmem:[#allocation2 + $0x158] sm:$0xf0]  ;;  %v10219_v49 = vld [vmem:[#allocation2 + $0x634] sm:$0xf0]  ;;  %v9677_v29 = vor.u32 %v10215_v33, %v9676_v15  ;;  %v10201_v33 = vld [vmem:[#allocation2 + $0x5ac] sm:$0xf] }
 0x80d   : > { %v9073_v41 = vor.u32 %v10061_v0, %v9070_v2  ;;  %v9374_v15 = vld [vmem:[#allocation2 + $0x3b8] sm:$0xf0] }
 0x80e   : > { %7528 = vmatpush.bf16.msrb.mxu0 %v9165_v53  ;;  %7617 = vmatpush.bf16.msra.mxu1 %v9009_v3  ;;  %v16038_v53 = vpop.f32.mrf.mxu1  ;;  %v16042_v4 = vpop.f32.mrf.mxu0  ;;  %v8958_v3 = vld [vmem:[#allocation2 + $0x78] sm:$0xf0] }
 0x80f   : > { %v8961_v44 = vor.u32 %v10033_v58, %v8958_v3  ;;  %v10025_v58 = vld [vmem:[#allocation2 + $0x2c] sm:$0xf] }
 0x810   : > { %7732 = vmatpush.bf16.msrb.mxu3 %v9761_v25  ;;  %7638 = vmatpush.bf16.msra.mxu2 %v9105_v37  ;;  %v10037_v25 = vld [vmem:[#allocation2 + $0x8c] sm:$0xf]  ;;  %v9054_v37 = vld [vmem:[#allocation2 + $0x138] sm:$0xf0]  ;;  %v16045_v5 = vpop.f32.mrf.mxu2 }
 0x811   : > { %v8977_v61 = vor.u32 %v10037_v25, %v8974_v36  ;;  %v9057_v24 = vor.u32 %v10057_v42, %v9054_v37  ;;  %v16047_v26 = vpop.f32.mrf.mxu3  ;;  %v9662_v36 = vld [vmem:[#allocation2 + $0x5f8] sm:$0xf0]  ;;  %v10205_v3 = vld [vmem:[#allocation2 + $0x5cc] sm:$0xf] }
 0x812   : > { %7599 = vmatpush.bf16.msra.mxu0 %v9757_v27  ;;  %7618 = vmatpush.bf16.msra.mxu1 %v8993_v1  ;;  %v16823_v27 = vld [vmem:[#allocation52_spill] sm:$0xff]  ;;  %v9406_v1 = vld [vmem:[#allocation2 + $0x3f8] sm:$0xf0] }
 0x813   : > { %7529 = vmatmul.bf16.vlgmr.msrb.gmra.mxu0 %v16823_v27  ;;  %7572 = vmatmul.bf16.gmra.mxu2 %v15836_v46 }
 0x814   : > { %7733 = vmatpush.bf16.msrb.mxu3 %v9745_v13  ;;  %7639 = vmatpush.bf16.msra.mxu2 %v9089_v52  ;;  %v10217_v13 = vld [vmem:[#allocation2 + $0x62c] sm:$0xf]  ;;  %v9678_v52 = vld [vmem:[#allocation2 + $0x618] sm:$0xf0] }
 0x815   : > { %7662 = vmatmul.bf16.vlgmr.msra.gmra.mxu3 %v16823_v27  ;;  %v9697_v14 = vor.u32 %v10217_v13, %v9694_v7  ;;  %v9681_v55 = vor.u32 %v10213_v8, %v9678_v52  ;;  %v10053_v27 = vld [vmem:[#allocation2 + $0x10c] sm:$0xf]  ;;  %v16054_v7 = vpop.permute.xlu0 %6043 }
 0x816   : > { %7600 = vmatpush.bf16.msra.mxu0 %v9741_v10  ;;  %7619 = vmatpush.bf16.msra.mxu1 %v8977_v61  ;;  %v9692_v10 = vld [vmem:[#allocation2 + $0x628] sm:$0xf]  ;;  %v16049_v59 = vpop.f32.mrf.mxu1  ;;  %v8926_v61 = vld [vmem:[#allocation2 + $0x38] sm:$0xf0]  ;;  %v10137_v52 = vld [vmem:[#allocation2 + $0x3ac] sm:$0xf] }
 0x817   : > { %v9693_v40 = vor.u32 %v10219_v49, %v9692_v10  ;;  %v10141_v49 = vld [vmem:[#allocation2 + $0x3cc] sm:$0xf]  ;;  %v9646_v10 = vld [vmem:[#allocation2 + $0x5d8] sm:$0xf0]  ;;  %v8929_v42 = vor.u32 %v10025_v58, %v8926_v61 }
 0x818   : > { %7734 = vmatpush.bf16.msrb.mxu3 %v9729_v20  ;;  %7640 = vmatpush.bf16.msra.mxu2 %v9073_v41  ;;  %v9038_v20 = vld [vmem:[#allocation2 + $0x118] sm:$0xf0]  ;;  %v16052_v41 = vpop.f32.mrf.mxu0  ;;  %v9649_v37 = vor.u32 %v10205_v3, %v9646_v10  ;;  %v16058_v8 = vpop.f32.mrf.mxu2  ;;  %v10173_v58 = vld [vmem:[#allocation2 + $0x4cc] sm:$0xf] }
 0x819   : > { %7553 = vmatmul.bf16.gmra.mxu1 %v15624_v23  ;;  %v9041_v43 = vor.u32 %v10053_v27, %v9038_v20  ;;  %v16060_v20 = vpop.f32.mrf.mxu3  ;;  %v9502_v3 = vld [vmem:[#allocation2 + $0x4b8] sm:$0xf0] }
 0x81a   : > { %7601 = vmatpush.bf16.msra.mxu0 %v9725_v48  ;;  %v8942_v48 = vld [vmem:[#allocation2 + $0x58] sm:$0xf0]  ;;  %7620 = vmatpush.bf16.msra.mxu1 %v8961_v44  ;;  %v7227_v44 = vadd.f32 %v16031_v6, %v16054_v7  ;;  %v9377_v6 = vor.u32 %v10137_v52, %v9374_v15  ;;  %v10169_v15 = vld [vmem:[#allocation2 + $0x4ac] sm:$0xf] }
 0x81b   : > { %v8945_v2 = vor.u32 %v10029_v39, %v8942_v48  ;;  %v8910_v48 = vld [vmem:[#allocation2 + $0x18] sm:$0xf0] }
 0x81c   : > { %7735 = vmatpush.bf16.msrb.mxu3 %v9713_v56  ;;  %7641 = vmatpush.bf16.msra.mxu2 %v9057_v24  ;;  %v10209_v56 = vld [vmem:[#allocation2 + $0x5ec] sm:$0xf]  ;;  %v9534_v39 = vld [vmem:[#allocation2 + $0x4f8] sm:$0xf0] }
 0x81d   : > { %v9665_v0 = vor.u32 %v10209_v56, %v9662_v36  ;;  %v10177_v24 = vld [vmem:[#allocation2 + $0x4ec] sm:$0xf]  ;;  %v16067_v56 = vpop.permute.xlu1 %6048 }
 0x81e   : > { %7602 = vmatpush.bf16.msra.mxu0 %v9709_v57  ;;  %v10145_v57 = vld [vmem:[#allocation2 + $0x3ec] sm:$0xf]  ;;  %7621 = vmatpush.bf16.msra.mxu1 %v8945_v2  ;;  %v16063_v36 = vpop.f32.mrf.mxu1  ;;  %v9630_v2 = vld [vmem:[#allocation2 + $0x5b8] sm:$0xf0] }
 0x81f   : > { %v9409_v25 = vor.u32 %v10145_v57, %v9406_v1  ;;  %v16824_v1 = vld [vmem:[#allocation53_spill] sm:$0xff]  ;;  %v9633_v27 = vor.u32 %v10201_v33, %v9630_v2  ;;  %v9358_v57 = vld [vmem:[#allocation2 + $0x398] sm:$0xf0]  ;;  %v9505_v33 = vor.u32 %v10169_v15, %v9502_v3 }
 0x820   : > { %7736 = vmatpush.bf16.msrb.mxu3 %v9697_v14  ;;  %7642 = vmatpush.bf16.msra.mxu2 %v9041_v43  ;;  %v10021_v14 = vld [vmem:[#allocation2 + $0xc] sm:$0xf]  ;;  %v9518_v43 = vld [vmem:[#allocation2 + $0x4d8] sm:$0xf0]  ;;  %v16069_v61 = vpop.f32.mrf.mxu0 }
 0x821   : > { %v10189_v2 = vld [vmem:[#allocation2 + $0x54c] sm:$0xf] }
 0x822   : > { %7603 = vmatpush.bf16.msra.mxu0 %v9693_v40  ;;  %v9390_v40 = vld [vmem:[#allocation2 + $0x3d8] sm:$0xf0]  ;;  %7622 = vmatpush.bf16.msra.mxu1 %v8929_v42  ;;  %v10197_v42 = vld [vmem:[#allocation2 + $0x58c] sm:$0xf] }
 0x823   : > { %v9393_v13 = vor.u32 %v10141_v49, %v9390_v40  ;;  %7534 = vmatmul.bf16.gmra.mxu0 %v16824_v1  ;;  %7643 = vmatmul.bf16.vlgmr.msra.gmra.mxu2 %v16799_v18  ;;  %v10133_v49 = vld [vmem:[#allocation2 + $0x38c] sm:$0xf]  ;;  %v9521_v18 = vor.u32 %v10173_v58, %v9518_v43  ;;  %v7229_v40 = vadd.f32 %v16042_v4, %v16067_v56  ;;  %v9486_v43 = vld [vmem:[#allocation2 + $0x498] sm:$0xf0] }
 0x824   : > { %7737 = vmatpush.bf16.msrb.mxu3 %v9681_v55  ;;  %7711 = vmatpush.bf16.msrb.mxu2 %v9665_v0  ;;  %v9537_v55 = vor.u32 %v10177_v24, %v9534_v39  ;;  %v9614_v0 = vld [vmem:[#allocation2 + $0x598] sm:$0xf0]  ;;  %v9361_v10 = vor.u32 %v10133_v49, %v9358_v57  ;;  %v16076_v24 = vpop.f32.mrf.mxu2  ;;  %v10125_v57 = vld [vmem:[#allocation2 + $0x34c] sm:$0xf] }
 0x825   : > { %7667 = vmatmul.bf16.gmra.mxu3 %v16824_v1  ;;  %v10193_v1 = vld [vmem:[#allocation2 + $0x56c] sm:$0xf]  ;;  %v7248_v4 = vadd.f32 %v16005_v32, %v7229_v40  ;;  %v9326_v39 = vld [vmem:[#allocation2 + $0x358] sm:$0xf0] }
 0x826   : > { %7604 = vmatpush.bf16.msra.mxu0 %v9677_v29  ;;  %v8913_v29 = vor.u32 %v10021_v14, %v8910_v48  ;;  %v9582_v32 = vld [vmem:[#allocation2 + $0x558] sm:$0xf0]  ;;  %v10161_v3 = vld [vmem:[#allocation2 + $0x46c] sm:$0xf] }
 0x827   : > { %v9585_v58 = vor.u32 %v10189_v2, %v9582_v32  ;;  %v9566_v40 = vld [vmem:[#allocation2 + $0x538] sm:$0xf0] }
 0x828   : > { %7712 = vmatpush.bf16.msrb.mxu2 %v9649_v37  ;;  %7623 = vmatpush.bf16.msra.mxu1 %v8913_v29  ;;  %v10129_v37 = vld [vmem:[#allocation2 + $0x36c] sm:$0xf]  ;;  %v16079_v29 = vpop.f32.mrf.mxu3 }
 0x82a   : > { %7673 = vmatpush.bf16.msrb.mxu0 %v9409_v25  ;;  %v7246_v25 = vadd.f32 %v15980_v35, %v7227_v44  ;;  %v9342_v35 = vld [vmem:[#allocation2 + $0x378] sm:$0xf0] }
 0x82b   : > { %v9598_v44 = vld [vmem:[#allocation2 + $0x578] sm:$0xf0]  ;;  %7624 = vmatmul.bf16.vlgmr.msra.gmra.mxu1 %v15417_v31  ;;  %v9345_v48 = vor.u32 %v10129_v37, %v9342_v35  ;;  %v10121_v35 = vld [vmem:[#allocation2 + $0x32c] sm:$0xf]  ;;  %v10407_v37 = vld [vmem:[%s10805_s19] sm:$0xff] }
 0x82c   : > { %7692 = vmatpush.bf16.msrb.mxu1 %v9537_v55  ;;  %7713 = vmatpush.bf16.msrb.mxu2 %v9633_v27  ;;  %v7265_v14 = vadd.f32 %v15968_v54, %v7246_v25  ;;  %v9601_v52 = vor.u32 %v10193_v1, %v9598_v44  ;;  %v16082_v55 = vpop.f32.mrf.mxu1  ;;  %v9329_v25 = vor.u32 %v10125_v57, %v9326_v39  ;;  %v10185_v44 = vld [vmem:[#allocation2 + $0x52c] sm:$0xf]  ;;  %v9550_v39 = vld [vmem:[#allocation2 + $0x518] sm:$0xf0] }
 0x82d   : > { %v10117_v1 = vld [vmem:[#allocation2 + $0x30c] sm:$0xf] }
 0x82e   : > { %7674 = vmatpush.bf16.msrb.mxu0 %v9393_v13  ;;  %v9617_v13 = vor.u32 %v10197_v42, %v9614_v0  ;;  %v7284_v54 = vadd.f32 %v15982_v9, %v7265_v14  ;;  %v7302_v31 = vpop.f32.mrf.mxu0  ;;  %v9470_v9 = vld [vmem:[#allocation2 + $0x478] sm:$0xf0]  ;;  %v16086_v42 = vpop.permute.xlu2 %6053  ;;  %v10181_v57 = vld [vmem:[#allocation2 + $0x50c] sm:$0xf] }
 0x82f   : > { %v9473_v14 = vor.u32 %v10161_v3, %v9470_v9  ;;  %v9553_v32 = vor.u32 %v10181_v57, %v9550_v39 }
 0x830   : > { %7693 = vmatpush.bf16.msrb.mxu1 %v9521_v18  ;;  %7714 = vmatpush.bf16.msrb.mxu2 %v9617_v13  ;;  %v7303_v27 = vadd.f32 %v7302_v31, %v7284_v54  ;;  %v7267_v18 = vadd.f32 %v16001_v11, %v7248_v4  ;;  %v7232_v11 = vadd.f32 %v16052_v41, %v16086_v42  ;;  %v9454_v4 = vld [vmem:[#allocation2 + $0x458] sm:$0xf0]  ;;  %v10157_v31 = vld [vmem:[#allocation2 + $0x44c] sm:$0xf] }
 0x831   : > { %v9294_v41 = vld [vmem:[#allocation2 + $0x318] sm:$0xf0] }
 0x832   : > { %7675 = vmatpush.bf16.msrb.mxu0 %v9377_v6  ;;  %v10165_v6 = vld [vmem:[#allocation2 + $0x48c] sm:$0xf]  ;;  %v7322_v49 = vadd.f32 %v16038_v53, %v7303_v27  ;;  %v9297_v2 = vor.u32 %v10117_v1, %v9294_v41  ;;  %v9457_v27 = vor.u32 %v10157_v31, %v9454_v4  ;;  %v10410_v1 = vld [vmem:[%s10805_s19 + $0x60] sm:$0xff] }
 0x833   : > { %v9489_v0 = vor.u32 %v10165_v6, %v9486_v43  ;;  %9766 = vmatmul.msk.bf16.vlgmr.msra.gmra.mxu0 %vm3570_vm15, %v15663_v62  ;;  %7648 = vmatmul.bf16.gmra.mxu2 %v16808_v30  ;;  %v16100_v6 = vpop.f32.mrf.mxu2  ;;  %v7251_v43 = vadd.f32 %v16020_v63, %v7232_v11  ;;  %v10409_v11 = vld [vmem:[%s10805_s19 + $0x40] sm:$0xff] }
 0x834   : > { %7694 = vmatpush.bf16.msrb.mxu1 %v9505_v33  ;;  %7715 = vmatpush.bf16.msrb.mxu2 %v9601_v52  ;;  %v7341_v13 = vadd.f32 %v16034_v47, %v7322_v49  ;;  %v9569_v47 = vor.u32 %v10185_v44, %v9566_v40  ;;  %v7286_v33 = vadd.f32 %v16003_v51, %v7267_v18  ;;  %v16098_v52 = vpop.permute.xlu0 %6058  ;;  %v16107_v51 = vpop.f32.mrf.mxu1  ;;  %v10153_v49 = vld [vmem:[#allocation2 + $0x42c] sm:$0xf]  ;;  %v10408_v18 = vld [vmem:[%s10805_s19 + $0x20] sm:$0xff]  ;;  %v9422_v40 = vld [vmem:[#allocation2 + $0x418] sm:$0xf0] }
 0x835   : > { %9768 = vmatmul.msk.bf16.vlgmr.msrb.gmra.mxu3 %vm3570_vm15, %v15663_v62 }
 0x836   : > { %7676 = vmatpush.bf16.msrb.mxu0 %v9361_v10  ;;  %v9310_v10 = vld [vmem:[#allocation2 + $0x338] sm:$0xf0]  ;;  %v7749_v15 = vadd.f32 %v10407_v37, %v7341_v13  ;;  %v7304_v54 = vpop.f32.mrf.mxu0 }
 0x837   : > { %v9313_v53 = vor.u32 %v10121_v35, %v9310_v10  ;;  %v7305_v30 = vadd.f32 %v7304_v54, %v7286_v33  ;;  %v9438_v10 = vld [vmem:[#allocation2 + $0x438] sm:$0xf0] }
 0x838   : > { %7695 = vmatpush.bf16.msrb.mxu1 %v9489_v0  ;;  %7716 = vmatpush.bf16.msrb.mxu2 %v9585_v58  ;;  %7765 = vst [vmem:[%s16104_s1] sm:$0xff] %v7749_v15  ;;  %v7270_v58 = vadd.f32 %v16016_v34, %v7251_v43  ;;  %v9441_v9 = vor.u32 %v10153_v49, %v9438_v10 }
 0x839   : > { %v7324_v0 = vadd.f32 %v16049_v59, %v7305_v30 }
 0x83a   : > { %7677 = vmatpush.bf16.msrb.mxu0 %v9345_v48  ;;  %v16095_v48 = vpop.f32.mrf.mxu3  ;;  %v7289_v63 = vadd.f32 %v16018_v19, %v7270_v58 }
 0x83b   : > { %v7343_v62 = vadd.f32 %v16045_v5, %v7324_v0  ;;  %7629 = vmatmul.bf16.gmra.mxu1 %v15466_v50  ;;  %v10149_v5 = vld [vmem:[#allocation2 + $0x40c] sm:$0xf] }
 0x83c   : > { %7696 = vmatpush.bf16.msrb.mxu1 %v9473_v14  ;;  %7717 = vmatpush.bf16.msrb.mxu2 %v9569_v47  ;;  %v9425_v3 = vor.u32 %v10149_v5, %v9422_v40  ;;  %v7399_v14 = vpop.f32.mrf.mxu1 }
 0x83d   : > { %v7753_v59 = vadd.f32 %v10408_v18, %v7343_v62 }
 0x83e   : > { %7678 = vmatpush.bf16.msrb.mxu0 %v9329_v25  ;;  %v7234_v25 = vadd.f32 %v16069_v61, %v16098_v52  ;;  %v7307_v35 = vpop.f32.mrf.mxu0 }
 0x83f   : > { %7769 = vst [vmem:[%s16104_s1 + $0x20] sm:$0xff] %v7753_v59  ;;  %v7308_v34 = vadd.f32 %v7307_v35, %v7289_v63  ;;  %v10411_v63 = vld [vmem:[%s10805_s19 + $0x8] sm:$0xff] }
 0x840   : > { %7697 = vmatpush.bf16.msrb.mxu1 %v9457_v27  ;;  %7718 = vmatpush.bf16.msrb.mxu2 %v9553_v32  ;;  %v7253_v61 = vadd.f32 %v16029_v16, %v7234_v25 }
 0x841   : > { %v7327_v19 = vadd.f32 %v16063_v36, %v7308_v34 }
 0x842   : > { %7679 = vmatpush.bf16.msrb.mxu0 %v9313_v53  ;;  %v16121_v13 = vpop.f32.mrf.mxu3  ;;  %v7272_v50 = vadd.f32 %v16024_v12, %v7253_v61  ;;  %v7418_v53 = vpop.f32.mrf.mxu2 }
 0x843   : > { %v7346_v16 = vadd.f32 %v16058_v8, %v7327_v19  ;;  %9767 = vmatmul.msk.bf16.gmra.mxu0 %vm3570_vm15, %v15714_v28  ;;  %7719 = vmatmul.bf16.vlgmr.msrb.gmra.mxu2 %v15502_v21 }
 0x844   : > { %7698 = vmatpush.bf16.msrb.mxu1 %v9441_v9  ;;  %v7291_v44 = vadd.f32 %v16026_v38, %v7272_v50  ;;  %v7402_v21 = vpop.f32.mrf.mxu1  ;;  %v10412_v50 = vld [vmem:[%s10805_s19 + $0x28] sm:$0xff] }
 0x845   : > { %v7757_v37 = vadd.f32 %v10409_v11, %v7346_v16  ;;  %9769 = vmatmul.msk.bf16.gmra.mxu3 %vm3570_vm15, %v15714_v28 }
 0x846   : > { %7680 = vmatpush.bf16.msrb.mxu0 %v9297_v2  ;;  %v7309_v15 = vpop.f32.mrf.mxu0 }
 0x847   : > { %7773 = vst [vmem:[%s16104_s1 + $0x40] sm:$0xff] %v7757_v37  ;;  %v7310_v12 = vadd.f32 %v7309_v15, %v7291_v44 }
 0x848   : > { %7699 = vmatpush.bf16.msrb.mxu1 %v9425_v3 }
 0x849   : > { %v7329_v8 = vadd.f32 %v16082_v55, %v7310_v12  ;;  %v10413_v12 = vld [vmem:[%s10805_s19 + $0x48] sm:$0xff] }
 0x84a   : > { %v7440_v36 = vpop.f32.mrf.mxu3  ;;  %v7421_v47 = vpop.f32.mrf.mxu2 }
 0x84b   : > { %v7348_v33 = vadd.f32 %v16076_v24, %v7329_v8  ;;  %7700 = vmatmul.bf16.vlgmr.msrb.gmra.mxu1 %v15782_v22  ;;  %v7360_v22 = vadd.f32 %v16036_v60, %v16054_v7 }
 0x84c   : > { %v7404_v28 = vpop.f32.mrf.mxu1 }
 0x84d   : > { %v7761_v38 = vadd.f32 %v10410_v1, %v7348_v33 }
 0x84f   : > { %7777 = vst [vmem:[%s16104_s1 + $0x60] sm:$0xff] %v7761_v38 }
 0x850   : > { %v7378_v4 = vpop.f32.mrf.mxu0 }
 0x851   : > { %v7379_v2 = vadd.f32 %v7378_v4, %v7360_v22 }
 0x852   : > { %v7442_v54 = vpop.f32.mrf.mxu3  ;;  %v7423_v39 = vpop.f32.mrf.mxu2 }
 0x853   : > { %7681 = vmatmul.bf16.vlgmr.msrb.gmra.mxu0 %v16822_v45  ;;  %7724 = vmatmul.bf16.gmra.mxu2 %v15712_v17  ;;  %v7398_v45 = vadd.f32 %v16107_v51, %v7379_v2  ;;  %v7365_v51 = vadd.f32 %v16060_v20, %v16086_v42  ;;  %v7367_v20 = vadd.f32 %v16079_v29, %v16098_v52 }
 0x854   : > { %v7473_v31 = vpop.f32.mrf.mxu1 }
 0x855   : > { %v7417_v60 = vadd.f32 %v16100_v6, %v7398_v45 }
 0x857   : > { %v7436_v32 = vadd.f32 %v16095_v48, %v7417_v60 }
 0x858   : > { %v7380_v30 = vpop.f32.mrf.mxu0 }
 0x85a   : > { %v16143_v55 = vpop.f32.mrf.mxu3  ;;  %v16147_v41 = vpop.f32.mrf.mxu2 }
 0x85b   : > { %7705 = vmatmul.bf16.gmra.mxu1 %v15836_v46  ;;  %v7362_v46 = vadd.f32 %v16047_v26, %v16067_v56 }
 0x85c   : > { %v7475_v25 = vpop.f32.mrf.mxu1 }
 0x85d   : > { %v7381_v43 = vadd.f32 %v7380_v30, %v7362_v46 }
 0x85f   : > { %v7400_v0 = vadd.f32 %v7399_v14, %v7381_v43 }
 0x860   : > { %v7383_v24 = vpop.f32.mrf.mxu0 }
 0x861   : > { %v7384_v62 = vadd.f32 %v7383_v24, %v7365_v51  ;;  %v7419_v26 = vadd.f32 %v7418_v53, %v7400_v0 }
 0x862   : > { %v16151_v17 = vpop.f32.mrf.mxu3  ;;  %v16155_v57 = vpop.f32.mrf.mxu2 }
 0x863   : > { %7686 = vmatmul.bf16.gmra.mxu0 %v15624_v23  ;;  %v7403_v18 = vadd.f32 %v7402_v21, %v7384_v62  ;;  %v7438_v48 = vadd.f32 %v16121_v13, %v7419_v26 }
 0x864   : > { %v7478_v6 = vpop.f32.mrf.mxu1 }
 0x865   : > { %v7422_v5 = vadd.f32 %v7421_v47, %v7403_v18 }
 0x867   : > { %v7441_v16 = vadd.f32 %v7440_v36, %v7422_v5 }
 0x868   : > { %v7385_v27 = vpop.f32.mrf.mxu0 }
 0x869   : > { %v7386_v35 = vadd.f32 %v7385_v27, %v7367_v20 }
 0x86a   : > { %v16161_v58 = vpop.f32.mrf.mxu3  ;;  %v7497_v9 = vpop.f32.mrf.mxu2 }
 0x86b   : > { %v7405_v14 = vadd.f32 %v7404_v28, %v7386_v35  ;;  %v10414_v28 = vld [vmem:[%s10805_s19 + $0x68] sm:$0xff] }
 0x86c   : > { %v7480_v13 = vpop.f32.mrf.mxu1 }
 0x86d   : > { %v7424_v37 = vadd.f32 %v7423_v39, %v7405_v14 }
 0x86f   : > { %v7443_v47 = vadd.f32 %v7442_v54, %v7424_v37  ;;  %v7493_v54 = vadd.f32 %v16147_v41, %v16054_v7 }
 0x870   : > { %v7454_v23 = vpop.f32.mrf.mxu0 }
 0x871   : > { %v7455_v49 = vadd.f32 %v7454_v23, %v7436_v32  ;;  %v7512_v0 = vadd.f32 %v16143_v55, %v7493_v54  ;;  %v7495_v23 = vadd.f32 %v16155_v57, %v16067_v56 }
 0x872   : > { %v16168_v3 = vpop.f32.mrf.mxu3  ;;  %v7499_v19 = vpop.f32.mrf.mxu2 }
 0x873   : > { %v7474_v10 = vadd.f32 %v7473_v31, %v7455_v49  ;;  %v7514_v26 = vadd.f32 %v16151_v17, %v7495_v23 }
 0x875   : > { %v7750_v61 = vadd.f32 %v10411_v63, %v7474_v10 }
 0x877   : > { %7766 = vst [vmem:[%s16104_s1 + $0x8] sm:$0xff] %v7750_v61 }
 0x878   : > { %v7456_v59 = vpop.f32.mrf.mxu0 }
 0x879   : > { %v7457_v40 = vadd.f32 %v7456_v59, %v7438_v48 }
 0x87a   : > { %v7587_v15 = vpop.f32.mrf.mxu3 }
 0x87b   : > { %v7476_v34 = vadd.f32 %v7475_v25, %v7457_v40 }
 0x87d   : > { %v7754_v53 = vadd.f32 %v10412_v50, %v7476_v34  ;;  %v10415_v34 = vld [vmem:[%s10805_s19 + $0x10] sm:$0xff] }
 0x87f   : > { %7770 = vst [vmem:[%s16104_s1 + $0x28] sm:$0xff] %v7754_v53  ;;  %v7500_v53 = vadd.f32 %v7499_v19, %v16098_v52 }
 0x880   : > { %v7459_v44 = vpop.f32.mrf.mxu0 }
 0x881   : > { %v7460_v11 = vadd.f32 %v7459_v44, %v7441_v16 }
 0x882   : > { %v7589_v36 = vpop.f32.mrf.mxu3 }
 0x883   : > { %v7479_v29 = vadd.f32 %v7478_v6, %v7460_v11  ;;  %v7498_v6 = vadd.f32 %v7497_v9, %v16086_v42 }
 0x885   : > { %v7758_v8 = vadd.f32 %v10413_v12, %v7479_v29  ;;  %v7517_v20 = vadd.f32 %v16161_v58, %v7498_v6  ;;  %v10416_v29 = vld [vmem:[%s10805_s19 + $0x30] sm:$0xff] }
 0x886   : > { %v7568_v33 = vpop.f32.mrf.mxu2  ;;  %v7549_v38 = vpop.f32.mrf.mxu1 }
 0x887   : > { %7774 = vst [vmem:[%s16104_s1 + $0x48] sm:$0xff] %v7758_v8 }
 0x888   : > { %v7461_v21 = vpop.f32.mrf.mxu0 }
 0x889   : > { %v7462_v1 = vadd.f32 %v7461_v21, %v7443_v47 }
 0x88a   : > { %v7592_v45 = vpop.f32.mrf.mxu3 }
 0x88b   : > { %v7481_v4 = vadd.f32 %v7480_v13, %v7462_v1  ;;  %v7519_v13 = vadd.f32 %v16168_v3, %v7500_v53  ;;  %v10417_v1 = vld [vmem:[%s10805_s19 + $0x50] sm:$0xff] }
 0x88d   : > { %v7762_v30 = vadd.f32 %v10414_v28, %v7481_v4 }
 0x88e   : > { %v7570_v24 = vpop.f32.mrf.mxu2  ;;  %v7551_v31 = vpop.f32.mrf.mxu1 }
 0x88f   : > { %7778 = vst [vmem:[%s16104_s1 + $0x68] sm:$0xff] %v7762_v30 }
 0x890   : > { %v7530_v22 = vpop.f32.mrf.mxu0 }
 0x891   : > { %v7531_v32 = vadd.f32 %v7530_v22, %v7512_v0 }
 0x892   : > { %v7594_v25 = vpop.f32.mrf.mxu3 }
 0x893   : > { %v7550_v51 = vadd.f32 %v7549_v38, %v7531_v32 }
 0x895   : > { %v7569_v41 = vadd.f32 %v7568_v33, %v7550_v51 }
 0x896   : > { %v7573_v2 = vpop.f32.mrf.mxu2  ;;  %v7554_v27 = vpop.f32.mrf.mxu1 }
 0x897   : > { %v7588_v48 = vadd.f32 %v7587_v15, %v7569_v41  ;;  %v10419_v41 = vld [vmem:[%s10805_s19 + $0x18] sm:$0xff] }
 0x898   : > { %v7532_v39 = vpop.f32.mrf.mxu0 }
 0x899   : > { %v7533_v61 = vadd.f32 %v7532_v39, %v7514_v26  ;;  %v10418_v39 = vld [vmem:[%s10805_s19 + $0x70] sm:$0xff] }
 0x89a   : > { %v7663_v63 = vpop.f32.mrf.mxu3 }
 0x89b   : > { %v7552_v18 = vadd.f32 %v7551_v31, %v7533_v61 }
 0x89d   : > { %v7571_v17 = vadd.f32 %v7570_v24, %v7552_v18 }
 0x89e   : > { %v7575_v46 = vpop.f32.mrf.mxu2  ;;  %v7556_v43 = vpop.f32.mrf.mxu1 }
 0x89f   : > { %v7590_v9 = vadd.f32 %v7589_v36, %v7571_v17 }
 0x8a0   : > { %v7535_v60 = vpop.f32.mrf.mxu0 }
 0x8a1   : > { %v7536_v35 = vadd.f32 %v7535_v60, %v7517_v20 }
 0x8a2   : > { %v7665_v50 = vpop.f32.mrf.mxu3 }
 0x8a3   : > { %v7555_v14 = vadd.f32 %v7554_v27, %v7536_v35  ;;  %v10420_v35 = vld [vmem:[%s10805_s19 + $0x38] sm:$0xff] }
 0x8a5   : > { %v7574_v15 = vadd.f32 %v7573_v2, %v7555_v14 }
 0x8a6   : > { %v7644_v49 = vpop.f32.mrf.mxu2 }
 0x8a7   : > { %v7593_v33 = vadd.f32 %v7592_v45, %v7574_v15 }
 0x8a8   : > { %v7537_v62 = vpop.f32.mrf.mxu0  ;;  %v7625_v10 = vpop.f32.mrf.mxu1 }
 0x8a9   : > { %v7538_v11 = vadd.f32 %v7537_v62, %v7519_v13  ;;  %v7626_v30 = vadd.f32 %v7625_v10, %v16054_v7 }
 0x8aa   : > { %v7668_v8 = vpop.f32.mrf.mxu3 }
 0x8ab   : > { %v7557_v47 = vadd.f32 %v7556_v43, %v7538_v11  ;;  %v7645_v2 = vadd.f32 %v7644_v49, %v7626_v30 }
 0x8ad   : > { %v7576_v4 = vadd.f32 %v7575_v46, %v7557_v47  ;;  %v7664_v43 = vadd.f32 %v7663_v63, %v7645_v2 }
 0x8ae   : > { %v7646_v40 = vpop.f32.mrf.mxu2 }
 0x8af   : > { %v7595_v36 = vadd.f32 %v7594_v25, %v7576_v4 }
 0x8b0   : > { %v7606_v55 = vpop.f32.mrf.mxu0  ;;  %v7627_v59 = vpop.f32.mrf.mxu1 }
 0x8b1   : > { %v7607_v57 = vadd.f32 %v7606_v55, %v7588_v48  ;;  %v7628_v60 = vadd.f32 %v7627_v59, %v16067_v56 }
 0x8b2   : > { %v7670_v24 = vpop.f32.mrf.mxu3 }
 0x8b3   : > { %v7751_v5 = vadd.f32 %v10415_v34, %v7607_v57  ;;  %v7647_v23 = vadd.f32 %v7646_v40, %v7628_v60 }
 0x8b5   : > { %7767 = vst [vmem:[%s16104_s1 + $0x10] sm:$0xff] %v7751_v5  ;;  %v7666_v62 = vadd.f32 %v7665_v50, %v7647_v23 }
 0x8b6   : > { %v7649_v12 = vpop.f32.mrf.mxu2 }
 0x8b8   : > { %v7608_v16 = vpop.f32.mrf.mxu0  ;;  %v7630_v58 = vpop.f32.mrf.mxu1 }
 0x8b9   : > { %v7609_v44 = vadd.f32 %v7608_v16, %v7590_v9  ;;  %v7631_v49 = vadd.f32 %v7630_v58, %v16086_v42 }
 0x8ba   : > { %v7739_v46 = vpop.f32.mrf.mxu3 }
 0x8bb   : > { %v7755_v37 = vadd.f32 %v10416_v29, %v7609_v44  ;;  %v7650_v18 = vadd.f32 %v7649_v12, %v7631_v49 }
 0x8bd   : > { %7771 = vst [vmem:[%s16104_s1 + $0x30] sm:$0xff] %v7755_v37  ;;  %v7669_v59 = vadd.f32 %v7668_v8, %v7650_v18 }
 0x8be   : > { %v7651_v28 = vpop.f32.mrf.mxu2 }
 0x8c0   : > { %v7611_v19 = vpop.f32.mrf.mxu0  ;;  %v7632_v3 = vpop.f32.mrf.mxu1 }
 0x8c1   : > { %v7612_v21 = vadd.f32 %v7611_v19, %v7593_v33  ;;  %v7633_v20 = vadd.f32 %v7632_v3, %v16098_v52  ;;  %v10421_v52 = vld [vmem:[%s10805_s19 + $0x58] sm:$0xff] }
 0x8c2   : > { %v7741_v56 = vpop.f32.mrf.mxu3  ;;  %v10422_v33 = vld [vmem:[%s10805_s19 + $0x78] sm:$0xff] }
 0x8c3   : > { %v7759_v38 = vadd.f32 %v10417_v1, %v7612_v21  ;;  %v7652_v50 = vadd.f32 %v7651_v28, %v7633_v20 }
 0x8c5   : > { %7775 = vst [vmem:[%s16104_s1 + $0x50] sm:$0xff] %v7759_v38  ;;  %v7671_v16 = vadd.f32 %v7670_v24, %v7652_v50 }
 0x8c6   : > { %v7720_v45 = vpop.f32.mrf.mxu2 }
 0x8c8   : > { %v7613_v22 = vpop.f32.mrf.mxu0  ;;  %v7701_v54 = vpop.f32.mrf.mxu1 }
 0x8c9   : > { %v7614_v31 = vadd.f32 %v7613_v22, %v7595_v36 }
 0x8ca   : > { %v7744_v14 = vpop.f32.mrf.mxu3 }
 0x8cb   : > { %v7763_v27 = vadd.f32 %v10418_v39, %v7614_v31 }
 0x8cd   : > { %7779 = vst [vmem:[%s16104_s1 + $0x70] sm:$0xff] %v7763_v27 }
 0x8ce   : > { %v7722_v26 = vpop.f32.mrf.mxu2 }
 0x8d0   : > { %v7682_v0 = vpop.f32.mrf.mxu0  ;;  %v7703_v51 = vpop.f32.mrf.mxu1 }
 0x8d1   : > { %v7683_v32 = vadd.f32 %v7682_v0, %v7664_v43 }
 0x8d2   : > { %v7746_v8 = vpop.f32.mrf.mxu3 }
 0x8d3   : > { %v7702_v7 = vadd.f32 %v7701_v54, %v7683_v32 }
 0x8d5   : > { %v7721_v25 = vadd.f32 %v7720_v45, %v7702_v7 }
 0x8d6   : > { %v7725_v17 = vpop.f32.mrf.mxu2 }
 0x8d7   : > { %v7740_v10 = vadd.f32 %v7739_v46, %v7721_v25 }
 0x8d8   : > { %v7684_v61 = vpop.f32.mrf.mxu0  ;;  %v7706_v42 = vpop.f32.mrf.mxu1 }
 0x8d9   : > { %v7752_v6 = vadd.f32 %v10419_v41, %v7740_v10  ;;  %v7685_v63 = vadd.f32 %v7684_v61, %v7666_v62 }
 0x8db   : > { %7768 = vst [vmem:[%s16104_s1 + $0x18] sm:$0xff] %v7752_v6  ;;  %v7704_v48 = vadd.f32 %v7703_v51, %v7685_v63 }
 0x8dd   : > { %v7723_v55 = vadd.f32 %v7722_v26, %v7704_v48 }
 0x8de   : > { %v7727_v15 = vpop.f32.mrf.mxu2 }
 0x8df   : > { %v7742_v57 = vadd.f32 %v7741_v56, %v7723_v55 }
 0x8e0   : > { %v7687_v40 = vpop.f32.mrf.mxu0  ;;  %v7708_v29 = vpop.f32.mrf.mxu1 }
 0x8e1   : > { %v7756_v34 = vadd.f32 %v10420_v35, %v7742_v57  ;;  %v7688_v5 = vadd.f32 %v7687_v40, %v7669_v59 }
 0x8e3   : > { %7772 = vst [vmem:[%s16104_s1 + $0x38] sm:$0xff] %v7756_v34  ;;  %v7707_v53 = vadd.f32 %v7706_v42, %v7688_v5 }
 0x8e5   : > { %v7726_v9 = vadd.f32 %v7725_v17, %v7707_v53 }
 0x8e7   : > { %v7745_v13 = vadd.f32 %v7744_v14, %v7726_v9 }
 0x8e8   : > { %v7689_v44 = vpop.f32.mrf.mxu0 }
 0x8e9   : > { %v7760_v58 = vadd.f32 %v10421_v52, %v7745_v13  ;;  %v7690_v11 = vadd.f32 %v7689_v44, %v7671_v16 }
 0x8eb   : > { %7776 = vst [vmem:[%s16104_s1 + $0x58] sm:$0xff] %v7760_v58  ;;  %v7709_v37 = vadd.f32 %v7708_v29, %v7690_v11 }
 0x8ed   : > { %v7728_v12 = vadd.f32 %v7727_v15, %v7709_v37 }
 0x8ef   : > { %v7747_v47 = vadd.f32 %v7746_v8, %v7728_v12 }
 0x8f1   : > { %v7764_v19 = vadd.f32 %v10422_v33, %v7747_v47 }
 0x8f3   : > { %7780 = vst [vmem:[%s16104_s1 + $0x78] sm:$0xff] %v7764_v19 }
 0x8f4   : > { %10570 = shalt.err (!%p10567_p10)
}
 0x8f5   : > { %s10645_s18 = smov 512   ;;  %s10646_s19 = smov 1024  }
 0x8f6   : > { %s10647_s1 = smov 32  }
 0x8f7   : > { %10251 = dma.vmem_to_hbm [thread:$0]  (%p10769_p7), %s7795_s12, 2048, %s7797_s13, %s7782_s25, %s10645_s18, %s10646_s19, %s10647_s1  }
 0x8f8 PF: > { %s7811_s27 = sand.u32 1, %s10605_s21   ;;  %p16826_p12 = scmp.ge.s32.totalorder %s10617_s24, 2 }
 0x8f9   : > { %s7812_s8 = scalar_lea.sflag [#allocation5], %s7811_s27 }
 0x8fa   : > { %p10268_p13 = pnand %p16826_p12, %p10718_p6 }
 0x8fc   : > { %p10269_p0 = pneg %p10268_p13 }
 0x8fe   : > { %10600 = dma.done.wait (%p10269_p0), %s7812_s8, 2048  }
 0x8ff   : > { %10602 = vsyncadd (%p10269_p0), %s7812_s8, 4294965248  ;;  %p21_p3 = scmp.ge.s32.totalorder %s10755_s10, 4   ;;  %s16827_s21 = smov %s10609_s22 }
 0x900   : > { %s16828_s22 = smov %s10613_s23  ;;  %s16829_s23 = smov %s10765_s14 }
 0x901   : > { %s16830_s24 = smov %s10755_s10  ;;  %23 = sbr.rel (!%p21_p3) target bundleno = 9 (0x9), region = 101 }
 0x906   :  { %7818 = vsyncpa [#allocation4], 1 }
 0x907   :  { %7820 = vsyncpa [#allocation4 + $0x1], 1 }
 0x908   :  { %7821 = vsyncpa [#allocation7], 1 }
 0x909   :  { %7822 = vsyncpa [#allocation10], 1 }
 0x90a   :  { %7823 = vsyncpa [#allocation5], 1 }
 0x90b   :  { %7825 = vsyncpa [#allocation5 + $0x1], 1 }

</bundles_post_ra>
